<compile_context>
chip_gen: v5e
topology: v5e:2x2
jax: 0.10.0
libtpu: 0.0.40
codegen_flags: <defaults>
</compile_context>

<pallas_src>
import jax
import jax.numpy as jnp
import numpy as np
from jax.experimental import pallas as pl
from jax.experimental.pallas import tpu as pltpu


# ------------------------------ static layout ------------------------------ #

_H1_ROWS = 680      # 676 real wide-grid rows (26*26) + 4 zero-pad rows
_CHUNK = 104        # 4 conv2 output rows (oh) = 2 pooled rows (ph) per chunk
_N_CHUNKS = 6       # 6 * 104 = 624 = 24 * 26 conv2 wide-grid rows

# Sanity checks for the wide-grid / pad / pool coupling (fragile by design;
# see review correctness notes): conv2's deepest h1 read and the pool's
# deepest y-chunk read must stay inside their buffers.
assert _N_CHUNKS * _CHUNK == 24 * 26
assert (_N_CHUNKS - 1) * _CHUNK + (2 * 26 + 2) + (_CHUNK - 1) < _H1_ROWS
assert 52 * 1 + 2 + 27 + 4 * 5 < _CHUNK
assert 5 * 128 + 40 == _H1_ROWS


# ----------------------------- Pallas kernels ------------------------------ #

def _conv_stage_kernel(p1t_ref, w1t_ref, b1_ref, w2_ref, b2_ref, out_ref,
                       h1_ref, y_ref):
    """conv1 + ReLU + conv2 + ReLU + 2x2 max-pool for a tile of BT samples.

    p1t_ref: (BT, 9, 680) bf16  conv1 im2col patches, TRANSPOSED: row k = patch
                                offset (dh*3+dw), column r = h*26 + w (676 real
                                columns + 4 zero-pad columns).
    w1t_ref: (32, 9)      bf16  conv1 weight, (cout, kh*kw).
    b1_ref : (32, 1)      f32
    w2_ref : (288, 64)    bf16  conv2 weight, ((kh, kw, cin), cout).
    b2_ref : (1, 64)      f32
    out_ref: (BT, 72, 128) bf16 pooled features, lane-dense; row ph*6+q holds
                                [pooled(ph,2q,:) | pooled(ph,2q+1,:)] — byte
                                identical to the (144, 64) HWC flatten.
    h1_ref : (680, 32)    f32   scratch: conv1 output, row = h*26 + w.
    y_ref  : (104, 64)    f32   scratch: one conv2 wide-grid chunk.
    """
    bt = p1t_ref.shape[0]

    # Loop-invariant weights / biases, hoisted out of the per-sample loop.
    w1t = w1t_ref[...]                                         # (32, 9)  bf16
    b1c = b1_ref[...]                                          # (32, 1)  f32
    w2s = [w2_ref[k * 32:(k + 1) * 32, :] for k in range(9)]   # 9 x (32, 64)
    b2r = b2_ref[...]                                          # (1, 64)  f32

    def per_sample(b, carry):
        # ---- conv1 + ReLU on the MXU (transposed orientation) --------------
        h1t = jnp.dot(w1t, p1t_ref[b], preferred_element_type=jnp.float32)
        h1t = jnp.maximum(h1t + b1c, 0.0)                      # (32, 680) f32
        # Transpose into the (spatial, channel) layout conv2 slices from.
        # Split at a lane-tile boundary (384 = 3*128) so the slices are free.
        h1_ref[pl.ds(0, 384), :] = h1t[:, 0:384].T
        h1_ref[pl.ds(384, _H1_ROWS - 384), :] = h1t[:, 384:_H1_ROWS].T

        out_rows = []
        for j in range(_N_CHUNKS):
            base = j * _CHUNK
            # ---- conv2: 9 accumulated (104,32)@(32,64) MXU dots -------------
            # Patch offset (dh, dw) of wide row r reads h1 row r + dh*26 + dw;
            # wide columns w in {24, 25} are junk and never selected below.
            acc = None
            for k in range(9):
                dh, dw = k // 3, k % 3
                lhs = h1_ref[pl.ds(base + 26 * dh + dw, _CHUNK), :]
                part = jnp.dot(lhs.astype(jnp.bfloat16), w2s[k],
                               preferred_element_type=jnp.float32)
                acc = part if acc is None else acc + part
            y_ref[...] = jnp.maximum(acc + b2r, 0.0)           # (104, 64) f32

            # ---- 2x2 max-pool via stride-4 reads of the chunk scratch -------
            # pooled(ph=2j+t, pw) = max over y_chunk rows 52t + 26a + 2pw + b.
            for t in range(2):
                def pool(col_off, _t=t):
                    s = 52 * _t + col_off
                    return jnp.maximum(
                        jnp.maximum(y_ref[pl.ds(s, 6, stride=4), :],
                                    y_ref[pl.ds(s + 1, 6, stride=4), :]),
                        jnp.maximum(y_ref[pl.ds(s + 26, 6, stride=4), :],
                                    y_ref[pl.ds(s + 27, 6, stride=4), :]))
                even = pool(0)                      # pw = 0, 2, ..., 10
                odd = pool(2)                       # pw = 1, 3, ..., 11
                # Lane-dense (6, 128) row: [pooled(ph,2q) | pooled(ph,2q+1)].
                out_rows.append(jnp.concatenate([even, odd], axis=1))

        # One lane-dense store per sample: (72, 128) == contiguous HWC 9216.
        out_ref[b] = jnp.concatenate(out_rows, axis=0).astype(out_ref.dtype)
        return carry

    jax.lax.fori_loop(0, bt, per_sample, 0, unroll=True)


def _fc_stage_kernel(x_ref, wf1_ref, bf1_ref, wf2_ref, bf2_ref,
                     feat_ref, pred_ref):
    """fc1 + ReLU (-> feat) and fc2 (padded to 128 lanes) for a batch tile."""
    h = jnp.dot(x_ref[...], wf1_ref[...], preferred_element_type=jnp.float32)
    h = jnp.maximum(h + bf1_ref[...], 0.0)                     # (BT, 128) f32
    feat_ref[...] = h
    p = jnp.dot(h.astype(wf2_ref.dtype), wf2_ref[...],
                preferred_element_type=jnp.float32)
    pred_ref[...] = p + bf2_ref[...]                           # (BT, 128) f32


# ----------------------------- pallas_call wrappers ------------------------ #

def conv_stage(p1t, pp, block_b):
    B = p1t.shape[0]
    return pl.pallas_call(
        _conv_stage_kernel,
        out_shape=jax.ShapeDtypeStruct((B, 72, 128), jnp.bfloat16),
        grid_spec=pltpu.PrefetchScalarGridSpec(
            num_scalar_prefetch=0,
            grid=(B // block_b,),
            in_specs=[
                pl.BlockSpec((block_b, 9, _H1_ROWS), lambda i: (i, 0, 0)),
                pl.BlockSpec((32, 9), lambda i: (0, 0)),
                pl.BlockSpec((32, 1), lambda i: (0, 0)),
                pl.BlockSpec((288, 64), lambda i: (0, 0)),
                pl.BlockSpec((1, 64), lambda i: (0, 0)),
            ],
            out_specs=pl.BlockSpec((block_b, 72, 128), lambda i: (i, 0, 0)),
            scratch_shapes=[
                pltpu.VMEM((_H1_ROWS, 32), jnp.float32),
                pltpu.VMEM((_CHUNK, 64), jnp.float32),
            ],
        ),
        compiler_params=pltpu.CompilerParams(
            dimension_semantics=("parallel",)),
    )(p1t, pp["w1t"], pp["b1"], pp["w2"], pp["b2"])


def fc_stage(flat, pp, block_b):
    B = flat.shape[0]
    return pl.pallas_call(
        _fc_stage_kernel,
        out_shape=(jax.ShapeDtypeStruct((B, 128), jnp.float32),
                   jax.ShapeDtypeStruct((B, 128), jnp.float32)),
        grid_spec=pltpu.PrefetchScalarGridSpec(
            num_scalar_prefetch=0,
            grid=(B // block_b,),
            in_specs=[
                pl.BlockSpec((block_b, 9216), lambda i: (i, 0)),
                pl.BlockSpec((9216, 128), lambda i: (0, 0)),
                pl.BlockSpec((1, 128), lambda i: (0, 0)),
                pl.BlockSpec((128, 128), lambda i: (0, 0)),
                pl.BlockSpec((1, 128), lambda i: (0, 0)),
            ],
            out_specs=[pl.BlockSpec((block_b, 128), lambda i: (i, 0)),
                       pl.BlockSpec((block_b, 128), lambda i: (i, 0))],
        ),
        compiler_params=pltpu.CompilerParams(
            dimension_semantics=("parallel",),
            # Allow BT=256 tiles (v6e/v7x 256-wide MXU) even under v5e's
            # 16 MiB default scoped-VMEM limit; well below v7x's 64 MiB.
            vmem_limit_bytes=48 * 1024 * 1024),
    )(flat, pp["wf1"], pp["bf1"], pp["wf2"], pp["bf2"])


# ------------------------------- JAX glue ---------------------------------- #

def init_params(key):
    """Deterministic synthetic parameters in PyTorch layout / default-init scale."""
    ks = jax.random.split(key, 8)

    def u(k, shape, fan_in):
        bound = 1.0 / np.sqrt(fan_in)
        return jax.random.uniform(k, shape, jnp.float32, -bound, bound)

    return dict(
        w1=u(ks[0], (32, 1, 3, 3), 9),        # conv1 (cout, cin, kh, kw)
        b1=u(ks[1], (32,), 9),
        w2=u(ks[2], (64, 32, 3, 3), 288),     # conv2
        b2=u(ks[3], (64,), 288),
        wf1=u(ks[4], (128, 9216), 9216),      # fc1 (out, in) PyTorch layout
        bf1=u(ks[5], (128,), 9216),
        wf2=u(ks[6], (10, 128), 128),         # fc2
        bf2=u(ks[7], (10,), 128),
    )


def prepare_params(params):
    """One-time (outside jit) reshape / permute / pad / cast of the weights."""
    # conv1: (32,1,3,3) -> (cout, kh*kw), bf16 (MXU LHS).
    w1t = params["w1"].reshape(32, 9).astype(jnp.bfloat16)             # (32, 9)
    b1 = params["b1"].reshape(32, 1).astype(jnp.float32)
    # conv2: (64,32,3,3) -> ((kh,kw,cin), cout), matches in-kernel slice order.
    w2 = params["w2"].transpose(2, 3, 1, 0).reshape(288, 64).astype(jnp.bfloat16)
    b2 = params["b2"].reshape(1, 64).astype(jnp.float32)
    # fc1: permute the 9216 input rows from PyTorch's (C,H,W) flatten order to
    # the kernel's (H,W,C) order, and store as (in, out).
    wf1 = (params["wf1"].reshape(128, 64, 12, 12)
           .transpose(2, 3, 1, 0).reshape(9216, 128).astype(jnp.bfloat16))
    bf1 = params["bf1"].reshape(1, 128).astype(jnp.float32)
    # fc2: (10,128) -> (128, 128) lane-dense, zero-padded output columns.
    wf2 = (jnp.zeros((128, 128), jnp.float32)
           .at[:, :10].set(params["wf2"].T).astype(jnp.bfloat16))
    bf2 = jnp.zeros((1, 128), jnp.float32).at[0, :10].set(params["bf2"])
    return dict(w1t=w1t, b1=b1, w2=w2, b2=b2, wf1=wf1, bf1=bf1, wf2=wf2, bf2=bf2)


def _pick_tile(b, candidates):
    """Largest candidate giving >= 2 grid steps (v7x megacore); else the largest
    divisor; else the full batch.  The full-batch fallback is only legal because
    a block dim equal to the full array dim is exempt from the multiple-of-8
    sublane rule."""
    for c in candidates:
        if b % c == 0 and b // c >= 2:
            return c
    for c in candidates:
        if b % c == 0:
            return c
    return b


def mnist_net_forward(pp, x):
    """Mirrors MNISTNet.forward: returns (features_128, logits_10)."""
    B = x.shape[0]
    x2 = x.reshape(B, 28, 28).astype(jnp.float32)

    # conv1 im2col, transposed + bf16 (~12 KB/sample, lane-dense DMA rows).
    cols = [x2[:, dh:dh + 26, dw:dw + 26].reshape(B, 676)
            for dh in range(3) for dw in range(3)]             # 9 x (B, 676)
    p1t = jnp.stack(cols, axis=1)                              # (B, 9, 676)
    p1t = jnp.pad(p1t, ((0, 0), (0, 0), (0, 4))).astype(jnp.bfloat16)

    bt_conv = _pick_tile(B, (8, 4, 2, 1))
    pooled = conv_stage(p1t, pp, bt_conv)                      # (B, 72, 128)

    # Flatten is contiguous (H, W, C) order: a free reshape.
    flat = pooled.reshape(B, 9216)

    bt_fc = _pick_tile(B, (256, 128, 64, 32, 16, 8))
    feat, pred_padded = fc_stage(flat, pp, bt_fc)
    return feat, pred_padded[:, :10]


def reference_forward(pp, x):
    """Pure-JAX/XLA reference on the same prepared (bf16-rounded) weights."""
    hp = jax.lax.Precision.HIGHEST
    B = x.shape[0]
    x2 = x.reshape(B, 28, 28).astype(jnp.float32)
    cols = [x2[:, dh:dh + 26, dw:dw + 26]
            for dh in range(3) for dw in range(3)]
    # Mirror the kernel's bf16 rounding of the conv1 patch input.
    p1 = (jnp.stack(cols, axis=-1).astype(jnp.bfloat16)
          .astype(jnp.float32))                                 # (B, 26, 26, 9)
    w1 = pp["w1t"].astype(jnp.float32).T                        # (9, 32)
    h1 = jnp.maximum(jnp.einsum("bhwk,kc->bhwc", p1, w1, precision=hp)
                     + pp["b1"].reshape(1, 1, 1, 32), 0.0)      # (B, 26, 26, 32)
    cols2 = [h1[:, dh:dh + 24, dw:dw + 24, :]
             for dh in range(3) for dw in range(3)]
    p2 = jnp.concatenate(cols2, axis=-1)                        # (B, 24, 24, 288)
    y = jnp.maximum(
        jnp.einsum("bhwk,kc->bhwc", p2, pp["w2"].astype(jnp.float32),
                   precision=hp) + pp["b2"].reshape(1, 1, 1, 64), 0.0)
    pooled = jnp.max(y.reshape(B, 12, 2, 12, 2, 64), axis=(2, 4))
    flat = pooled.reshape(B, 9216)
    feat = jnp.maximum(
        jnp.dot(flat, pp["wf1"].astype(jnp.float32), precision=hp) + pp["bf1"],
        0.0)
    pred = jnp.dot(feat, pp["wf2"].astype(jnp.float32), precision=hp) + pp["bf2"]
    return feat, pred[:, :10]


if __name__ == "__main__":
    key = jax.random.PRNGKey(0)
    k_param, k_x = jax.random.split(key)
    raw_params = init_params(k_param)
    pp = prepare_params(raw_params)          # once, outside jit

    # MNIST-shaped input: batch=2, 1 channel, 28x28 (required by fc1's 9216).
    x = jax.random.normal(k_x, (2, 1, 28, 28), dtype=jnp.float32)

    fwd = jax.jit(mnist_net_forward)
    feat, pred = fwd(pp, x)
    jax.block_until_ready((feat, pred))

    ref_feat, ref_pred = reference_forward(pp, x)
    np.testing.assert_allclose(np.asarray(feat), np.asarray(ref_feat),
                               rtol=2e-2, atol=2e-2)
    np.testing.assert_allclose(np.asarray(pred), np.asarray(ref_pred),
                               rtol=2e-2, atol=2e-2)

    assert feat.shape == (2, 128) and pred.shape == (2, 10)
    print("KERNEL_OK")
</pallas_src>

<mosaic_0001>
module attributes {stable_mosaic.version = 11 : i64} {
  func.func @_conv_stage_kernel(%arg0: i32, %arg1: memref<1x9x680xbf16, #tpu.memory_space<vmem>>, %arg2: memref<32x9xbf16, #tpu.memory_space<vmem>>, %arg3: memref<32x1xf32, #tpu.memory_space<vmem>>, %arg4: memref<288x64xbf16, #tpu.memory_space<vmem>>, %arg5: memref<1x64xf32, #tpu.memory_space<vmem>>, %arg6: memref<1x72x128xbf16, #tpu.memory_space<vmem>>, %arg7: memref<680x32xf32, #tpu.memory_space<vmem>>, %arg8: memref<104x64xf32, #tpu.memory_space<vmem>>) attributes {dimension_semantics = [#tpu.dimension_semantics<parallel>], iteration_bounds = array<i64: 2>, scalar_prefetch = 0 : i64, scratch_operands = 2 : i64, tpu.core_type = #tpu.core_type<tc>, window_params = [{transform_indices = @transform_0, window_bounds = array<i64: 1, 9, 680>}, {pipeline_mode = #tpu.pipeline_mode<synchronous>, transform_indices = @transform_1, window_bounds = array<i64: 32, 9>}, {pipeline_mode = #tpu.pipeline_mode<synchronous>, transform_indices = @transform_2, window_bounds = array<i64: 32, 1>}, {pipeline_mode = #tpu.pipeline_mode<synchronous>, transform_indices = @transform_3, window_bounds = array<i64: 288, 64>}, {pipeline_mode = #tpu.pipeline_mode<synchronous>, transform_indices = @transform_4, window_bounds = array<i64: 1, 64>}, {transform_indices = @transform_5, window_bounds = array<i64: 1, 72, 128>}]} {
    %c0 = arith.constant 0 : index
    %c0_0 = arith.constant 0 : index
    %0 = vector.load %arg2[%c0, %c0_0] : memref<32x9xbf16, #tpu.memory_space<vmem>>, vector<32x9xbf16>
    %c0_1 = arith.constant 0 : index
    %c0_2 = arith.constant 0 : index
    %1 = vector.load %arg3[%c0_1, %c0_2] : memref<32x1xf32, #tpu.memory_space<vmem>>, vector<32x1xf32>
    %c0_3 = arith.constant 0 : index
    %c0_4 = arith.constant 0 : index
    %2 = vector.load %arg4[%c0_3, %c0_4] : memref<288x64xbf16, #tpu.memory_space<vmem>>, vector<32x64xbf16>
    %c32 = arith.constant 32 : index
    %c0_5 = arith.constant 0 : index
    %3 = vector.load %arg4[%c32, %c0_5] : memref<288x64xbf16, #tpu.memory_space<vmem>>, vector<32x64xbf16>
    %c64 = arith.constant 64 : index
    %c0_6 = arith.constant 0 : index
    %4 = vector.load %arg4[%c64, %c0_6] : memref<288x64xbf16, #tpu.memory_space<vmem>>, vector<32x64xbf16>
    %c96 = arith.constant 96 : index
    %c0_7 = arith.constant 0 : index
    %5 = vector.load %arg4[%c96, %c0_7] : memref<288x64xbf16, #tpu.memory_space<vmem>>, vector<32x64xbf16>
    %c128 = arith.constant 128 : index
    %c0_8 = arith.constant 0 : index
    %6 = vector.load %arg4[%c128, %c0_8] : memref<288x64xbf16, #tpu.memory_space<vmem>>, vector<32x64xbf16>
    %c160 = arith.constant 160 : index
    %c0_9 = arith.constant 0 : index
    %7 = vector.load %arg4[%c160, %c0_9] : memref<288x64xbf16, #tpu.memory_space<vmem>>, vector<32x64xbf16>
    %c192 = arith.constant 192 : index
    %c0_10 = arith.constant 0 : index
    %8 = vector.load %arg4[%c192, %c0_10] : memref<288x64xbf16, #tpu.memory_space<vmem>>, vector<32x64xbf16>
    %c224 = arith.constant 224 : index
    %c0_11 = arith.constant 0 : index
    %9 = vector.load %arg4[%c224, %c0_11] : memref<288x64xbf16, #tpu.memory_space<vmem>>, vector<32x64xbf16>
    %c256 = arith.constant 256 : index
    %c0_12 = arith.constant 0 : index
    %10 = vector.load %arg4[%c256, %c0_12] : memref<288x64xbf16, #tpu.memory_space<vmem>>, vector<32x64xbf16>
    %c0_13 = arith.constant 0 : index
    %c0_14 = arith.constant 0 : index
    %11 = vector.load %arg5[%c0_13, %c0_14] : memref<1x64xf32, #tpu.memory_space<vmem>>, vector<1x64xf32>
    %c0_i32 = arith.constant 0 : i32
    %12 = arith.index_cast %c0_i32 : i32 to index
    %c0_15 = arith.constant 0 : index
    %c0_16 = arith.constant 0 : index
    %13 = vector.load %arg1[%12, %c0_15, %c0_16] : memref<1x9x680xbf16, #tpu.memory_space<vmem>>, vector<1x9x680xbf16>
    %14 = vector.shape_cast %13 : vector<1x9x680xbf16> to vector<9x680xbf16>
    %cst = arith.constant dense<0.000000e+00> : vector<32x680xf32>
    %15 = tpu.matmul %0, %14, %cst {dimension_numbers = #tpu.dot_dimension_numbers<[1], [0], [0], [1], [0, 0, 1, 1], [], []>} : vector<32x9xbf16>, vector<9x680xbf16>, vector<32x680xf32> -> vector<32x680xf32>
    %16 = vector.broadcast %1 : vector<32x1xf32> to vector<32x680xf32>
    %17 = arith.addf %15, %16 : vector<32x680xf32>
    %cst_17 = arith.constant 0.000000e+00 : f32
    %18 = vector.broadcast %cst_17 : f32 to vector<32x680xf32>
    %19 = arith.maximumf %17, %18 : vector<32x680xf32>
    %20 = vector.extract_strided_slice %19 {offsets = [0, 0], sizes = [32, 384], strides = [1, 1]} : vector<32x680xf32> to vector<32x384xf32>
    %21 = tpu.transpose %20, [1, 0] : vector<32x384xf32> -> vector<384x32xf32>
    %c0_18 = arith.constant 0 : index
    %c0_19 = arith.constant 0 : index
    %22 = vector.load %arg7[%c0_18, %c0_19] : memref<680x32xf32, #tpu.memory_space<vmem>>, vector<384x32xf32>
    tpu.vector_store %arg7[%c0_18, %c0_19], %21 {strides = array<i32>} : memref<680x32xf32, #tpu.memory_space<vmem>>, vector<384x32xf32>,
    %23 = vector.extract_strided_slice %19 {offsets = [0, 384], sizes = [32, 296], strides = [1, 1]} : vector<32x680xf32> to vector<32x296xf32>
    %24 = tpu.transpose %23, [1, 0] : vector<32x296xf32> -> vector<296x32xf32>
    %c384 = arith.constant 384 : index
    %c0_20 = arith.constant 0 : index
    %25 = vector.load %arg7[%c384, %c0_20] : memref<680x32xf32, #tpu.memory_space<vmem>>, vector<296x32xf32>
    tpu.vector_store %arg7[%c384, %c0_20], %24 {strides = array<i32>} : memref<680x32xf32, #tpu.memory_space<vmem>>, vector<296x32xf32>,
    %c0_21 = arith.constant 0 : index
    %c0_22 = arith.constant 0 : index
    %26 = vector.load %arg7[%c0_21, %c0_22] : memref<680x32xf32, #tpu.memory_space<vmem>>, vector<104x32xf32>
    %27 = arith.truncf %26 : vector<104x32xf32> to vector<104x32xbf16>
    %cst_23 = arith.constant dense<0.000000e+00> : vector<104x64xf32>
    %28 = tpu.matmul %27, %2, %cst_23 {dimension_numbers = #tpu.dot_dimension_numbers<[1], [0], [0], [1], [0, 0, 1, 1], [], []>} : vector<104x32xbf16>, vector<32x64xbf16>, vector<104x64xf32> -> vector<104x64xf32>
    %c1 = arith.constant 1 : index
    %c0_24 = arith.constant 0 : index
    %29 = vector.load %arg7[%c1, %c0_24] : memref<680x32xf32, #tpu.memory_space<vmem>>, vector<104x32xf32>
    %30 = arith.truncf %29 : vector<104x32xf32> to vector<104x32xbf16>
    %cst_25 = arith.constant dense<0.000000e+00> : vector<104x64xf32>
    %31 = tpu.matmul %30, %3, %cst_25 {dimension_numbers = #tpu.dot_dimension_numbers<[1], [0], [0], [1], [0, 0, 1, 1], [], []>} : vector<104x32xbf16>, vector<32x64xbf16>, vector<104x64xf32> -> vector<104x64xf32>
    %32 = arith.addf %28, %31 : vector<104x64xf32>
    %c2 = arith.constant 2 : index
    %c0_26 = arith.constant 0 : index
    %33 = vector.load %arg7[%c2, %c0_26] : memref<680x32xf32, #tpu.memory_space<vmem>>, vector<104x32xf32>
    %34 = arith.truncf %33 : vector<104x32xf32> to vector<104x32xbf16>
    %cst_27 = arith.constant dense<0.000000e+00> : vector<104x64xf32>
    %35 = tpu.matmul %34, %4, %cst_27 {dimension_numbers = #tpu.dot_dimension_numbers<[1], [0], [0], [1], [0, 0, 1, 1], [], []>} : vector<104x32xbf16>, vector<32x64xbf16>, vector<104x64xf32> -> vector<104x64xf32>
    %36 = arith.addf %32, %35 : vector<104x64xf32>
    %c26 = arith.constant 26 : index
    %c0_28 = arith.constant 0 : index
    %37 = vector.load %arg7[%c26, %c0_28] : memref<680x32xf32, #tpu.memory_space<vmem>>, vector<104x32xf32>
    %38 = arith.truncf %37 : vector<104x32xf32> to vector<104x32xbf16>
    %cst_29 = arith.constant dense<0.000000e+00> : vector<104x64xf32>
    %39 = tpu.matmul %38, %5, %cst_29 {dimension_numbers = #tpu.dot_dimension_numbers<[1], [0], [0], [1], [0, 0, 1, 1], [], []>} : vector<104x32xbf16>, vector<32x64xbf16>, vector<104x64xf32> -> vector<104x64xf32>
    %40 = arith.addf %36, %39 : vector<104x64xf32>
    %c27 = arith.constant 27 : index
    %c0_30 = arith.constant 0 : index
    %41 = vector.load %arg7[%c27, %c0_30] : memref<680x32xf32, #tpu.memory_space<vmem>>, vector<104x32xf32>
    %42 = arith.truncf %41 : vector<104x32xf32> to vector<104x32xbf16>
    %cst_31 = arith.constant dense<0.000000e+00> : vector<104x64xf32>
    %43 = tpu.matmul %42, %6, %cst_31 {dimension_numbers = #tpu.dot_dimension_numbers<[1], [0], [0], [1], [0, 0, 1, 1], [], []>} : vector<104x32xbf16>, vector<32x64xbf16>, vector<104x64xf32> -> vector<104x64xf32>
    %44 = arith.addf %40, %43 : vector<104x64xf32>
    %c28 = arith.constant 28 : index
    %c0_32 = arith.constant 0 : index
    %45 = vector.load %arg7[%c28, %c0_32] : memref<680x32xf32, #tpu.memory_space<vmem>>, vector<104x32xf32>
    %46 = arith.truncf %45 : vector<104x32xf32> to vector<104x32xbf16>
    %cst_33 = arith.constant dense<0.000000e+00> : vector<104x64xf32>
    %47 = tpu.matmul %46, %7, %cst_33 {dimension_numbers = #tpu.dot_dimension_numbers<[1], [0], [0], [1], [0, 0, 1, 1], [], []>} : vector<104x32xbf16>, vector<32x64xbf16>, vector<104x64xf32> -> vector<104x64xf32>
    %48 = arith.addf %44, %47 : vector<104x64xf32>
    %c52 = arith.constant 52 : index
    %c0_34 = arith.constant 0 : index
    %49 = vector.load %arg7[%c52, %c0_34] : memref<680x32xf32, #tpu.memory_space<vmem>>, vector<104x32xf32>
    %50 = arith.truncf %49 : vector<104x32xf32> to vector<104x32xbf16>
    %cst_35 = arith.constant dense<0.000000e+00> : vector<104x64xf32>
    %51 = tpu.matmul %50, %8, %cst_35 {dimension_numbers = #tpu.dot_dimension_numbers<[1], [0], [0], [1], [0, 0, 1, 1], [], []>} : vector<104x32xbf16>, vector<32x64xbf16>, vector<104x64xf32> -> vector<104x64xf32>
    %52 = arith.addf %48, %51 : vector<104x64xf32>
    %c53 = arith.constant 53 : index
    %c0_36 = arith.constant 0 : index
    %53 = vector.load %arg7[%c53, %c0_36] : memref<680x32xf32, #tpu.memory_space<vmem>>, vector<104x32xf32>
    %54 = arith.truncf %53 : vector<104x32xf32> to vector<104x32xbf16>
    %cst_37 = arith.constant dense<0.000000e+00> : vector<104x64xf32>
    %55 = tpu.matmul %54, %9, %cst_37 {dimension_numbers = #tpu.dot_dimension_numbers<[1], [0], [0], [1], [0, 0, 1, 1], [], []>} : vector<104x32xbf16>, vector<32x64xbf16>, vector<104x64xf32> -> vector<104x64xf32>
    %56 = arith.addf %52, %55 : vector<104x64xf32>
    %c54 = arith.constant 54 : index
    %c0_38 = arith.constant 0 : index
    %57 = vector.load %arg7[%c54, %c0_38] : memref<680x32xf32, #tpu.memory_space<vmem>>, vector<104x32xf32>
    %58 = arith.truncf %57 : vector<104x32xf32> to vector<104x32xbf16>
    %cst_39 = arith.constant dense<0.000000e+00> : vector<104x64xf32>
    %59 = tpu.matmul %58, %10, %cst_39 {dimension_numbers = #tpu.dot_dimension_numbers<[1], [0], [0], [1], [0, 0, 1, 1], [], []>} : vector<104x32xbf16>, vector<32x64xbf16>, vector<104x64xf32> -> vector<104x64xf32>
    %60 = arith.addf %56, %59 : vector<104x64xf32>
    %61 = vector.broadcast %11 : vector<1x64xf32> to vector<104x64xf32>
    %62 = arith.addf %60, %61 : vector<104x64xf32>
    %cst_40 = arith.constant 0.000000e+00 : f32
    %63 = vector.broadcast %cst_40 : f32 to vector<104x64xf32>
    %64 = arith.maximumf %62, %63 : vector<104x64xf32>
    %c0_41 = arith.constant 0 : index
    %c0_42 = arith.constant 0 : index
    %65 = vector.load %arg8[%c0_41, %c0_42] : memref<104x64xf32, #tpu.memory_space<vmem>>, vector<104x64xf32>
    tpu.vector_store %arg8[%c0_41, %c0_42], %64 {strides = array<i32>} : memref<104x64xf32, #tpu.memory_space<vmem>>, vector<104x64xf32>,
    %c0_43 = arith.constant 0 : index
    %c0_44 = arith.constant 0 : index
    %66 = tpu.strided_load %arg8[%c0_43, %c0_44] {strides = array<i32: 4, 1>} : memref<104x64xf32, #tpu.memory_space<vmem>>, vector<6x64xf32>
    %c1_45 = arith.constant 1 : index
    %c0_46 = arith.constant 0 : index
    %67 = tpu.strided_load %arg8[%c1_45, %c0_46] {strides = array<i32: 4, 1>} : memref<104x64xf32, #tpu.memory_space<vmem>>, vector<6x64xf32>
    %68 = arith.maximumf %66, %67 : vector<6x64xf32>
    %c26_47 = arith.constant 26 : index
    %c0_48 = arith.constant 0 : index
    %69 = tpu.strided_load %arg8[%c26_47, %c0_48] {strides = array<i32: 4, 1>} : memref<104x64xf32, #tpu.memory_space<vmem>>, vector<6x64xf32>
    %c27_49 = arith.constant 27 : index
    %c0_50 = arith.constant 0 : index
    %70 = tpu.strided_load %arg8[%c27_49, %c0_50] {strides = array<i32: 4, 1>} : memref<104x64xf32, #tpu.memory_space<vmem>>, vector<6x64xf32>
    %71 = arith.maximumf %69, %70 : vector<6x64xf32>
    %72 = arith.maximumf %68, %71 : vector<6x64xf32>
    %c2_51 = arith.constant 2 : index
    %c0_52 = arith.constant 0 : index
    %73 = tpu.strided_load %arg8[%c2_51, %c0_52] {strides = array<i32: 4, 1>} : memref<104x64xf32, #tpu.memory_space<vmem>>, vector<6x64xf32>
    %c3 = arith.constant 3 : index
    %c0_53 = arith.constant 0 : index
    %74 = tpu.strided_load %arg8[%c3, %c0_53] {strides = array<i32: 4, 1>} : memref<104x64xf32, #tpu.memory_space<vmem>>, vector<6x64xf32>
    %75 = arith.maximumf %73, %74 : vector<6x64xf32>
    %c28_54 = arith.constant 28 : index
    %c0_55 = arith.constant 0 : index
    %76 = tpu.strided_load %arg8[%c28_54, %c0_55] {strides = array<i32: 4, 1>} : memref<104x64xf32, #tpu.memory_space<vmem>>, vector<6x64xf32>
    %c29 = arith.constant 29 : index
    %c0_56 = arith.constant 0 : index
    %77 = tpu.strided_load %arg8[%c29, %c0_56] {strides = array<i32: 4, 1>} : memref<104x64xf32, #tpu.memory_space<vmem>>, vector<6x64xf32>
    %78 = arith.maximumf %76, %77 : vector<6x64xf32>
    %79 = arith.maximumf %75, %78 : vector<6x64xf32>
    %80 = tpu.concatenate %72, %79 in 1 : vector<6x64xf32>, vector<6x64xf32> -> vector<6x128xf32>
    %c52_57 = arith.constant 52 : index
    %c0_58 = arith.constant 0 : index
    %81 = tpu.strided_load %arg8[%c52_57, %c0_58] {strides = array<i32: 4, 1>} : memref<104x64xf32, #tpu.memory_space<vmem>>, vector<6x64xf32>
    %c53_59 = arith.constant 53 : index
    %c0_60 = arith.constant 0 : index
    %82 = tpu.strided_load %arg8[%c53_59, %c0_60] {strides = array<i32: 4, 1>} : memref<104x64xf32, #tpu.memory_space<vmem>>, vector<6x64xf32>
    %83 = arith.maximumf %81, %82 : vector<6x64xf32>
    %c78 = arith.constant 78 : index
    %c0_61 = arith.constant 0 : index
    %84 = tpu.strided_load %arg8[%c78, %c0_61] {strides = array<i32: 4, 1>} : memref<104x64xf32, #tpu.memory_space<vmem>>, vector<6x64xf32>
    %c79 = arith.constant 79 : index
    %c0_62 = arith.constant 0 : index
    %85 = tpu.strided_load %arg8[%c79, %c0_62] {strides = array<i32: 4, 1>} : memref<104x64xf32, #tpu.memory_space<vmem>>, vector<6x64xf32>
    %86 = arith.maximumf %84, %85 : vector<6x64xf32>
    %87 = arith.maximumf %83, %86 : vector<6x64xf32>
    %c54_63 = arith.constant 54 : index
    %c0_64 = arith.constant 0 : index
    %88 = tpu.strided_load %arg8[%c54_63, %c0_64] {strides = array<i32: 4, 1>} : memref<104x64xf32, #tpu.memory_space<vmem>>, vector<6x64xf32>
    %c55 = arith.constant 55 : index
    %c0_65 = arith.constant 0 : index
    %89 = tpu.strided_load %arg8[%c55, %c0_65] {strides = array<i32: 4, 1>} : memref<104x64xf32, #tpu.memory_space<vmem>>, vector<6x64xf32>
    %90 = arith.maximumf %88, %89 : vector<6x64xf32>
    %c80 = arith.constant 80 : index
    %c0_66 = arith.constant 0 : index
    %91 = tpu.strided_load %arg8[%c80, %c0_66] {strides = array<i32: 4, 1>} : memref<104x64xf32, #tpu.memory_space<vmem>>, vector<6x64xf32>
    %c81 = arith.constant 81 : index
    %c0_67 = arith.constant 0 : index
    %92 = tpu.strided_load %arg8[%c81, %c0_67] {strides = array<i32: 4, 1>} : memref<104x64xf32, #tpu.memory_space<vmem>>, vector<6x64xf32>
    %93 = arith.maximumf %91, %92 : vector<6x64xf32>
    %94 = arith.maximumf %90, %93 : vector<6x64xf32>
    %95 = tpu.concatenate %87, %94 in 1 : vector<6x64xf32>, vector<6x64xf32> -> vector<6x128xf32>
    %c104 = arith.constant 104 : index
    %c0_68 = arith.constant 0 : index
    %96 = vector.load %arg7[%c104, %c0_68] : memref<680x32xf32, #tpu.memory_space<vmem>>, vector<104x32xf32>
    %97 = arith.truncf %96 : vector<104x32xf32> to vector<104x32xbf16>
    %cst_69 = arith.constant dense<0.000000e+00> : vector<104x64xf32>
    %98 = tpu.matmul %97, %2, %cst_69 {dimension_numbers = #tpu.dot_dimension_numbers<[1], [0], [0], [1], [0, 0, 1, 1], [], []>} : vector<104x32xbf16>, vector<32x64xbf16>, vector<104x64xf32> -> vector<104x64xf32>
    %c105 = arith.constant 105 : index
    %c0_70 = arith.constant 0 : index
    %99 = vector.load %arg7[%c105, %c0_70] : memref<680x32xf32, #tpu.memory_space<vmem>>, vector<104x32xf32>
    %100 = arith.truncf %99 : vector<104x32xf32> to vector<104x32xbf16>
    %cst_71 = arith.constant dense<0.000000e+00> : vector<104x64xf32>
    %101 = tpu.matmul %100, %3, %cst_71 {dimension_numbers = #tpu.dot_dimension_numbers<[1], [0], [0], [1], [0, 0, 1, 1], [], []>} : vector<104x32xbf16>, vector<32x64xbf16>, vector<104x64xf32> -> vector<104x64xf32>
    %102 = arith.addf %98, %101 : vector<104x64xf32>
    %c106 = arith.constant 106 : index
    %c0_72 = arith.constant 0 : index
    %103 = vector.load %arg7[%c106, %c0_72] : memref<680x32xf32, #tpu.memory_space<vmem>>, vector<104x32xf32>
    %104 = arith.truncf %103 : vector<104x32xf32> to vector<104x32xbf16>
    %cst_73 = arith.constant dense<0.000000e+00> : vector<104x64xf32>
    %105 = tpu.matmul %104, %4, %cst_73 {dimension_numbers = #tpu.dot_dimension_numbers<[1], [0], [0], [1], [0, 0, 1, 1], [], []>} : vector<104x32xbf16>, vector<32x64xbf16>, vector<104x64xf32> -> vector<104x64xf32>
    %106 = arith.addf %102, %105 : vector<104x64xf32>
    %c130 = arith.constant 130 : index
    %c0_74 = arith.constant 0 : index
    %107 = vector.load %arg7[%c130, %c0_74] : memref<680x32xf32, #tpu.memory_space<vmem>>, vector<104x32xf32>
    %108 = arith.truncf %107 : vector<104x32xf32> to vector<104x32xbf16>
    %cst_75 = arith.constant dense<0.000000e+00> : vector<104x64xf32>
    %109 = tpu.matmul %108, %5, %cst_75 {dimension_numbers = #tpu.dot_dimension_numbers<[1], [0], [0], [1], [0, 0, 1, 1], [], []>} : vector<104x32xbf16>, vector<32x64xbf16>, vector<104x64xf32> -> vector<104x64xf32>
    %110 = arith.addf %106, %109 : vector<104x64xf32>
    %c131 = arith.constant 131 : index
    %c0_76 = arith.constant 0 : index
    %111 = vector.load %arg7[%c131, %c0_76] : memref<680x32xf32, #tpu.memory_space<vmem>>, vector<104x32xf32>
    %112 = arith.truncf %111 : vector<104x32xf32> to vector<104x32xbf16>
    %cst_77 = arith.constant dense<0.000000e+00> : vector<104x64xf32>
    %113 = tpu.matmul %112, %6, %cst_77 {dimension_numbers = #tpu.dot_dimension_numbers<[1], [0], [0], [1], [0, 0, 1, 1], [], []>} : vector<104x32xbf16>, vector<32x64xbf16>, vector<104x64xf32> -> vector<104x64xf32>
    %114 = arith.addf %110, %113 : vector<104x64xf32>
    %c132 = arith.constant 132 : index
    %c0_78 = arith.constant 0 : index
    %115 = vector.load %arg7[%c132, %c0_78] : memref<680x32xf32, #tpu.memory_space<vmem>>, vector<104x32xf32>
    %116 = arith.truncf %115 : vector<104x32xf32> to vector<104x32xbf16>
    %cst_79 = arith.constant dense<0.000000e+00> : vector<104x64xf32>
    %117 = tpu.matmul %116, %7, %cst_79 {dimension_numbers = #tpu.dot_dimension_numbers<[1], [0], [0], [1], [0, 0, 1, 1], [], []>} : vector<104x32xbf16>, vector<32x64xbf16>, vector<104x64xf32> -> vector<104x64xf32>
    %118 = arith.addf %114, %117 : vector<104x64xf32>
    %c156 = arith.constant 156 : index
    %c0_80 = arith.constant 0 : index
    %119 = vector.load %arg7[%c156, %c0_80] : memref<680x32xf32, #tpu.memory_space<vmem>>, vector<104x32xf32>
    %120 = arith.truncf %119 : vector<104x32xf32> to vector<104x32xbf16>
    %cst_81 = arith.constant dense<0.000000e+00> : vector<104x64xf32>
    %121 = tpu.matmul %120, %8, %cst_81 {dimension_numbers = #tpu.dot_dimension_numbers<[1], [0], [0], [1], [0, 0, 1, 1], [], []>} : vector<104x32xbf16>, vector<32x64xbf16>, vector<104x64xf32> -> vector<104x64xf32>
    %122 = arith.addf %118, %121 : vector<104x64xf32>
    %c157 = arith.constant 157 : index
    %c0_82 = arith.constant 0 : index
    %123 = vector.load %arg7[%c157, %c0_82] : memref<680x32xf32, #tpu.memory_space<vmem>>, vector<104x32xf32>
    %124 = arith.truncf %123 : vector<104x32xf32> to vector<104x32xbf16>
    %cst_83 = arith.constant dense<0.000000e+00> : vector<104x64xf32>
    %125 = tpu.matmul %124, %9, %cst_83 {dimension_numbers = #tpu.dot_dimension_numbers<[1], [0], [0], [1], [0, 0, 1, 1], [], []>} : vector<104x32xbf16>, vector<32x64xbf16>, vector<104x64xf32> -> vector<104x64xf32>
    %126 = arith.addf %122, %125 : vector<104x64xf32>
    %c158 = arith.constant 158 : index
    %c0_84 = arith.constant 0 : index
    %127 = vector.load %arg7[%c158, %c0_84] : memref<680x32xf32, #tpu.memory_space<vmem>>, vector<104x32xf32>
    %128 = arith.truncf %127 : vector<104x32xf32> to vector<104x32xbf16>
    %cst_85 = arith.constant dense<0.000000e+00> : vector<104x64xf32>
    %129 = tpu.matmul %128, %10, %cst_85 {dimension_numbers = #tpu.dot_dimension_numbers<[1], [0], [0], [1], [0, 0, 1, 1], [], []>} : vector<104x32xbf16>, vector<32x64xbf16>, vector<104x64xf32> -> vector<104x64xf32>
    %130 = arith.addf %126, %129 : vector<104x64xf32>
    %131 = vector.broadcast %11 : vector<1x64xf32> to vector<104x64xf32>
    %132 = arith.addf %130, %131 : vector<104x64xf32>
    %cst_86 = arith.constant 0.000000e+00 : f32
    %133 = vector.broadcast %cst_86 : f32 to vector<104x64xf32>
    %134 = arith.maximumf %132, %133 : vector<104x64xf32>
    %c0_87 = arith.constant 0 : index
    %c0_88 = arith.constant 0 : index
    %135 = vector.load %arg8[%c0_87, %c0_88] : memref<104x64xf32, #tpu.memory_space<vmem>>, vector<104x64xf32>
    tpu.vector_store %arg8[%c0_87, %c0_88], %134 {strides = array<i32>} : memref<104x64xf32, #tpu.memory_space<vmem>>, vector<104x64xf32>,
    %c0_89 = arith.constant 0 : index
    %c0_90 = arith.constant 0 : index
    %136 = tpu.strided_load %arg8[%c0_89, %c0_90] {strides = array<i32: 4, 1>} : memref<104x64xf32, #tpu.memory_space<vmem>>, vector<6x64xf32>
    %c1_91 = arith.constant 1 : index
    %c0_92 = arith.constant 0 : index
    %137 = tpu.strided_load %arg8[%c1_91, %c0_92] {strides = array<i32: 4, 1>} : memref<104x64xf32, #tpu.memory_space<vmem>>, vector<6x64xf32>
    %138 = arith.maximumf %136, %137 : vector<6x64xf32>
    %c26_93 = arith.constant 26 : index
    %c0_94 = arith.constant 0 : index
    %139 = tpu.strided_load %arg8[%c26_93, %c0_94] {strides = array<i32: 4, 1>} : memref<104x64xf32, #tpu.memory_space<vmem>>, vector<6x64xf32>
    %c27_95 = arith.constant 27 : index
    %c0_96 = arith.constant 0 : index
    %140 = tpu.strided_load %arg8[%c27_95, %c0_96] {strides = array<i32: 4, 1>} : memref<104x64xf32, #tpu.memory_space<vmem>>, vector<6x64xf32>
    %141 = arith.maximumf %139, %140 : vector<6x64xf32>
    %142 = arith.maximumf %138, %141 : vector<6x64xf32>
    %c2_97 = arith.constant 2 : index
    %c0_98 = arith.constant 0 : index
    %143 = tpu.strided_load %arg8[%c2_97, %c0_98] {strides = array<i32: 4, 1>} : memref<104x64xf32, #tpu.memory_space<vmem>>, vector<6x64xf32>
    %c3_99 = arith.constant 3 : index
    %c0_100 = arith.constant 0 : index
    %144 = tpu.strided_load %arg8[%c3_99, %c0_100] {strides = array<i32: 4, 1>} : memref<104x64xf32, #tpu.memory_space<vmem>>, vector<6x64xf32>
    %145 = arith.maximumf %143, %144 : vector<6x64xf32>
    %c28_101 = arith.constant 28 : index
    %c0_102 = arith.constant 0 : index
    %146 = tpu.strided_load %arg8[%c28_101, %c0_102] {strides = array<i32: 4, 1>} : memref<104x64xf32, #tpu.memory_space<vmem>>, vector<6x64xf32>
    %c29_103 = arith.constant 29 : index
    %c0_104 = arith.constant 0 : index
    %147 = tpu.strided_load %arg8[%c29_103, %c0_104] {strides = array<i32: 4, 1>} : memref<104x64xf32, #tpu.memory_space<vmem>>, vector<6x64xf32>
    %148 = arith.maximumf %146, %147 : vector<6x64xf32>
    %149 = arith.maximumf %145, %148 : vector<6x64xf32>
    %150 = tpu.concatenate %142, %149 in 1 : vector<6x64xf32>, vector<6x64xf32> -> vector<6x128xf32>
    %c52_105 = arith.constant 52 : index
    %c0_106 = arith.constant 0 : index
    %151 = tpu.strided_load %arg8[%c52_105, %c0_106] {strides = array<i32: 4, 1>} : memref<104x64xf32, #tpu.memory_space<vmem>>, vector<6x64xf32>
    %c53_107 = arith.constant 53 : index
    %c0_108 = arith.constant 0 : index
    %152 = tpu.strided_load %arg8[%c53_107, %c0_108] {strides = array<i32: 4, 1>} : memref<104x64xf32, #tpu.memory_space<vmem>>, vector<6x64xf32>
    %153 = arith.maximumf %151, %152 : vector<6x64xf32>
    %c78_109 = arith.constant 78 : index
    %c0_110 = arith.constant 0 : index
    %154 = tpu.strided_load %arg8[%c78_109, %c0_110] {strides = array<i32: 4, 1>} : memref<104x64xf32, #tpu.memory_space<vmem>>, vector<6x64xf32>
    %c79_111 = arith.constant 79 : index
    %c0_112 = arith.constant 0 : index
    %155 = tpu.strided_load %arg8[%c79_111, %c0_112] {strides = array<i32: 4, 1>} : memref<104x64xf32, #tpu.memory_space<vmem>>, vector<6x64xf32>
    %156 = arith.maximumf %154, %155 : vector<6x64xf32>
    %157 = arith.maximumf %153, %156 : vector<6x64xf32>
    %c54_113 = arith.constant 54 : index
    %c0_114 = arith.constant 0 : index
    %158 = tpu.strided_load %arg8[%c54_113, %c0_114] {strides = array<i32: 4, 1>} : memref<104x64xf32, #tpu.memory_space<vmem>>, vector<6x64xf32>
    %c55_115 = arith.constant 55 : index
    %c0_116 = arith.constant 0 : index
    %159 = tpu.strided_load %arg8[%c55_115, %c0_116] {strides = array<i32: 4, 1>} : memref<104x64xf32, #tpu.memory_space<vmem>>, vector<6x64xf32>
    %160 = arith.maximumf %158, %159 : vector<6x64xf32>
    %c80_117 = arith.constant 80 : index
    %c0_118 = arith.constant 0 : index
    %161 = tpu.strided_load %arg8[%c80_117, %c0_118] {strides = array<i32: 4, 1>} : memref<104x64xf32, #tpu.memory_space<vmem>>, vector<6x64xf32>
    %c81_119 = arith.constant 81 : index
    %c0_120 = arith.constant 0 : index
    %162 = tpu.strided_load %arg8[%c81_119, %c0_120] {strides = array<i32: 4, 1>} : memref<104x64xf32, #tpu.memory_space<vmem>>, vector<6x64xf32>
    %163 = arith.maximumf %161, %162 : vector<6x64xf32>
    %164 = arith.maximumf %160, %163 : vector<6x64xf32>
    %165 = tpu.concatenate %157, %164 in 1 : vector<6x64xf32>, vector<6x64xf32> -> vector<6x128xf32>
    %c208 = arith.constant 208 : index
    %c0_121 = arith.constant 0 : index
    %166 = vector.load %arg7[%c208, %c0_121] : memref<680x32xf32, #tpu.memory_space<vmem>>, vector<104x32xf32>
    %167 = arith.truncf %166 : vector<104x32xf32> to vector<104x32xbf16>
    %cst_122 = arith.constant dense<0.000000e+00> : vector<104x64xf32>
    %168 = tpu.matmul %167, %2, %cst_122 {dimension_numbers = #tpu.dot_dimension_numbers<[1], [0], [0], [1], [0, 0, 1, 1], [], []>} : vector<104x32xbf16>, vector<32x64xbf16>, vector<104x64xf32> -> vector<104x64xf32>
    %c209 = arith.constant 209 : index
    %c0_123 = arith.constant 0 : index
    %169 = vector.load %arg7[%c209, %c0_123] : memref<680x32xf32, #tpu.memory_space<vmem>>, vector<104x32xf32>
    %170 = arith.truncf %169 : vector<104x32xf32> to vector<104x32xbf16>
    %cst_124 = arith.constant dense<0.000000e+00> : vector<104x64xf32>
    %171 = tpu.matmul %170, %3, %cst_124 {dimension_numbers = #tpu.dot_dimension_numbers<[1], [0], [0], [1], [0, 0, 1, 1], [], []>} : vector<104x32xbf16>, vector<32x64xbf16>, vector<104x64xf32> -> vector<104x64xf32>
    %172 = arith.addf %168, %171 : vector<104x64xf32>
    %c210 = arith.constant 210 : index
    %c0_125 = arith.constant 0 : index
    %173 = vector.load %arg7[%c210, %c0_125] : memref<680x32xf32, #tpu.memory_space<vmem>>, vector<104x32xf32>
    %174 = arith.truncf %173 : vector<104x32xf32> to vector<104x32xbf16>
    %cst_126 = arith.constant dense<0.000000e+00> : vector<104x64xf32>
    %175 = tpu.matmul %174, %4, %cst_126 {dimension_numbers = #tpu.dot_dimension_numbers<[1], [0], [0], [1], [0, 0, 1, 1], [], []>} : vector<104x32xbf16>, vector<32x64xbf16>, vector<104x64xf32> -> vector<104x64xf32>
    %176 = arith.addf %172, %175 : vector<104x64xf32>
    %c234 = arith.constant 234 : index
    %c0_127 = arith.constant 0 : index
    %177 = vector.load %arg7[%c234, %c0_127] : memref<680x32xf32, #tpu.memory_space<vmem>>, vector<104x32xf32>
    %178 = arith.truncf %177 : vector<104x32xf32> to vector<104x32xbf16>
    %cst_128 = arith.constant dense<0.000000e+00> : vector<104x64xf32>
    %179 = tpu.matmul %178, %5, %cst_128 {dimension_numbers = #tpu.dot_dimension_numbers<[1], [0], [0], [1], [0, 0, 1, 1], [], []>} : vector<104x32xbf16>, vector<32x64xbf16>, vector<104x64xf32> -> vector<104x64xf32>
    %180 = arith.addf %176, %179 : vector<104x64xf32>
    %c235 = arith.constant 235 : index
    %c0_129 = arith.constant 0 : index
    %181 = vector.load %arg7[%c235, %c0_129] : memref<680x32xf32, #tpu.memory_space<vmem>>, vector<104x32xf32>
    %182 = arith.truncf %181 : vector<104x32xf32> to vector<104x32xbf16>
    %cst_130 = arith.constant dense<0.000000e+00> : vector<104x64xf32>
    %183 = tpu.matmul %182, %6, %cst_130 {dimension_numbers = #tpu.dot_dimension_numbers<[1], [0], [0], [1], [0, 0, 1, 1], [], []>} : vector<104x32xbf16>, vector<32x64xbf16>, vector<104x64xf32> -> vector<104x64xf32>
    %184 = arith.addf %180, %183 : vector<104x64xf32>
    %c236 = arith.constant 236 : index
    %c0_131 = arith.constant 0 : index
    %185 = vector.load %arg7[%c236, %c0_131] : memref<680x32xf32, #tpu.memory_space<vmem>>, vector<104x32xf32>
    %186 = arith.truncf %185 : vector<104x32xf32> to vector<104x32xbf16>
    %cst_132 = arith.constant dense<0.000000e+00> : vector<104x64xf32>
    %187 = tpu.matmul %186, %7, %cst_132 {dimension_numbers = #tpu.dot_dimension_numbers<[1], [0], [0], [1], [0, 0, 1, 1], [], []>} : vector<104x32xbf16>, vector<32x64xbf16>, vector<104x64xf32> -> vector<104x64xf32>
    %188 = arith.addf %184, %187 : vector<104x64xf32>
    %c260 = arith.constant 260 : index
    %c0_133 = arith.constant 0 : index
    %189 = vector.load %arg7[%c260, %c0_133] : memref<680x32xf32, #tpu.memory_space<vmem>>, vector<104x32xf32>
    %190 = arith.truncf %189 : vector<104x32xf32> to vector<104x32xbf16>
    %cst_134 = arith.constant dense<0.000000e+00> : vector<104x64xf32>
    %191 = tpu.matmul %190, %8, %cst_134 {dimension_numbers = #tpu.dot_dimension_numbers<[1], [0], [0], [1], [0, 0, 1, 1], [], []>} : vector<104x32xbf16>, vector<32x64xbf16>, vector<104x64xf32> -> vector<104x64xf32>
    %192 = arith.addf %188, %191 : vector<104x64xf32>
    %c261 = arith.constant 261 : index
    %c0_135 = arith.constant 0 : index
    %193 = vector.load %arg7[%c261, %c0_135] : memref<680x32xf32, #tpu.memory_space<vmem>>, vector<104x32xf32>
    %194 = arith.truncf %193 : vector<104x32xf32> to vector<104x32xbf16>
    %cst_136 = arith.constant dense<0.000000e+00> : vector<104x64xf32>
    %195 = tpu.matmul %194, %9, %cst_136 {dimension_numbers = #tpu.dot_dimension_numbers<[1], [0], [0], [1], [0, 0, 1, 1], [], []>} : vector<104x32xbf16>, vector<32x64xbf16>, vector<104x64xf32> -> vector<104x64xf32>
    %196 = arith.addf %192, %195 : vector<104x64xf32>
    %c262 = arith.constant 262 : index
    %c0_137 = arith.constant 0 : index
    %197 = vector.load %arg7[%c262, %c0_137] : memref<680x32xf32, #tpu.memory_space<vmem>>, vector<104x32xf32>
    %198 = arith.truncf %197 : vector<104x32xf32> to vector<104x32xbf16>
    %cst_138 = arith.constant dense<0.000000e+00> : vector<104x64xf32>
    %199 = tpu.matmul %198, %10, %cst_138 {dimension_numbers = #tpu.dot_dimension_numbers<[1], [0], [0], [1], [0, 0, 1, 1], [], []>} : vector<104x32xbf16>, vector<32x64xbf16>, vector<104x64xf32> -> vector<104x64xf32>
    %200 = arith.addf %196, %199 : vector<104x64xf32>
    %201 = vector.broadcast %11 : vector<1x64xf32> to vector<104x64xf32>
    %202 = arith.addf %200, %201 : vector<104x64xf32>
    %cst_139 = arith.constant 0.000000e+00 : f32
    %203 = vector.broadcast %cst_139 : f32 to vector<104x64xf32>
    %204 = arith.maximumf %202, %203 : vector<104x64xf32>
    %c0_140 = arith.constant 0 : index
    %c0_141 = arith.constant 0 : index
    %205 = vector.load %arg8[%c0_140, %c0_141] : memref<104x64xf32, #tpu.memory_space<vmem>>, vector<104x64xf32>
    tpu.vector_store %arg8[%c0_140, %c0_141], %204 {strides = array<i32>} : memref<104x64xf32, #tpu.memory_space<vmem>>, vector<104x64xf32>,
    %c0_142 = arith.constant 0 : index
    %c0_143 = arith.constant 0 : index
    %206 = tpu.strided_load %arg8[%c0_142, %c0_143] {strides = array<i32: 4, 1>} : memref<104x64xf32, #tpu.memory_space<vmem>>, vector<6x64xf32>
    %c1_144 = arith.constant 1 : index
    %c0_145 = arith.constant 0 : index
    %207 = tpu.strided_load %arg8[%c1_144, %c0_145] {strides = array<i32: 4, 1>} : memref<104x64xf32, #tpu.memory_space<vmem>>, vector<6x64xf32>
    %208 = arith.maximumf %206, %207 : vector<6x64xf32>
    %c26_146 = arith.constant 26 : index
    %c0_147 = arith.constant 0 : index
    %209 = tpu.strided_load %arg8[%c26_146, %c0_147] {strides = array<i32: 4, 1>} : memref<104x64xf32, #tpu.memory_space<vmem>>, vector<6x64xf32>
    %c27_148 = arith.constant 27 : index
    %c0_149 = arith.constant 0 : index
    %210 = tpu.strided_load %arg8[%c27_148, %c0_149] {strides = array<i32: 4, 1>} : memref<104x64xf32, #tpu.memory_space<vmem>>, vector<6x64xf32>
    %211 = arith.maximumf %209, %210 : vector<6x64xf32>
    %212 = arith.maximumf %208, %211 : vector<6x64xf32>
    %c2_150 = arith.constant 2 : index
    %c0_151 = arith.constant 0 : index
    %213 = tpu.strided_load %arg8[%c2_150, %c0_151] {strides = array<i32: 4, 1>} : memref<104x64xf32, #tpu.memory_space<vmem>>, vector<6x64xf32>
    %c3_152 = arith.constant 3 : index
    %c0_153 = arith.constant 0 : index
    %214 = tpu.strided_load %arg8[%c3_152, %c0_153] {strides = array<i32: 4, 1>} : memref<104x64xf32, #tpu.memory_space<vmem>>, vector<6x64xf32>
    %215 = arith.maximumf %213, %214 : vector<6x64xf32>
    %c28_154 = arith.constant 28 : index
    %c0_155 = arith.constant 0 : index
    %216 = tpu.strided_load %arg8[%c28_154, %c0_155] {strides = array<i32: 4, 1>} : memref<104x64xf32, #tpu.memory_space<vmem>>, vector<6x64xf32>
    %c29_156 = arith.constant 29 : index
    %c0_157 = arith.constant 0 : index
    %217 = tpu.strided_load %arg8[%c29_156, %c0_157] {strides = array<i32: 4, 1>} : memref<104x64xf32, #tpu.memory_space<vmem>>, vector<6x64xf32>
    %218 = arith.maximumf %216, %217 : vector<6x64xf32>
    %219 = arith.maximumf %215, %218 : vector<6x64xf32>
    %220 = tpu.concatenate %212, %219 in 1 : vector<6x64xf32>, vector<6x64xf32> -> vector<6x128xf32>
    %c52_158 = arith.constant 52 : index
    %c0_159 = arith.constant 0 : index
    %221 = tpu.strided_load %arg8[%c52_158, %c0_159] {strides = array<i32: 4, 1>} : memref<104x64xf32, #tpu.memory_space<vmem>>, vector<6x64xf32>
    %c53_160 = arith.constant 53 : index
    %c0_161 = arith.constant 0 : index
    %222 = tpu.strided_load %arg8[%c53_160, %c0_161] {strides = array<i32: 4, 1>} : memref<104x64xf32, #tpu.memory_space<vmem>>, vector<6x64xf32>
    %223 = arith.maximumf %221, %222 : vector<6x64xf32>
    %c78_162 = arith.constant 78 : index
    %c0_163 = arith.constant 0 : index
    %224 = tpu.strided_load %arg8[%c78_162, %c0_163] {strides = array<i32: 4, 1>} : memref<104x64xf32, #tpu.memory_space<vmem>>, vector<6x64xf32>
    %c79_164 = arith.constant 79 : index
    %c0_165 = arith.constant 0 : index
    %225 = tpu.strided_load %arg8[%c79_164, %c0_165] {strides = array<i32: 4, 1>} : memref<104x64xf32, #tpu.memory_space<vmem>>, vector<6x64xf32>
    %226 = arith.maximumf %224, %225 : vector<6x64xf32>
    %227 = arith.maximumf %223, %226 : vector<6x64xf32>
    %c54_166 = arith.constant 54 : index
    %c0_167 = arith.constant 0 : index
    %228 = tpu.strided_load %arg8[%c54_166, %c0_167] {strides = array<i32: 4, 1>} : memref<104x64xf32, #tpu.memory_space<vmem>>, vector<6x64xf32>
    %c55_168 = arith.constant 55 : index
    %c0_169 = arith.constant 0 : index
    %229 = tpu.strided_load %arg8[%c55_168, %c0_169] {strides = array<i32: 4, 1>} : memref<104x64xf32, #tpu.memory_space<vmem>>, vector<6x64xf32>
    %230 = arith.maximumf %228, %229 : vector<6x64xf32>
    %c80_170 = arith.constant 80 : index
    %c0_171 = arith.constant 0 : index
    %231 = tpu.strided_load %arg8[%c80_170, %c0_171] {strides = array<i32: 4, 1>} : memref<104x64xf32, #tpu.memory_space<vmem>>, vector<6x64xf32>
    %c81_172 = arith.constant 81 : index
    %c0_173 = arith.constant 0 : index
    %232 = tpu.strided_load %arg8[%c81_172, %c0_173] {strides = array<i32: 4, 1>} : memref<104x64xf32, #tpu.memory_space<vmem>>, vector<6x64xf32>
    %233 = arith.maximumf %231, %232 : vector<6x64xf32>
    %234 = arith.maximumf %230, %233 : vector<6x64xf32>
    %235 = tpu.concatenate %227, %234 in 1 : vector<6x64xf32>, vector<6x64xf32> -> vector<6x128xf32>
    %c312 = arith.constant 312 : index
    %c0_174 = arith.constant 0 : index
    %236 = vector.load %arg7[%c312, %c0_174] : memref<680x32xf32, #tpu.memory_space<vmem>>, vector<104x32xf32>
    %237 = arith.truncf %236 : vector<104x32xf32> to vector<104x32xbf16>
    %cst_175 = arith.constant dense<0.000000e+00> : vector<104x64xf32>
    %238 = tpu.matmul %237, %2, %cst_175 {dimension_numbers = #tpu.dot_dimension_numbers<[1], [0], [0], [1], [0, 0, 1, 1], [], []>} : vector<104x32xbf16>, vector<32x64xbf16>, vector<104x64xf32> -> vector<104x64xf32>
    %c313 = arith.constant 313 : index
    %c0_176 = arith.constant 0 : index
    %239 = vector.load %arg7[%c313, %c0_176] : memref<680x32xf32, #tpu.memory_space<vmem>>, vector<104x32xf32>
    %240 = arith.truncf %239 : vector<104x32xf32> to vector<104x32xbf16>
    %cst_177 = arith.constant dense<0.000000e+00> : vector<104x64xf32>
    %241 = tpu.matmul %240, %3, %cst_177 {dimension_numbers = #tpu.dot_dimension_numbers<[1], [0], [0], [1], [0, 0, 1, 1], [], []>} : vector<104x32xbf16>, vector<32x64xbf16>, vector<104x64xf32> -> vector<104x64xf32>
    %242 = arith.addf %238, %241 : vector<104x64xf32>
    %c314 = arith.constant 314 : index
    %c0_178 = arith.constant 0 : index
    %243 = vector.load %arg7[%c314, %c0_178] : memref<680x32xf32, #tpu.memory_space<vmem>>, vector<104x32xf32>
    %244 = arith.truncf %243 : vector<104x32xf32> to vector<104x32xbf16>
    %cst_179 = arith.constant dense<0.000000e+00> : vector<104x64xf32>
    %245 = tpu.matmul %244, %4, %cst_179 {dimension_numbers = #tpu.dot_dimension_numbers<[1], [0], [0], [1], [0, 0, 1, 1], [], []>} : vector<104x32xbf16>, vector<32x64xbf16>, vector<104x64xf32> -> vector<104x64xf32>
    %246 = arith.addf %242, %245 : vector<104x64xf32>
    %c338 = arith.constant 338 : index
    %c0_180 = arith.constant 0 : index
    %247 = vector.load %arg7[%c338, %c0_180] : memref<680x32xf32, #tpu.memory_space<vmem>>, vector<104x32xf32>
    %248 = arith.truncf %247 : vector<104x32xf32> to vector<104x32xbf16>
    %cst_181 = arith.constant dense<0.000000e+00> : vector<104x64xf32>
    %249 = tpu.matmul %248, %5, %cst_181 {dimension_numbers = #tpu.dot_dimension_numbers<[1], [0], [0], [1], [0, 0, 1, 1], [], []>} : vector<104x32xbf16>, vector<32x64xbf16>, vector<104x64xf32> -> vector<104x64xf32>
    %250 = arith.addf %246, %249 : vector<104x64xf32>
    %c339 = arith.constant 339 : index
    %c0_182 = arith.constant 0 : index
    %251 = vector.load %arg7[%c339, %c0_182] : memref<680x32xf32, #tpu.memory_space<vmem>>, vector<104x32xf32>
    %252 = arith.truncf %251 : vector<104x32xf32> to vector<104x32xbf16>
    %cst_183 = arith.constant dense<0.000000e+00> : vector<104x64xf32>
    %253 = tpu.matmul %252, %6, %cst_183 {dimension_numbers = #tpu.dot_dimension_numbers<[1], [0], [0], [1], [0, 0, 1, 1], [], []>} : vector<104x32xbf16>, vector<32x64xbf16>, vector<104x64xf32> -> vector<104x64xf32>
    %254 = arith.addf %250, %253 : vector<104x64xf32>
    %c340 = arith.constant 340 : index
    %c0_184 = arith.constant 0 : index
    %255 = vector.load %arg7[%c340, %c0_184] : memref<680x32xf32, #tpu.memory_space<vmem>>, vector<104x32xf32>
    %256 = arith.truncf %255 : vector<104x32xf32> to vector<104x32xbf16>
    %cst_185 = arith.constant dense<0.000000e+00> : vector<104x64xf32>
    %257 = tpu.matmul %256, %7, %cst_185 {dimension_numbers = #tpu.dot_dimension_numbers<[1], [0], [0], [1], [0, 0, 1, 1], [], []>} : vector<104x32xbf16>, vector<32x64xbf16>, vector<104x64xf32> -> vector<104x64xf32>
    %258 = arith.addf %254, %257 : vector<104x64xf32>
    %c364 = arith.constant 364 : index
    %c0_186 = arith.constant 0 : index
    %259 = vector.load %arg7[%c364, %c0_186] : memref<680x32xf32, #tpu.memory_space<vmem>>, vector<104x32xf32>
    %260 = arith.truncf %259 : vector<104x32xf32> to vector<104x32xbf16>
    %cst_187 = arith.constant dense<0.000000e+00> : vector<104x64xf32>
    %261 = tpu.matmul %260, %8, %cst_187 {dimension_numbers = #tpu.dot_dimension_numbers<[1], [0], [0], [1], [0, 0, 1, 1], [], []>} : vector<104x32xbf16>, vector<32x64xbf16>, vector<104x64xf32> -> vector<104x64xf32>
    %262 = arith.addf %258, %261 : vector<104x64xf32>
    %c365 = arith.constant 365 : index
    %c0_188 = arith.constant 0 : index
    %263 = vector.load %arg7[%c365, %c0_188] : memref<680x32xf32, #tpu.memory_space<vmem>>, vector<104x32xf32>
    %264 = arith.truncf %263 : vector<104x32xf32> to vector<104x32xbf16>
    %cst_189 = arith.constant dense<0.000000e+00> : vector<104x64xf32>
    %265 = tpu.matmul %264, %9, %cst_189 {dimension_numbers = #tpu.dot_dimension_numbers<[1], [0], [0], [1], [0, 0, 1, 1], [], []>} : vector<104x32xbf16>, vector<32x64xbf16>, vector<104x64xf32> -> vector<104x64xf32>
    %266 = arith.addf %262, %265 : vector<104x64xf32>
    %c366 = arith.constant 366 : index
    %c0_190 = arith.constant 0 : index
    %267 = vector.load %arg7[%c366, %c0_190] : memref<680x32xf32, #tpu.memory_space<vmem>>, vector<104x32xf32>
    %268 = arith.truncf %267 : vector<104x32xf32> to vector<104x32xbf16>
    %cst_191 = arith.constant dense<0.000000e+00> : vector<104x64xf32>
    %269 = tpu.matmul %268, %10, %cst_191 {dimension_numbers = #tpu.dot_dimension_numbers<[1], [0], [0], [1], [0, 0, 1, 1], [], []>} : vector<104x32xbf16>, vector<32x64xbf16>, vector<104x64xf32> -> vector<104x64xf32>
    %270 = arith.addf %266, %269 : vector<104x64xf32>
    %271 = vector.broadcast %11 : vector<1x64xf32> to vector<104x64xf32>
    %272 = arith.addf %270, %271 : vector<104x64xf32>
    %cst_192 = arith.constant 0.000000e+00 : f32
    %273 = vector.broadcast %cst_192 : f32 to vector<104x64xf32>
    %274 = arith.maximumf %272, %273 : vector<104x64xf32>
    %c0_193 = arith.constant 0 : index
    %c0_194 = arith.constant 0 : index
    %275 = vector.load %arg8[%c0_193, %c0_194] : memref<104x64xf32, #tpu.memory_space<vmem>>, vector<104x64xf32>
    tpu.vector_store %arg8[%c0_193, %c0_194], %274 {strides = array<i32>} : memref<104x64xf32, #tpu.memory_space<vmem>>, vector<104x64xf32>,
    %c0_195 = arith.constant 0 : index
    %c0_196 = arith.constant 0 : index
    %276 = tpu.strided_load %arg8[%c0_195, %c0_196] {strides = array<i32: 4, 1>} : memref<104x64xf32, #tpu.memory_space<vmem>>, vector<6x64xf32>
    %c1_197 = arith.constant 1 : index
    %c0_198 = arith.constant 0 : index
    %277 = tpu.strided_load %arg8[%c1_197, %c0_198] {strides = array<i32: 4, 1>} : memref<104x64xf32, #tpu.memory_space<vmem>>, vector<6x64xf32>
    %278 = arith.maximumf %276, %277 : vector<6x64xf32>
    %c26_199 = arith.constant 26 : index
    %c0_200 = arith.constant 0 : index
    %279 = tpu.strided_load %arg8[%c26_199, %c0_200] {strides = array<i32: 4, 1>} : memref<104x64xf32, #tpu.memory_space<vmem>>, vector<6x64xf32>
    %c27_201 = arith.constant 27 : index
    %c0_202 = arith.constant 0 : index
    %280 = tpu.strided_load %arg8[%c27_201, %c0_202] {strides = array<i32: 4, 1>} : memref<104x64xf32, #tpu.memory_space<vmem>>, vector<6x64xf32>
    %281 = arith.maximumf %279, %280 : vector<6x64xf32>
    %282 = arith.maximumf %278, %281 : vector<6x64xf32>
    %c2_203 = arith.constant 2 : index
    %c0_204 = arith.constant 0 : index
    %283 = tpu.strided_load %arg8[%c2_203, %c0_204] {strides = array<i32: 4, 1>} : memref<104x64xf32, #tpu.memory_space<vmem>>, vector<6x64xf32>
    %c3_205 = arith.constant 3 : index
    %c0_206 = arith.constant 0 : index
    %284 = tpu.strided_load %arg8[%c3_205, %c0_206] {strides = array<i32: 4, 1>} : memref<104x64xf32, #tpu.memory_space<vmem>>, vector<6x64xf32>
    %285 = arith.maximumf %283, %284 : vector<6x64xf32>
    %c28_207 = arith.constant 28 : index
    %c0_208 = arith.constant 0 : index
    %286 = tpu.strided_load %arg8[%c28_207, %c0_208] {strides = array<i32: 4, 1>} : memref<104x64xf32, #tpu.memory_space<vmem>>, vector<6x64xf32>
    %c29_209 = arith.constant 29 : index
    %c0_210 = arith.constant 0 : index
    %287 = tpu.strided_load %arg8[%c29_209, %c0_210] {strides = array<i32: 4, 1>} : memref<104x64xf32, #tpu.memory_space<vmem>>, vector<6x64xf32>
    %288 = arith.maximumf %286, %287 : vector<6x64xf32>
    %289 = arith.maximumf %285, %288 : vector<6x64xf32>
    %290 = tpu.concatenate %282, %289 in 1 : vector<6x64xf32>, vector<6x64xf32> -> vector<6x128xf32>
    %c52_211 = arith.constant 52 : index
    %c0_212 = arith.constant 0 : index
    %291 = tpu.strided_load %arg8[%c52_211, %c0_212] {strides = array<i32: 4, 1>} : memref<104x64xf32, #tpu.memory_space<vmem>>, vector<6x64xf32>
    %c53_213 = arith.constant 53 : index
    %c0_214 = arith.constant 0 : index
    %292 = tpu.strided_load %arg8[%c53_213, %c0_214] {strides = array<i32: 4, 1>} : memref<104x64xf32, #tpu.memory_space<vmem>>, vector<6x64xf32>
    %293 = arith.maximumf %291, %292 : vector<6x64xf32>
    %c78_215 = arith.constant 78 : index
    %c0_216 = arith.constant 0 : index
    %294 = tpu.strided_load %arg8[%c78_215, %c0_216] {strides = array<i32: 4, 1>} : memref<104x64xf32, #tpu.memory_space<vmem>>, vector<6x64xf32>
    %c79_217 = arith.constant 79 : index
    %c0_218 = arith.constant 0 : index
    %295 = tpu.strided_load %arg8[%c79_217, %c0_218] {strides = array<i32: 4, 1>} : memref<104x64xf32, #tpu.memory_space<vmem>>, vector<6x64xf32>
    %296 = arith.maximumf %294, %295 : vector<6x64xf32>
    %297 = arith.maximumf %293, %296 : vector<6x64xf32>
    %c54_219 = arith.constant 54 : index
    %c0_220 = arith.constant 0 : index
    %298 = tpu.strided_load %arg8[%c54_219, %c0_220] {strides = array<i32: 4, 1>} : memref<104x64xf32, #tpu.memory_space<vmem>>, vector<6x64xf32>
    %c55_221 = arith.constant 55 : index
    %c0_222 = arith.constant 0 : index
    %299 = tpu.strided_load %arg8[%c55_221, %c0_222] {strides = array<i32: 4, 1>} : memref<104x64xf32, #tpu.memory_space<vmem>>, vector<6x64xf32>
    %300 = arith.maximumf %298, %299 : vector<6x64xf32>
    %c80_223 = arith.constant 80 : index
    %c0_224 = arith.constant 0 : index
    %301 = tpu.strided_load %arg8[%c80_223, %c0_224] {strides = array<i32: 4, 1>} : memref<104x64xf32, #tpu.memory_space<vmem>>, vector<6x64xf32>
    %c81_225 = arith.constant 81 : index
    %c0_226 = arith.constant 0 : index
    %302 = tpu.strided_load %arg8[%c81_225, %c0_226] {strides = array<i32: 4, 1>} : memref<104x64xf32, #tpu.memory_space<vmem>>, vector<6x64xf32>
    %303 = arith.maximumf %301, %302 : vector<6x64xf32>
    %304 = arith.maximumf %300, %303 : vector<6x64xf32>
    %305 = tpu.concatenate %297, %304 in 1 : vector<6x64xf32>, vector<6x64xf32> -> vector<6x128xf32>
    %c416 = arith.constant 416 : index
    %c0_227 = arith.constant 0 : index
    %306 = vector.load %arg7[%c416, %c0_227] : memref<680x32xf32, #tpu.memory_space<vmem>>, vector<104x32xf32>
    %307 = arith.truncf %306 : vector<104x32xf32> to vector<104x32xbf16>
    %cst_228 = arith.constant dense<0.000000e+00> : vector<104x64xf32>
    %308 = tpu.matmul %307, %2, %cst_228 {dimension_numbers = #tpu.dot_dimension_numbers<[1], [0], [0], [1], [0, 0, 1, 1], [], []>} : vector<104x32xbf16>, vector<32x64xbf16>, vector<104x64xf32> -> vector<104x64xf32>
    %c417 = arith.constant 417 : index
    %c0_229 = arith.constant 0 : index
    %309 = vector.load %arg7[%c417, %c0_229] : memref<680x32xf32, #tpu.memory_space<vmem>>, vector<104x32xf32>
    %310 = arith.truncf %309 : vector<104x32xf32> to vector<104x32xbf16>
    %cst_230 = arith.constant dense<0.000000e+00> : vector<104x64xf32>
    %311 = tpu.matmul %310, %3, %cst_230 {dimension_numbers = #tpu.dot_dimension_numbers<[1], [0], [0], [1], [0, 0, 1, 1], [], []>} : vector<104x32xbf16>, vector<32x64xbf16>, vector<104x64xf32> -> vector<104x64xf32>
    %312 = arith.addf %308, %311 : vector<104x64xf32>
    %c418 = arith.constant 418 : index
    %c0_231 = arith.constant 0 : index
    %313 = vector.load %arg7[%c418, %c0_231] : memref<680x32xf32, #tpu.memory_space<vmem>>, vector<104x32xf32>
    %314 = arith.truncf %313 : vector<104x32xf32> to vector<104x32xbf16>
    %cst_232 = arith.constant dense<0.000000e+00> : vector<104x64xf32>
    %315 = tpu.matmul %314, %4, %cst_232 {dimension_numbers = #tpu.dot_dimension_numbers<[1], [0], [0], [1], [0, 0, 1, 1], [], []>} : vector<104x32xbf16>, vector<32x64xbf16>, vector<104x64xf32> -> vector<104x64xf32>
    %316 = arith.addf %312, %315 : vector<104x64xf32>
    %c442 = arith.constant 442 : index
    %c0_233 = arith.constant 0 : index
    %317 = vector.load %arg7[%c442, %c0_233] : memref<680x32xf32, #tpu.memory_space<vmem>>, vector<104x32xf32>
    %318 = arith.truncf %317 : vector<104x32xf32> to vector<104x32xbf16>
    %cst_234 = arith.constant dense<0.000000e+00> : vector<104x64xf32>
    %319 = tpu.matmul %318, %5, %cst_234 {dimension_numbers = #tpu.dot_dimension_numbers<[1], [0], [0], [1], [0, 0, 1, 1], [], []>} : vector<104x32xbf16>, vector<32x64xbf16>, vector<104x64xf32> -> vector<104x64xf32>
    %320 = arith.addf %316, %319 : vector<104x64xf32>
    %c443 = arith.constant 443 : index
    %c0_235 = arith.constant 0 : index
    %321 = vector.load %arg7[%c443, %c0_235] : memref<680x32xf32, #tpu.memory_space<vmem>>, vector<104x32xf32>
    %322 = arith.truncf %321 : vector<104x32xf32> to vector<104x32xbf16>
    %cst_236 = arith.constant dense<0.000000e+00> : vector<104x64xf32>
    %323 = tpu.matmul %322, %6, %cst_236 {dimension_numbers = #tpu.dot_dimension_numbers<[1], [0], [0], [1], [0, 0, 1, 1], [], []>} : vector<104x32xbf16>, vector<32x64xbf16>, vector<104x64xf32> -> vector<104x64xf32>
    %324 = arith.addf %320, %323 : vector<104x64xf32>
    %c444 = arith.constant 444 : index
    %c0_237 = arith.constant 0 : index
    %325 = vector.load %arg7[%c444, %c0_237] : memref<680x32xf32, #tpu.memory_space<vmem>>, vector<104x32xf32>
    %326 = arith.truncf %325 : vector<104x32xf32> to vector<104x32xbf16>
    %cst_238 = arith.constant dense<0.000000e+00> : vector<104x64xf32>
    %327 = tpu.matmul %326, %7, %cst_238 {dimension_numbers = #tpu.dot_dimension_numbers<[1], [0], [0], [1], [0, 0, 1, 1], [], []>} : vector<104x32xbf16>, vector<32x64xbf16>, vector<104x64xf32> -> vector<104x64xf32>
    %328 = arith.addf %324, %327 : vector<104x64xf32>
    %c468 = arith.constant 468 : index
    %c0_239 = arith.constant 0 : index
    %329 = vector.load %arg7[%c468, %c0_239] : memref<680x32xf32, #tpu.memory_space<vmem>>, vector<104x32xf32>
    %330 = arith.truncf %329 : vector<104x32xf32> to vector<104x32xbf16>
    %cst_240 = arith.constant dense<0.000000e+00> : vector<104x64xf32>
    %331 = tpu.matmul %330, %8, %cst_240 {dimension_numbers = #tpu.dot_dimension_numbers<[1], [0], [0], [1], [0, 0, 1, 1], [], []>} : vector<104x32xbf16>, vector<32x64xbf16>, vector<104x64xf32> -> vector<104x64xf32>
    %332 = arith.addf %328, %331 : vector<104x64xf32>
    %c469 = arith.constant 469 : index
    %c0_241 = arith.constant 0 : index
    %333 = vector.load %arg7[%c469, %c0_241] : memref<680x32xf32, #tpu.memory_space<vmem>>, vector<104x32xf32>
    %334 = arith.truncf %333 : vector<104x32xf32> to vector<104x32xbf16>
    %cst_242 = arith.constant dense<0.000000e+00> : vector<104x64xf32>
    %335 = tpu.matmul %334, %9, %cst_242 {dimension_numbers = #tpu.dot_dimension_numbers<[1], [0], [0], [1], [0, 0, 1, 1], [], []>} : vector<104x32xbf16>, vector<32x64xbf16>, vector<104x64xf32> -> vector<104x64xf32>
    %336 = arith.addf %332, %335 : vector<104x64xf32>
    %c470 = arith.constant 470 : index
    %c0_243 = arith.constant 0 : index
    %337 = vector.load %arg7[%c470, %c0_243] : memref<680x32xf32, #tpu.memory_space<vmem>>, vector<104x32xf32>
    %338 = arith.truncf %337 : vector<104x32xf32> to vector<104x32xbf16>
    %cst_244 = arith.constant dense<0.000000e+00> : vector<104x64xf32>
    %339 = tpu.matmul %338, %10, %cst_244 {dimension_numbers = #tpu.dot_dimension_numbers<[1], [0], [0], [1], [0, 0, 1, 1], [], []>} : vector<104x32xbf16>, vector<32x64xbf16>, vector<104x64xf32> -> vector<104x64xf32>
    %340 = arith.addf %336, %339 : vector<104x64xf32>
    %341 = vector.broadcast %11 : vector<1x64xf32> to vector<104x64xf32>
    %342 = arith.addf %340, %341 : vector<104x64xf32>
    %cst_245 = arith.constant 0.000000e+00 : f32
    %343 = vector.broadcast %cst_245 : f32 to vector<104x64xf32>
    %344 = arith.maximumf %342, %343 : vector<104x64xf32>
    %c0_246 = arith.constant 0 : index
    %c0_247 = arith.constant 0 : index
    %345 = vector.load %arg8[%c0_246, %c0_247] : memref<104x64xf32, #tpu.memory_space<vmem>>, vector<104x64xf32>
    tpu.vector_store %arg8[%c0_246, %c0_247], %344 {strides = array<i32>} : memref<104x64xf32, #tpu.memory_space<vmem>>, vector<104x64xf32>,
    %c0_248 = arith.constant 0 : index
    %c0_249 = arith.constant 0 : index
    %346 = tpu.strided_load %arg8[%c0_248, %c0_249] {strides = array<i32: 4, 1>} : memref<104x64xf32, #tpu.memory_space<vmem>>, vector<6x64xf32>
    %c1_250 = arith.constant 1 : index
    %c0_251 = arith.constant 0 : index
    %347 = tpu.strided_load %arg8[%c1_250, %c0_251] {strides = array<i32: 4, 1>} : memref<104x64xf32, #tpu.memory_space<vmem>>, vector<6x64xf32>
    %348 = arith.maximumf %346, %347 : vector<6x64xf32>
    %c26_252 = arith.constant 26 : index
    %c0_253 = arith.constant 0 : index
    %349 = tpu.strided_load %arg8[%c26_252, %c0_253] {strides = array<i32: 4, 1>} : memref<104x64xf32, #tpu.memory_space<vmem>>, vector<6x64xf32>
    %c27_254 = arith.constant 27 : index
    %c0_255 = arith.constant 0 : index
    %350 = tpu.strided_load %arg8[%c27_254, %c0_255] {strides = array<i32: 4, 1>} : memref<104x64xf32, #tpu.memory_space<vmem>>, vector<6x64xf32>
    %351 = arith.maximumf %349, %350 : vector<6x64xf32>
    %352 = arith.maximumf %348, %351 : vector<6x64xf32>
    %c2_256 = arith.constant 2 : index
    %c0_257 = arith.constant 0 : index
    %353 = tpu.strided_load %arg8[%c2_256, %c0_257] {strides = array<i32: 4, 1>} : memref<104x64xf32, #tpu.memory_space<vmem>>, vector<6x64xf32>
    %c3_258 = arith.constant 3 : index
    %c0_259 = arith.constant 0 : index
    %354 = tpu.strided_load %arg8[%c3_258, %c0_259] {strides = array<i32: 4, 1>} : memref<104x64xf32, #tpu.memory_space<vmem>>, vector<6x64xf32>
    %355 = arith.maximumf %353, %354 : vector<6x64xf32>
    %c28_260 = arith.constant 28 : index
    %c0_261 = arith.constant 0 : index
    %356 = tpu.strided_load %arg8[%c28_260, %c0_261] {strides = array<i32: 4, 1>} : memref<104x64xf32, #tpu.memory_space<vmem>>, vector<6x64xf32>
    %c29_262 = arith.constant 29 : index
    %c0_263 = arith.constant 0 : index
    %357 = tpu.strided_load %arg8[%c29_262, %c0_263] {strides = array<i32: 4, 1>} : memref<104x64xf32, #tpu.memory_space<vmem>>, vector<6x64xf32>
    %358 = arith.maximumf %356, %357 : vector<6x64xf32>
    %359 = arith.maximumf %355, %358 : vector<6x64xf32>
    %360 = tpu.concatenate %352, %359 in 1 : vector<6x64xf32>, vector<6x64xf32> -> vector<6x128xf32>
    %c52_264 = arith.constant 52 : index
    %c0_265 = arith.constant 0 : index
    %361 = tpu.strided_load %arg8[%c52_264, %c0_265] {strides = array<i32: 4, 1>} : memref<104x64xf32, #tpu.memory_space<vmem>>, vector<6x64xf32>
    %c53_266 = arith.constant 53 : index
    %c0_267 = arith.constant 0 : index
    %362 = tpu.strided_load %arg8[%c53_266, %c0_267] {strides = array<i32: 4, 1>} : memref<104x64xf32, #tpu.memory_space<vmem>>, vector<6x64xf32>
    %363 = arith.maximumf %361, %362 : vector<6x64xf32>
    %c78_268 = arith.constant 78 : index
    %c0_269 = arith.constant 0 : index
    %364 = tpu.strided_load %arg8[%c78_268, %c0_269] {strides = array<i32: 4, 1>} : memref<104x64xf32, #tpu.memory_space<vmem>>, vector<6x64xf32>
    %c79_270 = arith.constant 79 : index
    %c0_271 = arith.constant 0 : index
    %365 = tpu.strided_load %arg8[%c79_270, %c0_271] {strides = array<i32: 4, 1>} : memref<104x64xf32, #tpu.memory_space<vmem>>, vector<6x64xf32>
    %366 = arith.maximumf %364, %365 : vector<6x64xf32>
    %367 = arith.maximumf %363, %366 : vector<6x64xf32>
    %c54_272 = arith.constant 54 : index
    %c0_273 = arith.constant 0 : index
    %368 = tpu.strided_load %arg8[%c54_272, %c0_273] {strides = array<i32: 4, 1>} : memref<104x64xf32, #tpu.memory_space<vmem>>, vector<6x64xf32>
    %c55_274 = arith.constant 55 : index
    %c0_275 = arith.constant 0 : index
    %369 = tpu.strided_load %arg8[%c55_274, %c0_275] {strides = array<i32: 4, 1>} : memref<104x64xf32, #tpu.memory_space<vmem>>, vector<6x64xf32>
    %370 = arith.maximumf %368, %369 : vector<6x64xf32>
    %c80_276 = arith.constant 80 : index
    %c0_277 = arith.constant 0 : index
    %371 = tpu.strided_load %arg8[%c80_276, %c0_277] {strides = array<i32: 4, 1>} : memref<104x64xf32, #tpu.memory_space<vmem>>, vector<6x64xf32>
    %c81_278 = arith.constant 81 : index
    %c0_279 = arith.constant 0 : index
    %372 = tpu.strided_load %arg8[%c81_278, %c0_279] {strides = array<i32: 4, 1>} : memref<104x64xf32, #tpu.memory_space<vmem>>, vector<6x64xf32>
    %373 = arith.maximumf %371, %372 : vector<6x64xf32>
    %374 = arith.maximumf %370, %373 : vector<6x64xf32>
    %375 = tpu.concatenate %367, %374 in 1 : vector<6x64xf32>, vector<6x64xf32> -> vector<6x128xf32>
    %c520 = arith.constant 520 : index
    %c0_280 = arith.constant 0 : index
    %376 = vector.load %arg7[%c520, %c0_280] : memref<680x32xf32, #tpu.memory_space<vmem>>, vector<104x32xf32>
    %377 = arith.truncf %376 : vector<104x32xf32> to vector<104x32xbf16>
    %cst_281 = arith.constant dense<0.000000e+00> : vector<104x64xf32>
    %378 = tpu.matmul %377, %2, %cst_281 {dimension_numbers = #tpu.dot_dimension_numbers<[1], [0], [0], [1], [0, 0, 1, 1], [], []>} : vector<104x32xbf16>, vector<32x64xbf16>, vector<104x64xf32> -> vector<104x64xf32>
    %c521 = arith.constant 521 : index
    %c0_282 = arith.constant 0 : index
    %379 = vector.load %arg7[%c521, %c0_282] : memref<680x32xf32, #tpu.memory_space<vmem>>, vector<104x32xf32>
    %380 = arith.truncf %379 : vector<104x32xf32> to vector<104x32xbf16>
    %cst_283 = arith.constant dense<0.000000e+00> : vector<104x64xf32>
    %381 = tpu.matmul %380, %3, %cst_283 {dimension_numbers = #tpu.dot_dimension_numbers<[1], [0], [0], [1], [0, 0, 1, 1], [], []>} : vector<104x32xbf16>, vector<32x64xbf16>, vector<104x64xf32> -> vector<104x64xf32>
    %382 = arith.addf %378, %381 : vector<104x64xf32>
    %c522 = arith.constant 522 : index
    %c0_284 = arith.constant 0 : index
    %383 = vector.load %arg7[%c522, %c0_284] : memref<680x32xf32, #tpu.memory_space<vmem>>, vector<104x32xf32>
    %384 = arith.truncf %383 : vector<104x32xf32> to vector<104x32xbf16>
    %cst_285 = arith.constant dense<0.000000e+00> : vector<104x64xf32>
    %385 = tpu.matmul %384, %4, %cst_285 {dimension_numbers = #tpu.dot_dimension_numbers<[1], [0], [0], [1], [0, 0, 1, 1], [], []>} : vector<104x32xbf16>, vector<32x64xbf16>, vector<104x64xf32> -> vector<104x64xf32>
    %386 = arith.addf %382, %385 : vector<104x64xf32>
    %c546 = arith.constant 546 : index
    %c0_286 = arith.constant 0 : index
    %387 = vector.load %arg7[%c546, %c0_286] : memref<680x32xf32, #tpu.memory_space<vmem>>, vector<104x32xf32>
    %388 = arith.truncf %387 : vector<104x32xf32> to vector<104x32xbf16>
    %cst_287 = arith.constant dense<0.000000e+00> : vector<104x64xf32>
    %389 = tpu.matmul %388, %5, %cst_287 {dimension_numbers = #tpu.dot_dimension_numbers<[1], [0], [0], [1], [0, 0, 1, 1], [], []>} : vector<104x32xbf16>, vector<32x64xbf16>, vector<104x64xf32> -> vector<104x64xf32>
    %390 = arith.addf %386, %389 : vector<104x64xf32>
    %c547 = arith.constant 547 : index
    %c0_288 = arith.constant 0 : index
    %391 = vector.load %arg7[%c547, %c0_288] : memref<680x32xf32, #tpu.memory_space<vmem>>, vector<104x32xf32>
    %392 = arith.truncf %391 : vector<104x32xf32> to vector<104x32xbf16>
    %cst_289 = arith.constant dense<0.000000e+00> : vector<104x64xf32>
    %393 = tpu.matmul %392, %6, %cst_289 {dimension_numbers = #tpu.dot_dimension_numbers<[1], [0], [0], [1], [0, 0, 1, 1], [], []>} : vector<104x32xbf16>, vector<32x64xbf16>, vector<104x64xf32> -> vector<104x64xf32>
    %394 = arith.addf %390, %393 : vector<104x64xf32>
    %c548 = arith.constant 548 : index
    %c0_290 = arith.constant 0 : index
    %395 = vector.load %arg7[%c548, %c0_290] : memref<680x32xf32, #tpu.memory_space<vmem>>, vector<104x32xf32>
    %396 = arith.truncf %395 : vector<104x32xf32> to vector<104x32xbf16>
    %cst_291 = arith.constant dense<0.000000e+00> : vector<104x64xf32>
    %397 = tpu.matmul %396, %7, %cst_291 {dimension_numbers = #tpu.dot_dimension_numbers<[1], [0], [0], [1], [0, 0, 1, 1], [], []>} : vector<104x32xbf16>, vector<32x64xbf16>, vector<104x64xf32> -> vector<104x64xf32>
    %398 = arith.addf %394, %397 : vector<104x64xf32>
    %c572 = arith.constant 572 : index
    %c0_292 = arith.constant 0 : index
    %399 = vector.load %arg7[%c572, %c0_292] : memref<680x32xf32, #tpu.memory_space<vmem>>, vector<104x32xf32>
    %400 = arith.truncf %399 : vector<104x32xf32> to vector<104x32xbf16>
    %cst_293 = arith.constant dense<0.000000e+00> : vector<104x64xf32>
    %401 = tpu.matmul %400, %8, %cst_293 {dimension_numbers = #tpu.dot_dimension_numbers<[1], [0], [0], [1], [0, 0, 1, 1], [], []>} : vector<104x32xbf16>, vector<32x64xbf16>, vector<104x64xf32> -> vector<104x64xf32>
    %402 = arith.addf %398, %401 : vector<104x64xf32>
    %c573 = arith.constant 573 : index
    %c0_294 = arith.constant 0 : index
    %403 = vector.load %arg7[%c573, %c0_294] : memref<680x32xf32, #tpu.memory_space<vmem>>, vector<104x32xf32>
    %404 = arith.truncf %403 : vector<104x32xf32> to vector<104x32xbf16>
    %cst_295 = arith.constant dense<0.000000e+00> : vector<104x64xf32>
    %405 = tpu.matmul %404, %9, %cst_295 {dimension_numbers = #tpu.dot_dimension_numbers<[1], [0], [0], [1], [0, 0, 1, 1], [], []>} : vector<104x32xbf16>, vector<32x64xbf16>, vector<104x64xf32> -> vector<104x64xf32>
    %406 = arith.addf %402, %405 : vector<104x64xf32>
    %c574 = arith.constant 574 : index
    %c0_296 = arith.constant 0 : index
    %407 = vector.load %arg7[%c574, %c0_296] : memref<680x32xf32, #tpu.memory_space<vmem>>, vector<104x32xf32>
    %408 = arith.truncf %407 : vector<104x32xf32> to vector<104x32xbf16>
    %cst_297 = arith.constant dense<0.000000e+00> : vector<104x64xf32>
    %409 = tpu.matmul %408, %10, %cst_297 {dimension_numbers = #tpu.dot_dimension_numbers<[1], [0], [0], [1], [0, 0, 1, 1], [], []>} : vector<104x32xbf16>, vector<32x64xbf16>, vector<104x64xf32> -> vector<104x64xf32>
    %410 = arith.addf %406, %409 : vector<104x64xf32>
    %411 = vector.broadcast %11 : vector<1x64xf32> to vector<104x64xf32>
    %412 = arith.addf %410, %411 : vector<104x64xf32>
    %cst_298 = arith.constant 0.000000e+00 : f32
    %413 = vector.broadcast %cst_298 : f32 to vector<104x64xf32>
    %414 = arith.maximumf %412, %413 : vector<104x64xf32>
    %c0_299 = arith.constant 0 : index
    %c0_300 = arith.constant 0 : index
    %415 = vector.load %arg8[%c0_299, %c0_300] : memref<104x64xf32, #tpu.memory_space<vmem>>, vector<104x64xf32>
    tpu.vector_store %arg8[%c0_299, %c0_300], %414 {strides = array<i32>} : memref<104x64xf32, #tpu.memory_space<vmem>>, vector<104x64xf32>,
    %c0_301 = arith.constant 0 : index
    %c0_302 = arith.constant 0 : index
    %416 = tpu.strided_load %arg8[%c0_301, %c0_302] {strides = array<i32: 4, 1>} : memref<104x64xf32, #tpu.memory_space<vmem>>, vector<6x64xf32>
    %c1_303 = arith.constant 1 : index
    %c0_304 = arith.constant 0 : index
    %417 = tpu.strided_load %arg8[%c1_303, %c0_304] {strides = array<i32: 4, 1>} : memref<104x64xf32, #tpu.memory_space<vmem>>, vector<6x64xf32>
    %418 = arith.maximumf %416, %417 : vector<6x64xf32>
    %c26_305 = arith.constant 26 : index
    %c0_306 = arith.constant 0 : index
    %419 = tpu.strided_load %arg8[%c26_305, %c0_306] {strides = array<i32: 4, 1>} : memref<104x64xf32, #tpu.memory_space<vmem>>, vector<6x64xf32>
    %c27_307 = arith.constant 27 : index
    %c0_308 = arith.constant 0 : index
    %420 = tpu.strided_load %arg8[%c27_307, %c0_308] {strides = array<i32: 4, 1>} : memref<104x64xf32, #tpu.memory_space<vmem>>, vector<6x64xf32>
    %421 = arith.maximumf %419, %420 : vector<6x64xf32>
    %422 = arith.maximumf %418, %421 : vector<6x64xf32>
    %c2_309 = arith.constant 2 : index
    %c0_310 = arith.constant 0 : index
    %423 = tpu.strided_load %arg8[%c2_309, %c0_310] {strides = array<i32: 4, 1>} : memref<104x64xf32, #tpu.memory_space<vmem>>, vector<6x64xf32>
    %c3_311 = arith.constant 3 : index
    %c0_312 = arith.constant 0 : index
    %424 = tpu.strided_load %arg8[%c3_311, %c0_312] {strides = array<i32: 4, 1>} : memref<104x64xf32, #tpu.memory_space<vmem>>, vector<6x64xf32>
    %425 = arith.maximumf %423, %424 : vector<6x64xf32>
    %c28_313 = arith.constant 28 : index
    %c0_314 = arith.constant 0 : index
    %426 = tpu.strided_load %arg8[%c28_313, %c0_314] {strides = array<i32: 4, 1>} : memref<104x64xf32, #tpu.memory_space<vmem>>, vector<6x64xf32>
    %c29_315 = arith.constant 29 : index
    %c0_316 = arith.constant 0 : index
    %427 = tpu.strided_load %arg8[%c29_315, %c0_316] {strides = array<i32: 4, 1>} : memref<104x64xf32, #tpu.memory_space<vmem>>, vector<6x64xf32>
    %428 = arith.maximumf %426, %427 : vector<6x64xf32>
    %429 = arith.maximumf %425, %428 : vector<6x64xf32>
    %430 = tpu.concatenate %422, %429 in 1 : vector<6x64xf32>, vector<6x64xf32> -> vector<6x128xf32>
    %c52_317 = arith.constant 52 : index
    %c0_318 = arith.constant 0 : index
    %431 = tpu.strided_load %arg8[%c52_317, %c0_318] {strides = array<i32: 4, 1>} : memref<104x64xf32, #tpu.memory_space<vmem>>, vector<6x64xf32>
    %c53_319 = arith.constant 53 : index
    %c0_320 = arith.constant 0 : index
    %432 = tpu.strided_load %arg8[%c53_319, %c0_320] {strides = array<i32: 4, 1>} : memref<104x64xf32, #tpu.memory_space<vmem>>, vector<6x64xf32>
    %433 = arith.maximumf %431, %432 : vector<6x64xf32>
    %c78_321 = arith.constant 78 : index
    %c0_322 = arith.constant 0 : index
    %434 = tpu.strided_load %arg8[%c78_321, %c0_322] {strides = array<i32: 4, 1>} : memref<104x64xf32, #tpu.memory_space<vmem>>, vector<6x64xf32>
    %c79_323 = arith.constant 79 : index
    %c0_324 = arith.constant 0 : index
    %435 = tpu.strided_load %arg8[%c79_323, %c0_324] {strides = array<i32: 4, 1>} : memref<104x64xf32, #tpu.memory_space<vmem>>, vector<6x64xf32>
    %436 = arith.maximumf %434, %435 : vector<6x64xf32>
    %437 = arith.maximumf %433, %436 : vector<6x64xf32>
    %c54_325 = arith.constant 54 : index
    %c0_326 = arith.constant 0 : index
    %438 = tpu.strided_load %arg8[%c54_325, %c0_326] {strides = array<i32: 4, 1>} : memref<104x64xf32, #tpu.memory_space<vmem>>, vector<6x64xf32>
    %c55_327 = arith.constant 55 : index
    %c0_328 = arith.constant 0 : index
    %439 = tpu.strided_load %arg8[%c55_327, %c0_328] {strides = array<i32: 4, 1>} : memref<104x64xf32, #tpu.memory_space<vmem>>, vector<6x64xf32>
    %440 = arith.maximumf %438, %439 : vector<6x64xf32>
    %c80_329 = arith.constant 80 : index
    %c0_330 = arith.constant 0 : index
    %441 = tpu.strided_load %arg8[%c80_329, %c0_330] {strides = array<i32: 4, 1>} : memref<104x64xf32, #tpu.memory_space<vmem>>, vector<6x64xf32>
    %c81_331 = arith.constant 81 : index
    %c0_332 = arith.constant 0 : index
    %442 = tpu.strided_load %arg8[%c81_331, %c0_332] {strides = array<i32: 4, 1>} : memref<104x64xf32, #tpu.memory_space<vmem>>, vector<6x64xf32>
    %443 = arith.maximumf %441, %442 : vector<6x64xf32>
    %444 = arith.maximumf %440, %443 : vector<6x64xf32>
    %445 = tpu.concatenate %437, %444 in 1 : vector<6x64xf32>, vector<6x64xf32> -> vector<6x128xf32>
    %446 = tpu.concatenate %80, %95, %150, %165, %220, %235, %290, %305, %360, %375, %430, %445 in 0 : vector<6x128xf32>, vector<6x128xf32>, vector<6x128xf32>, vector<6x128xf32>, vector<6x128xf32>, vector<6x128xf32>, vector<6x128xf32>, vector<6x128xf32>, vector<6x128xf32>, vector<6x128xf32>, vector<6x128xf32>, vector<6x128xf32> -> vector<72x128xf32>
    %447 = arith.truncf %446 : vector<72x128xf32> to vector<72x128xbf16>
    %448 = arith.index_cast %c0_i32 : i32 to index
    %c0_333 = arith.constant 0 : index
    %c0_334 = arith.constant 0 : index
    %449 = vector.load %arg6[%448, %c0_333, %c0_334] : memref<1x72x128xbf16, #tpu.memory_space<vmem>>, vector<1x72x128xbf16>
    %450 = vector.shape_cast %449 : vector<1x72x128xbf16> to vector<72x128xbf16>
    %451 = vector.shape_cast %447 : vector<72x128xbf16> to vector<1x72x128xbf16>
    tpu.vector_store %arg6[%448, %c0_333, %c0_334], %451 {strides = array<i32>} : memref<1x72x128xbf16, #tpu.memory_space<vmem>>, vector<1x72x128xbf16>,
    %c1_i32 = arith.constant 1 : i32
    return
  }
  func.func @transform_0(%arg0: i32) -> (i32, i32, i32) {
    %c0_i32 = arith.constant 0 : i32
    %c0_i32_0 = arith.constant 0 : i32
    %c0_i32_1 = arith.constant 0 : i32
    return %arg0, %c0_i32, %c0_i32_0 : i32, i32, i32
  }
  func.func @transform_1(%arg0: i32) -> (i32, i32) {
    %c0_i32 = arith.constant 0 : i32
    %c0_i32_0 = arith.constant 0 : i32
    %c0_i32_1 = arith.constant 0 : i32
    return %c0_i32, %c0_i32_0 : i32, i32
  }
  func.func @transform_2(%arg0: i32) -> (i32, i32) {
    %c0_i32 = arith.constant 0 : i32
    %c0_i32_0 = arith.constant 0 : i32
    %c0_i32_1 = arith.constant 0 : i32
    return %c0_i32, %c0_i32_0 : i32, i32
  }
  func.func @transform_3(%arg0: i32) -> (i32, i32) {
    %c0_i32 = arith.constant 0 : i32
    %c0_i32_0 = arith.constant 0 : i32
    %c0_i32_1 = arith.constant 0 : i32
    return %c0_i32, %c0_i32_0 : i32, i32
  }
  func.func @transform_4(%arg0: i32) -> (i32, i32) {
    %c0_i32 = arith.constant 0 : i32
    %c0_i32_0 = arith.constant 0 : i32
    %c0_i32_1 = arith.constant 0 : i32
    return %c0_i32, %c0_i32_0 : i32, i32
  }
  func.func @transform_5(%arg0: i32) -> (i32, i32, i32) {
    %c0_i32 = arith.constant 0 : i32
    %c0_i32_0 = arith.constant 0 : i32
    %c0_i32_1 = arith.constant 0 : i32
    return %arg0, %c0_i32, %c0_i32_0 : i32, i32, i32
  }
}

module attributes {stable_mosaic.version = 11 : i64} {
  func.func @_fc_stage_kernel(%arg0: i32, %arg1: memref<2x9216xbf16, #tpu.memory_space<vmem>>, %arg2: memref<9216x128xbf16, #tpu.memory_space<vmem>>, %arg3: memref<1x128xf32, #tpu.memory_space<vmem>>, %arg4: memref<128x128xbf16, #tpu.memory_space<vmem>>, %arg5: memref<1x128xf32, #tpu.memory_space<vmem>>, %arg6: memref<2x128xf32, #tpu.memory_space<vmem>>, %arg7: memref<2x128xf32, #tpu.memory_space<vmem>>) attributes {dimension_semantics = [#tpu.dimension_semantics<parallel>], iteration_bounds = array<i64: 1>, scalar_prefetch = 0 : i64, scratch_operands = 0 : i64, tpu.core_type = #tpu.core_type<tc>, window_params = [{transform_indices = @transform_0, window_bounds = array<i64: 2, 9216>}, {pipeline_mode = #tpu.pipeline_mode<synchronous>, transform_indices = @transform_1, window_bounds = array<i64: 9216, 128>}, {pipeline_mode = #tpu.pipeline_mode<synchronous>, transform_indices = @transform_2, window_bounds = array<i64: 1, 128>}, {pipeline_mode = #tpu.pipeline_mode<synchronous>, transform_indices = @transform_3, window_bounds = array<i64: 128, 128>}, {pipeline_mode = #tpu.pipeline_mode<synchronous>, transform_indices = @transform_4, window_bounds = array<i64: 1, 128>}, {transform_indices = @transform_5, window_bounds = array<i64: 2, 128>}, {transform_indices = @transform_6, window_bounds = array<i64: 2, 128>}]} {
    %c0 = arith.constant 0 : index
    %c0_0 = arith.constant 0 : index
    %0 = vector.load %arg1[%c0, %c0_0] : memref<2x9216xbf16, #tpu.memory_space<vmem>>, vector<2x9216xbf16>
    %c0_1 = arith.constant 0 : index
    %c0_2 = arith.constant 0 : index
    %1 = vector.load %arg2[%c0_1, %c0_2] : memref<9216x128xbf16, #tpu.memory_space<vmem>>, vector<9216x128xbf16>
    %cst = arith.constant dense<0.000000e+00> : vector<2x128xf32>
    %2 = tpu.matmul %0, %1, %cst {dimension_numbers = #tpu.dot_dimension_numbers<[1], [0], [0], [1], [0, 0, 1, 1], [], []>} : vector<2x9216xbf16>, vector<9216x128xbf16>, vector<2x128xf32> -> vector<2x128xf32>
    %c0_3 = arith.constant 0 : index
    %c0_4 = arith.constant 0 : index
    %3 = vector.load %arg3[%c0_3, %c0_4] : memref<1x128xf32, #tpu.memory_space<vmem>>, vector<1x128xf32>
    %4 = vector.broadcast %3 : vector<1x128xf32> to vector<2x128xf32>
    %5 = arith.addf %2, %4 : vector<2x128xf32>
    %cst_5 = arith.constant 0.000000e+00 : f32
    %6 = vector.broadcast %cst_5 : f32 to vector<2x128xf32>
    %7 = arith.maximumf %5, %6 : vector<2x128xf32>
    %c0_6 = arith.constant 0 : index
    %c0_7 = arith.constant 0 : index
    %8 = vector.load %arg6[%c0_6, %c0_7] : memref<2x128xf32, #tpu.memory_space<vmem>>, vector<2x128xf32>
    tpu.vector_store %arg6[%c0_6, %c0_7], %7 {strides = array<i32>} : memref<2x128xf32, #tpu.memory_space<vmem>>, vector<2x128xf32>,
    %9 = arith.truncf %7 : vector<2x128xf32> to vector<2x128xbf16>
    %c0_8 = arith.constant 0 : index
    %c0_9 = arith.constant 0 : index
    %10 = vector.load %arg4[%c0_8, %c0_9] : memref<128x128xbf16, #tpu.memory_space<vmem>>, vector<128x128xbf16>
    %cst_10 = arith.constant dense<0.000000e+00> : vector<2x128xf32>
    %11 = tpu.matmul %9, %10, %cst_10 {dimension_numbers = #tpu.dot_dimension_numbers<[1], [0], [0], [1], [0, 0, 1, 1], [], []>} : vector<2x128xbf16>, vector<128x128xbf16>, vector<2x128xf32> -> vector<2x128xf32>
    %c0_11 = arith.constant 0 : index
    %c0_12 = arith.constant 0 : index
    %12 = vector.load %arg5[%c0_11, %c0_12] : memref<1x128xf32, #tpu.memory_space<vmem>>, vector<1x128xf32>
    %13 = vector.broadcast %12 : vector<1x128xf32> to vector<2x128xf32>
    %14 = arith.addf %11, %13 : vector<2x128xf32>
    %c0_13 = arith.constant 0 : index
    %c0_14 = arith.constant 0 : index
    %15 = vector.load %arg7[%c0_13, %c0_14] : memref<2x128xf32, #tpu.memory_space<vmem>>, vector<2x128xf32>
    tpu.vector_store %arg7[%c0_13, %c0_14], %14 {strides = array<i32>} : memref<2x128xf32, #tpu.memory_space<vmem>>, vector<2x128xf32>,
    return
  }
  func.func @transform_0(%arg0: i32) -> (i32, i32) {
    %c0_i32 = arith.constant 0 : i32
    %c0_i32_0 = arith.constant 0 : i32
    return %arg0, %c0_i32 : i32, i32
  }
  func.func @transform_1(%arg0: i32) -> (i32, i32) {
    %c0_i32 = arith.constant 0 : i32
    %c0_i32_0 = arith.constant 0 : i32
    %c0_i32_1 = arith.constant 0 : i32
    return %c0_i32, %c0_i32_0 : i32, i32
  }
  func.func @transform_2(%arg0: i32) -> (i32, i32) {
    %c0_i32 = arith.constant 0 : i32
    %c0_i32_0 = arith.constant 0 : i32
    %c0_i32_1 = arith.constant 0 : i32
    return %c0_i32, %c0_i32_0 : i32, i32
  }
  func.func @transform_3(%arg0: i32) -> (i32, i32) {
    %c0_i32 = arith.constant 0 : i32
    %c0_i32_0 = arith.constant 0 : i32
    %c0_i32_1 = arith.constant 0 : i32
    return %c0_i32, %c0_i32_0 : i32, i32
  }
  func.func @transform_4(%arg0: i32) -> (i32, i32) {
    %c0_i32 = arith.constant 0 : i32
    %c0_i32_0 = arith.constant 0 : i32
    %c0_i32_1 = arith.constant 0 : i32
    return %c0_i32, %c0_i32_0 : i32, i32
  }
  func.func @transform_5(%arg0: i32) -> (i32, i32) {
    %c0_i32 = arith.constant 0 : i32
    %c0_i32_0 = arith.constant 0 : i32
    return %arg0, %c0_i32 : i32, i32
  }
  func.func @transform_6(%arg0: i32) -> (i32, i32) {
    %c0_i32 = arith.constant 0 : i32
    %c0_i32_0 = arith.constant 0 : i32
    return %arg0, %c0_i32 : i32, i32
  }
}

</mosaic_0001>

<bundles_post_ra>
// kernel: mnist_net_forward.2
= control target key start
LH: loop header
LB: loop body
LE: loop exit
PB: predicated region body
PF: predicated region fallthrough
CT: control target
= control target key end

     0   :  { %10 = vsyncpa [#allocation5], 0  ;;  %s7325_s18 = smov 0   ;;  %s9598_s0 = inlined_call_operand.vmem [shape: bf16[2,9,680], index: 0, kind: input, shape index: {}]   ;;  %s9599_s1 = inlined_call_operand.vmem [shape: bf16[32,9], index: 1, kind: input, shape index: {}]   ;;  %s9600_s2 = inlined_call_operand.vmem [shape: f32[32,1], index: 2, kind: input, shape index: {}]   ;;  %s9601_s3 = inlined_call_operand.vmem [shape: bf16[288,64], index: 3, kind: input, shape index: {}]   ;;  %s9602_s4 = inlined_call_operand.hbm [shape: f32[1,64], index: 4, kind: input, shape index: {}]   ;;  %s9603_s5 = inlined_call_operand.vmem [shape: bf16[2,72,128], index: 5, kind: output, shape index: {}]  }
   0x1 LB: > { %s6585_s19 = sadd.s32 4294967295, %s7289_s18   ;;  %p6587_p0 = scmp.ge.s32.totalorder %s7289_s18, 1  ;;  %s7289_s18 = sphi %s7325_s18, %s16_s18  }
   0x2   : > { %p157_p1 = scmp.lt.s32.totalorder %s7289_s18, 3  ;;  %s178_s22 = sshll.u32 %s9602_s4, 4  ;;  %s179_s22 = int_to_ptr.hbm [resolvable:$true] %s178_s22 }
   0x3   : > { %p7153_p3 = scmp.eq.s32.totalorder %s6585_s19, 0  ;;  %s7291_s23 = smov [#allocation4]  }
   0x4   : > { %p158_p2 = pnand %p6587_p0, %p157_p1  ;;  %s180_s24 = sshll.u32 %s7291_s23, 4  ;;  %s181_s24 = int_to_ptr.vmem [resolvable:$true] %s180_s24 }
   0x6   : > { %p7149_p4 = pneg %p158_p2  ;;  %201 = sbr.rel (%p158_p2) target bundleno = 2173 (0x87d), region = 40 }
   0x8   : > { %p7150_p5 = pnand %p7153_p3, %p7149_p4 }
   0xa   : > { %7152 = dma.hbm_to_vmem [thread:$0]  (!%p7150_p5), %s179_s22, 16, %s181_s24, [#allocation5]  }
   0xb   : > { %7284 = dma.done.wait (%p7153_p3), [#allocation5], 16  }
   0xc   : > { %7286 = vsyncadd (%p7153_p3), [#allocation5], 4294967280  ;;  %p230_p6 = scmp.lt.s32.totalorder %s6585_s19, 1  ;;  %vm353_vm0 = vcmask 1043456   ;;  %v7292_v0 = vmov 0   ;;  %vm354_vm1 = vcmask 1044480  }
   0xd   : > { %7168 = vset.pattern.permute.xlu0 %v7292_v0  ;;  %7169 = vset.pattern.permute.xlu1 %v7292_v0  ;;  %v7293_v1 = vmov 65535   ;;  %v245_v17 = vld [vmem:[%s9600_s2] sm:$0xff]  ;;  %vm346_vm2 = vcmask 72704   ;;  %v247_v21 = vld [vmem:[%s9600_s2 + $0x10] sm:$0xff]  ;;  %v246_v31 = vld [vmem:[%s9600_s2 + $0x8] sm:$0xff]  ;;  %vm609_vm3 = vcmask 261120  }
   0xe   : > { %s9605_s19 = smov (!%p230_p6, %s6585_s19), 1  ;;  %v355_v2 = vsel %vm353_vm0, 4294967295, %v7293_v1  ;;  %v7090_v20 = vld [vmem:[%s9599_s1] sm:$0xff]  ;;  %294 = vperm.xlu0 %7168, %v245_v17   ;;  %304 = vperm.xlu1 %7169, %v247_v21   ;;  %v248_v32 = vld [vmem:[%s9600_s2 + $0x18] sm:$0xff]  ;;  %v7091_v33 = vld [vmem:[%s9599_s1 + $0x8] sm:$0xff]  ;;  %vm1775_vm4 = vcmask 523264  }
   0xf   : > { %s7143_s25 = smul.u32 48, %s9605_s19  ;;  %v356_v3 = vsel %vm354_vm1, %v355_v2, 0  ;;  %s7294_s7 = smov 64   ;;  %vm6489_vm5 = vcmask 1045504   ;;  %vm6492_vm6 = vcmask 1041408  }
  0x10   : > { %s7144_s16 = smul.u32 36, %s9605_s19 }
  0x11   : > { %s234_s28 = scalar_lea.vmem %s9598_s0, %s7143_s25 }
  0x12   : > { %v6604_v4 = vld [vmem:[%s234_s28] sm:$0xf]  ;;  %v7113_v5 = vld [vmem:[%s234_s28 + $0x14] sm:$0x10]  ;;  %v7110_v6 = vld [vmem:[%s234_s28 + $0x4] sm:$0xf]  ;;  %s8538_s22 = scalar_lea.vmem %s9603_s5, %s7144_s16 }
  0x13   : > { %v6605_v7 = vor.u32 %v7113_v5, %v6604_v4  ;;  %v6606_v8 = vld [vmem:[%s234_s28 + $0x18] sm:$0x10]  ;;  %v6612_v9 = vld [vmem:[%s234_s28 + $0x8] sm:$0xf]  ;;  %v7114_v10 = vld [vmem:[%s234_s28 + $0x1c] sm:$0x10] }
  0x14   : > { %v6609_v11 = vor.u32 %v7110_v6, %v6606_v8  ;;  %v6613_v12 = vor.u32 %v7114_v10, %v6612_v9  ;;  %v7111_v13 = vld [vmem:[%s234_s28 + $0xc] sm:$0xf]  ;;  %v6614_v14 = vld [vmem:[%s234_s28 + $0x20] sm:$0x10]  ;;  %v6620_v22 = vld [vmem:[%s234_s28 + $0x10] sm:$0xf] }
  0x15   : > { %v358_v15 = vand.u32 %v6605_v7, %v356_v3  ;;  %v6617_v16 = vor.u32 %v7111_v13, %v6614_v14  ;;  %v7115_v24 = vld [vmem:[%s234_s28 + $0x24] sm:$0x10]  ;;  %v7112_v25 = vld [vmem:[%s234_s28 + $0x14] sm:$0xf]  ;;  %v6622_v26 = vld [vmem:[%s234_s28 + $0x28] sm:$0x10] }
  0x16   : > { %v361_v18 = vand.u32 %v6609_v11, %v356_v3  ;;  %v364_v19 = vand.u32 %v6613_v12, %v356_v3  ;;  %v6621_v27 = vor.u32 %v7115_v24, %v6620_v22  ;;  %v6625_v28 = vor.u32 %v7112_v25, %v6622_v26  ;;  %299 = vperm.xlu0 %7168, %v246_v31   ;;  %v7392_v22 = vld [vmem:[%s9601_s3 + $0x8] sm:$0xff]  ;;  %v7399_v24 = vld [vmem:[%s9601_s3] sm:$0xff] }
  0x17   : > { %382 = vmatpush.bf16.msra.mxu0 %v358_v15  ;;  %v367_v23 = vand.u32 %v6617_v16, %v356_v3  ;;  %309 = vperm.xlu1 %7169, %v248_v32  }
  0x18   : > { %401 = vmatpush.bf16.msra.mxu1 %v361_v18  ;;  %420 = vmatpush.bf16.msra.mxu2 %v364_v19  ;;  %v370_v29 = vand.u32 %v6621_v27, %v356_v3  ;;  %v373_v30 = vand.u32 %v6625_v28, %v356_v3 }
  0x19   : > { %439 = vmatpush.bf16.msra.mxu3 %v367_v23 }
  0x1a   : > { %6626 = vmatmul.msk.bf16.vlgmr.msra.gmra.mxu0 %vm346_vm2, %v7090_v20 }
  0x1b   : > { %6628 = vmatmul.msk.bf16.vlgmr.msra.gmra.mxu1 %vm346_vm2, %v7090_v20  ;;  %6630 = vmatmul.msk.bf16.vlgmr.msra.gmra.mxu2 %vm346_vm2, %v7090_v20 }
  0x1c   : > { %6632 = vmatmul.msk.bf16.vlgmr.msra.gmra.mxu3 %vm346_vm2, %v7090_v20  ;;  %458 = vmatpush.bf16.msrb.mxu0 %v370_v29 }
  0x1d   : > { %477 = vmatpush.bf16.msrb.mxu1 %v373_v30  ;;  %7141 = vmatpush.bf16.msrb.mxu3 %v7392_v22 }
  0x21   : > { %946 = vmatpush.bf16.msra.mxu1 %v7392_v22  ;;  %7142 = vmatpush.bf16.msrb.mxu3 %v7399_v24 }
  0x25   : > { %947 = vmatpush.bf16.msra.mxu1 %v7399_v24 }
  0x2a   : > { %6627 = vmatmul.msk.bf16.gmra.mxu0 %vm346_vm2, %v7091_v33 }
  0x2b   : > { %6629 = vmatmul.msk.bf16.gmra.mxu1 %vm346_vm2, %v7091_v33  ;;  %6631 = vmatmul.msk.bf16.gmra.mxu2 %vm346_vm2, %v7091_v33 }
  0x2c   : > { %6633 = vmatmul.msk.bf16.gmra.mxu3 %vm346_vm2, %v7091_v33 }
  0x3a   : > { %6634 = vmatmul.msk.bf16.vlgmr.msrb.gmra.mxu0 %vm346_vm2, %v7090_v20 }
  0x3b   : > { %6636 = vmatmul.msk.bf16.vlgmr.msrb.gmra.mxu1 %vm346_vm2, %v7090_v20 }
  0x4a   : > { %6635 = vmatmul.msk.bf16.gmra.mxu0 %vm346_vm2, %v7091_v33 }
  0x4b   : > { %6637 = vmatmul.msk.bf16.gmra.mxu1 %vm346_vm2, %v7091_v33 }
  0x80   : > { %v295_v34 = vpop.permute.xlu0 %294  ;;  %v7377_v51 = vpop.permute.xlu1 %304 }
  0x88   : > { %v7373_v42 = vpop.permute.xlu0 %299 }
  0x89   : > { %v7382_v62 = vpop.permute.xlu1 %309 }
  0x97   : > { %v384_v35 = vpop.f32.mrf.mxu0 }
  0x98   : > { %v403_v36 = vpop.f32.mrf.mxu1  ;;  %v385_v37 = vadd.f32 %v384_v35, %v295_v34 }
  0x99   : > { %v404_v38 = vadd.f32 %v403_v36, %v295_v34 }
  0x9a   : > { %v489_v39 = vmax.f32 %v385_v37, 0.0  ;;  %v7416_v37 = vld [vmem:[%s9601_s3 + $0x10] sm:$0xff] }
  0x9b   : > { %v490_v40 = vmax.f32 %v404_v38, 0.0 }
  0x9c   : > { %513 = vxpose.xlu2.b32.start [1/4] (short) %v489_v39, 128 }
  0x9d   : > { %545 = vxpose.xlu0.b32.start [1/4] (short) %v490_v40, 128 }
  0x9e   : > { %v422_v41 = vpop.f32.mrf.mxu2 }
  0x9f   : > { %v423_v43 = vadd.f32 %v422_v41, %v295_v34  ;;  %v386_v44 = vpop.f32.mrf.mxu0  ;;  %v441_v10 = vpop.f32.mrf.mxu3 }
  0xa0   : > { %v387_v45 = vadd.f32 %v386_v44, %v7373_v42  ;;  %v405_v46 = vpop.f32.mrf.mxu1  ;;  %v442_v13 = vadd.f32 %v441_v10, %v295_v34 }
  0xa1   : > { %v491_v47 = vmax.f32 %v423_v43, 0.0  ;;  %v406_v48 = vadd.f32 %v405_v46, %v7373_v42 }
  0xa2   : > { %v495_v49 = vmax.f32 %v387_v45, 0.0  ;;  %v492_v17 = vmax.f32 %v442_v13, 0.0 }
  0xa3   : > { %v496_v50 = vmax.f32 %v406_v48, 0.0  ;;  %577 = vxpose.xlu1.b32.start [1/4] (short) %v491_v47, 128 }
  0xa4   : > { %514 = vxpose.xlu2.b32.cont [2/4] (short) %v495_v49, 128 }
  0xa5   : > { %546 = vxpose.xlu0.b32.cont [2/4] (short) %v496_v50, 128 }
  0xa6   : > { %v424_v52 = vpop.f32.mrf.mxu2 }
  0xa7   : > { %v425_v53 = vadd.f32 %v424_v52, %v7373_v42  ;;  %v389_v54 = vpop.f32.mrf.mxu0  ;;  %v443_v14 = vpop.f32.mrf.mxu3  ;;  %v7430_v52 = vld [vmem:[%s9601_s3 + $0x38] sm:$0xff] }
  0xa8   : > { %v390_v55 = vadd.f32 %v389_v54, %v7377_v51  ;;  %v408_v56 = vpop.f32.mrf.mxu1  ;;  %v444_v20 = vadd.f32 %v443_v14, %v7373_v42  ;;  %1151 = vmatpush.bf16.msrb.mxu1 %v7430_v52 }
  0xa9   : > { %v497_v57 = vmax.f32 %v425_v53, 0.0  ;;  %v409_v58 = vadd.f32 %v408_v56, %v7377_v51  ;;  %v7436_v53 = vld [vmem:[%s9601_s3 + $0x30] sm:$0xff] }
  0xaa   : > { %v501_v59 = vmax.f32 %v390_v55, 0.0  ;;  %v498_v27 = vmax.f32 %v444_v20, 0.0 }
  0xab   : > { %v502_v60 = vmax.f32 %v409_v58, 0.0  ;;  %578 = vxpose.xlu1.b32.cont [2/4] (short) %v497_v57, 128  ;;  %v7444_v58 = vld [vmem:[%s9601_s3 + $0x28] sm:$0xff] }
  0xac   : > { %515 = vxpose.xlu2.b32.cont [3/4] (short) %v501_v59, 128  ;;  %1152 = vmatpush.bf16.msrb.mxu1 %v7436_v53  ;;  %v7450_v59 = vld [vmem:[%s9601_s3 + $0x20] sm:$0xff] }
  0xad   : > { %547 = vxpose.xlu0.b32.cont [3/4] (short) %v502_v60, 128 }
  0xae   : > { %v427_v61 = vpop.f32.mrf.mxu2 }
  0xaf   : > { %v428_v63 = vadd.f32 %v427_v61, %v7377_v51  ;;  %v391_v0 = vpop.f32.mrf.mxu0  ;;  %v446_v25 = vpop.f32.mrf.mxu3 }
  0xb0   : > { %v392_v1 = vadd.f32 %v391_v0, %v7382_v62  ;;  %v410_v2 = vpop.f32.mrf.mxu1  ;;  %v447_v31 = vadd.f32 %v446_v25, %v7377_v51  ;;  %v7458_v0 = vld [vmem:[%s9601_s3 + $0x48] sm:$0xff] }
  0xb1   : > { %v503_v3 = vmax.f32 %v428_v63, 0.0  ;;  %v411_v4 = vadd.f32 %v410_v2, %v7382_v62 }
  0xb2   : > { %v507_v5 = vmax.f32 %v392_v1, 0.0  ;;  %v504_v36 = vmax.f32 %v447_v31, 0.0  ;;  %v7463_v1 = vld [vmem:[%s9601_s3 + $0x58] sm:$0xff] }
  0xb3   : > { %v508_v6 = vmax.f32 %v411_v4, 0.0  ;;  %579 = vxpose.xlu1.b32.cont [3/4] (short) %v503_v3, 128  ;;  %1369 = vmatpush.bf16.msra.mxu3 %v7463_v1 }
  0xb4   : > { %516 = vxpose.xlu2.b32.end [4/4] (short) %v507_v5, 128 }
  0xb5   : > { %548 = vxpose.xlu0.b32.end [4/4] (short) %v508_v6, 128 }
  0xb6   : > { %v429_v7 = vpop.f32.mrf.mxu2 }
  0xb7   : > { %v430_v8 = vadd.f32 %v429_v7, %v7382_v62  ;;  %v460_v11 = vpop.f32.mrf.mxu0  ;;  %v448_v38 = vpop.f32.mrf.mxu3 }
  0xb8   : > { %v479_v12 = vpop.f32.mrf.mxu1  ;;  %v461_v15 = vadd.f32 %v460_v11, %v295_v34 }
  0xb9   : > { %v509_v9 = vmax.f32 %v430_v8, 0.0  ;;  %v480_v19 = vadd.f32 %v479_v12, %v295_v34  ;;  %v7410_v34 = vld [vmem:[%s9601_s3 + $0x18] sm:$0xff] }
  0xba   : > { %v493_v18 = vmax.f32 %v461_v15, 0.0  ;;  %870 = vmatpush.bf16.msra.mxu0 %v7410_v34  ;;  %7139 = vmatpush.bf16.msrb.mxu2 %v7410_v34 }
  0xbb   : > { %580 = vxpose.xlu1.b32.end [4/4] (short) %v509_v9, 128  ;;  %v494_v26 = vmax.f32 %v480_v19, 0.0 }
  0xbe   : > { %871 = vmatpush.bf16.msra.mxu0 %v7416_v37  ;;  %7140 = vmatpush.bf16.msrb.mxu2 %v7416_v37 }
  0xbf   : > { %v462_v16 = vpop.f32.mrf.mxu0 }
  0xc0   : > { %v481_v21 = vpop.f32.mrf.mxu1  ;;  %v463_v23 = vadd.f32 %v462_v16, %v7373_v42 }
  0xc1   : > { %v482_v30 = vadd.f32 %v481_v21, %v7373_v42  ;;  %v449_v42 = vadd.f32 %v448_v38, %v7382_v62 }
  0xc2   : > { %v499_v29 = vmax.f32 %v463_v23, 0.0  ;;  %1042 = vmatpush.bf16.msrb.mxu0 %v7444_v58  ;;  %1260 = vmatpush.bf16.msra.mxu2 %v7458_v0 }
  0xc3   : > { %v500_v35 = vmax.f32 %v482_v30, 0.0  ;;  %v510_v45 = vmax.f32 %v449_v42, 0.0 }
  0xc6   : > { %1043 = vmatpush.bf16.msrb.mxu0 %v7450_v59 }
  0xc7   : > { %v465_v28 = vpop.f32.mrf.mxu0 }
  0xc8   : > { %v466_v32 = vadd.f32 %v465_v28, %v7377_v51  ;;  %v484_v33 = vpop.f32.mrf.mxu1 }
  0xc9   : > { %v485_v41 = vadd.f32 %v484_v33, %v7377_v51  ;;  %v7483_v33 = vld [vmem:[%s9601_s3 + $0x40] sm:$0xff] }
  0xca   : > { %v505_v39 = vmax.f32 %v466_v32, 0.0  ;;  %1261 = vmatpush.bf16.msra.mxu2 %v7483_v33 }
  0xcb   : > { %v506_v44 = vmax.f32 %v485_v41, 0.0 }
  0xcf   : > { %v467_v40 = vpop.f32.mrf.mxu0 }
  0xd0   : > { %v468_v43 = vadd.f32 %v467_v40, %v7382_v62  ;;  %v486_v46 = vpop.f32.mrf.mxu1 }
  0xd1   : > { %v487_v48 = vadd.f32 %v486_v46, %v7382_v62 }
  0xd2   : > { %v511_v47 = vmax.f32 %v468_v43, 0.0 }
  0xd3   : > { %v512_v50 = vmax.f32 %v487_v48, 0.0 }
 0x11c   : > { %658 = vxpose.xlu2.b32.start [1/4] (short) %v492_v17, 128 }
 0x11d   : > { %690 = vxpose.xlu0.b32.start [1/4] (short) %v493_v18, 128 }
 0x123   : > { %722 = vxpose.xlu1.b32.start [1/4] (short) (narrow) %v494_v26, 40 }
 0x124   : > { %659 = vxpose.xlu2.b32.cont [2/4] (short) %v498_v27, 128 }
 0x125   : > { %691 = vxpose.xlu0.b32.cont [2/4] (short) %v499_v29, 128 }
 0x12b   : > { %723 = vxpose.xlu1.b32.cont [2/4] (short) (narrow) %v500_v35, 40  ;;  %v7488_v35 = vld [vmem:[%s9601_s3 + $0x50] sm:$0xff] }
 0x12c   : > { %660 = vxpose.xlu2.b32.cont [3/4] (short) %v504_v36, 128  ;;  %1370 = vmatpush.bf16.msra.mxu3 %v7488_v35 }
 0x12d   : > { %692 = vxpose.xlu0.b32.cont [3/4] (short) %v505_v39, 128 }
 0x133   : > { %724 = vxpose.xlu1.b32.cont [3/4] (short) (narrow) %v506_v44, 40 }
 0x134   : > { %661 = vxpose.xlu2.b32.end [4/4] (short) %v510_v45, 128 }
 0x135   : > { %693 = vxpose.xlu0.b32.end [4/4] (short) %v511_v47, 128  ;;  %v529_v49 = vpop.trf.xlu2 }
 0x136   : > { %610 = vst.msk [vmem:[#allocation2] sm:$0xff] %vm609_vm3, %v529_v49 }
 0x13b   : > { %725 = vxpose.xlu1.b32.end [4/4] (short) (narrow) %v512_v50, 40 }
 0x13d   : > { %v530_v51 = vpop.trf.xlu2  ;;  %v791_v55 = vld [vmem:[#allocation2] sm:$0xff] }
 0x13e   : > { %611 = vst.msk [vmem:[#allocation2 + $0x8] sm:$0xff] %vm609_vm3, %v530_v51 }
 0x145   : > { %v531_v54 = vpop.trf.xlu2  ;;  %v792_v56 = vld [vmem:[#allocation2 + $0x8] sm:$0xff] }
 0x146   : > { %612 = vst.msk [vmem:[#allocation2 + $0x10] sm:$0xff] %vm609_vm3, %v531_v54  ;;  %v804_v57 = vpack.c.bf16 %v792_v56, %v791_v55  ;;  %v811_v61 = vld [vmem:[#allocation2 + $0x1] sm:$0xff] }
 0x147   : > { %v983_v21 = vld [vmem:[#allocation2 + $0x2] sm:$0xff] }
 0x148   : > { %6661 = vmatmul.msk.bf16.vlgmr.msra.gmra.mxu1 %vm609_vm3, %v804_v57 }
 0x14d   : > { %v532_v60 = vpop.trf.xlu2  ;;  %v812_v62 = vld [vmem:[#allocation2 + $0x9] sm:$0xff] }
 0x14e   : > { %613 = vst.msk [vmem:[#allocation2 + $0x18] sm:$0xff] %vm609_vm3, %v532_v60  ;;  %v824_v63 = vpack.c.bf16 %v812_v62, %v811_v61  ;;  %v793_v3 = vld [vmem:[#allocation2 + $0x10] sm:$0xff] }
 0x14f   : > { %v984_v17 = vld [vmem:[#allocation2 + $0xa] sm:$0xff] }
 0x150   : > { %6646 = vmatmul.msk.bf16.vlgmr.msra.gmra.mxu0 %vm609_vm3, %v824_v63  ;;  %v996_v25 = vpack.c.bf16 %v984_v17, %v983_v21 }
 0x155   : > { %v533_v2 = vpop.trf.xlu2  ;;  %v794_v4 = vld [vmem:[#allocation2 + $0x18] sm:$0xff] }
 0x156   : > { %614 = vst.msk [vmem:[#allocation2 + $0x20] sm:$0xff] %vm609_vm3, %v533_v2  ;;  %v805_v5 = vpack.c.bf16 %v794_v4, %v793_v3  ;;  %v813_v7 = vld [vmem:[#allocation2 + $0x11] sm:$0xff]  ;;  %v561_v4 = vpop.trf.xlu0 }
 0x157   : > { %v985_v40 = vld [vmem:[#allocation2 + $0x12] sm:$0xff]  ;;  %626 = vst.msk [vmem:[#allocation2 + $0x80] sm:$0xff] %vm609_vm3, %v561_v4 }
 0x158   : > { %6662 = vmatmul.msk.bf16.gmra.mxu1 %vm609_vm3, %v805_v5 }
 0x15d   : > { %v534_v6 = vpop.trf.xlu2  ;;  %v814_v8 = vld [vmem:[#allocation2 + $0x19] sm:$0xff] }
 0x15e   : > { %615 = vst.msk [vmem:[#allocation2 + $0x28] sm:$0xff] %vm609_vm3, %v534_v6  ;;  %v825_v9 = vpack.c.bf16 %v814_v8, %v813_v7  ;;  %v795_v10 = vld [vmem:[#allocation2 + $0x20] sm:$0xff] }
 0x15f   : > { %v1092_v13 = vld [vmem:[#allocation2 + $0x1a] sm:$0xff] }
 0x160   : > { %6647 = vmatmul.msk.bf16.gmra.mxu0 %vm609_vm3, %v825_v9  ;;  %v997_v42 = vpack.c.bf16 %v1092_v13, %v985_v40 }
 0x165   : > { %v535_v11 = vpop.trf.xlu2  ;;  %v796_v12 = vld [vmem:[#allocation2 + $0x28] sm:$0xff] }
 0x166   : > { %v1093_v14 = vld [vmem:[#allocation2 + $0x22] sm:$0xff]  ;;  %616 = vst.msk [vmem:[#allocation2 + $0x30] sm:$0xff] %vm609_vm3, %v535_v11  ;;  %v806_v15 = vpack.c.bf16 %v796_v12, %v795_v10  ;;  %v7523_v12 = vld [vmem:[%s9601_s3 + $0x78] sm:$0xff] }
 0x167   : > { %v1105_v16 = vpack.c.bf16 %v1093_v14, %v1092_v13  ;;  %v815_v19 = vld [vmem:[#allocation2 + $0x21] sm:$0xff]  ;;  %1587 = vmatpush.bf16.msra.mxu1 %v7523_v12 }
 0x168   : > { %6663 = vmatmul.msk.bf16.vlgmr.msrb.gmra.mxu3 %vm609_vm3, %v806_v15  ;;  %v7513_v10 = vld [vmem:[%s9601_s3 + $0x88] sm:$0xff] }
 0x169   : > { %6691 = vmatmul.msk.bf16.vlgmr.msrb.gmra.mxu1 %vm609_vm3, %v1105_v16  ;;  %1909 = vmatpush.bf16.msrb.mxu3 %v7410_v34  ;;  %v7518_v11 = vld [vmem:[%s9601_s3 + $0x68] sm:$0xff] }
 0x16a   : > { %1478 = vmatpush.bf16.msra.mxu0 %v7518_v11 }
 0x16d   : > { %v536_v18 = vpop.trf.xlu2  ;;  %v816_v20 = vld [vmem:[#allocation2 + $0x29] sm:$0xff]  ;;  %1910 = vmatpush.bf16.msrb.mxu3 %v7416_v37 }
 0x16e   : > { %617 = vst.msk [vmem:[#allocation2 + $0x38] sm:$0xff] %vm609_vm3, %v536_v18  ;;  %v826_v23 = vpack.c.bf16 %v816_v20, %v815_v19  ;;  %v797_v26 = vld [vmem:[#allocation2 + $0x30] sm:$0xff] }
 0x16f   : > { %v1094_v29 = vld [vmem:[#allocation2 + $0x2a] sm:$0xff] }
 0x170   : > { %6648 = vmatmul.msk.bf16.vlgmr.msrb.gmra.mxu2 %vm609_vm3, %v826_v23  ;;  %6676 = vmatmul.msk.bf16.vlgmr.msrb.gmra.mxu0 %vm609_vm3, %v996_v25  ;;  %v998_v56 = vpack.c.bf16 %v1094_v29, %v1093_v14  ;;  %v1311_v25 = vld [vmem:[#allocation2 + $0x24] sm:$0xff] }
 0x171   : > { %1696 = vmatpush.bf16.msrb.mxu2 %v7513_v10 }
 0x175   : > { %v537_v27 = vpop.trf.xlu2  ;;  %v798_v28 = vld [vmem:[#allocation2 + $0x38] sm:$0xff] }
 0x176   : > { %v1095_v30 = vld [vmem:[#allocation2 + $0x32] sm:$0xff]  ;;  %618 = vst.msk [vmem:[#allocation2 + $0x40] sm:$0xff] %vm609_vm3, %v537_v27  ;;  %v807_v31 = vpack.c.bf16 %v798_v28, %v797_v26  ;;  %v1310_v26 = vld [vmem:[#allocation2 + $0x1c] sm:$0xff] }
 0x177   : > { %v1106_v32 = vpack.c.bf16 %v1095_v30, %v1094_v29  ;;  %v817_v38 = vld [vmem:[#allocation2 + $0x31] sm:$0xff] }
 0x178   : > { %6664 = vmatmul.msk.bf16.gmra.mxu3 %vm609_vm3, %v807_v31  ;;  %v7537_v29 = vld [vmem:[%s9601_s3 + $0x70] sm:$0xff]  ;;  %v1323_v31 = vpack.c.bf16 %v1311_v25, %v1310_v26 }
 0x179   : > { %6692 = vmatmul.msk.bf16.gmra.mxu1 %vm609_vm3, %v1106_v32  ;;  %v1202_v32 = vld [vmem:[#allocation2 + $0x23] sm:$0xff] }
 0x17a   : > { %1588 = vmatpush.bf16.msra.mxu1 %v7537_v29 }
 0x17d   : > { %v538_v36 = vpop.trf.xlu2  ;;  %v818_v39 = vld [vmem:[#allocation2 + $0x39] sm:$0xff] }
 0x17e   : > { %619 = vst.msk [vmem:[#allocation2 + $0x48] sm:$0xff] %vm609_vm3, %v538_v36  ;;  %v827_v41 = vpack.c.bf16 %v818_v39, %v817_v38  ;;  %v799_v43 = vld [vmem:[#allocation2 + $0x40] sm:$0xff]  ;;  %2057 = vmatpush.bf16.msrb.mxu1 %v7444_v58  ;;  %v1313_v58 = vld [vmem:[#allocation2 + $0x34] sm:$0xff] }
 0x17f   : > { %v1096_v46 = vld [vmem:[#allocation2 + $0x3a] sm:$0xff] }
 0x180   : > { %6649 = vmatmul.msk.bf16.gmra.mxu2 %vm609_vm3, %v827_v41  ;;  %6677 = vmatmul.msk.bf16.gmra.mxu0 %vm609_vm3, %v997_v42  ;;  %v999_v9 = vpack.c.bf16 %v1096_v46, %v1095_v30  ;;  %v1201_v36 = vld [vmem:[#allocation2 + $0x1b] sm:$0xff] }
 0x181   : > { %v7104_v38 = vld [vmem:[%s9601_s3 + $0x60] sm:$0xff]  ;;  %v1214_v40 = vpack.c.bf16 %v1202_v32, %v1201_v36 }
 0x182   : > { %2058 = vmatpush.bf16.msrb.mxu1 %v7450_v59  ;;  %1479 = vmatpush.bf16.msra.mxu0 %v7104_v38 }
 0x185   : > { %v539_v44 = vpop.trf.xlu2  ;;  %v800_v45 = vld [vmem:[#allocation2 + $0x48] sm:$0xff] }
 0x186   : > { %v1097_v47 = vld [vmem:[#allocation2 + $0x42] sm:$0xff]  ;;  %620 = vst.msk [vmem:[#allocation2 + $0x50] sm:$0xff] %vm609_vm3, %v539_v44  ;;  %v808_v48 = vpack.c.bf16 %v800_v45, %v799_v43  ;;  %1973 = vmatpush.bf16.msrb.mxu0 %v7392_v22  ;;  %v1312_v43 = vld [vmem:[#allocation2 + $0x2c] sm:$0xff] }
 0x187   : > { %v1107_v49 = vpack.c.bf16 %v1097_v47, %v1096_v46  ;;  %v819_v51 = vld [vmem:[#allocation2 + $0x41] sm:$0xff]  ;;  %v1324_v59 = vpack.c.bf16 %v1313_v58, %v1312_v43  ;;  %v1203_v46 = vld [vmem:[#allocation2 + $0x2b] sm:$0xff] }
 0x188   : > { %6665 = vmatmul.msk.bf16.gmra.mxu3 %vm609_vm3, %v808_v48 }
 0x189   : > { %6693 = vmatmul.msk.bf16.gmra.mxu1 %vm609_vm3, %v1107_v49 }
 0x18a   : > { %1974 = vmatpush.bf16.msrb.mxu0 %v7399_v24 }
 0x18d   : > { %v540_v50 = vpop.trf.xlu2  ;;  %v820_v54 = vld [vmem:[#allocation2 + $0x49] sm:$0xff] }
 0x18e   : > { %621 = vst.msk [vmem:[#allocation2 + $0x58] sm:$0xff] %vm609_vm3, %v540_v50  ;;  %v828_v55 = vpack.c.bf16 %v820_v54, %v819_v51  ;;  %v801_v57 = vld [vmem:[#allocation2 + $0x50] sm:$0xff]  ;;  %v1315_v50 = vld [vmem:[#allocation2 + $0x44] sm:$0xff] }
 0x18f   : > { %v1098_v62 = vld [vmem:[#allocation2 + $0x4a] sm:$0xff]  ;;  %v1529_v51 = vld [vmem:[#allocation2 + $0x3d] sm:$0xff] }
 0x190   : > { %6650 = vmatmul.msk.bf16.gmra.mxu2 %vm609_vm3, %v828_v55  ;;  %6678 = vmatmul.msk.bf16.gmra.mxu0 %vm609_vm3, %v998_v56  ;;  %v1000_v23 = vpack.c.bf16 %v1098_v62, %v1097_v47  ;;  %v1314_v56 = vld [vmem:[#allocation2 + $0x3c] sm:$0xff] }
 0x195   : > { %v541_v60 = vpop.trf.xlu2  ;;  %v802_v61 = vld [vmem:[#allocation2 + $0x58] sm:$0xff] }
 0x196   : > { %v1099_v63 = vld [vmem:[#allocation2 + $0x52] sm:$0xff]  ;;  %622 = vst.msk [vmem:[#allocation2 + $0x60] sm:$0xff] %vm609_vm3, %v541_v60  ;;  %v809_v2 = vpack.c.bf16 %v802_v61, %v801_v57  ;;  %v1325_v61 = vpack.c.bf16 %v1315_v50, %v1314_v56 }
 0x197   : > { %v1108_v3 = vpack.c.bf16 %v1099_v63, %v1098_v62  ;;  %v821_v6 = vld [vmem:[#allocation2 + $0x51] sm:$0xff] }
 0x198   : > { %6666 = vmatmul.msk.bf16.gmra.mxu3 %vm609_vm3, %v809_v2  ;;  %v1528_v57 = vld [vmem:[#allocation2 + $0x35] sm:$0xff]  ;;  %v1206_v2 = vld [vmem:[#allocation2 + $0x43] sm:$0xff] }
 0x199   : > { %6694 = vmatmul.msk.bf16.gmra.mxu1 %vm609_vm3, %v1108_v3  ;;  %v1541_v62 = vpack.c.bf16 %v1529_v51, %v1528_v57 }
 0x19d   : > { %v542_v5 = vpop.trf.xlu2  ;;  %v822_v7 = vld [vmem:[#allocation2 + $0x59] sm:$0xff] }
 0x19e   : > { %623 = vst.msk [vmem:[#allocation2 + $0x68] sm:$0xff] %vm609_vm3, %v542_v5  ;;  %v829_v8 = vpack.c.bf16 %v822_v7, %v821_v6  ;;  %v803_v13 = vld [vmem:[#allocation2 + $0x60] sm:$0xff] }
 0x19f   : > { %v1100_v15 = vld [vmem:[#allocation2 + $0x5a] sm:$0xff]  ;;  %v810_v17 = vpack.c.bf16 %v803_v13, %v803_v13  ;;  %v562_v13 = vpop.trf.xlu0 }
 0x1a0   : > { %6651 = vmatmul.msk.bf16.gmra.mxu2 %vm609_vm3, %v829_v8  ;;  %6679 = vmatmul.msk.bf16.gmra.mxu0 %vm609_vm3, %v999_v9  ;;  %v1001_v39 = vpack.c.bf16 %v1100_v15, %v1099_v63  ;;  %v7569_v63 = vld [vmem:[%s9601_s3 + $0x80] sm:$0xff]  ;;  %v1432_v8 = vpack.c.bf16 %v1314_v56, %v1313_v58  ;;  %v1317_v9 = vld [vmem:[#allocation2 + $0x54] sm:$0xff]  ;;  %627 = vst.msk [vmem:[#allocation2 + $0x88] sm:$0xff] %vm609_vm3, %v562_v13 }
 0x1a1   : > { %1697 = vmatpush.bf16.msrb.mxu2 %v7569_v63  ;;  %v1205_v5 = vld [vmem:[#allocation2 + $0x3b] sm:$0xff] }
 0x1a2   : > { %v1216_v7 = vpack.c.bf16 %v1206_v2, %v1205_v5  ;;  %v1533_v36 = vld [vmem:[#allocation2 + $0x5d] sm:$0xff] }
 0x1a3   : > { %v1209_v51 = vld [vmem:[#allocation2 + $0x5b] sm:$0xff] }
 0x1a5   : > { %v543_v14 = vpop.trf.xlu2  ;;  %v1101_v16 = vld [vmem:[#allocation2 + $0x62] sm:$0xff] }
 0x1a6   : > { %624 = vst.msk [vmem:[#allocation2 + $0x70] sm:$0xff] %vm609_vm3, %v543_v14  ;;  %v1109_v18 = vpack.c.bf16 %v1101_v16, %v1100_v15  ;;  %v823_v19 = vld [vmem:[#allocation2 + $0x61] sm:$0xff]  ;;  %v1002_v48 = vpack.c.bf16 %v1101_v16, %v1101_v16  ;;  %v1316_v15 = vld [vmem:[#allocation2 + $0x4c] sm:$0xff] }
 0x1a7   : > { %v830_v21 = vpack.c.bf16 %v823_v19, %v823_v19  ;;  %v1530_v16 = vld [vmem:[#allocation2 + $0x45] sm:$0xff] }
 0x1a8   : > { %6667 = vmatmul.msk.bf16.gmra.mxu3 %vm609_vm3, %v810_v17  ;;  %v1319_v32 = vld [vmem:[#allocation2 + $0x64] sm:$0xff] }
 0x1a9   : > { %6695 = vmatmul.msk.bf16.gmra.mxu1 %vm609_vm3, %v1109_v18  ;;  %v1326_v18 = vpack.c.bf16 %v1317_v9, %v1316_v15 }
 0x1ad   : > { %v544_v20 = vpop.trf.xlu2  ;;  %v1102_v27 = vld [vmem:[#allocation2 + $0x6a] sm:$0xff] }
 0x1ae   : > { %625 = vst.msk [vmem:[#allocation2 + $0x78] sm:$0xff] %vm609_vm3, %v544_v20  ;;  %v1535_v2 = vld [vmem:[#allocation2 + $0x6d] sm:$0xff] }
 0x1b0   : > { %6652 = vmatmul.msk.bf16.gmra.mxu2 %vm609_vm3, %v830_v21  ;;  %6680 = vmatmul.msk.bf16.gmra.mxu0 %vm609_vm3, %v1000_v23  ;;  %v1207_v23 = vld [vmem:[#allocation2 + $0x4b] sm:$0xff] }
 0x1b5   : > { %v1103_v28 = vld [vmem:[#allocation2 + $0x72] sm:$0xff] }
 0x1b6   : > { %v7539_v30 = vpack.c.bf16 %v1103_v28, %v1102_v27  ;;  %v1433_v27 = vpack.c.bf16 %v1316_v15, %v1315_v50  ;;  %v1212_v15 = vld [vmem:[#allocation2 + $0x73] sm:$0xff] }
 0x1b8   : > { %6721 = vmatmul.msk.bf16.vlgmr.msra.gmra.mxu3 %vm609_vm3, %v1323_v31 }
 0x1b9   : > { %6696 = vmatmul.msk.bf16.gmra.mxu1 %vm609_vm3, %v7539_v30  ;;  %2251 = vmatpush.bf16.msra.mxu3 %v7458_v0  ;;  %v7554_v0 = vld [vmem:[#allocation2 + $0x7a] sm:$0xff] }
 0x1ba   : > { %v1111_v41 = vpack.c.bf16 %v7554_v0, %v7554_v0 }
 0x1bd   : > { %2252 = vmatpush.bf16.msra.mxu3 %v7483_v33  ;;  %v1204_v33 = vld [vmem:[#allocation2 + $0x33] sm:$0xff] }
 0x1be   : > { %v1215_v49 = vpack.c.bf16 %v1204_v33, %v1203_v46 }
 0x1c0   : > { %6681 = vmatmul.msk.bf16.gmra.mxu0 %vm609_vm3, %v1001_v39  ;;  %6706 = vmatmul.msk.bf16.vlgmr.msra.gmra.mxu2 %vm609_vm3, %v1214_v40  ;;  %v563_v39 = vpop.trf.xlu0 }
 0x1c1   : > { %2154 = vmatpush.bf16.msra.mxu2 %v7430_v52  ;;  %628 = vst.msk [vmem:[#allocation2 + $0x90] sm:$0xff] %vm609_vm3, %v563_v39 }
 0x1c5   : > { %v949_v42 = vpop.f32.mrf.mxu1  ;;  %2155 = vmatpush.bf16.msra.mxu2 %v7436_v53 }
 0x1c8   : > { %6722 = vmatmul.msk.bf16.gmra.mxu3 %vm609_vm3, %v1324_v59 }
 0x1c9   : > { %6697 = vmatmul.msk.bf16.gmra.mxu1 %vm609_vm3, %v1111_v41  ;;  %v1318_v41 = vld [vmem:[#allocation2 + $0x5c] sm:$0xff] }
 0x1ca   : > { %v1327_v59 = vpack.c.bf16 %v1319_v32, %v1318_v41  ;;  %v1434_v56 = vpack.c.bf16 %v1318_v41, %v1317_v9 }
 0x1cd   : > { %v873_v44 = vpop.f32.mrf.mxu0  ;;  %v951_v45 = vpop.f32.mrf.mxu1 }
 0x1ce   : > { %v950_v47 = vadd.f32 %v949_v42, %v873_v44  ;;  %v1532_v42 = vld [vmem:[#allocation2 + $0x55] sm:$0xff] }
 0x1cf   : > { %v1543_v33 = vpack.c.bf16 %v1533_v36, %v1532_v42 }
 0x1d0   : > { %6682 = vmatmul.msk.bf16.gmra.mxu0 %vm609_vm3, %v1002_v48  ;;  %6707 = vmatmul.msk.bf16.gmra.mxu2 %vm609_vm3, %v1215_v49 }
 0x1d5   : > { %v875_v54 = vpop.f32.mrf.mxu0  ;;  %v954_v55 = vpop.f32.mrf.mxu1 }
 0x1d6   : > { %v952_v60 = vadd.f32 %v951_v45, %v875_v54 }
 0x1d8   : > { %6723 = vmatmul.msk.bf16.gmra.mxu3 %vm609_vm3, %v1325_v61 }
 0x1d9   : > { %6751 = vmatmul.msk.bf16.vlgmr.msra.gmra.mxu1 %vm609_vm3, %v1541_v62  ;;  %v1321_v62 = vld [vmem:[#allocation2 + $0x74] sm:$0xff] }
 0x1da   : > { %2445 = vmatpush.bf16.msra.mxu1 %v7518_v11  ;;  %v1531_v11 = vld [vmem:[#allocation2 + $0x4d] sm:$0xff] }
 0x1db   : > { %v1542_v53 = vpack.c.bf16 %v1531_v11, %v1530_v16 }
 0x1dd   : > { %v878_v3 = vpop.f32.mrf.mxu0  ;;  %v956_v4 = vpop.f32.mrf.mxu1 }
 0x1de   : > { %2446 = vmatpush.bf16.msra.mxu1 %v7104_v38  ;;  %v955_v6 = vadd.f32 %v954_v55, %v878_v3 }
 0x1e0   : > { %6708 = vmatmul.msk.bf16.gmra.mxu2 %vm609_vm3, %v1216_v7  ;;  %6736 = vmatmul.msk.bf16.vlgmr.msra.gmra.mxu0 %vm609_vm3, %v1432_v8  ;;  %v1320_v7 = vld [vmem:[#allocation2 + $0x6c] sm:$0xff] }
 0x1e1   : > { %2348 = vmatpush.bf16.msra.mxu0 %v7463_v1  ;;  %v1208_v1 = vld [vmem:[#allocation2 + $0x53] sm:$0xff]  ;;  %v1534_v8 = vld [vmem:[#allocation2 + $0x65] sm:$0xff]  ;;  %v1328_v13 = vpack.c.bf16 %v1321_v62, %v1320_v7 }
 0x1e2   : > { %v1217_v26 = vpack.c.bf16 %v1208_v1, %v1207_v23  ;;  %v1211_v1 = vld [vmem:[#allocation2 + $0x6b] sm:$0xff] }
 0x1e5   : > { %v880_v14 = vpop.f32.mrf.mxu0  ;;  %2349 = vmatpush.bf16.msra.mxu0 %v7488_v35 }
 0x1e6   : > { %v1154_v52 = vpop.f32.mrf.mxu1  ;;  %v957_v17 = vadd.f32 %v956_v4, %v880_v14 }
 0x1e8   : > { %6724 = vmatmul.msk.bf16.gmra.mxu3 %vm609_vm3, %v1326_v18  ;;  %v564_v18 = vpop.trf.xlu0 }
 0x1e9   : > { %6752 = vmatmul.msk.bf16.gmra.mxu1 %vm609_vm3, %v1542_v53  ;;  %629 = vst.msk [vmem:[#allocation2 + $0x98] sm:$0xff] %vm609_vm3, %v564_v18  ;;  %v1638_v18 = vld [vmem:[#allocation2 + $0x3e] sm:$0xff] }
 0x1eb   : > { %v959_v19 = vpop.f32.mrf.mxu3 }
 0x1ed   : > { %v1045_v20 = vpop.f32.mrf.mxu0 }
 0x1ee   : > { %v1156_v21 = vpop.f32.mrf.mxu1  ;;  %v1079_v25 = vadd.f32 %v1045_v20, %v950_v47  ;;  %v1210_v47 = vld [vmem:[#allocation2 + $0x63] sm:$0xff] }
 0x1ef   : > { %v1218_v55 = vpack.c.bf16 %v1210_v47, %v1209_v51 }
 0x1f0   : > { %6709 = vmatmul.msk.bf16.gmra.mxu2 %vm609_vm3, %v1217_v26  ;;  %6737 = vmatmul.msk.bf16.gmra.mxu0 %vm609_vm3, %v1433_v27  ;;  %v7584_v35 = vadd.f32 %v1154_v52, %v1079_v25  ;;  %v1536_v27 = vld [vmem:[#allocation2 + $0x75] sm:$0xff]  ;;  %v565_v51 = vpop.trf.xlu0 }
 0x1f1   : > { %630 = vst.msk [vmem:[#allocation2 + $0xa0] sm:$0xff] %vm609_vm3, %v565_v51 }
 0x1f3   : > { %v883_v28 = vpop.f32.mrf.mxu2  ;;  %v961_v31 = vpop.f32.mrf.mxu3 }
 0x1f4   : > { %v960_v38 = vadd.f32 %v959_v19, %v883_v28  ;;  %v1537_v28 = vld [vmem:[#allocation2 + $0x7d] sm:$0xff] }
 0x1f5   : > { %v1047_v40 = vpop.f32.mrf.mxu0  ;;  %v1545_v42 = vpack.c.bf16 %v1537_v28, %v1536_v27 }
 0x1f6   : > { %v1159_v58 = vpop.f32.mrf.mxu1  ;;  %v1080_v43 = vadd.f32 %v1047_v40, %v952_v60  ;;  %v1322_v40 = vld [vmem:[#allocation2 + $0x7c] sm:$0xff] }
 0x1f7   : > { %v1329_v41 = vpack.c.bf16 %v1322_v40, %v1322_v40 }
 0x1f8   : > { %6725 = vmatmul.msk.bf16.gmra.mxu3 %vm609_vm3, %v1327_v59  ;;  %v7589_v44 = vadd.f32 %v1156_v21, %v1080_v43  ;;  %v1435_v21 = vpack.c.bf16 %v1320_v7, %v1319_v32  ;;  %v1213_v59 = vld [vmem:[#allocation2 + $0x7b] sm:$0xff] }
 0x1f9   : > { %6753 = vmatmul.msk.bf16.gmra.mxu1 %vm609_vm3, %v1543_v33 }
 0x1fb   : > { %v885_v45 = vpop.f32.mrf.mxu2  ;;  %v964_v46 = vpop.f32.mrf.mxu3 }
 0x1fc   : > { %v962_v48 = vadd.f32 %v961_v31, %v885_v45 }
 0x1fd   : > { %v1050_v49 = vpop.f32.mrf.mxu0 }
 0x1fe   : > { %v1161_v50 = vpop.f32.mrf.mxu1  ;;  %v1081_v54 = vadd.f32 %v1050_v49, %v955_v6  ;;  %v1544_v6 = vpack.c.bf16 %v1535_v2, %v1534_v8  ;;  %v1220_v49 = vpack.c.bf16 %v1213_v59, %v1213_v59 }
 0x200   : > { %6710 = vmatmul.msk.bf16.gmra.mxu2 %vm609_vm3, %v1218_v55  ;;  %6738 = vmatmul.msk.bf16.gmra.mxu0 %vm609_vm3, %v1434_v56  ;;  %v7593_v57 = vadd.f32 %v1159_v58, %v1081_v54  ;;  %v1538_v56 = vld [vmem:[#allocation2 + $0x85] sm:$0xff] }
 0x203   : > { %v888_v60 = vpop.f32.mrf.mxu2  ;;  %v966_v61 = vpop.f32.mrf.mxu3 }
 0x204   : > { %v965_v3 = vadd.f32 %v964_v46, %v888_v60  ;;  %v1539_v60 = vld [vmem:[#allocation2 + $0x8d] sm:$0xff] }
 0x205   : > { %v1052_v4 = vpop.f32.mrf.mxu0 }
 0x206   : > { %v1164_v5 = vpop.f32.mrf.mxu1  ;;  %v1082_v11 = vadd.f32 %v1052_v4, %v957_v17  ;;  %v1219_v17 = vpack.c.bf16 %v1212_v15, %v1211_v1  ;;  %v1430_v15 = vld [vmem:[#allocation2 + $0x8c] sm:$0xff]  ;;  %v1637_v1 = vld [vmem:[#allocation2 + $0x36] sm:$0xff] }
 0x208   : > { %6726 = vmatmul.msk.bf16.gmra.mxu3 %vm609_vm3, %v1328_v13  ;;  %v7597_v9 = vadd.f32 %v1161_v50, %v1082_v11  ;;  %v1436_v50 = vpack.c.bf16 %v1322_v40, %v1321_v62  ;;  %v1546_v62 = vpack.c.bf16 %v1539_v60, %v1538_v56  ;;  %v566_v11 = vpop.trf.xlu0 }
 0x209   : > { %6754 = vmatmul.msk.bf16.gmra.mxu1 %vm609_vm3, %v1544_v6  ;;  %631 = vst.msk [vmem:[#allocation2 + $0xa8] sm:$0xff] %vm609_vm3, %v566_v11 }
 0x20b   : > { %v890_v14 = vpop.f32.mrf.mxu2  ;;  %v969_v52 = vpop.f32.mrf.mxu3 }
 0x20c   : > { %v967_v16 = vadd.f32 %v966_v61, %v890_v14  ;;  %v1863_v61 = vld [vmem:[#allocation2 + $0x71] sm:$0xff] }
 0x20d   : > { %v1055_v53 = vpop.f32.mrf.mxu0 }
 0x20e   : > { %v1166_v19 = vpop.f32.mrf.mxu1  ;;  %v1083_v20 = vadd.f32 %v1055_v53, %v960_v38 }
 0x210   : > { %6711 = vmatmul.msk.bf16.gmra.mxu2 %vm609_vm3, %v1219_v17  ;;  %6739 = vmatmul.msk.bf16.gmra.mxu0 %vm609_vm3, %v1435_v21  ;;  %v7602_v23 = vadd.f32 %v1164_v5, %v1083_v20  ;;  %v1650_v21 = vpack.c.bf16 %v1638_v18, %v1637_v1  ;;  %v1843_v18 = vld [vmem:[#allocation2 + $0x70] sm:$0xff] }
 0x211   : > { %v1641_v1 = vld [vmem:[#allocation2 + $0x56] sm:$0xff] }
 0x213   : > { %v893_v25 = vpop.f32.mrf.mxu2  ;;  %v971_v26 = vpop.f32.mrf.mxu3 }
 0x214   : > { %v970_v31 = vadd.f32 %v969_v52, %v893_v25  ;;  %v1429_v52 = vld [vmem:[#allocation2 + $0x84] sm:$0xff]  ;;  %v567_v25 = vpop.trf.xlu0 }
 0x215   : > { %v1057_v36 = vpop.f32.mrf.mxu0  ;;  %v7620_v17 = vpack.c.bf16 %v1430_v15, %v1429_v52  ;;  %632 = vst.msk [vmem:[#allocation2 + $0xb0] sm:$0xff] %vm609_vm3, %v567_v25  ;;  %v1842_v15 = vld [vmem:[#allocation2 + $0x68] sm:$0xff] }
 0x216   : > { %v1169_v39 = vpop.f32.mrf.mxu1  ;;  %v1084_v58 = vadd.f32 %v1057_v36, %v962_v48  ;;  %v1855_v25 = vpack.c.bf16 %v1843_v18, %v1842_v15  ;;  %v1646_v18 = vld [vmem:[#allocation2 + $0x7e] sm:$0xff] }
 0x218   : > { %6727 = vmatmul.msk.bf16.gmra.mxu3 %vm609_vm3, %v1329_v41  ;;  %v7606_v32 = vadd.f32 %v1166_v19, %v1084_v58 }
 0x219   : > { %6755 = vmatmul.msk.bf16.gmra.mxu1 %vm609_vm3, %v1545_v42 }
 0x21b   : > { %v895_v38 = vpop.f32.mrf.mxu2  ;;  %v974_v43 = vpop.f32.mrf.mxu3 }
 0x21c   : > { %v972_v33 = vadd.f32 %v971_v26, %v895_v38  ;;  %v1540_v26 = vld [vmem:[#allocation2 + $0x95] sm:$0xff]  ;;  %v568_v38 = vpop.trf.xlu0 }
 0x21d   : > { %v1060_v45 = vpop.f32.mrf.mxu0  ;;  %633 = vst.msk [vmem:[#allocation2 + $0xb8] sm:$0xff] %vm609_vm3, %v568_v38 }
 0x21e   : > { %v1171_v46 = vpop.f32.mrf.mxu1  ;;  %v1085_v47 = vadd.f32 %v1060_v45, %v965_v3  ;;  %v1862_v3 = vld [vmem:[#allocation2 + $0x69] sm:$0xff] }
 0x21f   : > { %v1875_v8 = vpack.c.bf16 %v1863_v61, %v1862_v3  ;;  %v1866_v61 = vld [vmem:[#allocation2 + $0x89] sm:$0xff] }
 0x220   : > { %6712 = vmatmul.msk.bf16.gmra.mxu2 %vm609_vm3, %v1220_v49  ;;  %6740 = vmatmul.msk.bf16.gmra.mxu0 %vm609_vm3, %v1436_v50  ;;  %v7611_v48 = vadd.f32 %v1169_v39, %v1085_v47  ;;  %v1547_v39 = vpack.c.bf16 %v1540_v26, %v1540_v26  ;;  %v1639_v49 = vld [vmem:[#allocation2 + $0x46] sm:$0xff] }
 0x223   : > { %v898_v54 = vpop.f32.mrf.mxu2  ;;  %v976_v55 = vpop.f32.mrf.mxu3 }
 0x224   : > { %v975_v2 = vadd.f32 %v974_v43, %v898_v54  ;;  %v7635_v43 = vld [vmem:[#allocation2 + $0x94] sm:$0xff]  ;;  %v569_v54 = vpop.trf.xlu0 }
 0x225   : > { %v1062_v4 = vpop.f32.mrf.mxu0  ;;  %v1438_v47 = vpack.c.bf16 %v7635_v43, %v7635_v43  ;;  %634 = vst.msk [vmem:[#allocation2 + $0xc0] sm:$0xff] %vm609_vm3, %v569_v54 }
 0x226   : > { %v1174_v5 = vpop.f32.mrf.mxu1  ;;  %v1086_v7 = vadd.f32 %v1062_v4, %v967_v16  ;;  %v1867_v4 = vld [vmem:[#allocation2 + $0x91] sm:$0xff] }
 0x228   : > { %6773 = vmatmul.msk.bf16.vlgmr.msrb.gmra.mxu3 %vm609_vm3, %v1875_v8  ;;  %v7616_v13 = vadd.f32 %v1171_v46, %v1086_v7  ;;  %v1640_v46 = vld [vmem:[#allocation2 + $0x4e] sm:$0xff] }
 0x229   : > { %6756 = vmatmul.msk.bf16.gmra.mxu1 %vm609_vm3, %v1546_v62  ;;  %2639 = vmatpush.bf16.msrb.mxu3 %v7513_v10  ;;  %v1651_v51 = vpack.c.bf16 %v1640_v46, %v1639_v49 }
 0x22b   : > { %v900_v6 = vpop.f32.mrf.mxu2  ;;  %v979_v14 = vpop.f32.mrf.mxu3 }
 0x22c   : > { %v977_v53 = vadd.f32 %v976_v55, %v900_v6  ;;  %v570_v11 = vpop.trf.xlu0 }
 0x22d   : > { %v1065_v16 = vpop.f32.mrf.mxu0  ;;  %2640 = vmatpush.bf16.msrb.mxu3 %v7569_v63  ;;  %v1864_v63 = vld [vmem:[#allocation2 + $0x79] sm:$0xff]  ;;  %635 = vst.msk [vmem:[#allocation2 + $0xc8] sm:$0xff] %vm609_vm3, %v570_v11 }
 0x22e   : > { %v1176_v19 = vpop.f32.mrf.mxu1  ;;  %v1087_v20 = vadd.f32 %v1065_v16, %v970_v31  ;;  %v1865_v31 = vld [vmem:[#allocation2 + $0x81] sm:$0xff] }
 0x22f   : > { %v1876_v42 = vpack.c.bf16 %v1865_v31, %v1864_v63  ;;  %v1869_v63 = vld [vmem:[#allocation2 + $0xa1] sm:$0xff] }
 0x230   : > { %6741 = vmatmul.msk.bf16.gmra.mxu0 %vm609_vm3, %v7620_v17  ;;  %6766 = vmatmul.msk.bf16.vlgmr.msrb.gmra.mxu2 %vm609_vm3, %v1650_v21  ;;  %v7626_v10 = vadd.f32 %v1174_v5, %v1087_v20 }
 0x231   : > { %2542 = vmatpush.bf16.msrb.mxu2 %v7523_v12 }
 0x233   : > { %v903_v27 = vpop.f32.mrf.mxu2  ;;  %v981_v28 = vpop.f32.mrf.mxu3 }
 0x234   : > { %v980_v36 = vadd.f32 %v979_v14, %v903_v27  ;;  %v571_v26 = vpop.trf.xlu0  ;;  %v1868_v28 = vld [vmem:[#allocation2 + $0x99] sm:$0xff] }
 0x235   : > { %v1067_v40 = vpop.f32.mrf.mxu0  ;;  %2543 = vmatpush.bf16.msrb.mxu2 %v7537_v29  ;;  %636 = vst.msk [vmem:[#allocation2 + $0xd0] sm:$0xff] %vm609_vm3, %v571_v26 }
 0x236   : > { %v1179_v58 = vpop.f32.mrf.mxu1  ;;  %v1088_v41 = vadd.f32 %v1067_v40, %v972_v33  ;;  %v1878_v40 = vpack.c.bf16 %v1869_v63, %v1868_v28  ;;  %v1872_v63 = vld [vmem:[#allocation2 + $0xb9] sm:$0xff] }
 0x238   : > { %6774 = vmatmul.msk.bf16.gmra.mxu3 %vm609_vm3, %v1876_v42  ;;  %v7633_v12 = vadd.f32 %v1176_v19, %v1088_v41 }
 0x239   : > { %6757 = vmatmul.msk.bf16.gmra.mxu1 %vm609_vm3, %v1547_v39 }
 0x23b   : > { %v905_v59 = vpop.f32.mrf.mxu2  ;;  %v1372_v45 = vpop.f32.mrf.mxu3 }
 0x23c   : > { %v572_v42 = vpop.trf.xlu0  ;;  %v1644_v59 = vld [vmem:[#allocation2 + $0x6e] sm:$0xff] }
 0x23d   : > { %v1070_v29 = vpop.f32.mrf.mxu0  ;;  %637 = vst.msk [vmem:[#allocation2 + $0xd8] sm:$0xff] %vm609_vm3, %v572_v42 }
 0x23e   : > { %v1181_v33 = vpop.f32.mrf.mxu1  ;;  %v1089_v50 = vadd.f32 %v1070_v29, %v975_v2  ;;  %v1877_v2 = vpack.c.bf16 %v1867_v4, %v1866_v61  ;;  %v1643_v29 = vld [vmem:[#allocation2 + $0x66] sm:$0xff]  ;;  %v1871_v61 = vld [vmem:[#allocation2 + $0xb1] sm:$0xff] }
 0x23f   : > { %v7674_v4 = vld [vmem:[#allocation2 + $0x92] sm:$0xff] }
 0x240   : > { %6742 = vmatmul.msk.bf16.gmra.mxu0 %vm609_vm3, %v1438_v47  ;;  %6767 = vmatmul.msk.bf16.gmra.mxu2 %vm609_vm3, %v1651_v51  ;;  %v7642_v55 = vadd.f32 %v1179_v58, %v1089_v50 }
 0x243   : > { %v1263_v56 = vpop.f32.mrf.mxu2  ;;  %v1374_v60 = vpop.f32.mrf.mxu3 }
 0x244   : > { %v1297_v5 = vadd.f32 %v1263_v56, %v7584_v35  ;;  %v1642_v35 = vld [vmem:[#allocation2 + $0x5e] sm:$0xff] }
 0x245   : > { %v1072_v3 = vpop.f32.mrf.mxu0  ;;  %v1652_v21 = vpack.c.bf16 %v1642_v35, %v1641_v1 }
 0x246   : > { %v1184_v7 = vpop.f32.mrf.mxu1  ;;  %v1090_v62 = vadd.f32 %v1072_v3, %v977_v53  ;;  %v1406_v8 = vadd.f32 %v1372_v45, %v1297_v5  ;;  %v1845_v45 = vld [vmem:[#allocation2 + $0x80] sm:$0xff] }
 0x248   : > { %6775 = vmatmul.msk.bf16.gmra.mxu3 %vm609_vm3, %v1877_v2  ;;  %v7649_v6 = vadd.f32 %v1181_v33, %v1090_v62 }
 0x249   : > { %6787 = vmatmul.msk.bf16.vlgmr.msrb.gmra.mxu1 %vm609_vm3, %v7539_v30 }
 0x24a   : > { %2897 = vmatpush.bf16.msrb.mxu1 %v7392_v22 }
 0x24b   : > { %v1265_v14 = vpop.f32.mrf.mxu2  ;;  %v1377_v52 = vpop.f32.mrf.mxu3 }
 0x24c   : > { %v1298_v53 = vadd.f32 %v1265_v14, %v7589_v44  ;;  %v573_v14 = vpop.trf.xlu0 }
 0x24d   : > { %v1075_v16 = vpop.f32.mrf.mxu0  ;;  %638 = vst.msk [vmem:[#allocation2 + $0xe0] sm:$0xff] %vm609_vm3, %v573_v14 }
 0x24e   : > { %v1186_v19 = vpop.f32.mrf.mxu1  ;;  %2898 = vmatpush.bf16.msrb.mxu1 %v7399_v24  ;;  %v1091_v20 = vadd.f32 %v1075_v16, %v980_v36  ;;  %v1407_v30 = vadd.f32 %v1374_v60, %v1298_v53  ;;  %v7660_v24 = vld [vmem:[#allocation2 + $0x82] sm:$0xff]  ;;  %v1847_v16 = vld [vmem:[#allocation2 + $0x90] sm:$0xff] }
 0x24f   : > { %v2024_v58 = vpack.c.bf16 %v7660_v24, %v7554_v0  ;;  %v1653_v0 = vpack.c.bf16 %v1644_v59, %v1643_v29  ;;  %v1870_v60 = vld [vmem:[#allocation2 + $0xa9] sm:$0xff] }
 0x250   : > { %6768 = vmatmul.msk.bf16.gmra.mxu2 %vm609_vm3, %v1652_v21  ;;  %6780 = vmatmul.msk.bf16.vlgmr.msrb.gmra.mxu0 %vm609_vm3, %v1855_v25  ;;  %v7657_v22 = vadd.f32 %v1184_v7, %v1091_v20  ;;  %v7677_v7 = vld [vmem:[#allocation2 + $0x8a] sm:$0xff]  ;;  %v1879_v2 = vpack.c.bf16 %v1871_v61, %v1870_v60 }
 0x251   : > { %2833 = vmatpush.bf16.msrb.mxu0 %v7410_v34  ;;  %v1846_v53 = vld [vmem:[#allocation2 + $0x88] sm:$0xff] }
 0x253   : > { %v1268_v44 = vpop.f32.mrf.mxu2  ;;  %v1379_v27 = vpop.f32.mrf.mxu3 }
 0x254   : > { %v1299_v31 = vadd.f32 %v1268_v44, %v7593_v57  ;;  %v1844_v57 = vld [vmem:[#allocation2 + $0x78] sm:$0xff] }
 0x255   : > { %v1077_v36 = vpop.f32.mrf.mxu0  ;;  %2834 = vmatpush.bf16.msrb.mxu0 %v7416_v37  ;;  %v1856_v49 = vpack.c.bf16 %v1845_v45, %v1844_v57  ;;  %v1647_v57 = vld [vmem:[#allocation2 + $0x86] sm:$0xff] }
 0x256   : > { %v1590_v39 = vpop.f32.mrf.mxu1  ;;  %v1408_v41 = vadd.f32 %v1377_v52, %v1299_v31  ;;  %v1873_v31 = vld [vmem:[#allocation2 + $0xc1] sm:$0xff] }
 0x257   : > { %v7691_v36 = vld [vmem:[#allocation2 + $0xa2] sm:$0xff]  ;;  %v1880_v42 = vpack.c.bf16 %v1873_v31, %v1872_v63 }
 0x258   : > { %6776 = vmatmul.msk.bf16.gmra.mxu3 %vm609_vm3, %v1878_v40 }
 0x259   : > { %6788 = vmatmul.msk.bf16.gmra.mxu1 %vm609_vm3, %v2024_v58  ;;  %v7694_v58 = vld [vmem:[#allocation2 + $0x9a] sm:$0xff] }
 0x25b   : > { %v1270_v34 = vpop.f32.mrf.mxu2  ;;  %v1382_v38 = vpop.f32.mrf.mxu3 }
 0x25c   : > { %v1300_v46 = vadd.f32 %v1270_v34, %v7597_v9  ;;  %v2026_v34 = vpack.c.bf16 %v7691_v36, %v7694_v58 }
 0x25d   : > { %v1481_v37 = vpop.f32.mrf.mxu0 }
 0x25e   : > { %v1592_v47 = vpop.f32.mrf.mxu1  ;;  %v1515_v33 = vadd.f32 %v1481_v37, %v1406_v8  ;;  %v1409_v50 = vadd.f32 %v1379_v27, %v1300_v46  ;;  %v2025_v8 = vpack.c.bf16 %v7674_v4, %v7677_v7  ;;  %v1848_v37 = vld [vmem:[#allocation2 + $0x98] sm:$0xff] }
 0x260   : > { %6769 = vmatmul.msk.bf16.gmra.mxu2 %vm609_vm3, %v1653_v0  ;;  %6781 = vmatmul.msk.bf16.gmra.mxu0 %vm609_vm3, %v1856_v49  ;;  %v7672_v51 = vadd.f32 %v1590_v39, %v1515_v33 }
 0x263   : > { %v1273_v54 = vpop.f32.mrf.mxu2  ;;  %v1384_v56 = vpop.f32.mrf.mxu3 }
 0x264   : > { %v1301_v9 = vadd.f32 %v1273_v54, %v7602_v23  ;;  %v1645_v23 = vld [vmem:[#allocation2 + $0x76] sm:$0xff] }
 0x265   : > { %v1483_v5 = vpop.f32.mrf.mxu0  ;;  %v1654_v25 = vpack.c.bf16 %v1646_v18, %v1645_v23 }
 0x266   : > { %v1595_v3 = vpop.f32.mrf.mxu1  ;;  %v1516_v62 = vadd.f32 %v1483_v5, %v1407_v30  ;;  %v1410_v11 = vadd.f32 %v1382_v38, %v1301_v9  ;;  %v1857_v30 = vpack.c.bf16 %v1847_v16, %v1846_v53  ;;  %v1874_v5 = vld [vmem:[#allocation2 + $0xc9] sm:$0xff]  ;;  %v1649_v16 = vld [vmem:[#allocation2 + $0x96] sm:$0xff] }
 0x267   : > { %v1881_v14 = vpack.c.bf16 %v1874_v5, %v1874_v5 }
 0x268   : > { %6777 = vmatmul.msk.bf16.gmra.mxu3 %vm609_vm3, %v1879_v2  ;;  %v7684_v52 = vadd.f32 %v1592_v47, %v1516_v62  ;;  %v1849_v47 = vld [vmem:[#allocation2 + $0xa0] sm:$0xff] }
 0x269   : > { %6789 = vmatmul.msk.bf16.gmra.mxu1 %vm609_vm3, %v2025_v8  ;;  %v1858_v54 = vpack.c.bf16 %v1849_v47, %v1848_v37  ;;  %v7710_v8 = vld [vmem:[#allocation2 + $0xaa] sm:$0xff] }
 0x26b   : > { %v1275_v35 = vpop.f32.mrf.mxu2  ;;  %v1387_v15 = vpop.f32.mrf.mxu3 }
 0x26c   : > { %v1302_v19 = vadd.f32 %v1275_v35, %v7606_v32 }
 0x26d   : > { %v1486_v1 = vpop.f32.mrf.mxu0 }
 0x26e   : > { %v1597_v20 = vpop.f32.mrf.mxu1  ;;  %v1517_v21 = vadd.f32 %v1486_v1, %v1408_v41  ;;  %v1411_v26 = vadd.f32 %v1384_v56, %v1302_v19  ;;  %v1851_v19 = vld [vmem:[#allocation2 + $0xb0] sm:$0xff] }
 0x270   : > { %6770 = vmatmul.msk.bf16.gmra.mxu2 %vm609_vm3, %v1654_v25  ;;  %6782 = vmatmul.msk.bf16.gmra.mxu0 %vm609_vm3, %v1857_v30  ;;  %v7689_v44 = vadd.f32 %v1595_v3, %v1517_v21  ;;  %v7707_v3 = vld [vmem:[#allocation2 + $0xb2] sm:$0xff]  ;;  %v1656_v30 = vpack.c.bf16 %v1649_v16, %v1649_v16 }
 0x271   : > { %v2027_v23 = vpack.c.bf16 %v7707_v3, %v7710_v8 }
 0x273   : > { %v1278_v27 = vpop.f32.mrf.mxu2  ;;  %v1389_v28 = vpop.f32.mrf.mxu3 }
 0x274   : > { %v1303_v32 = vadd.f32 %v1278_v27, %v7611_v48  ;;  %v1648_v48 = vld [vmem:[#allocation2 + $0x8e] sm:$0xff] }
 0x275   : > { %v1488_v39 = vpop.f32.mrf.mxu0 }
 0x276   : > { %v1600_v40 = vpop.f32.mrf.mxu1  ;;  %v1518_v41 = vadd.f32 %v1488_v39, %v1409_v50  ;;  %v1412_v38 = vadd.f32 %v1387_v15, %v1303_v32  ;;  %v1655_v50 = vpack.c.bf16 %v1648_v48, %v1647_v57  ;;  %v7723_v32 = vld [vmem:[#allocation2 + $0xc2] sm:$0xff] }
 0x277   : > { %v2204_v39 = vld [vmem:[#allocation2 + $0x83] sm:$0xff] }
 0x278   : > { %6778 = vmatmul.msk.bf16.gmra.mxu3 %vm609_vm3, %v1880_v42  ;;  %v7700_v59 = vadd.f32 %v1597_v20, %v1518_v41 }
 0x279   : > { %6790 = vmatmul.msk.bf16.gmra.mxu1 %vm609_vm3, %v2026_v34  ;;  %v7726_v34 = vld [vmem:[#allocation2 + $0xba] sm:$0xff] }
 0x27a   : > { %v2028_v57 = vpack.c.bf16 %v7723_v32, %v7726_v34 }
 0x27b   : > { %v1280_v45 = vpop.f32.mrf.mxu2  ;;  %v1392_v46 = vpop.f32.mrf.mxu3 }
 0x27c   : > { %v1304_v29 = vadd.f32 %v1280_v45, %v7616_v13 }
 0x27d   : > { %v1491_v33 = vpop.f32.mrf.mxu0 }
 0x27e   : > { %v1602_v0 = vpop.f32.mrf.mxu1  ;;  %v1519_v49 = vadd.f32 %v1491_v33, %v1410_v11  ;;  %v1413_v56 = vadd.f32 %v1389_v28, %v1304_v29  ;;  %v1852_v29 = vld [vmem:[#allocation2 + $0xb8] sm:$0xff]  ;;  %v1853_v33 = vld [vmem:[#allocation2 + $0xc0] sm:$0xff] }
 0x280   : > { %6771 = vmatmul.msk.bf16.gmra.mxu2 %vm609_vm3, %v1655_v50  ;;  %6783 = vmatmul.msk.bf16.gmra.mxu0 %vm609_vm3, %v1858_v54  ;;  %v7705_v60 = vadd.f32 %v1600_v40, %v1519_v49  ;;  %v2205_v40 = vld [vmem:[#allocation2 + $0x8b] sm:$0xff] }
 0x281   : > { %v2217_v45 = vpack.c.bf16 %v2205_v40, %v2204_v39  ;;  %v7202_v54 = vld [vmem:[%s9601_s3 + $0x30] sm:$0xff] }
 0x282   : > { %v7776_v39 = vld [vmem:[#allocation4] ss:$0 sm:$0xff] }
 0x283   : > { %v1283_v61 = vpop.f32.mrf.mxu2  ;;  %v1394_v9 = vpop.f32.mrf.mxu3 }
 0x284   : > { %v1305_v62 = vadd.f32 %v1283_v61, %v7626_v10  ;;  %v1850_v10 = vld [vmem:[#allocation2 + $0xa8] sm:$0xff]  ;;  %v1860_v61 = vpack.c.bf16 %v1853_v33, %v1852_v29 }
 0x285   : > { %v1493_v13 = vpop.f32.mrf.mxu0 }
 0x286   : > { %v1605_v2 = vpop.f32.mrf.mxu1  ;;  %v1520_v11 = vadd.f32 %v1493_v13, %v1411_v26  ;;  %v1414_v35 = vadd.f32 %v1392_v46, %v1305_v62  ;;  %v1859_v26 = vpack.c.bf16 %v1851_v19, %v1850_v10 }
 0x288   : > { %6779 = vmatmul.msk.bf16.gmra.mxu3 %vm609_vm3, %v1881_v14  ;;  %v7716_v15 = vadd.f32 %v1602_v0, %v1520_v11  ;;  %v2206_v11 = vld [vmem:[#allocation2 + $0x93] sm:$0xff]  ;;  %v2207_v14 = vld [vmem:[#allocation2 + $0x9b] sm:$0xff] }
 0x289   : > { %6791 = vmatmul.msk.bf16.gmra.mxu1 %vm609_vm3, %v2027_v23  ;;  %v2218_v10 = vpack.c.bf16 %v2207_v14, %v2206_v11  ;;  %v7814_v14 = vld [vmem:[%s9601_s3 + $0x48] sm:$0xff] }
 0x28b   : > { %v1285_v18 = vpop.f32.mrf.mxu2  ;;  %v1397_v53 = vpop.f32.mrf.mxu3 }
 0x28c   : > { %v1306_v1 = vadd.f32 %v1285_v18, %v7633_v12  ;;  %v7759_v18 = vld [vmem:[%s9601_s3 + $0x20] sm:$0xff] }
 0x28d   : > { %v1496_v20 = vpop.f32.mrf.mxu0 }
 0x28e   : > { %v1607_v21 = vpop.f32.mrf.mxu1  ;;  %v1521_v25 = vadd.f32 %v1496_v20, %v1412_v38  ;;  %v1415_v27 = vadd.f32 %v1394_v9, %v1306_v1  ;;  %v2120_v9 = vpack.c.bf16 %v7677_v7, %v7660_v24 }
 0x290   : > { %6772 = vmatmul.msk.bf16.gmra.mxu2 %vm609_vm3, %v1656_v30  ;;  %6784 = vmatmul.msk.bf16.gmra.mxu0 %vm609_vm3, %v1859_v26  ;;  %v7721_v28 = vadd.f32 %v1605_v2, %v1521_v25 }
 0x293   : > { %v1288_v63 = vpop.f32.mrf.mxu2  ;;  %v1399_v31 = vpop.f32.mrf.mxu3 }
 0x294   : > { %v1307_v12 = vadd.f32 %v1288_v63, %v7642_v55  ;;  %v7201_v55 = vld [vmem:[%s9601_s3 + $0x38] sm:$0xff] }
 0x295   : > { %v1498_v41 = vpop.f32.mrf.mxu0 }
 0x296   : > { %v1610_v42 = vpop.f32.mrf.mxu1  ;;  %v1522_v38 = vadd.f32 %v1498_v41, %v1413_v56  ;;  %v1416_v46 = vadd.f32 %v1397_v53, %v1307_v12  ;;  %v2208_v41 = vld [vmem:[#allocation2 + $0xa3] sm:$0xff] }
 0x298   : > { %6801 = vmatmul.msk.bf16.vlgmr.msra.gmra.mxu3 %vm609_vm3, %v2217_v45  ;;  %v7732_v48 = vadd.f32 %v1607_v21, %v1522_v38  ;;  %v1854_v21 = vld [vmem:[#allocation2 + $0xc8] sm:$0xff] }
 0x299   : > { %6792 = vmatmul.msk.bf16.gmra.mxu1 %vm609_vm3, %v2028_v57  ;;  %3078 = vmatpush.bf16.msra.mxu3 %v7201_v55  ;;  %v1861_v63 = vpack.c.bf16 %v1854_v21, %v1854_v21  ;;  %v7780_v38 = vld [vmem:[#allocation2 + $0xa4] sm:$0xff] }
 0x29b   : > { %v1290_v37 = vpop.f32.mrf.mxu2  ;;  %v1402_v47 = vpop.f32.mrf.mxu3 }
 0x29c   : > { %v1308_v0 = vadd.f32 %v1290_v37, %v7649_v6  ;;  %v7750_v6 = vld [vmem:[%s9601_s3 + $0x28] sm:$0xff] }
 0x29d   : > { %v1501_v49 = vpop.f32.mrf.mxu0  ;;  %3079 = vmatpush.bf16.msra.mxu3 %v7202_v54 }
 0x29e   : > { %v1612_v50 = vpop.f32.mrf.mxu1  ;;  %v1523_v56 = vadd.f32 %v1501_v49, %v1414_v35  ;;  %v1417_v5 = vadd.f32 %v1399_v31, %v1308_v0  ;;  %v7754_v35 = vld [vmem:[#allocation2 + $0xca] sm:$0xff] }
 0x29f   : > { %v2029_v16 = vpack.c.bf16 %v7754_v35, %v7754_v35 }
 0x2a0   : > { %6785 = vmatmul.msk.bf16.gmra.mxu0 %vm609_vm3, %v1860_v61  ;;  %6794 = vmatmul.msk.bf16.vlgmr.msra.gmra.mxu2 %vm609_vm3, %v2120_v9  ;;  %v7745_v62 = vadd.f32 %v1610_v42, %v1523_v56  ;;  %v2209_v42 = vld [vmem:[#allocation2 + $0xab] sm:$0xff] }
 0x2a1   : > { %2981 = vmatpush.bf16.msra.mxu2 %v7750_v6  ;;  %v2219_v37 = vpack.c.bf16 %v2209_v42, %v2208_v41  ;;  %v7206_v61 = vld [vmem:[%s9601_s3 + $0x50] sm:$0xff] }
 0x2a3   : > { %v1293_v13 = vpop.f32.mrf.mxu2  ;;  %v1404_v2 = vpop.f32.mrf.mxu3 }
 0x2a4   : > { %v1309_v24 = vadd.f32 %v1293_v13, %v7657_v22  ;;  %v2122_v13 = vpack.c.bf16 %v7710_v8, %v7691_v36  ;;  %v574_v2 = vpop.trf.xlu0 }
 0x2a5   : > { %v1503_v7 = vpop.f32.mrf.mxu0  ;;  %2982 = vmatpush.bf16.msra.mxu2 %v7759_v18  ;;  %639 = vst.msk [vmem:[#allocation2 + $0xe8] sm:$0xff] %vm609_vm3, %v574_v2 }
 0x2a6   : > { %v1615_v23 = vpop.f32.mrf.mxu1  ;;  %v1524_v53 = vadd.f32 %v1503_v7, %v1415_v27  ;;  %v1418_v19 = vadd.f32 %v1402_v47, %v1309_v24  ;;  %v2121_v27 = vpack.c.bf16 %v7694_v58, %v7674_v4  ;;  %v7783_v4 = vld [vmem:[#allocation2 + $0x9c] sm:$0xff]  ;;  %v2210_v24 = vld [vmem:[#allocation2 + $0xb3] sm:$0xff] }
 0x2a7   : > { %v2411_v47 = vpack.c.bf16 %v7780_v38, %v7783_v4  ;;  %v2211_v7 = vld [vmem:[#allocation2 + $0xbb] sm:$0xff] }
 0x2a8   : > { %6802 = vmatmul.msk.bf16.gmra.mxu3 %vm609_vm3, %v2218_v10  ;;  %v7766_v22 = vadd.f32 %v1612_v50, %v1524_v53  ;;  %v2400_v10 = vld [vmem:[#allocation2 + $0xac] sm:$0xff]  ;;  %v2220_v21 = vpack.c.bf16 %v2211_v7, %v2210_v24  ;;  %v2124_v24 = vpack.c.bf16 %v7754_v35, %v7723_v32  ;;  %v674_v35 = vpop.trf.xlu2 }
 0x2a9   : > { %6793 = vmatmul.msk.bf16.gmra.mxu1 %vm609_vm3, %v2029_v16  ;;  %v2316_v7 = vpack.c.bf16 %v2400_v10, %v7780_v38  ;;  %754 = vst.msk [vmem:[#allocation2 + $0x180] sm:$0xff] %vm609_vm3, %v674_v35 }
 0x2ab   : > { %v1295_v1 = vpop.f32.mrf.mxu2  ;;  %v7768_v20 = vpop.f32.mrf.mxu3 }
 0x2ad   : > { %v1506_v25 = vpop.f32.mrf.mxu0 }
 0x2ae   : > { %v1617_v30 = vpop.f32.mrf.mxu1  ;;  %v1525_v26 = vadd.f32 %v1506_v25, %v1416_v46 }
 0x2b0   : > { %6786 = vmatmul.msk.bf16.gmra.mxu0 %vm609_vm3, %v1861_v63  ;;  %6795 = vmatmul.msk.bf16.gmra.mxu2 %vm609_vm3, %v2121_v27  ;;  %v7774_v31 = vadd.f32 %v1615_v23, %v1525_v26  ;;  %v7820_v23 = vld [vmem:[#allocation2 + $0xb4] sm:$0xff] }
 0x2b1   : > { %v2412_v25 = vpack.c.bf16 %v7820_v23, %v2400_v10 }
 0x2b3   : > { %v1699_v40 = vpop.f32.mrf.mxu2  ;;  %v7778_v12 = vpop.f32.mrf.mxu3 }
 0x2b4   : > { %v1733_v57 = vadd.f32 %v1699_v40, %v7672_v51  ;;  %v7205_v51 = vld [vmem:[%s9601_s3 + $0x58] sm:$0xff] }
 0x2b5   : > { %v1508_v45 = vpop.f32.mrf.mxu0 }
 0x2b6   : > { %v1620_v46 = vpop.f32.mrf.mxu1  ;;  %v1749_v58 = vadd.f32 %v7776_v39, %v1733_v57  ;;  %v1526_v55 = vadd.f32 %v1508_v45, %v1417_v5  ;;  %v2123_v45 = vpack.c.bf16 %v7726_v34, %v7707_v3 }
 0x2b8   : > { %v1762_v29 = vmax.f32 %v1749_v58, 0.0  ;;  %6803 = vmatmul.msk.bf16.gmra.mxu3 %vm609_vm3, %v2219_v37  ;;  %v7790_v33 = vadd.f32 %v1617_v30, %v1526_v55  ;;  %v575_v30 = vpop.trf.xlu0 }
 0x2b9   : > { %6815 = vmatmul.msk.bf16.vlgmr.msra.gmra.mxu1 %vm609_vm3, %v2411_v47  ;;  %640 = vst.msk [vmem:[#allocation2 + $0xf0] sm:$0xff] %vm609_vm3, %v575_v30  ;;  %v2212_v47 = vld [vmem:[#allocation2 + $0xc3] sm:$0xff] }
 0x2ba   : > { %3272 = vmatpush.bf16.msra.mxu1 %v7205_v51  ;;  %1776 = vst.msk [vmem:[#allocation3] sm:$0xff] %vm1775_vm4, %v1762_v29  ;;  %v7851_v29 = vld [vmem:[#allocation2 + $0xc4] sm:$0xff] }
 0x2bb   : > { %v1701_v0 = vpop.f32.mrf.mxu2  ;;  %v7796_v49 = vpop.f32.mrf.mxu3 }
 0x2bc   : > { %v1734_v50 = vadd.f32 %v1701_v0, %v7684_v52 }
 0x2bd   : > { %v1511_v54 = vpop.f32.mrf.mxu0 }
 0x2be   : > { %v1622_v56 = vpop.f32.mrf.mxu1  ;;  %3273 = vmatpush.bf16.msra.mxu1 %v7206_v61  ;;  %v1750_v9 = vadd.f32 %v7776_v39, %v1734_v50  ;;  %v1527_v5 = vadd.f32 %v1511_v54, %v1418_v19  ;;  %v7826_v19 = vld [vmem:[%s9601_s3 + $0x40] sm:$0xff] }
 0x2c0   : > { %v1763_v11 = vmax.f32 %v1750_v9, 0.0  ;;  %6796 = vmatmul.msk.bf16.gmra.mxu2 %vm609_vm3, %v2122_v13  ;;  %6808 = vmatmul.msk.bf16.vlgmr.msra.gmra.mxu0 %vm609_vm3, %v7620_v17  ;;  %v7809_v52 = vadd.f32 %v1620_v46, %v1527_v5  ;;  %v2315_v46 = vpack.c.bf16 %v7783_v4, %v7635_v43  ;;  %v7854_v4 = vld [vmem:[#allocation2 + $0xbc] sm:$0xff]  ;;  %v576_v56 = vpop.trf.xlu0 }
 0x2c1   : > { %3175 = vmatpush.bf16.msra.mxu0 %v7814_v14  ;;  %v2413_v54 = vpack.c.bf16 %v7851_v29, %v7854_v4  ;;  %641 = vst.msk [vmem:[#allocation2 + $0xf8] sm:$0xff] %vm609_vm3, %v576_v56 }
 0x2c2   : > { %1777 = vst.msk [vmem:[#allocation3 + $0x8] sm:$0xff] %vm1775_vm4, %v1763_v11 }
 0x2c3   : > { %v1704_v36 = vpop.f32.mrf.mxu2  ;;  %v7818_v8 = vpop.f32.mrf.mxu3 }
 0x2c4   : > { %v1735_v17 = vadd.f32 %v1704_v36, %v7689_v44 }
 0x2c5   : > { %v1513_v53 = vpop.f32.mrf.mxu0  ;;  %3176 = vmatpush.bf16.msra.mxu0 %v7826_v19 }
 0x2c6   : > { %v2060_v16 = vpop.f32.mrf.mxu1  ;;  %v1751_v1 = vadd.f32 %v7776_v39, %v1735_v17 }
 0x2c8   : > { %v1764_v26 = vmax.f32 %v1751_v1, 0.0  ;;  %6804 = vmatmul.msk.bf16.gmra.mxu3 %vm609_vm3, %v2220_v21  ;;  %v2214_v1 = vld [vmem:[#allocation2 + $0xd3] sm:$0xff]  ;;  %v2215_v21 = vld [vmem:[#allocation2 + $0xdb] sm:$0xff] }
 0x2c9   : > { %6816 = vmatmul.msk.bf16.gmra.mxu1 %vm609_vm3, %v2412_v25  ;;  %v7884_v25 = vld [vmem:[#allocation2 + $0xcc] sm:$0xff] }
 0x2ca   : > { %1778 = vst.msk [vmem:[#allocation3 + $0x10] sm:$0xff] %vm1775_vm4, %v1764_v26 }
 0x2cb   : > { %v1706_v44 = vpop.f32.mrf.mxu2  ;;  %v7835_v63 = vpop.f32.mrf.mxu3 }
 0x2cc   : > { %v1736_v27 = vadd.f32 %v1706_v44, %v7700_v59  ;;  %v2222_v44 = vpack.c.bf16 %v2215_v21, %v2214_v1 }
 0x2cd   : > { %v1976_v40 = vpop.f32.mrf.mxu0 }
 0x2ce   : > { %v2062_v41 = vpop.f32.mrf.mxu1  ;;  %v1752_v42 = vadd.f32 %v7776_v39, %v1736_v27  ;;  %v1977_v57 = vadd.f32 %v1976_v40, %v7768_v20  ;;  %v2213_v20 = vld [vmem:[#allocation2 + $0xcb] sm:$0xff] }
 0x2cf   : > { %v2221_v50 = vpack.c.bf16 %v2213_v20, %v2212_v47 }
 0x2d0   : > { %v1765_v58 = vmax.f32 %v1752_v42, 0.0  ;;  %6797 = vmatmul.msk.bf16.gmra.mxu2 %vm609_vm3, %v2123_v45  ;;  %6809 = vmatmul.msk.bf16.gmra.mxu0 %vm609_vm3, %v2315_v46  ;;  %v7846_v55 = vadd.f32 %v2060_v16, %v1977_v57  ;;  %v2117_v57 = vld [vmem:[#allocation2 + $0xd2] sm:$0xff]  ;;  %v2118_v45 = vld [vmem:[#allocation2 + $0xda] sm:$0xff]  ;;  %v675_v46 = vpop.trf.xlu2 }
 0x2d1   : > { %755 = vst.msk [vmem:[#allocation2 + $0x188] sm:$0xff] %vm609_vm3, %v675_v46 }
 0x2d2   : > { %1779 = vst.msk [vmem:[#allocation3 + $0x18] sm:$0xff] %vm1775_vm4, %v1765_v58 }
 0x2d3   : > { %v1709_v59 = vpop.f32.mrf.mxu2  ;;  %v7849_v37 = vpop.f32.mrf.mxu3 }
 0x2d4   : > { %v1737_v3 = vadd.f32 %v1709_v59, %v7705_v60 }
 0x2d5   : > { %v1978_v34 = vpop.f32.mrf.mxu0 }
 0x2d6   : > { %v2065_v43 = vpop.f32.mrf.mxu1  ;;  %v1753_v51 = vadd.f32 %v7776_v39, %v1737_v3  ;;  %v1979_v0 = vadd.f32 %v1978_v34, %v7778_v12  ;;  %v7902_v3 = vpack.c.bf16 %v2118_v45, %v2117_v57  ;;  %v2317_v34 = vpack.c.bf16 %v7854_v4, %v7820_v23 }
 0x2d8   : > { %v1766_v61 = vmax.f32 %v1753_v51, 0.0  ;;  %6805 = vmatmul.msk.bf16.gmra.mxu3 %vm609_vm3, %v2221_v50  ;;  %v7863_v60 = vadd.f32 %v2062_v41, %v1979_v0  ;;  %v2216_v50 = vld [vmem:[#allocation2 + $0xe3] sm:$0xff]  ;;  %v676_v4 = vpop.trf.xlu2 }
 0x2d9   : > { %6817 = vmatmul.msk.bf16.gmra.mxu1 %vm609_vm3, %v2413_v54  ;;  %v7915_v54 = vld [vmem:[#allocation2 + $0xe4] sm:$0xff]  ;;  %756 = vst.msk [vmem:[#allocation2 + $0x190] sm:$0xff] %vm609_vm3, %v676_v4 }
 0x2da   : > { %1780 = vst.msk [vmem:[#allocation3 + $0x20] sm:$0xff] %vm1775_vm4, %v1766_v61 }
 0x2db   : > { %v1711_v9 = vpop.f32.mrf.mxu2  ;;  %v7866_v5 = vpop.f32.mrf.mxu3 }
 0x2dc   : > { %v1738_v12 = vadd.f32 %v1711_v9, %v7716_v15  ;;  %v7918_v9 = vld [vmem:[#allocation2 + $0xdc] sm:$0xff] }
 0x2dd   : > { %v1981_v13 = vpop.f32.mrf.mxu0 }
 0x2de   : > { %v2067_v2 = vpop.f32.mrf.mxu1  ;;  %v1754_v11 = vadd.f32 %v7776_v39, %v1738_v12  ;;  %v1982_v36 = vadd.f32 %v1981_v13, %v7796_v49  ;;  %v7881_v49 = vld [vmem:[#allocation2 + $0xd4] sm:$0xff] }
 0x2df   : > { %v2414_v27 = vpack.c.bf16 %v7881_v49, %v7884_v25 }
 0x2e0   : > { %v1767_v17 = vmax.f32 %v1754_v11, 0.0  ;;  %6798 = vmatmul.msk.bf16.gmra.mxu2 %vm609_vm3, %v2124_v24  ;;  %6810 = vmatmul.msk.bf16.gmra.mxu0 %vm609_vm3, %v2316_v7  ;;  %v7876_v53 = vadd.f32 %v2065_v43, %v1982_v36  ;;  %v593_v43 = vpop.trf.xlu1  ;;  %v2415_v11 = vpack.c.bf16 %v7915_v54, %v7918_v9 }
 0x2e1   : > { %642 = vst.msk [vmem:[#allocation2 + $0x100] sm:$0xff] %vm609_vm3, %v593_v43  ;;  %v2495_v43 = vld [vmem:[#allocation2 + $0x9d] sm:$0xff] }
 0x2e2   : > { %1781 = vst.msk [vmem:[#allocation3 + $0x28] sm:$0xff] %vm1775_vm4, %v1767_v17  ;;  %v7932_v17 = vld [vmem:[#allocation2 + $0xe2] sm:$0xff] }
 0x2e3   : > { %v1714_v15 = vpop.f32.mrf.mxu2  ;;  %v7879_v16 = vpop.f32.mrf.mxu3 }
 0x2e4   : > { %v1739_v32 = vadd.f32 %v1714_v15, %v7721_v28  ;;  %v677_v15 = vpop.trf.xlu2 }
 0x2e5   : > { %v1983_v38 = vpop.f32.mrf.mxu0  ;;  %757 = vst.msk [vmem:[#allocation2 + $0x198] sm:$0xff] %vm609_vm3, %v677_v15 }
 0x2e6   : > { %v2070_v10 = vpop.f32.mrf.mxu1  ;;  %v1755_v30 = vadd.f32 %v7776_v39, %v1739_v32  ;;  %v1984_v26 = vadd.f32 %v1983_v38, %v7818_v8  ;;  %v2126_v38 = vpack.c.bf16 %v7932_v17, %v7932_v17 }
 0x2e8   : > { %v1768_v40 = vmax.f32 %v1755_v30, 0.0  ;;  %6806 = vmatmul.msk.bf16.gmra.mxu3 %vm609_vm3, %v2222_v44  ;;  %v7893_v28 = vadd.f32 %v2067_v2, %v1984_v26  ;;  %v2223_v2 = vpack.c.bf16 %v2216_v50, %v2216_v50  ;;  %v2592_v26 = vld [vmem:[#allocation2 + $0x9e] sm:$0xff] }
 0x2e9   : > { %6818 = vmatmul.msk.bf16.gmra.mxu1 %vm609_vm3, %v2414_v27 }
 0x2ea   : > { %1782 = vst.msk [vmem:[#allocation3 + $0x30] sm:$0xff] %vm1775_vm4, %v1768_v40  ;;  %v2409_v40 = vld [vmem:[#allocation2 + $0xf4] sm:$0xff] }
 0x2eb   : > { %v1716_v41 = vpop.f32.mrf.mxu2  ;;  %v7896_v42 = vpop.f32.mrf.mxu3 }
 0x2ec   : > { %v1740_v8 = vadd.f32 %v1716_v41, %v7732_v48  ;;  %v2593_v41 = vld [vmem:[#allocation2 + $0xa6] sm:$0xff]  ;;  %v678_v45 = vpop.trf.xlu2 }
 0x2ed   : > { %v1986_v58 = vpop.f32.mrf.mxu0  ;;  %758 = vst.msk [vmem:[#allocation2 + $0x1a0] sm:$0xff] %vm609_vm3, %v678_v45 }
 0x2ee   : > { %v2072_v59 = vpop.f32.mrf.mxu1  ;;  %v1756_v47 = vadd.f32 %v7776_v39, %v1740_v8  ;;  %v1987_v20 = vadd.f32 %v1986_v58, %v7835_v63 }
 0x2f0   : > { %v1769_v51 = vmax.f32 %v1756_v47, 0.0  ;;  %6799 = vmatmul.msk.bf16.gmra.mxu2 %vm609_vm3, %v7902_v3  ;;  %6811 = vmatmul.msk.bf16.gmra.mxu0 %vm609_vm3, %v2317_v34  ;;  %v7910_v48 = vadd.f32 %v2070_v10, %v1987_v20  ;;  %v2318_v10 = vpack.c.bf16 %v7884_v25, %v7851_v29 }
 0x2f2   : > { %1783 = vst.msk [vmem:[#allocation3 + $0x38] sm:$0xff] %vm1775_vm4, %v1769_v51  ;;  %v2496_v51 = vld [vmem:[#allocation2 + $0xa5] sm:$0xff] }
 0x2f3   : > { %v1719_v0 = vpop.f32.mrf.mxu2  ;;  %v7913_v63 = vpop.f32.mrf.mxu3 }
 0x2f4   : > { %v1741_v23 = vadd.f32 %v1719_v0, %v7745_v62  ;;  %v679_v50 = vpop.trf.xlu2 }
 0x2f5   : > { %v1988_v56 = vpop.f32.mrf.mxu0  ;;  %759 = vst.msk [vmem:[#allocation2 + $0x1a8] sm:$0xff] %vm609_vm3, %v679_v50 }
 0x2f6   : > { %v2075_v61 = vpop.f32.mrf.mxu1  ;;  %v1757_v12 = vadd.f32 %v7776_v39, %v1741_v23  ;;  %v1989_v13 = vadd.f32 %v1988_v56, %v7849_v37  ;;  %v7210_v56 = vld [vmem:[%s9601_s3 + $0x70] sm:$0xff] }
 0x2f8   : > { %v1770_v36 = vmax.f32 %v1757_v12, 0.0  ;;  %6807 = vmatmul.msk.bf16.gmra.mxu3 %vm609_vm3, %v2223_v2  ;;  %v7927_v62 = vadd.f32 %v2072_v59, %v1989_v13  ;;  %v2605_v59 = vpack.c.bf16 %v2593_v41, %v2592_v26  ;;  %v2319_v13 = vpack.c.bf16 %v7918_v9, %v7881_v49  ;;  %v2594_v9 = vld [vmem:[#allocation2 + $0xae] sm:$0xff] }
 0x2f9   : > { %6819 = vmatmul.msk.bf16.gmra.mxu1 %vm609_vm3, %v2415_v11  ;;  %v2508_v2 = vpack.c.bf16 %v2496_v51, %v2495_v43  ;;  %v2497_v41 = vld [vmem:[#allocation2 + $0xad] sm:$0xff] }
 0x2fa   : > { %1784 = vst.msk [vmem:[#allocation3 + $0x40] sm:$0xff] %vm1775_vm4, %v1770_v36  ;;  %v7979_v36 = vld [vmem:[#allocation2 + $0xfc] sm:$0xff] }
 0x2fb   : > { %v1721_v24 = vpop.f32.mrf.mxu2  ;;  %v7930_v7 = vpop.f32.mrf.mxu3 }
 0x2fc   : > { %v1742_v37 = vadd.f32 %v1721_v24, %v7766_v22  ;;  %v7984_v24 = vld [vmem:[%s9601_s3 + $0x68] sm:$0xff] }
 0x2fd   : > { %v1991_v1 = vpop.f32.mrf.mxu0 }
 0x2fe   : > { %v2077_v21 = vpop.f32.mrf.mxu1  ;;  %v1758_v32 = vadd.f32 %v7776_v39, %v1742_v37  ;;  %v1992_v35 = vadd.f32 %v1991_v1, %v7866_v5  ;;  %v2408_v5 = vld [vmem:[#allocation2 + $0xec] sm:$0xff]  ;;  %v2595_v37 = vld [vmem:[#allocation2 + $0xb6] sm:$0xff]  ;;  %v2417_v1 = vpack.c.bf16 %v7979_v36, %v7979_v36 }
 0x2ff   : > { %v7953_v58 = vpack.c.bf16 %v2409_v40, %v2408_v5 }
 0x300   : > { %v1771_v30 = vmax.f32 %v1758_v32, 0.0  ;;  %6800 = vmatmul.msk.bf16.gmra.mxu2 %vm609_vm3, %v2126_v38  ;;  %6812 = vmatmul.msk.bf16.gmra.mxu0 %vm609_vm3, %v2318_v10  ;;  %v7944_v22 = vadd.f32 %v2075_v61, %v1992_v35  ;;  %v7995_v38 = vld [vmem:[%s9601_s3 + $0x60] sm:$0xff] }
 0x302   : > { %1785 = vst.msk [vmem:[#allocation3 + $0x48] sm:$0xff] %vm1775_vm4, %v1771_v30 }
 0x303   : > { %v1724_v44 = vpop.f32.mrf.mxu2  ;;  %v7947_v27 = vpop.f32.mrf.mxu3 }
 0x304   : > { %v1743_v57 = vadd.f32 %v1724_v44, %v7774_v31  ;;  %v7209_v31 = vld [vmem:[%s9601_s3 + $0x78] sm:$0xff] }
 0x305   : > { %v1993_v29 = vpop.f32.mrf.mxu0 }
 0x306   : > { %v2080_v25 = vpop.f32.mrf.mxu1  ;;  %v1759_v8 = vadd.f32 %v7776_v39, %v1743_v57  ;;  %v1994_v46 = vadd.f32 %v1993_v29, %v7879_v16  ;;  %v2498_v57 = vld [vmem:[#allocation2 + $0xb5] sm:$0xff] }
 0x308   : > { %v1772_v47 = vmax.f32 %v1759_v8, 0.0  ;;  %6829 = vmatmul.msk.bf16.vlgmr.msrb.gmra.mxu3 %vm609_vm3, %v2605_v59  ;;  %v7958_v20 = vadd.f32 %v2077_v21, %v1994_v46  ;;  %v680_v21 = vpop.trf.xlu2  ;;  %v2320_v46 = vpack.c.bf16 %v7915_v54, %v7915_v54  ;;  %v2509_v59 = vpack.c.bf16 %v2498_v57, %v2497_v41  ;;  %v2786_v41 = vld [vmem:[#allocation2 + $0xd1] sm:$0xff]  ;;  %v2787_v57 = vld [vmem:[#allocation2 + $0xd9] sm:$0xff] }
 0x309   : > { %6820 = vmatmul.msk.bf16.gmra.mxu1 %vm609_vm3, %v7953_v58  ;;  %3466 = vmatpush.bf16.msrb.mxu3 %v7209_v31  ;;  %760 = vst.msk [vmem:[#allocation2 + $0x1b0] sm:$0xff] %vm609_vm3, %v680_v21  ;;  %v1802_v31 = vld [vmem:[#allocation3 + $0x3] ss:$4 sm:$0x3f] }
 0x30a   : > { %1786 = vst.msk [vmem:[#allocation3 + $0x50] sm:$0xff] %vm1775_vm4, %v1772_v47  ;;  %v1800_v47 = vld [vmem:[#allocation3 + $0x2] ss:$4 sm:$0x3f] }
 0x30b   : > { %v1726_v34 = vpop.f32.mrf.mxu2  ;;  %v7964_v16 = vpop.f32.mrf.mxu3  ;;  %v1829_v43 = vld [vmem:[#allocation3 + $0x37] ss:$4 sm:$0x3f] }
 0x30c   : > { %v1744_v0 = vadd.f32 %v1726_v34, %v7790_v33  ;;  %v1827_v34 = vld [vmem:[#allocation3 + $0x36] ss:$4 sm:$0x3f] }
 0x30d   : > { %v1996_v23 = vpop.f32.mrf.mxu0  ;;  %3467 = vmatpush.bf16.msrb.mxu3 %v7210_v56  ;;  %v1830_v54 = vmax.f32 %v1827_v34, %v1829_v43  ;;  %v8040_v34 = vld [vmem:[%s9601_s3 + $0x88] sm:$0xff] }
 0x30e   : > { %v2082_v4 = vpop.f32.mrf.mxu1  ;;  %v1760_v61 = vadd.f32 %v7776_v39, %v1744_v0  ;;  %v1997_v12 = vadd.f32 %v1996_v23, %v7896_v42  ;;  %v2596_v0 = vld [vmem:[#allocation2 + $0xbe] sm:$0xff]  ;;  %v2598_v43 = vld [vmem:[#allocation2 + $0xce] sm:$0xff] }
 0x310   : > { %v1773_v11 = vmax.f32 %v1760_v61, 0.0  ;;  %6813 = vmatmul.msk.bf16.gmra.mxu0 %vm609_vm3, %v2319_v13  ;;  %6822 = vmatmul.msk.bf16.vlgmr.msrb.gmra.mxu2 %vm609_vm3, %v2508_v2  ;;  %v7977_v33 = vadd.f32 %v2080_v25, %v1997_v12  ;;  %v681_v45 = vpop.trf.xlu2  ;;  %v2597_v61 = vld [vmem:[#allocation2 + $0xc6] sm:$0xff]  ;;  %v1803_v12 = vmax.f32 %v1800_v47, %v1802_v31  ;;  %v2766_v2 = vld [vmem:[#allocation2 + $0xd0] sm:$0xff]  ;;  %v2799_v47 = vpack.c.bf16 %v2787_v57, %v2786_v41  ;;  %v2771_v57 = vld [vmem:[#allocation2 + $0xf8] sm:$0xff] }
 0x311   : > { %3369 = vmatpush.bf16.msrb.mxu2 %v7984_v24  ;;  %761 = vst.msk [vmem:[#allocation2 + $0x1b8] sm:$0xff] %vm609_vm3, %v681_v45 }
 0x312   : > { %1787 = vst.msk [vmem:[#allocation3 + $0x58] sm:$0xff] %vm1775_vm4, %v1773_v11  ;;  %v2767_v11 = vld [vmem:[#allocation2 + $0xd8] sm:$0xff] }
 0x313   : > { %v1729_v49 = vpop.f32.mrf.mxu2  ;;  %v1944_v42 = vpop.f32.mrf.mxu3 }
 0x314   : > { %v1745_v15 = vadd.f32 %v1729_v49, %v7809_v52  ;;  %v2606_v52 = vpack.c.bf16 %v2595_v37, %v2594_v9 }
 0x315   : > { %v1998_v32 = vpop.f32.mrf.mxu0  ;;  %3370 = vmatpush.bf16.msrb.mxu2 %v7995_v38 }
 0x316   : > { %v2085_v35 = vpop.f32.mrf.mxu1  ;;  %v1761_v10 = vadd.f32 %v7776_v39, %v1745_v15  ;;  %v1999_v30 = vadd.f32 %v1998_v32, %v7913_v63  ;;  %v1805_v39 = vld [vmem:[#allocation3 + $0x1c] ss:$4 sm:$0x3f]  ;;  %v1807_v63 = vld [vmem:[#allocation3 + $0x1d] ss:$4 sm:$0x3f]  ;;  %v2607_v32 = vpack.c.bf16 %v2597_v61, %v2596_v0 }
 0x317   : > { %v1808_v50 = vmax.f32 %v1805_v39, %v1807_v63  ;;  %v594_v39 = vpop.trf.xlu1 }
 0x318   : > { %v1774_v26 = vmax.f32 %v1761_v10, 0.0  ;;  %6830 = vmatmul.msk.bf16.gmra.mxu3 %vm609_vm3, %v2606_v52  ;;  %v8002_v44 = vadd.f32 %v2082_v4, %v1999_v30  ;;  %v682_v42 = vpop.trf.xlu2  ;;  %643 = vst.msk [vmem:[#allocation2 + $0x108] sm:$0xff] %vm609_vm3, %v594_v39  ;;  %v2600_v39 = vld [vmem:[#allocation2 + $0xde] sm:$0xff] }
 0x319   : > { %6821 = vmatmul.msk.bf16.gmra.mxu1 %vm609_vm3, %v2417_v1  ;;  %v1809_v15 = vmax.f32 %v1803_v12, %v1808_v50  ;;  %762 = vst.msk [vmem:[#allocation2 + $0x1c0] sm:$0xff] %vm609_vm3, %v682_v42  ;;  %v2599_v50 = vld [vmem:[#allocation2 + $0xd6] sm:$0xff] }
 0x31a   : > { %1788 = vst.msk [vmem:[#allocation3 + $0x60] sm:$0xff] %vm1775_vm4, %v1774_v26 }
 0x31b   : > { %v1731_v5 = vpop.f32.mrf.mxu2  ;;  %v2254_v40 = vpop.f32.mrf.mxu3 }
 0x31d   : > { %v2001_v29 = vpop.f32.mrf.mxu0 }
 0x31e   : > { %v2087_v25 = vpop.f32.mrf.mxu1  ;;  %v2002_v8 = vadd.f32 %v2001_v29, %v7930_v7 }
 0x31f   : > { %v595_v61 = vpop.trf.xlu1 }
 0x320   : > { %6814 = vmatmul.msk.bf16.gmra.mxu0 %vm609_vm3, %v2320_v46  ;;  %6823 = vmatmul.msk.bf16.gmra.mxu2 %vm609_vm3, %v2509_v59  ;;  %v8011_v51 = vadd.f32 %v2085_v35, %v2002_v8  ;;  %v2779_v35 = vpack.c.bf16 %v2767_v11, %v2766_v2  ;;  %v683_v29 = vpop.trf.xlu2  ;;  %v7214_v8 = vld [vmem:[%s9601_s3 + $0x10] sm:$0xff]  ;;  %v2608_v2 = vpack.c.bf16 %v2599_v50, %v2598_v43 }
 0x321   : > { %v1832_v23 = vld [vmem:[#allocation3 + $0x50] ss:$4 sm:$0x3f]  ;;  %v1834_v4 = vld [vmem:[#allocation3 + $0x51] ss:$4 sm:$0x3f] }
 0x322   : > { %v1835_v13 = vmax.f32 %v1832_v23, %v1834_v4  ;;  %763 = vst.msk [vmem:[#allocation2 + $0x1c8] sm:$0xff] %vm609_vm3, %v683_v29  ;;  %v2768_v23 = vld [vmem:[#allocation2 + $0xe0] sm:$0xff]  ;;  %v2769_v4 = vld [vmem:[#allocation2 + $0xe8] sm:$0xff] }
 0x323   : > { %v2157_v56 = vpop.f32.mrf.mxu2  ;;  %v2256_v7 = vpop.f32.mrf.mxu3  ;;  %v2780_v11 = vpack.c.bf16 %v2769_v4, %v2768_v23  ;;  %644 = vst.msk [vmem:[#allocation2 + $0x110] sm:$0xff] %vm609_vm3, %v595_v61  ;;  %v2790_v23 = vld [vmem:[#allocation2 + $0xf1] sm:$0xff]  ;;  %v2504_v61 = vld [vmem:[#allocation2 + $0xe5] sm:$0xff] }
 0x324   : > { %v2191_v49 = vadd.f32 %v2157_v56, %v7846_v55  ;;  %v1836_v1 = vmax.f32 %v1830_v54, %v1835_v13  ;;  %v7213_v55 = vld [vmem:[%s9601_s3 + $0x18] sm:$0xff]  ;;  %v8048_v13 = vld [vmem:[%s9601_s3 + $0x80] sm:$0xff] }
 0x325   : > { %v2003_v9 = vpop.f32.mrf.mxu0 }
 0x326   : > { %v2090_v37 = vpop.f32.mrf.mxu1  ;;  %v2004_v21 = vadd.f32 %v2003_v9, %v7947_v27  ;;  %v8016_v10 = vadd.f32 %v2254_v40, %v2191_v49  ;;  %v7170_v30 = vpack.i.bf16 %v1836_v1, %v1809_v15  ;;  %v2499_v27 = vld [vmem:[#allocation2 + $0xbd] sm:$0xff]  ;;  %v2500_v40 = vld [vmem:[#allocation2 + $0xc5] sm:$0xff] }
 0x327   : > { %v2510_v59 = vpack.c.bf16 %v2500_v40, %v2499_v27  ;;  %v2788_v15 = vld [vmem:[#allocation2 + $0xe1] sm:$0xff]  ;;  %v2789_v1 = vld [vmem:[#allocation2 + $0xe9] sm:$0xff] }
 0x328   : > { %6831 = vmatmul.msk.bf16.gmra.mxu3 %vm609_vm3, %v2607_v32  ;;  %v8020_v52 = vadd.f32 %v2087_v25, %v2004_v21  ;;  %7171 = vrot.lane.b32.xlu2 %v7170_v30, %s7294_s7 }
 0x329   : > { %6843 = vmatmul.msk.bf16.vlgmr.msrb.gmra.mxu1 %vm609_vm3, %v2779_v35  ;;  %v596_v35 = vpop.trf.xlu1 }
 0x32a   : > { %3757 = vmatpush.bf16.msrb.mxu1 %v7213_v55  ;;  %645 = vst.msk [vmem:[#allocation2 + $0x118] sm:$0xff] %vm609_vm3, %v596_v35  ;;  %v2602_v35 = vld [vmem:[#allocation2 + $0xee] sm:$0xff] }
 0x32b   : > { %v2159_v26 = vpop.f32.mrf.mxu2  ;;  %v2259_v5 = vpop.f32.mrf.mxu3 }
 0x32c   : > { %v2192_v45 = vadd.f32 %v2159_v26, %v7863_v60 }
 0x32d   : > { %v2006_v25 = vpop.f32.mrf.mxu0 }
 0x32e   : > { %v2092_v63 = vpop.f32.mrf.mxu1  ;;  %3758 = vmatpush.bf16.msrb.mxu1 %v7214_v8  ;;  %v2007_v46 = vadd.f32 %v2006_v25, %v7964_v16  ;;  %v2289_v31 = vadd.f32 %v2256_v7, %v2192_v45  ;;  %v684_v7 = vpop.trf.xlu2  ;;  %v2601_v25 = vld [vmem:[#allocation2 + $0xe6] sm:$0xff] }
 0x32f   : > { %764 = vst.msk [vmem:[#allocation2 + $0x1d0] sm:$0xff] %vm609_vm3, %v684_v7  ;;  %v2503_v7 = vld [vmem:[#allocation2 + $0xdd] sm:$0xff] }
 0x330   : > { %6824 = vmatmul.msk.bf16.gmra.mxu2 %vm609_vm3, %v2510_v59  ;;  %6836 = vmatmul.msk.bf16.vlgmr.msrb.gmra.mxu0 %vm609_vm3, %v2799_v47  ;;  %v8035_v60 = vadd.f32 %v2090_v37, %v2007_v46  ;;  %v2502_v37 = vld [vmem:[#allocation2 + $0xd5] sm:$0xff] }
 0x331   : > { %3563 = vmatpush.bf16.msrb.mxu0 %v8040_v34  ;;  %v597_v46 = vpop.trf.xlu1 }
 0x332   : > { %646 = vst.msk [vmem:[#allocation2 + $0x120] sm:$0xff] %vm609_vm3, %v597_v46  ;;  %v2506_v46 = vld [vmem:[#allocation2 + $0xf5] sm:$0xff] }
 0x333   : > { %v2162_v16 = vpop.f32.mrf.mxu2  ;;  %v2261_v0 = vpop.f32.mrf.mxu3 }
 0x334   : > { %v2193_v56 = vadd.f32 %v2162_v16, %v7876_v53  ;;  %v2501_v53 = vld [vmem:[#allocation2 + $0xcd] sm:$0xff]  ;;  %v2609_v16 = vpack.c.bf16 %v2601_v25, %v2600_v39  ;;  %v2792_v25 = vld [vmem:[#allocation2 + $0x101] sm:$0xff] }
 0x335   : > { %v2008_v12 = vpop.f32.mrf.mxu0  ;;  %3564 = vmatpush.bf16.msrb.mxu0 %v8048_v13  ;;  %v2511_v26 = vpack.c.bf16 %v2502_v37, %v2501_v53 }
 0x336   : > { %v2448_v54 = vpop.f32.mrf.mxu1  ;;  %v2290_v49 = vadd.f32 %v2259_v5, %v2193_v56  ;;  %v685_v32 = vpop.trf.xlu2  ;;  %v2800_v5 = vpack.c.bf16 %v2789_v1, %v2788_v15  ;;  %v2772_v1 = vld [vmem:[#allocation2 + $0x100] sm:$0xff] }
 0x337   : > { %765 = vst.msk [vmem:[#allocation2 + $0x1d8] sm:$0xff] %vm609_vm3, %v685_v32 }
 0x338   : > { %6832 = vmatmul.msk.bf16.gmra.mxu3 %vm609_vm3, %v2608_v2 }
 0x339   : > { %6844 = vmatmul.msk.bf16.gmra.mxu1 %vm609_vm3, %v2780_v11  ;;  %v598_v2 = vpop.trf.xlu1 }
 0x33a   : > { %647 = vst.msk [vmem:[#allocation2 + $0x128] sm:$0xff] %vm609_vm3, %v598_v2 }
 0x33b   : > { %v2164_v42 = vpop.f32.mrf.mxu2  ;;  %v2264_v9 = vpop.f32.mrf.mxu3 }
 0x33c   : > { %v2194_v21 = vadd.f32 %v2164_v42, %v7893_v28  ;;  %v2770_v28 = vld [vmem:[#allocation2 + $0xf0] sm:$0xff] }
 0x33d   : > { %v2351_v30 = vpop.f32.mrf.mxu0 }
 0x33e   : > { %v2450_v55 = vpop.f32.mrf.mxu1  ;;  %v2385_v27 = vadd.f32 %v2351_v30, %v8016_v10  ;;  %v2291_v40 = vadd.f32 %v2261_v0, %v2194_v21  ;;  %v2781_v10 = vpack.c.bf16 %v2771_v57, %v2770_v28  ;;  %v686_v8 = vpop.trf.xlu2  ;;  %v2603_v30 = vld [vmem:[#allocation2 + $0xf6] sm:$0xff] }
 0x33f   : > { %766 = vst.msk [vmem:[#allocation2 + $0x1e0] sm:$0xff] %vm609_vm3, %v686_v8  ;;  %v2505_v8 = vld [vmem:[#allocation2 + $0xed] sm:$0xff] }
 0x340   : > { %6825 = vmatmul.msk.bf16.gmra.mxu2 %vm609_vm3, %v2511_v26  ;;  %6837 = vmatmul.msk.bf16.gmra.mxu0 %vm609_vm3, %v2800_v5  ;;  %v8060_v41 = vadd.f32 %v2448_v54, %v2385_v27 }
 0x341   : > { %v599_v26 = vpop.trf.xlu1 }
 0x342   : > { %648 = vst.msk [vmem:[#allocation2 + $0x130] sm:$0xff] %vm609_vm3, %v599_v26 }
 0x343   : > { %v2167_v45 = vpop.f32.mrf.mxu2  ;;  %v2266_v29 = vpop.f32.mrf.mxu3 }
 0x344   : > { %v2195_v63 = vadd.f32 %v2167_v45, %v7910_v48  ;;  %v2791_v48 = vld [vmem:[#allocation2 + $0xf9] sm:$0xff]  ;;  %v2610_v45 = vpack.c.bf16 %v2603_v30, %v2602_v35 }
 0x345   : > { %v2353_v59 = vpop.f32.mrf.mxu0  ;;  %v2801_v54 = vpack.c.bf16 %v2791_v48, %v2790_v23  ;;  %v2513_v48 = vpack.c.bf16 %v2506_v46, %v2505_v8 }
 0x346   : > { %v2453_v47 = vpop.f32.mrf.mxu1  ;;  %v2386_v43 = vadd.f32 %v2353_v59, %v2289_v31  ;;  %v2292_v0 = vadd.f32 %v2264_v9, %v2195_v63  ;;  %v687_v31 = vpop.trf.xlu2  ;;  %v2512_v9 = vpack.c.bf16 %v2504_v61, %v2503_v7  ;;  %v2774_v7 = vld [vmem:[#allocation2 + $0x110] sm:$0xff]  ;;  %v2775_v61 = vld [vmem:[#allocation2 + $0x118] sm:$0xff] }
 0x347   : > { %767 = vst.msk [vmem:[#allocation2 + $0x1e8] sm:$0xff] %vm609_vm3, %v687_v31  ;;  %v2783_v2 = vpack.c.bf16 %v2775_v61, %v2774_v7 }
 0x348   : > { %6833 = vmatmul.msk.bf16.gmra.mxu3 %vm609_vm3, %v2609_v16  ;;  %v8067_v50 = vadd.f32 %v2450_v55, %v2386_v43 }
 0x349   : > { %6845 = vmatmul.msk.bf16.gmra.mxu1 %vm609_vm3, %v2781_v10 }
 0x34b   : > { %v2169_v4 = vpop.f32.mrf.mxu2  ;;  %v2269_v56 = vpop.f32.mrf.mxu3 }
 0x34c   : > { %v2196_v12 = vadd.f32 %v2169_v4, %v7927_v62  ;;  %v2773_v62 = vld [vmem:[#allocation2 + $0x108] sm:$0xff] }
 0x34d   : > { %v2356_v11 = vpop.f32.mrf.mxu0  ;;  %v2782_v27 = vpack.c.bf16 %v2773_v62, %v2772_v1  ;;  %v600_v1 = vpop.trf.xlu1 }
 0x34e   : > { %v2455_v53 = vpop.f32.mrf.mxu1  ;;  %v2387_v42 = vadd.f32 %v2356_v11, %v2290_v49  ;;  %v2293_v37 = vadd.f32 %v2266_v29, %v2196_v12  ;;  %v688_v49 = vpop.trf.xlu2  ;;  %649 = vst.msk [vmem:[#allocation2 + $0x138] sm:$0xff] %vm609_vm3, %v600_v1 }
 0x34f   : > { %768 = vst.msk [vmem:[#allocation2 + $0x1f0] sm:$0xff] %vm609_vm3, %v688_v49 }
 0x350   : > { %6826 = vmatmul.msk.bf16.gmra.mxu2 %vm609_vm3, %v2512_v9  ;;  %6838 = vmatmul.msk.bf16.gmra.mxu0 %vm609_vm3, %v2801_v54  ;;  %v8074_v15 = vadd.f32 %v2453_v47, %v2387_v42 }
 0x353   : > { %v2172_v21 = vpop.f32.mrf.mxu2  ;;  %v2271_v32 = vpop.f32.mrf.mxu3 }
 0x354   : > { %v2197_v55 = vadd.f32 %v2172_v21, %v7944_v22  ;;  %v2793_v22 = vld [vmem:[#allocation2 + $0x109] sm:$0xff]  ;;  %v2794_v21 = vld [vmem:[#allocation2 + $0x111] sm:$0xff] }
 0x355   : > { %v2358_v5 = vpop.f32.mrf.mxu0  ;;  %v2802_v47 = vpack.c.bf16 %v2793_v22, %v2792_v25  ;;  %v2777_v25 = vld [vmem:[#allocation2 + $0x128] sm:$0xff] }
 0x356   : > { %v2458_v28 = vpop.f32.mrf.mxu1  ;;  %v2388_v57 = vadd.f32 %v2358_v5, %v2291_v40  ;;  %v2294_v29 = vadd.f32 %v2269_v56, %v2197_v55  ;;  %v689_v40 = vpop.trf.xlu2 }
 0x357   : > { %769 = vst.msk [vmem:[#allocation2 + $0x1f8] sm:$0xff] %vm609_vm3, %v689_v40 }
 0x358   : > { %6834 = vmatmul.msk.bf16.gmra.mxu3 %vm609_vm3, %v2610_v45  ;;  %v8081_v39 = vadd.f32 %v2455_v53, %v2388_v57  ;;  %v2776_v45 = vld [vmem:[#allocation2 + $0x120] sm:$0xff] }
 0x359   : > { %6846 = vmatmul.msk.bf16.gmra.mxu1 %vm609_vm3, %v2782_v27  ;;  %v2784_v8 = vpack.c.bf16 %v2777_v25, %v2776_v45  ;;  %v601_v25 = vpop.trf.xlu1 }
 0x35a   : > { %650 = vst.msk [vmem:[#allocation2 + $0x140] sm:$0xff] %vm609_vm3, %v601_v25 }
 0x35b   : > { %v2174_v63 = vpop.f32.mrf.mxu2  ;;  %v2274_v10 = vpop.f32.mrf.mxu3 }
 0x35c   : > { %v2198_v59 = vadd.f32 %v2174_v63, %v7958_v20  ;;  %v2604_v20 = vld [vmem:[#allocation2 + $0xfe] sm:$0xff] }
 0x35d   : > { %v2361_v43 = vpop.f32.mrf.mxu0 }
 0x35e   : > { %v2460_v16 = vpop.f32.mrf.mxu1  ;;  %v2389_v23 = vadd.f32 %v2361_v43, %v2292_v0  ;;  %v2295_v4 = vadd.f32 %v2271_v32, %v2198_v59  ;;  %v2611_v0 = vpack.c.bf16 %v2604_v20, %v2604_v20  ;;  %v2795_v32 = vld [vmem:[#allocation2 + $0x119] sm:$0xff] }
 0x35f   : > { %v2803_v27 = vpack.c.bf16 %v2795_v32, %v2794_v21  ;;  %v8128_v21 = vld [vmem:[%s9601_s3] sm:$0xff] }
 0x360   : > { %6827 = vmatmul.msk.bf16.gmra.mxu2 %vm609_vm3, %v2513_v48  ;;  %6839 = vmatmul.msk.bf16.gmra.mxu0 %vm609_vm3, %v2802_v47  ;;  %v8087_v56 = vadd.f32 %v2458_v28, %v2389_v23  ;;  %v2796_v23 = vld [vmem:[#allocation2 + $0x121] sm:$0xff]  ;;  %v2797_v48 = vld [vmem:[#allocation2 + $0x129] sm:$0xff] }
 0x363   : > { %v2177_v12 = vpop.f32.mrf.mxu2  ;;  %v2276_v54 = vpop.f32.mrf.mxu3 }
 0x364   : > { %v2199_v31 = vadd.f32 %v2177_v12, %v7977_v33  ;;  %v2507_v33 = vld [vmem:[#allocation2 + $0xfd] sm:$0xff]  ;;  %v2804_v12 = vpack.c.bf16 %v2797_v48, %v2796_v23  ;;  %v602_v48 = vpop.trf.xlu1 }
 0x365   : > { %v2363_v11 = vpop.f32.mrf.mxu0  ;;  %v2514_v5 = vpack.c.bf16 %v2507_v33, %v2507_v33  ;;  %v2798_v33 = vld [vmem:[#allocation2 + $0x131] sm:$0xff]  ;;  %651 = vst.msk [vmem:[#allocation2 + $0x148] sm:$0xff] %vm609_vm3, %v602_v48 }
 0x366   : > { %v2463_v53 = vpop.f32.mrf.mxu1  ;;  %v2390_v42 = vadd.f32 %v2363_v11, %v2293_v37  ;;  %v2296_v9 = vadd.f32 %v2274_v10, %v2199_v31  ;;  %v8100_v10 = vld [vmem:[#allocation2 + $0xf2] sm:$0xff] }
 0x367   : > { %v2778_v11 = vld [vmem:[#allocation2 + $0x130] sm:$0xff] }
 0x368   : > { %6835 = vmatmul.msk.bf16.gmra.mxu3 %vm609_vm3, %v2611_v0  ;;  %v8093_v62 = vadd.f32 %v2460_v16, %v2390_v42  ;;  %v2785_v0 = vpack.c.bf16 %v2778_v11, %v2778_v11 }
 0x369   : > { %6847 = vmatmul.msk.bf16.gmra.mxu1 %vm609_vm3, %v2783_v2 }
 0x36b   : > { %v2179_v35 = vpop.f32.mrf.mxu2  ;;  %v2279_v30 = vpop.f32.mrf.mxu3 }
 0x36c   : > { %v2200_v55 = vadd.f32 %v2179_v35, %v8002_v44 }
 0x36d   : > { %v2366_v37 = vpop.f32.mrf.mxu0 }
 0x36e   : > { %v2465_v49 = vpop.f32.mrf.mxu1  ;;  %v2391_v26 = vadd.f32 %v2366_v37, %v2294_v29  ;;  %v2297_v28 = vadd.f32 %v2276_v54, %v2200_v55  ;;  %v3031_v29 = vld [vmem:[#allocation2 + $0xea] sm:$0xff]  ;;  %v2805_v37 = vpack.c.bf16 %v2798_v33, %v2798_v33 }
 0x36f   : > { %v3044_v40 = vpack.c.bf16 %v8100_v10, %v3031_v29  ;;  %v2948_v45 = vpack.c.bf16 %v3031_v29, %v7932_v17 }
 0x370   : > { %6828 = vmatmul.msk.bf16.gmra.mxu2 %vm609_vm3, %v2514_v5  ;;  %6840 = vmatmul.msk.bf16.gmra.mxu0 %vm609_vm3, %v2803_v27  ;;  %v8098_v57 = vadd.f32 %v2463_v53, %v2391_v26  ;;  %v8122_v53 = vld [vmem:[#allocation2 + $0x102] sm:$0xff] }
 0x373   : > { %v2182_v22 = vpop.f32.mrf.mxu2  ;;  %v2281_v63 = vpop.f32.mrf.mxu3 }
 0x374   : > { %v2201_v44 = vadd.f32 %v2182_v22, %v8011_v51 }
 0x375   : > { %v2368_v46 = vpop.f32.mrf.mxu0 }
 0x376   : > { %v2468_v59 = vpop.f32.mrf.mxu1  ;;  %v2392_v47 = vadd.f32 %v2368_v46, %v2295_v4  ;;  %v2298_v43 = vadd.f32 %v2279_v30, %v2201_v44 }
 0x378   : > { %6857 = vmatmul.msk.bf16.vlgmr.msra.gmra.mxu3 %vm609_vm3, %v3044_v40  ;;  %v8106_v16 = vadd.f32 %v2465_v49, %v2392_v47  ;;  %v8145_v47 = vld [vmem:[#allocation2 + $0x10a] sm:$0xff] }
 0x379   : > { %6848 = vmatmul.msk.bf16.gmra.mxu1 %vm609_vm3, %v2784_v8  ;;  %3905 = vmatpush.bf16.msra.mxu3 %v7750_v6  ;;  %v8119_v6 = vld [vmem:[%s9601_s3 + $0x8] sm:$0xff] }
 0x37b   : > { %v2184_v7 = vpop.f32.mrf.mxu2  ;;  %v2284_v51 = vpop.f32.mrf.mxu3 }
 0x37c   : > { %v2202_v61 = vadd.f32 %v2184_v7, %v8020_v52  ;;  %v8158_v7 = vld [vmem:[#allocation3] ss:$4 sm:$0x3f] }
 0x37d   : > { %v2371_v54 = vpop.f32.mrf.mxu0  ;;  %3906 = vmatpush.bf16.msra.mxu3 %v7759_v18 }
 0x37e   : > { %v2470_v4 = vpop.f32.mrf.mxu1  ;;  %v2393_v20 = vadd.f32 %v2371_v54, %v2296_v9  ;;  %v2299_v31 = vadd.f32 %v2281_v63, %v2202_v61  ;;  %v8142_v63 = vld [vmem:[#allocation2 + $0x112] sm:$0xff] }
 0x37f   : > { %v3046_v40 = vpack.c.bf16 %v8142_v63, %v8145_v47  ;;  %v8161_v61 = vld [vmem:[#allocation3 + $0x1] ss:$4 sm:$0x3f] }
 0x380   : > { %6841 = vmatmul.msk.bf16.gmra.mxu0 %vm609_vm3, %v2804_v12  ;;  %6850 = vmatmul.msk.bf16.vlgmr.msra.gmra.mxu2 %vm609_vm3, %v7902_v3  ;;  %v8114_v2 = vadd.f32 %v2468_v59, %v2393_v20  ;;  %v3033_v3 = vld [vmem:[#allocation2 + $0xfa] sm:$0xff]  ;;  %v3128_v54 = vld [vmem:[#allocation2 + $0xeb] sm:$0xff] }
 0x381   : > { %3821 = vmatpush.bf16.msra.mxu2 %v8119_v6  ;;  %v3045_v35 = vpack.c.bf16 %v8122_v53, %v3033_v3 }
 0x383   : > { %v2187_v52 = vpop.f32.mrf.mxu2  ;;  %v2286_v42 = vpop.f32.mrf.mxu3 }
 0x384   : > { %v2203_v18 = vadd.f32 %v2187_v52, %v8035_v60 }
 0x385   : > { %v2373_v9 = vpop.f32.mrf.mxu0  ;;  %3822 = vmatpush.bf16.msra.mxu2 %v8128_v21 }
 0x386   : > { %v2473_v1 = vpop.f32.mrf.mxu1  ;;  %v2394_v32 = vadd.f32 %v2373_v9, %v2297_v28  ;;  %v2300_v30 = vadd.f32 %v2284_v51, %v2203_v18  ;;  %v2949_v18 = vpack.c.bf16 %v3033_v3, %v8100_v10  ;;  %v8179_v3 = vld [vmem:[#allocation2 + $0x122] sm:$0xff] }
 0x388   : > { %6858 = vmatmul.msk.bf16.gmra.mxu3 %vm609_vm3, %v3045_v35  ;;  %v8134_v60 = vadd.f32 %v2470_v4, %v2394_v32  ;;  %v3129_v4 = vld [vmem:[#allocation2 + $0xf3] sm:$0xff]  ;;  %v8181_v32 = vld [vmem:[#allocation2 + $0x104] sm:$0xff] }
 0x389   : > { %6849 = vmatmul.msk.bf16.gmra.mxu1 %vm609_vm3, %v2785_v0  ;;  %v3141_v42 = vpack.c.bf16 %v3129_v4, %v3128_v54 }
 0x38b   : > { %v2189_v55 = vpop.f32.mrf.mxu2  ;;  %v2642_v27 = vpop.f32.mrf.mxu3 }
 0x38d   : > { %v2376_v49 = vpop.f32.mrf.mxu0 }
 0x38e   : > { %v2475_v26 = vpop.f32.mrf.mxu1  ;;  %v2395_v5 = vadd.f32 %v2376_v49, %v2298_v43  ;;  %v8149_v43 = vld [vmem:[#allocation4] ss:$0 sm:$0xff] }
 0x390   : > { %6842 = vmatmul.msk.bf16.gmra.mxu0 %vm609_vm3, %v2805_v37  ;;  %6851 = vmatmul.msk.bf16.gmra.mxu2 %vm609_vm3, %v2948_v45  ;;  %v8139_v28 = vadd.f32 %v2473_v1, %v2395_v5  ;;  %v603_v1 = vpop.trf.xlu1  ;;  %v7221_v37 = vld [vmem:[%s9601_s3 + $0x30] sm:$0xff]  ;;  %v3239_v5 = vpack.c.bf16 %v8181_v32, %v7979_v36 }
 0x391   : > { %652 = vst.msk [vmem:[#allocation2 + $0x150] sm:$0xff] %vm609_vm3, %v603_v1 }
 0x393   : > { %v2545_v22 = vpop.f32.mrf.mxu2  ;;  %v2644_v8 = vpop.f32.mrf.mxu3 }
 0x394   : > { %v2579_v44 = vadd.f32 %v2545_v22, %v8060_v41 }
 0x395   : > { %v2378_v46 = vpop.f32.mrf.mxu0 }
 0x396   : > { %v2478_v59 = vpop.f32.mrf.mxu1  ;;  %v2676_v17 = vadd.f32 %v2642_v27, %v2579_v44  ;;  %v2396_v29 = vadd.f32 %v2378_v46, %v2299_v31  ;;  %v8185_v27 = vld [vmem:[#allocation2 + $0x11a] sm:$0xff] }
 0x397   : > { %v3130_v44 = vld [vmem:[#allocation2 + $0xfb] sm:$0xff] }
 0x398   : > { %v2689_v23 = vadd.f32 %v8149_v43, %v2676_v17  ;;  %6859 = vmatmul.msk.bf16.gmra.mxu3 %vm609_vm3, %v3046_v40  ;;  %v8155_v41 = vadd.f32 %v2475_v26, %v2396_v29  ;;  %v3047_v26 = vpack.c.bf16 %v8179_v3, %v8185_v27 }
 0x399   : > { %6871 = vmatmul.msk.bf16.vlgmr.msra.gmra.mxu1 %vm609_vm3, %v7953_v58 }
 0x39a   : > { %4099 = vmatpush.bf16.msra.mxu1 %v7814_v14  ;;  %v2702_v51 = vmax.f32 %v2689_v23, 0.0  ;;  %v2950_v23 = vpack.c.bf16 %v8145_v47, %v8122_v53 }
 0x39b   : > { %v2547_v12 = vpop.f32.mrf.mxu2  ;;  %v2647_v58 = vpop.f32.mrf.mxu3 }
 0x39c   : > { %2715 = vst.msk [vmem:[#allocation3] sm:$0xff] %vm1775_vm4, %v2702_v51  ;;  %v2580_v20 = vadd.f32 %v2547_v12, %v8067_v50  ;;  %v8175_v50 = vld [vmem:[%s9601_s3 + $0x38] sm:$0xff]  ;;  %v8207_v12 = vld [vmem:[#allocation3 + $0x1a] ss:$4 sm:$0x3f] }
 0x39d   : > { %v2381_v31 = vpop.f32.mrf.mxu0 }
 0x39e   : > { %v2480_v11 = vpop.f32.mrf.mxu1  ;;  %4100 = vmatpush.bf16.msra.mxu1 %v7826_v19  ;;  %v2677_v14 = vadd.f32 %v2644_v8, %v2580_v20  ;;  %v2397_v52 = vadd.f32 %v2381_v31, %v2300_v30  ;;  %v3131_v8 = vld [vmem:[#allocation2 + $0x103] sm:$0xff]  ;;  %v8211_v20 = vld [vmem:[#allocation2 + $0x132] sm:$0xff] }
 0x39f   : > { %v3142_v48 = vpack.c.bf16 %v3131_v8, %v3130_v44 }
 0x3a0   : > { %v2690_v0 = vadd.f32 %v8149_v43, %v2677_v14  ;;  %6852 = vmatmul.msk.bf16.gmra.mxu2 %vm609_vm3, %v2949_v18  ;;  %6864 = vmatmul.msk.bf16.vlgmr.msra.gmra.mxu0 %vm609_vm3, %v3141_v42  ;;  %v8170_v9 = vadd.f32 %v2478_v59, %v2397_v52  ;;  %v3039_v14 = vld [vmem:[#allocation2 + $0x12a] sm:$0xff] }
 0x3a1   : > { %4002 = vmatpush.bf16.msra.mxu0 %v8175_v50  ;;  %v8217_v52 = vld [vmem:[#allocation2 + $0x10c] sm:$0xff] }
 0x3a2   : > { %v2703_v19 = vmax.f32 %v2690_v0, 0.0  ;;  %v3048_v0 = vpack.c.bf16 %v8211_v20, %v3039_v14 }
 0x3a3   : > { %v2550_v10 = vpop.f32.mrf.mxu2  ;;  %v2649_v30 = vpop.f32.mrf.mxu3 }
 0x3a4   : > { %2716 = vst.msk [vmem:[#allocation3 + $0x8] sm:$0xff] %vm1775_vm4, %v2703_v19  ;;  %v2581_v35 = vadd.f32 %v2550_v10, %v8074_v15  ;;  %v604_v15 = vpop.trf.xlu1 }
 0x3a5   : > { %v2383_v33 = vpop.f32.mrf.mxu0  ;;  %4003 = vmatpush.bf16.msra.mxu0 %v7221_v37  ;;  %653 = vst.msk [vmem:[#allocation2 + $0x158] sm:$0xff] %vm609_vm3, %v604_v15  ;;  %v2951_v15 = vpack.c.bf16 %v8185_v27, %v8142_v63  ;;  %v8241_v27 = vld [vmem:[#allocation2 + $0x11c] sm:$0xff] }
 0x3a6   : > { %v2900_v55 = vpop.f32.mrf.mxu1  ;;  %v2678_v49 = vadd.f32 %v2647_v58, %v2581_v35  ;;  %v8213_v58 = vld [vmem:[#allocation2 + $0x114] sm:$0xff] }
 0x3a7   : > { %v3240_v1 = vpack.c.bf16 %v8213_v58, %v8217_v52  ;;  %v3133_v33 = vld [vmem:[#allocation2 + $0x113] sm:$0xff] }
 0x3a8   : > { %v2691_v45 = vadd.f32 %v8149_v43, %v2678_v49  ;;  %6860 = vmatmul.msk.bf16.gmra.mxu3 %vm609_vm3, %v3047_v26 }
 0x3a9   : > { %6872 = vmatmul.msk.bf16.gmra.mxu1 %vm609_vm3, %v3239_v5 }
 0x3aa   : > { %v2704_v25 = vmax.f32 %v2691_v45, 0.0 }
 0x3ab   : > { %v2552_v22 = vpop.f32.mrf.mxu2  ;;  %v2652_v59 = vpop.f32.mrf.mxu3 }
 0x3ac   : > { %2717 = vst.msk [vmem:[#allocation3 + $0x10] sm:$0xff] %vm1775_vm4, %v2704_v25  ;;  %v2582_v46 = vadd.f32 %v2552_v22, %v8081_v39  ;;  %v8209_v39 = vld [vmem:[#allocation3 + $0x1b] ss:$4 sm:$0x3f] }
 0x3ad   : > { %v2836_v17 = vpop.f32.mrf.mxu0 }
 0x3ae   : > { %v2902_v36 = vpop.f32.mrf.mxu1  ;;  %v2679_v29 = vadd.f32 %v2649_v30, %v2582_v46  ;;  %v8200_v40 = vadd.f32 %v2900_v55, %v2836_v17  ;;  %v3132_v30 = vld [vmem:[#allocation2 + $0x10b] sm:$0xff]  ;;  %v3041_v46 = vld [vmem:[#allocation2 + $0x13a] sm:$0xff] }
 0x3af   : > { %v3143_v25 = vpack.c.bf16 %v3133_v33, %v3132_v30  ;;  %v2952_v30 = vpack.c.bf16 %v3039_v14, %v8179_v3  ;;  %v8271_v14 = vld [vmem:[#allocation2 + $0x12c] sm:$0xff] }
 0x3b0   : > { %v2692_v51 = vadd.f32 %v8149_v43, %v2679_v29  ;;  %6853 = vmatmul.msk.bf16.gmra.mxu2 %vm609_vm3, %v2950_v23  ;;  %6865 = vmatmul.msk.bf16.gmra.mxu0 %vm609_vm3, %v3142_v48 }
 0x3b2   : > { %v2705_v54 = vmax.f32 %v2692_v51, 0.0 }
 0x3b3   : > { %v2555_v4 = vpop.f32.mrf.mxu2  ;;  %v2654_v47 = vpop.f32.mrf.mxu3 }
 0x3b4   : > { %2718 = vst.msk [vmem:[#allocation3 + $0x18] sm:$0xff] %vm1775_vm4, %v2705_v54  ;;  %v2583_v53 = vadd.f32 %v2555_v4, %v8087_v56  ;;  %v605_v56 = vpop.trf.xlu1 }
 0x3b5   : > { %v2838_v31 = vpop.f32.mrf.mxu0  ;;  %654 = vst.msk [vmem:[#allocation2 + $0x160] sm:$0xff] %vm609_vm3, %v605_v56 }
 0x3b6   : > { %v2905_v11 = vpop.f32.mrf.mxu1  ;;  %v2680_v18 = vadd.f32 %v2652_v59, %v2583_v53  ;;  %v8219_v42 = vadd.f32 %v2902_v36, %v2838_v31  ;;  %v8237_v59 = vld [vmem:[#allocation2 + $0x124] sm:$0xff] }
 0x3b7   : > { %v3241_v54 = vpack.c.bf16 %v8237_v59, %v8241_v27 }
 0x3b8   : > { %v2693_v19 = vadd.f32 %v8149_v43, %v2680_v18  ;;  %6861 = vmatmul.msk.bf16.gmra.mxu3 %vm609_vm3, %v3048_v0  ;;  %v3135_v18 = vld [vmem:[#allocation2 + $0x123] sm:$0xff] }
 0x3b9   : > { %6873 = vmatmul.msk.bf16.gmra.mxu1 %vm609_vm3, %v3240_v1 }
 0x3ba   : > { %v2706_v10 = vmax.f32 %v2693_v19, 0.0 }
 0x3bb   : > { %v2557_v35 = vpop.f32.mrf.mxu2  ;;  %v2657_v37 = vpop.f32.mrf.mxu3 }
 0x3bc   : > { %2719 = vst.msk [vmem:[#allocation3 + $0x20] sm:$0xff] %vm1775_vm4, %v2706_v10  ;;  %v2584_v55 = vadd.f32 %v2557_v35, %v8093_v62  ;;  %v3042_v62 = vld [vmem:[#allocation2 + $0x142] sm:$0xff] }
 0x3bd   : > { %v2841_v49 = vpop.f32.mrf.mxu0  ;;  %v8245_v51 = vpack.c.bf16 %v3042_v62, %v3041_v46 }
 0x3be   : > { %v2907_v26 = vpop.f32.mrf.mxu1  ;;  %v2681_v5 = vadd.f32 %v2654_v47, %v2584_v55  ;;  %v8230_v45 = vadd.f32 %v2905_v11, %v2841_v49  ;;  %v8255_v47 = vld [vmem:[#allocation3 + $0x35] ss:$4 sm:$0x3f] }
 0x3bf   : > { %v3134_v11 = vld [vmem:[#allocation2 + $0x11b] sm:$0xff] }
 0x3c0   : > { %v2694_v22 = vadd.f32 %v8149_v43, %v2681_v5  ;;  %6854 = vmatmul.msk.bf16.gmra.mxu2 %vm609_vm3, %v2951_v15  ;;  %6866 = vmatmul.msk.bf16.gmra.mxu0 %vm609_vm3, %v3143_v25  ;;  %v3144_v33 = vpack.c.bf16 %v3135_v18, %v3134_v11  ;;  %v2953_v11 = vpack.c.bf16 %v8211_v20, %v8211_v20  ;;  %v3420_v20 = vld [vmem:[#allocation2 + $0x10d] sm:$0xff] }
 0x3c2   : > { %v2707_v44 = vmax.f32 %v2694_v22, 0.0 }
 0x3c3   : > { %v2560_v8 = vpop.f32.mrf.mxu2  ;;  %v2659_v36 = vpop.f32.mrf.mxu3 }
 0x3c4   : > { %2720 = vst.msk [vmem:[#allocation3 + $0x28] sm:$0xff] %vm1775_vm4, %v2707_v44  ;;  %v2585_v17 = vadd.f32 %v2560_v8, %v8098_v57  ;;  %v8253_v57 = vld [vmem:[#allocation3 + $0x34] ss:$4 sm:$0x3f] }
 0x3c5   : > { %v2843_v29 = vpop.f32.mrf.mxu0 }
 0x3c6   : > { %v2910_v63 = vpop.f32.mrf.mxu1  ;;  %v2682_v23 = vadd.f32 %v2657_v37, %v2585_v17  ;;  %v8243_v48 = vadd.f32 %v2907_v26, %v2843_v29  ;;  %v8265_v26 = vld [vmem:[#allocation2 + $0x14a] sm:$0xff]  ;;  %v3137_v29 = vld [vmem:[#allocation2 + $0x133] sm:$0xff] }
 0x3c7   : > { %v3050_v8 = vpack.c.bf16 %v8265_v26, %v8265_v26 }
 0x3c8   : > { %v2695_v4 = vadd.f32 %v8149_v43, %v2682_v23  ;;  %6862 = vmatmul.msk.bf16.gmra.mxu3 %vm609_vm3, %v8245_v51 }
 0x3c9   : > { %6874 = vmatmul.msk.bf16.gmra.mxu1 %vm609_vm3, %v3241_v54 }
 0x3ca   : > { %v2708_v53 = vmax.f32 %v2695_v4, 0.0 }
 0x3cb   : > { %v2562_v31 = vpop.f32.mrf.mxu2  ;;  %v2662_v1 = vpop.f32.mrf.mxu3 }
 0x3cc   : > { %2721 = vst.msk [vmem:[#allocation3 + $0x30] sm:$0xff] %vm1775_vm4, %v2708_v53  ;;  %v2586_v0 = vadd.f32 %v2562_v31, %v8106_v16  ;;  %v8267_v16 = vld [vmem:[#allocation2 + $0x134] sm:$0xff] }
 0x3cd   : > { %v2846_v19 = vpop.f32.mrf.mxu0  ;;  %v3242_v46 = vpack.c.bf16 %v8267_v16, %v8271_v14 }
 0x3ce   : > { %v2912_v56 = vpop.f32.mrf.mxu1  ;;  %v2683_v10 = vadd.f32 %v2659_v36, %v2586_v0  ;;  %v8259_v35 = vadd.f32 %v2910_v63, %v2846_v19  ;;  %v3136_v36 = vld [vmem:[#allocation2 + $0x12b] sm:$0xff]  ;;  %v706_v0 = vpop.trf.xlu0 }
 0x3cf   : > { %v3145_v18 = vpack.c.bf16 %v3137_v29, %v3136_v36  ;;  %770 = vst.msk [vmem:[#allocation2 + $0x200] sm:$0xff] %vm609_vm3, %v706_v0  ;;  %v8294_v19 = vld [vmem:[#allocation3 + $0x4f] ss:$4 sm:$0x3f] }
 0x3d0   : > { %v2696_v55 = vadd.f32 %v8149_v43, %v2683_v10  ;;  %6855 = vmatmul.msk.bf16.gmra.mxu2 %vm609_vm3, %v2952_v30  ;;  %6867 = vmatmul.msk.bf16.gmra.mxu0 %vm609_vm3, %v3144_v33  ;;  %v8296_v30 = vld [vmem:[#allocation2 + $0x144] sm:$0xff] }
 0x3d1   : > { %v3419_v33 = vld [vmem:[#allocation2 + $0x105] sm:$0xff] }
 0x3d2   : > { %v2709_v37 = vmax.f32 %v2696_v55, 0.0  ;;  %v3139_v36 = vld [vmem:[#allocation2 + $0x143] sm:$0xff] }
 0x3d3   : > { %v2565_v49 = vpop.f32.mrf.mxu2  ;;  %v2664_v15 = vpop.f32.mrf.mxu3 }
 0x3d4   : > { %2722 = vst.msk [vmem:[#allocation3 + $0x38] sm:$0xff] %vm1775_vm4, %v2709_v37  ;;  %v2587_v5 = vadd.f32 %v2565_v49, %v8114_v2 }
 0x3d5   : > { %v2848_v25 = vpop.f32.mrf.mxu0 }
 0x3d6   : > { %v2915_v3 = vpop.f32.mrf.mxu1  ;;  %v2684_v22 = vadd.f32 %v2662_v1, %v2587_v5  ;;  %v8273_v44 = vadd.f32 %v2912_v56, %v2848_v25 }
 0x3d8   : > { %v2697_v62 = vadd.f32 %v8149_v43, %v2684_v22  ;;  %6863 = vmatmul.msk.bf16.gmra.mxu3 %vm609_vm3, %v3050_v8  ;;  %v3432_v8 = vpack.c.bf16 %v3420_v20, %v3419_v33 }
 0x3d9   : > { %6875 = vmatmul.msk.bf16.gmra.mxu1 %vm609_vm3, %v3242_v46  ;;  %v707_v46 = vpop.trf.xlu0 }
 0x3da   : > { %v2710_v2 = vmax.f32 %v2697_v62, 0.0  ;;  %771 = vst.msk [vmem:[#allocation2 + $0x208] sm:$0xff] %vm609_vm3, %v707_v46 }
 0x3db   : > { %v2567_v17 = vpop.f32.mrf.mxu2  ;;  %v2667_v23 = vpop.f32.mrf.mxu3 }
 0x3dc   : > { %2723 = vst.msk [vmem:[#allocation3 + $0x40] sm:$0xff] %vm1775_vm4, %v2710_v2  ;;  %v2588_v63 = vadd.f32 %v2567_v17, %v8134_v60  ;;  %v8292_v60 = vld [vmem:[#allocation3 + $0x4e] ss:$4 sm:$0x3f] }
 0x3dd   : > { %v2851_v54 = vpop.f32.mrf.mxu0  ;;  %v3138_v17 = vld [vmem:[#allocation2 + $0x13b] sm:$0xff] }
 0x3de   : > { %v2917_v4 = vpop.f32.mrf.mxu1  ;;  %v2685_v53 = vadd.f32 %v2664_v15, %v2588_v63  ;;  %v8284_v31 = vadd.f32 %v2915_v3, %v2851_v54  ;;  %v8300_v15 = vld [vmem:[#allocation2 + $0x13c] sm:$0xff] }
 0x3df   : > { %v3243_v22 = vpack.c.bf16 %v8296_v30, %v8300_v15 }
 0x3e0   : > { %v2698_v1 = vadd.f32 %v8149_v43, %v2685_v53  ;;  %6856 = vmatmul.msk.bf16.gmra.mxu2 %vm609_vm3, %v2953_v11  ;;  %6868 = vmatmul.msk.bf16.gmra.mxu0 %vm609_vm3, %v3145_v18  ;;  %v3146_v11 = vpack.c.bf16 %v3139_v36, %v3138_v17  ;;  %v606_v17 = vpop.trf.xlu1 }
 0x3e1   : > { %v708_v18 = vpop.trf.xlu0  ;;  %655 = vst.msk [vmem:[#allocation2 + $0x168] sm:$0xff] %vm609_vm3, %v606_v17 }
 0x3e2   : > { %v2711_v56 = vmax.f32 %v2698_v1, 0.0  ;;  %772 = vst.msk [vmem:[#allocation2 + $0x210] sm:$0xff] %vm609_vm3, %v708_v18  ;;  %v2735_v18 = vld [vmem:[#allocation3 + $0x2] ss:$4 sm:$0x3f] }
 0x3e3   : > { %v2570_v10 = vpop.f32.mrf.mxu2  ;;  %v2669_v37 = vpop.f32.mrf.mxu3 }
 0x3e4   : > { %2724 = vst.msk [vmem:[#allocation3 + $0x48] sm:$0xff] %vm1775_vm4, %v2711_v56  ;;  %v2589_v55 = vadd.f32 %v2570_v10, %v8139_v28  ;;  %v3421_v56 = vld [vmem:[#allocation2 + $0x115] sm:$0xff] }
 0x3e5   : > { %v2853_v49 = vpop.f32.mrf.mxu0 }
 0x3e6   : > { %v2920_v5 = vpop.f32.mrf.mxu1  ;;  %v2686_v25 = vadd.f32 %v2667_v23, %v2589_v55  ;;  %v8302_v3 = vadd.f32 %v2917_v4, %v2853_v49  ;;  %v8330_v55 = vld [vmem:[#allocation2 + $0x14c] sm:$0xff] }
 0x3e8   : > { %v2699_v62 = vadd.f32 %v8149_v43, %v2686_v25  ;;  %6885 = vmatmul.msk.bf16.vlgmr.msrb.gmra.mxu3 %vm609_vm3, %v3432_v8  ;;  %v3244_v25 = vpack.c.bf16 %v8330_v55, %v8330_v55 }
 0x3e9   : > { %6876 = vmatmul.msk.bf16.gmra.mxu1 %vm609_vm3, %v3243_v22  ;;  %4293 = vmatpush.bf16.msrb.mxu3 %v7984_v24  ;;  %v3335_v24 = vpack.c.bf16 %v8217_v52, %v8181_v32  ;;  %v3422_v32 = vld [vmem:[#allocation2 + $0x11d] sm:$0xff] }
 0x3ea   : > { %v2712_v28 = vmax.f32 %v2699_v62, 0.0  ;;  %v3433_v22 = vpack.c.bf16 %v3422_v32, %v3421_v56  ;;  %v3424_v32 = vld [vmem:[#allocation2 + $0x12d] sm:$0xff] }
 0x3eb   : > { %v2572_v2 = vpop.f32.mrf.mxu2  ;;  %v2672_v63 = vpop.f32.mrf.mxu3 }
 0x3ec   : > { %2725 = vst.msk [vmem:[#allocation3 + $0x50] sm:$0xff] %vm1775_vm4, %v2712_v28  ;;  %v2590_v29 = vadd.f32 %v2572_v2, %v8155_v41  ;;  %v3140_v28 = vld [vmem:[#allocation2 + $0x14b] sm:$0xff] }
 0x3ed   : > { %v2856_v23 = vpop.f32.mrf.mxu0  ;;  %4294 = vmatpush.bf16.msrb.mxu3 %v7995_v38  ;;  %v8325_v38 = vld [vmem:[%s9601_s3 + $0x58] sm:$0xff] }
 0x3ee   : > { %v2922_v54 = vpop.f32.mrf.mxu1  ;;  %v2687_v4 = vadd.f32 %v2669_v37, %v2590_v29  ;;  %v8314_v53 = vadd.f32 %v2920_v5, %v2856_v23  ;;  %v8335_v37 = vld [vmem:[%s9601_s3 + $0x50] sm:$0xff]  ;;  %v3147_v23 = vpack.c.bf16 %v3140_v28, %v3140_v28 }
 0x3f0   : > { %v2700_v0 = vadd.f32 %v8149_v43, %v2687_v4  ;;  %6869 = vmatmul.msk.bf16.gmra.mxu0 %vm609_vm3, %v3146_v11  ;;  %6878 = vmatmul.msk.bf16.vlgmr.msrb.gmra.mxu2 %vm609_vm3, %v3335_v24  ;;  %v2738_v4 = vld [vmem:[#allocation3 + $0x1c] ss:$4 sm:$0x3f]  ;;  %v2739_v11 = vld [vmem:[#allocation3 + $0x1d] ss:$4 sm:$0x3f] }
 0x3f1   : > { %4196 = vmatpush.bf16.msrb.mxu2 %v8325_v38  ;;  %v3423_v24 = vld [vmem:[#allocation2 + $0x125] sm:$0xff] }
 0x3f2   : > { %v2713_v41 = vmax.f32 %v2700_v0, 0.0  ;;  %v2736_v0 = vld [vmem:[#allocation3 + $0x3] ss:$4 sm:$0x3f]  ;;  %v3434_v17 = vpack.c.bf16 %v3424_v32, %v3423_v24 }
 0x3f3   : > { %v2575_v1 = vpop.f32.mrf.mxu2  ;;  %v2674_v10 = vpop.f32.mrf.mxu3 }
 0x3f4   : > { %2726 = vst.msk [vmem:[#allocation3 + $0x58] sm:$0xff] %vm1775_vm4, %v2713_v41  ;;  %v2591_v52 = vadd.f32 %v2575_v1, %v8170_v9  ;;  %v709_v9 = vpop.trf.xlu0  ;;  %v2754_v41 = vld [vmem:[#allocation3 + $0x36] ss:$4 sm:$0x3f] }
 0x3f5   : > { %v2858_v33 = vpop.f32.mrf.mxu0  ;;  %4197 = vmatpush.bf16.msrb.mxu2 %v8335_v37  ;;  %773 = vst.msk [vmem:[#allocation2 + $0x218] sm:$0xff] %vm609_vm3, %v709_v9  ;;  %v2755_v1 = vld [vmem:[#allocation3 + $0x37] ss:$4 sm:$0x3f] }
 0x3f6   : > { %v2925_v20 = vpop.f32.mrf.mxu1  ;;  %v2688_v49 = vadd.f32 %v2672_v63, %v2591_v52  ;;  %v8338_v5 = vadd.f32 %v2922_v54, %v2858_v33  ;;  %v3710_v52 = vld [vmem:[#allocation2 + $0x139] sm:$0xff]  ;;  %v3711_v10 = vld [vmem:[#allocation2 + $0x141] sm:$0xff]  ;;  %v2740_v33 = vmax.f32 %v2738_v4, %v2739_v11 }
 0x3f8   : > { %v2701_v8 = vadd.f32 %v8149_v43, %v2688_v49  ;;  %6886 = vmatmul.msk.bf16.gmra.mxu3 %vm609_vm3, %v3433_v22  ;;  %v3336_v43 = vpack.c.bf16 %v8241_v27, %v8213_v58 }
 0x3f9   : > { %6877 = vmatmul.msk.bf16.gmra.mxu1 %vm609_vm3, %v3244_v25  ;;  %v607_v25 = vpop.trf.xlu1 }
 0x3fa   : > { %v2714_v46 = vmax.f32 %v2701_v8, 0.0  ;;  %v2737_v8 = vmax.f32 %v2735_v18, %v2736_v0  ;;  %656 = vst.msk [vmem:[#allocation2 + $0x170] sm:$0xff] %vm609_vm3, %v607_v25  ;;  %v3517_v18 = vld [vmem:[#allocation2 + $0x10e] sm:$0xff] }
 0x3fb   : > { %v2577_v62 = vpop.f32.mrf.mxu2  ;;  %v3081_v2 = vpop.f32.mrf.mxu3 }
 0x3fc   : > { %2727 = vst.msk [vmem:[#allocation3 + $0x60] sm:$0xff] %vm1775_vm4, %v2714_v46  ;;  %v710_v54 = vpop.trf.xlu0  ;;  %v2756_v46 = vmax.f32 %v2754_v41, %v2755_v1 }
 0x3fd   : > { %v2861_v36 = vpop.f32.mrf.mxu0  ;;  %774 = vst.msk [vmem:[#allocation2 + $0x220] sm:$0xff] %vm609_vm3, %v710_v54  ;;  %v2741_v54 = vmax.f32 %v2737_v8, %v2740_v33 }
 0x3fe   : > { %v2927_v29 = vpop.f32.mrf.mxu1  ;;  %v8348_v63 = vadd.f32 %v2925_v20, %v2861_v36  ;;  %v3723_v36 = vpack.c.bf16 %v3711_v10, %v3710_v52 }
 0x400   : > { %6870 = vmatmul.msk.bf16.gmra.mxu0 %vm609_vm3, %v3147_v23  ;;  %6879 = vmatmul.msk.bf16.gmra.mxu2 %vm609_vm3, %v3336_v43 }
 0x401   : > { %v608_v0 = vpop.trf.xlu1 }
 0x402   : > { %657 = vst.msk [vmem:[#allocation2 + $0x178] sm:$0xff] %vm609_vm3, %v608_v0  ;;  %v3714_v0 = vld [vmem:[#allocation2 + $0x159] sm:$0xff] }
 0x403   : > { %v2984_v56 = vpop.f32.mrf.mxu2  ;;  %v3083_v27 = vpop.f32.mrf.mxu3  ;;  %v2757_v20 = vld [vmem:[#allocation3 + $0x50] ss:$4 sm:$0x3f]  ;;  %v2758_v49 = vld [vmem:[#allocation3 + $0x51] ss:$4 sm:$0x3f] }
 0x404   : > { %v3018_v58 = vadd.f32 %v2984_v56, %v8200_v40  ;;  %v2759_v62 = vmax.f32 %v2757_v20, %v2758_v49  ;;  %v711_v43 = vpop.trf.xlu0 }
 0x405   : > { %v2863_v22 = vpop.f32.mrf.mxu0  ;;  %775 = vst.msk [vmem:[#allocation2 + $0x228] sm:$0xff] %vm609_vm3, %v711_v43 }
 0x406   : > { %v2930_v9 = vpop.f32.mrf.mxu1  ;;  %v8357_v28 = vadd.f32 %v2927_v29, %v2863_v22  ;;  %v3115_v23 = vadd.f32 %v3081_v2, %v3018_v58  ;;  %v2760_v4 = vmax.f32 %v2756_v46, %v2759_v62  ;;  %v3516_v29 = vld [vmem:[#allocation2 + $0x106] sm:$0xff]  ;;  %v3426_v58 = vld [vmem:[#allocation2 + $0x13d] sm:$0xff]  ;;  %v8384_v22 = vld [vmem:[%s9601_s3 + $0x70] sm:$0xff] }
 0x407   : > { %v3529_v32 = vpack.c.bf16 %v3517_v18, %v3516_v29  ;;  %v3338_v29 = vpack.c.bf16 %v8300_v15, %v8267_v16 }
 0x408   : > { %6887 = vmatmul.msk.bf16.gmra.mxu3 %vm609_vm3, %v3434_v17  ;;  %v7175_v40 = vpack.i.bf16 %v2760_v4, %v2741_v54  ;;  %v3518_v17 = vld [vmem:[#allocation2 + $0x116] sm:$0xff] }
 0x409   : > { %6899 = vmatmul.msk.bf16.vlgmr.msrb.gmra.mxu1 %vm609_vm3, %v3723_v36  ;;  %v3519_v36 = vld [vmem:[#allocation2 + $0x11e] sm:$0xff] }
 0x40a   : > { %4487 = vmatpush.bf16.msrb.mxu1 %v8040_v34  ;;  %7176 = vrot.lane.b32.xlu0 %v7175_v40, %s7294_s7  ;;  %v3337_v34 = vpack.c.bf16 %v8271_v14, %v8237_v59  ;;  %v3712_v59 = vld [vmem:[#allocation2 + $0x149] sm:$0xff]  ;;  %v3713_v14 = vld [vmem:[#allocation2 + $0x151] sm:$0xff]  ;;  %v3530_v18 = vpack.c.bf16 %v3519_v36, %v3518_v17 }
 0x40b   : > { %v2986_v11 = vpop.f32.mrf.mxu2  ;;  %v3086_v2 = vpop.f32.mrf.mxu3  ;;  %v3724_v8 = vpack.c.bf16 %v3713_v14, %v3712_v59 }
 0x40c   : > { %v3019_v24 = vadd.f32 %v2986_v11, %v8219_v42  ;;  %v712_v10 = vpop.trf.xlu0  ;;  %v8377_v42 = vld [vmem:[%s9601_s3 + $0x78] sm:$0xff] }
 0x40d   : > { %v2866_v41 = vpop.f32.mrf.mxu0  ;;  %776 = vst.msk [vmem:[#allocation2 + $0x230] sm:$0xff] %vm609_vm3, %v712_v10 }
 0x40e   : > { %v2932_v1 = vpop.f32.mrf.mxu1  ;;  %4488 = vmatpush.bf16.msrb.mxu1 %v8048_v13  ;;  %v8367_v56 = vadd.f32 %v2930_v9, %v2866_v41  ;;  %v3116_v52 = vadd.f32 %v3083_v27, %v3019_v24  ;;  %v3425_v13 = vld [vmem:[#allocation2 + $0x135] sm:$0xff]  ;;  %v3715_v41 = vld [vmem:[#allocation2 + $0x161] sm:$0xff] }
 0x40f   : > { %v3435_v9 = vpack.c.bf16 %v3426_v58, %v3425_v13  ;;  %v3725_v16 = vpack.c.bf16 %v3715_v41, %v3714_v0 }
 0x410   : > { %6880 = vmatmul.msk.bf16.gmra.mxu2 %vm609_vm3, %v3337_v34  ;;  %6892 = vmatmul.msk.bf16.vlgmr.msrb.gmra.mxu0 %vm609_vm3, %v3529_v32  ;;  %v3427_v34 = vld [vmem:[#allocation2 + $0x145] sm:$0xff]  ;;  %v3428_v32 = vld [vmem:[#allocation2 + $0x14d] sm:$0xff] }
 0x411   : > { %4390 = vmatpush.bf16.msrb.mxu0 %v8377_v42  ;;  %v3436_v58 = vpack.c.bf16 %v3428_v32, %v3427_v34 }
 0x413   : > { %v2989_v33 = vpop.f32.mrf.mxu2  ;;  %v3088_v20 = vpop.f32.mrf.mxu3 }
 0x414   : > { %v3020_v27 = vadd.f32 %v2989_v33, %v8230_v45  ;;  %v713_v62 = vpop.trf.xlu0 }
 0x415   : > { %v2868_v49 = vpop.f32.mrf.mxu0  ;;  %4391 = vmatpush.bf16.msrb.mxu0 %v8384_v22  ;;  %777 = vst.msk [vmem:[#allocation2 + $0x238] sm:$0xff] %vm609_vm3, %v713_v62 }
 0x416   : > { %v3275_v25 = vpop.f32.mrf.mxu1  ;;  %v3117_v46 = vadd.f32 %v3086_v2, %v3020_v27  ;;  %v3520_v49 = vld [vmem:[#allocation2 + $0x126] sm:$0xff] }
 0x418   : > { %6888 = vmatmul.msk.bf16.gmra.mxu3 %vm609_vm3, %v3435_v9 }
 0x419   : > { %6900 = vmatmul.msk.bf16.gmra.mxu1 %vm609_vm3, %v3724_v8 }
 0x41b   : > { %v2991_v45 = vpop.f32.mrf.mxu2  ;;  %v3091_v54 = vpop.f32.mrf.mxu3 }
 0x41c   : > { %v3021_v43 = vadd.f32 %v2991_v45, %v8243_v48  ;;  %v714_v2 = vpop.trf.xlu0  ;;  %v3339_v45 = vpack.c.bf16 %v8330_v55, %v8296_v30 }
 0x41d   : > { %v3178_v4 = vpop.f32.mrf.mxu0  ;;  %778 = vst.msk [vmem:[#allocation2 + $0x240] sm:$0xff] %vm609_vm3, %v714_v2 }
 0x41e   : > { %v3277_v40 = vpop.f32.mrf.mxu1  ;;  %v3212_v11 = vadd.f32 %v3178_v4, %v3115_v23  ;;  %v3118_v24 = vadd.f32 %v3088_v20, %v3021_v43  ;;  %v3716_v4 = vld [vmem:[#allocation2 + $0x169] sm:$0xff] }
 0x420   : > { %6881 = vmatmul.msk.bf16.gmra.mxu2 %vm609_vm3, %v3338_v29  ;;  %6893 = vmatmul.msk.bf16.gmra.mxu0 %vm609_vm3, %v3530_v18  ;;  %v8396_v1 = vadd.f32 %v3275_v25, %v3212_v11  ;;  %v3521_v25 = vld [vmem:[#allocation2 + $0x12e] sm:$0xff]  ;;  %v3430_v29 = vld [vmem:[#allocation2 + $0x15d] sm:$0xff] }
 0x421   : > { %v3531_v17 = vpack.c.bf16 %v3521_v25, %v3520_v49  ;;  %v3429_v11 = vld [vmem:[#allocation2 + $0x155] sm:$0xff] }
 0x422   : > { %v3437_v41 = vpack.c.bf16 %v3430_v29, %v3429_v11 }
 0x423   : > { %v2994_v48 = vpop.f32.mrf.mxu2  ;;  %v3093_v10 = vpop.f32.mrf.mxu3 }
 0x424   : > { %v3022_v23 = vadd.f32 %v2994_v48, %v8259_v35  ;;  %v715_v14 = vpop.trf.xlu0 }
 0x425   : > { %v3180_v15 = vpop.f32.mrf.mxu0  ;;  %779 = vst.msk [vmem:[#allocation2 + $0x248] sm:$0xff] %vm609_vm3, %v715_v14 }
 0x426   : > { %v3280_v13 = vpop.f32.mrf.mxu1  ;;  %v3213_v33 = vadd.f32 %v3180_v15, %v3116_v52  ;;  %v3119_v59 = vadd.f32 %v3091_v54, %v3022_v23  ;;  %v3522_v23 = vld [vmem:[#allocation2 + $0x136] sm:$0xff]  ;;  %v3523_v15 = vld [vmem:[#allocation2 + $0x13e] sm:$0xff] }
 0x427   : > { %v3532_v49 = vpack.c.bf16 %v3523_v15, %v3522_v23 }
 0x428   : > { %6889 = vmatmul.msk.bf16.gmra.mxu3 %vm609_vm3, %v3436_v58  ;;  %v8402_v27 = vadd.f32 %v3277_v40, %v3213_v33 }
 0x429   : > { %6901 = vmatmul.msk.bf16.gmra.mxu1 %vm609_vm3, %v3725_v16  ;;  %v3332_v16 = vld [vmem:[#allocation2 + $0x154] sm:$0xff] }
 0x42b   : > { %v2996_v20 = vpop.f32.mrf.mxu2  ;;  %v3096_v9 = vpop.f32.mrf.mxu3 }
 0x42c   : > { %v3023_v35 = vadd.f32 %v2996_v20, %v8273_v44  ;;  %v716_v43 = vpop.trf.xlu0  ;;  %v3717_v44 = vld [vmem:[#allocation2 + $0x171] sm:$0xff] }
 0x42d   : > { %v3183_v8 = vpop.f32.mrf.mxu0  ;;  %780 = vst.msk [vmem:[#allocation2 + $0x250] sm:$0xff] %vm609_vm3, %v716_v43  ;;  %v3726_v30 = vpack.c.bf16 %v3717_v44, %v3716_v4 }
 0x42e   : > { %v3282_v62 = vpop.f32.mrf.mxu1  ;;  %v3214_v52 = vadd.f32 %v3183_v8, %v3117_v46  ;;  %v3120_v36 = vadd.f32 %v3093_v10, %v3023_v35  ;;  %v3718_v8 = vld [vmem:[#allocation2 + $0x179] sm:$0xff] }
 0x430   : > { %6882 = vmatmul.msk.bf16.gmra.mxu2 %vm609_vm3, %v3339_v45  ;;  %6894 = vmatmul.msk.bf16.gmra.mxu0 %vm609_vm3, %v3531_v17  ;;  %v8410_v54 = vadd.f32 %v3280_v13, %v3214_v52  ;;  %v3431_v52 = vld [vmem:[#allocation2 + $0x165] sm:$0xff] }
 0x433   : > { %v2999_v40 = vpop.f32.mrf.mxu2  ;;  %v3098_v18 = vpop.f32.mrf.mxu3 }
 0x434   : > { %v3024_v46 = vadd.f32 %v2999_v40, %v8284_v31  ;;  %v717_v34 = vpop.trf.xlu0  ;;  %v3333_v31 = vld [vmem:[#allocation2 + $0x15c] sm:$0xff]  ;;  %v3438_v40 = vpack.c.bf16 %v3431_v52, %v3431_v52 }
 0x435   : > { %v3185_v55 = vpop.f32.mrf.mxu0  ;;  %781 = vst.msk [vmem:[#allocation2 + $0x258] sm:$0xff] %vm609_vm3, %v717_v34  ;;  %v8419_v20 = vpack.c.bf16 %v3333_v31, %v3332_v16  ;;  %v3690_v52 = vld [vmem:[#allocation2 + $0x138] sm:$0xff] }
 0x436   : > { %v3285_v2 = vpop.f32.mrf.mxu1  ;;  %v3215_v0 = vadd.f32 %v3185_v55, %v3118_v24  ;;  %v3121_v48 = vadd.f32 %v3096_v9, %v3024_v46  ;;  %v3525_v55 = vld [vmem:[#allocation2 + $0x14e] sm:$0xff] }
 0x438   : > { %6890 = vmatmul.msk.bf16.gmra.mxu3 %vm609_vm3, %v3437_v41  ;;  %v8416_v32 = vadd.f32 %v3282_v62, %v3215_v0 }
 0x439   : > { %6902 = vmatmul.msk.bf16.gmra.mxu1 %vm609_vm3, %v3726_v30  ;;  %v8433_v30 = vld [vmem:[#allocation2 + $0x164] sm:$0xff] }
 0x43a   : > { %v3341_v23 = vpack.c.bf16 %v8433_v30, %v8433_v30 }
 0x43b   : > { %v3001_v10 = vpop.f32.mrf.mxu2  ;;  %v3101_v33 = vpop.f32.mrf.mxu3 }
 0x43c   : > { %v3025_v13 = vadd.f32 %v3001_v10, %v8302_v3  ;;  %v718_v35 = vpop.trf.xlu0  ;;  %v3719_v3 = vld [vmem:[#allocation2 + $0x181] sm:$0xff] }
 0x43d   : > { %v3188_v24 = vpop.f32.mrf.mxu0  ;;  %782 = vst.msk [vmem:[#allocation2 + $0x260] sm:$0xff] %vm609_vm3, %v718_v35  ;;  %v3727_v17 = vpack.c.bf16 %v3719_v3, %v3718_v8 }
 0x43e   : > { %v3287_v58 = vpop.f32.mrf.mxu1  ;;  %v3216_v14 = vadd.f32 %v3188_v24, %v3119_v59  ;;  %v3122_v25 = vadd.f32 %v3098_v18, %v3025_v13  ;;  %v3720_v13 = vld [vmem:[#allocation2 + $0x189] sm:$0xff] }
 0x440   : > { %6883 = vmatmul.msk.bf16.gmra.mxu2 %vm609_vm3, %v8419_v20  ;;  %6895 = vmatmul.msk.bf16.gmra.mxu0 %vm609_vm3, %v3532_v49  ;;  %v8425_v9 = vadd.f32 %v3285_v2, %v3216_v14 }
 0x443   : > { %v3004_v62 = vpop.f32.mrf.mxu2  ;;  %v3103_v45 = vpop.f32.mrf.mxu3 }
 0x444   : > { %v3026_v59 = vadd.f32 %v3004_v62, %v8314_v53  ;;  %v719_v29 = vpop.trf.xlu0  ;;  %v3524_v53 = vld [vmem:[#allocation2 + $0x146] sm:$0xff] }
 0x445   : > { %v3190_v43 = vpop.f32.mrf.mxu0  ;;  %783 = vst.msk [vmem:[#allocation2 + $0x268] sm:$0xff] %vm609_vm3, %v719_v29  ;;  %v3533_v10 = vpack.c.bf16 %v3525_v55, %v3524_v53  ;;  %v3722_v53 = vld [vmem:[#allocation2 + $0x199] sm:$0xff] }
 0x446   : > { %v3290_v4 = vpop.f32.mrf.mxu1  ;;  %v3217_v44 = vadd.f32 %v3190_v43, %v3120_v36  ;;  %v3123_v11 = vadd.f32 %v3101_v33, %v3026_v59  ;;  %v3526_v59 = vld [vmem:[#allocation2 + $0x156] sm:$0xff] }
 0x448   : > { %6891 = vmatmul.msk.bf16.gmra.mxu3 %vm609_vm3, %v3438_v40  ;;  %v8431_v46 = vadd.f32 %v3287_v58, %v3217_v44 }
 0x449   : > { %6903 = vmatmul.msk.bf16.gmra.mxu1 %vm609_vm3, %v3727_v17  ;;  %v3691_v17 = vld [vmem:[#allocation2 + $0x140] sm:$0xff] }
 0x44b   : > { %v3006_v18 = vpop.f32.mrf.mxu2  ;;  %v3106_v0 = vpop.f32.mrf.mxu3 }
 0x44c   : > { %v3027_v2 = vadd.f32 %v3006_v18, %v8338_v5  ;;  %v720_v31 = vpop.trf.xlu0  ;;  %v3721_v5 = vld [vmem:[#allocation2 + $0x191] sm:$0xff]  ;;  %v3703_v18 = vpack.c.bf16 %v3691_v17, %v3690_v52  ;;  %v8488_v52 = vld [vmem:[#allocation2 + $0x162] sm:$0xff] }
 0x44d   : > { %v3193_v36 = vpop.f32.mrf.mxu0  ;;  %784 = vst.msk [vmem:[#allocation2 + $0x270] sm:$0xff] %vm609_vm3, %v720_v31  ;;  %v3728_v58 = vpack.c.bf16 %v3721_v5, %v3720_v13  ;;  %v3528_v5 = vld [vmem:[#allocation2 + $0x166] sm:$0xff] }
 0x44e   : > { %v3292_v41 = vpop.f32.mrf.mxu1  ;;  %v3218_v34 = vadd.f32 %v3193_v36, %v3121_v48  ;;  %v3124_v16 = vadd.f32 %v3103_v45, %v3027_v2  ;;  %v3527_v45 = vld [vmem:[#allocation2 + $0x15e] sm:$0xff] }
 0x44f   : > { %v3534_v29 = vpack.c.bf16 %v3527_v45, %v3526_v59  ;;  %v4053_v59 = vld [vmem:[#allocation2 + $0x15b] sm:$0xff]  ;;  %v8490_v45 = vpop.permute.xlu2 %7171 }
 0x450   : > { %6884 = vmatmul.msk.bf16.gmra.mxu2 %vm609_vm3, %v3341_v23  ;;  %6896 = vmatmul.msk.bf16.gmra.mxu0 %vm609_vm3, %v3533_v10  ;;  %v8441_v15 = vadd.f32 %v3290_v4, %v3218_v34  ;;  %v8469_v34 = vld [vmem:[%s9601_s3 + $0x10] sm:$0xff] }
 0x453   : > { %v3009_v33 = vpop.f32.mrf.mxu2  ;;  %v3108_v48 = vpop.f32.mrf.mxu3 }
 0x454   : > { %v3028_v24 = vadd.f32 %v3009_v33, %v8348_v63  ;;  %v721_v3 = vpop.trf.xlu0  ;;  %v3692_v33 = vld [vmem:[#allocation2 + $0x148] sm:$0xff] }
 0x455   : > { %v3195_v14 = vpop.f32.mrf.mxu0  ;;  %785 = vst.msk [vmem:[#allocation2 + $0x278] sm:$0xff] %vm609_vm3, %v721_v3 }
 0x456   : > { %v3295_v49 = vpop.f32.mrf.mxu1  ;;  %v3219_v35 = vadd.f32 %v3195_v14, %v3122_v25  ;;  %v3125_v8 = vadd.f32 %v3106_v0, %v3028_v24  ;;  %v3729_v0 = vpack.c.bf16 %v3722_v53, %v3722_v53  ;;  %v3693_v24 = vld [vmem:[#allocation2 + $0x150] sm:$0xff] }
 0x458   : > { %6913 = vmatmul.msk.bf16.vlgmr.msra.gmra.mxu3 %vm609_vm3, %v8245_v51  ;;  %v8448_v62 = vadd.f32 %v3292_v41, %v3219_v35  ;;  %v3704_v35 = vpack.c.bf16 %v3693_v24, %v3692_v33  ;;  %v3694_v24 = vld [vmem:[#allocation2 + $0x158] sm:$0xff] }
 0x459   : > { %6904 = vmatmul.msk.bf16.gmra.mxu1 %vm609_vm3, %v3728_v58  ;;  %4745 = vmatpush.bf16.msra.mxu3 %v8119_v6 }
 0x45b   : > { %v3011_v63 = vpop.f32.mrf.mxu2  ;;  %v3111_v43 = vpop.f32.mrf.mxu3 }
 0x45c   : > { %v3029_v25 = vadd.f32 %v3011_v63, %v8357_v28  ;;  %v8460_v28 = vld [vmem:[%s9601_s3 + $0x18] sm:$0xff] }
 0x45d   : > { %v3198_v4 = vpop.f32.mrf.mxu0  ;;  %4746 = vmatpush.bf16.msra.mxu3 %v8128_v21  ;;  %v8463_v21 = vld [vmem:[#allocation2 + $0x152] sm:$0xff] }
 0x45e   : > { %v3297_v44 = vpop.f32.mrf.mxu1  ;;  %v3220_v40 = vadd.f32 %v3198_v4, %v3123_v11  ;;  %v3126_v51 = vadd.f32 %v3108_v48, %v3029_v25  ;;  %v3872_v10 = vpack.c.bf16 %v8463_v21, %v8265_v26  ;;  %v4052_v63 = vld [vmem:[#allocation2 + $0x153] sm:$0xff] }
 0x45f   : > { %v3862_v25 = vld [vmem:[#allocation2 + $0x15a] sm:$0xff]  ;;  %v2731_v4 = vld [vmem:[#allocation3 + $0x1a] ss:$4 sm:$0x3f] }
 0x460   : > { %6897 = vmatmul.msk.bf16.gmra.mxu0 %vm609_vm3, %v3534_v29  ;;  %6906 = vmatmul.msk.bf16.vlgmr.msra.gmra.mxu2 %vm609_vm3, %v3703_v18  ;;  %v8455_v6 = vadd.f32 %v3295_v49, %v3220_v40  ;;  %v3535_v49 = vpack.c.bf16 %v3528_v5, %v3528_v5  ;;  %v1824_v40 = vmax.f32 %v8292_v60, %v8294_v19  ;;  %v2750_v29 = vld [vmem:[#allocation3 + $0x4e] ss:$4 sm:$0x3f]  ;;  %v2751_v18 = vld [vmem:[#allocation3 + $0x4f] ss:$4 sm:$0x3f] }
 0x461   : > { %4681 = vmatpush.bf16.msra.mxu2 %v8460_v28  ;;  %v1797_v5 = vmax.f32 %v8207_v12, %v8209_v39  ;;  %v3968_v39 = vpack.c.bf16 %v3862_v25, %v8463_v21 }
 0x463   : > { %v3014_v55 = vpop.f32.mrf.mxu2  ;;  %v3113_v2 = vpop.f32.mrf.mxu3 }
 0x464   : > { %v3030_v11 = vadd.f32 %v3014_v55, %v8367_v56  ;;  %v3873_v55 = vpack.c.bf16 %v8488_v52, %v3862_v25  ;;  %v2728_v2 = vld [vmem:[#allocation3] ss:$4 sm:$0x3f] }
 0x465   : > { %v3200_v36 = vpop.f32.mrf.mxu0  ;;  %4682 = vmatpush.bf16.msra.mxu2 %v8469_v34 }
 0x466   : > { %v3300_v41 = vpop.f32.mrf.mxu1  ;;  %v3221_v23 = vadd.f32 %v3200_v36, %v3124_v16  ;;  %v8474_v31 = vadd.f32 %v3111_v43, %v3030_v11  ;;  %v4065_v11 = vpack.c.bf16 %v4053_v59, %v4052_v63  ;;  %v1819_v36 = vmax.f32 %v8253_v57, %v8255_v47 }
 0x468   : > { %6914 = vmatmul.msk.bf16.gmra.mxu3 %vm609_vm3, %v3872_v10  ;;  %v8478_v56 = vadd.f32 %v3297_v44, %v3221_v23  ;;  %v2732_v44 = vld [vmem:[#allocation3 + $0x1b] ss:$4 sm:$0x3f]  ;;  %v2747_v23 = vld [vmem:[#allocation3 + $0x34] ss:$4 sm:$0x3f] }
 0x469   : > { %6905 = vmatmul.msk.bf16.gmra.mxu1 %vm609_vm3, %v3729_v0  ;;  %v2729_v0 = vld [vmem:[#allocation3 + $0x1] ss:$4 sm:$0x3f]  ;;  %v2733_v19 = vmax.f32 %v2731_v4, %v2732_v44 }
 0x46a   : > { %v2748_v10 = vld [vmem:[#allocation3 + $0x35] ss:$4 sm:$0x3f]  ;;  %v2730_v57 = vmax.f32 %v2728_v2, %v2729_v0 }
 0x46b   : > { %v3016_v13 = vpop.f32.mrf.mxu2  ;;  %v8480_v48 = vpop.f32.mrf.mxu3  ;;  %v2749_v47 = vmax.f32 %v2747_v23, %v2748_v10  ;;  %v4055_v23 = vld [vmem:[#allocation2 + $0x16b] sm:$0xff] }
 0x46c   : > { %v1825_v13 = vmax.f32 %v1819_v36, %v1824_v40  ;;  %v8541_v36 = vld [vmem:[#allocation2 + $0x172] sm:$0xff] }
 0x46d   : > { %v3203_v58 = vpop.f32.mrf.mxu0 }
 0x46e   : > { %v3302_v14 = vpop.f32.mrf.mxu1  ;;  %v3222_v16 = vadd.f32 %v3203_v58, %v3125_v8  ;;  %v3695_v58 = vld [vmem:[#allocation2 + $0x160] sm:$0xff] }
 0x46f   : > { %v3705_v40 = vpack.c.bf16 %v3695_v58, %v3694_v24 }
 0x470   : > { %6898 = vmatmul.msk.bf16.gmra.mxu0 %vm609_vm3, %v3535_v49  ;;  %6907 = vmatmul.msk.bf16.gmra.mxu2 %vm609_vm3, %v3704_v35  ;;  %v8484_v26 = vadd.f32 %v3300_v41, %v3222_v16  ;;  %v7174_v41 = vunpack.i.h.bf16 %v8490_v45  ;;  %v1792_v16 = vmax.f32 %v8158_v7, %v8161_v61  ;;  %v7173_v35 = vunpack.i.l.bf16 %v8490_v45 }
 0x473   : > { %v8486_v3 = vpop.f32.mrf.mxu2  ;;  %v8492_v17 = vpop.f32.mrf.mxu3 }
 0x475   : > { %v3205_v8 = vpop.f32.mrf.mxu0 }
 0x476   : > { %v3305_v43 = vpop.f32.mrf.mxu1  ;;  %v3223_v53 = vadd.f32 %v3205_v8, %v3126_v51  ;;  %v2752_v51 = vmax.f32 %v2750_v29, %v2751_v18  ;;  %v7228_v8 = vld [vmem:[%s9601_s3 + $0x30] sm:$0xff]  ;;  %v1798_v29 = vmax.f32 %v1792_v16, %v1797_v5  ;;  %v3406_v16 = vadd.f32 %v8486_v3, %v8396_v1 }
 0x477   : > { %v3864_v5 = vld [vmem:[#allocation2 + $0x16a] sm:$0xff] }
 0x478   : > { %6915 = vmatmul.msk.bf16.gmra.mxu3 %vm609_vm3, %v3873_v55  ;;  %v8502_v60 = vadd.f32 %v3302_v14, %v3223_v53  ;;  %v1841_v14 = vsel %vm1775_vm4, %v1825_v13, %v7174_v41  ;;  %v2753_v59 = vmax.f32 %v2749_v47, %v2752_v51  ;;  %v4054_v41 = vld [vmem:[#allocation2 + $0x163] sm:$0xff]  ;;  %v3874_v24 = vpack.c.bf16 %v8541_v36, %v3864_v5  ;;  %v8570_v3 = vld [vmem:[#allocation4] ss:$0 sm:$0xff] }
 0x479   : > { %6927 = vmatmul.msk.bf16.vlgmr.msra.gmra.mxu1 %vm609_vm3, %v4065_v11  ;;  %v6463_v45 = vrot.slane %v1841_v14, 2  ;;  %v1814_v11 = vsel %vm1775_vm4, %v1798_v29, %v7173_v35  ;;  %v4066_v58 = vpack.c.bf16 %v4055_v23, %v4054_v41  ;;  %v3696_v35 = vld [vmem:[#allocation2 + $0x168] sm:$0xff]  ;;  %v4056_v29 = vld [vmem:[#allocation2 + $0x173] sm:$0xff] }
 0x47a   : > { %4926 = vmatpush.bf16.msra.mxu1 %v8175_v50  ;;  %v2734_v50 = vmax.f32 %v2730_v57, %v2733_v19  ;;  %v8551_v57 = vld [vmem:[%s9601_s3 + $0x20] sm:$0xff] }
 0x47b   : > { %v8507_v33 = vpop.f32.mrf.mxu2  ;;  %v8512_v49 = vpop.f32.mrf.mxu3  ;;  %v6490_v2 = vsel %vm6489_vm5, %v1814_v11, %v6463_v45 }
 0x47c   : > { %v7177_v63 = vpop.permute.xlu0 %7176  ;;  %v3407_v1 = vadd.f32 %v8507_v33, %v8402_v27 }
 0x47d   : > { %v3208_v12 = vpop.f32.mrf.mxu0  ;;  %v7179_v4 = vunpack.i.h.bf16 %v7177_v63  ;;  %v7178_v7 = vunpack.i.l.bf16 %v7177_v63 }
 0x47e   : > { %4927 = vmatpush.bf16.msra.mxu1 %v7228_v8  ;;  %v3224_v61 = vadd.f32 %v3208_v12, %v8474_v31  ;;  %v3307_v44 = vpop.f32.mrf.mxu1  ;;  %v8530_v31 = vld [vmem:[%s9601_s3 + $0x28] sm:$0xff]  ;;  %v3504_v27 = vadd.f32 %v8492_v17, %v3407_v1  ;;  %v3699_v17 = vld [vmem:[#allocation2 + $0x180] sm:$0xff] }
 0x47f   : > { %v2746_v18 = vsel %vm1775_vm4, %v2734_v50, %v7178_v7  ;;  %v2765_v53 = vsel %vm1775_vm4, %v2753_v59, %v7179_v4  ;;  %v3697_v50 = vld [vmem:[#allocation2 + $0x170] sm:$0xff]  ;;  %v3503_v59 = vadd.f32 %v8480_v48, %v3406_v16  ;;  %v3969_v7 = vpack.c.bf16 %v3864_v5, %v8488_v52 }
 0x480   : > { %6908 = vmatmul.msk.bf16.gmra.mxu2 %vm609_vm3, %v3705_v40  ;;  %6920 = vmatmul.msk.bf16.vlgmr.msra.gmra.mxu0 %vm609_vm3, %v3968_v39  ;;  %v8525_v21 = vadd.f32 %v3305_v43, %v3224_v61  ;;  %v6466_v25 = vrot.slane %v2746_v18, 4  ;;  %v6469_v55 = vrot.slane %v2765_v53, 6  ;;  %v3706_v4 = vpack.c.bf16 %v3697_v50, %v3696_v35  ;;  %v8575_v40 = vld [vmem:[#allocation2 + $0x182] sm:$0xff]  ;;  %v3866_v18 = vld [vmem:[#allocation2 + $0x17a] sm:$0xff] }
 0x481   : > { %4829 = vmatpush.bf16.msra.mxu0 %v8530_v31 }
 0x482   : > { %v6491_v43 = vsel %vm353_vm0, %v6463_v45, %v6466_v25  ;;  %v8544_v10 = vsel %vm6492_vm6, %v6466_v25, %v6469_v55  ;;  %v4057_v45 = vld [vmem:[#allocation2 + $0x17b] sm:$0xff]  ;;  %v3875_v55 = vpack.c.bf16 %v8575_v40, %v3866_v18 }
 0x483   : > { %v3377_v0 = vpop.f32.mrf.mxu2  ;;  %v7119_v19 = vpack.c.bf16 %v6491_v43, %v6490_v2  ;;  %v8546_v51 = vpop.f32.mrf.mxu3  ;;  %v4067_v11 = vpack.c.bf16 %v4057_v45, %v4056_v29 }
 0x484   : > { %v3408_v2 = vadd.f32 %v3377_v0, %v8410_v54  ;;  %v3970_v0 = vpack.c.bf16 %v3866_v18, %v8541_v36 }
 0x485   : > { %v3210_v13 = vpop.f32.mrf.mxu0  ;;  %4830 = vmatpush.bf16.msra.mxu0 %v8551_v57  ;;  %7120 = vst [vmem:[%s8538_s22] sm:$0xff] %v7119_v19   ;;  %v3698_v19 = vld [vmem:[#allocation2 + $0x178] sm:$0xff] }
 0x486   : > { %v8555_v47 = vpop.f32.mrf.mxu1  ;;  %v3505_v5 = vadd.f32 %v8512_v49, %v3408_v2  ;;  %v3707_v54 = vpack.c.bf16 %v3699_v17, %v3698_v19  ;;  %v4058_v49 = vld [vmem:[#allocation2 + $0x183] sm:$0xff] }
 0x488   : > { %6916 = vmatmul.msk.bf16.gmra.mxu3 %vm609_vm3, %v3874_v24 }
 0x489   : > { %6928 = vmatmul.msk.bf16.gmra.mxu1 %vm609_vm3, %v4066_v58 }
 0x48b   : > { %v3379_v14 = vpop.f32.mrf.mxu2  ;;  %v8562_v63 = vpop.f32.mrf.mxu3 }
 0x48c   : > { %v3409_v35 = vadd.f32 %v3379_v14, %v8416_v32  ;;  %v3868_v32 = vld [vmem:[#allocation2 + $0x18a] sm:$0xff] }
 0x48d   : > { %v3566_v12 = vpop.f32.mrf.mxu0 }
 0x48e   : > { %v3600_v39 = vadd.f32 %v3566_v12, %v3503_v59  ;;  %v8565_v8 = vpop.f32.mrf.mxu1  ;;  %v3506_v36 = vadd.f32 %v8546_v51, %v3409_v35  ;;  %v3701_v51 = vld [vmem:[#allocation2 + $0x190] sm:$0xff] }
 0x490   : > { %v3613_v61 = vadd.f32 %v8570_v3, %v3600_v39  ;;  %6909 = vmatmul.msk.bf16.gmra.mxu2 %vm609_vm3, %v3706_v4  ;;  %6921 = vmatmul.msk.bf16.gmra.mxu0 %vm609_vm3, %v3969_v7  ;;  %v8599_v39 = vld [vmem:[#allocation2 + $0x192] sm:$0xff] }
 0x491   : > { %v4059_v4 = vld [vmem:[#allocation2 + $0x18b] sm:$0xff] }
 0x492   : > { %v3626_v44 = vmax.f32 %v3613_v61, 0.0  ;;  %v4068_v29 = vpack.c.bf16 %v4059_v4, %v4058_v49 }
 0x493   : > { %v3382_v48 = vpop.f32.mrf.mxu2  ;;  %v8578_v52 = vpop.f32.mrf.mxu3 }
 0x494   : > { %3639 = vst.msk [vmem:[#allocation3] sm:$0xff] %vm1775_vm4, %v3626_v44  ;;  %v3876_v44 = vpack.c.bf16 %v8599_v39, %v3868_v32  ;;  %v3410_v45 = vadd.f32 %v3382_v48, %v8425_v9  ;;  %v3971_v48 = vpack.c.bf16 %v3868_v32, %v8575_v40  ;;  %v3870_v40 = vld [vmem:[#allocation2 + $0x19a] sm:$0xff] }
 0x495   : > { %v3568_v33 = vpop.f32.mrf.mxu0  ;;  %v3702_v32 = vld [vmem:[#allocation2 + $0x198] sm:$0xff] }
 0x496   : > { %v3601_v53 = vadd.f32 %v3568_v33, %v3504_v27  ;;  %v8581_v25 = vpop.f32.mrf.mxu1 }
 0x498   : > { %v3614_v43 = vadd.f32 %v8570_v3, %v3601_v53  ;;  %6917 = vmatmul.msk.bf16.gmra.mxu3 %vm609_vm3, %v3875_v55  ;;  %v3700_v53 = vld [vmem:[#allocation2 + $0x188] sm:$0xff] }
 0x499   : > { %6929 = vmatmul.msk.bf16.gmra.mxu1 %vm609_vm3, %v4067_v11  ;;  %v3507_v11 = vadd.f32 %v8562_v63, %v3410_v45  ;;  %v3708_v9 = vpack.c.bf16 %v3701_v51, %v3700_v53  ;;  %v4060_v63 = vld [vmem:[#allocation2 + $0x193] sm:$0xff] }
 0x49a   : > { %v3627_v41 = vmax.f32 %v3614_v43, 0.0 }
 0x49b   : > { %v3384_v23 = vpop.f32.mrf.mxu2  ;;  %v8589_v13 = vpop.f32.mrf.mxu3 }
 0x49c   : > { %3640 = vst.msk [vmem:[#allocation3 + $0x8] sm:$0xff] %vm1775_vm4, %v3627_v41  ;;  %v3411_v19 = vadd.f32 %v3384_v23, %v8431_v46  ;;  %v3877_v23 = vpack.c.bf16 %v3870_v40, %v3870_v40 }
 0x49d   : > { %v3571_v24 = vpop.f32.mrf.mxu0 }
 0x49e   : > { %v3602_v58 = vadd.f32 %v3571_v24, %v3505_v5  ;;  %v8592_v16 = vpop.f32.mrf.mxu1 }
 0x4a0   : > { %v3615_v50 = vadd.f32 %v8570_v3, %v3602_v58  ;;  %6910 = vmatmul.msk.bf16.gmra.mxu2 %vm609_vm3, %v3707_v54  ;;  %6922 = vmatmul.msk.bf16.gmra.mxu0 %vm609_vm3, %v3970_v0  ;;  %v4061_v58 = vld [vmem:[#allocation2 + $0x19b] sm:$0xff]  ;;  %v3508_v0 = vadd.f32 %v8578_v52, %v3411_v19 }
 0x4a2   : > { %v3628_v59 = vmax.f32 %v3615_v50, 0.0 }
 0x4a3   : > { %v3387_v12 = vpop.f32.mrf.mxu2  ;;  %v8602_v7 = vpop.f32.mrf.mxu3 }
 0x4a4   : > { %3641 = vst.msk [vmem:[#allocation3 + $0x10] sm:$0xff] %vm1775_vm4, %v3628_v59  ;;  %v4069_v59 = vpack.c.bf16 %v4061_v58, %v4060_v63  ;;  %v3412_v49 = vadd.f32 %v3387_v12, %v8441_v15  ;;  %v3709_v15 = vpack.c.bf16 %v3702_v32, %v3702_v32  ;;  %v3972_v12 = vpack.c.bf16 %v3870_v40, %v8599_v39  ;;  %v8679_v32 = vld [vmem:[#allocation2 + $0x184] sm:$0xff] }
 0x4a5   : > { %v3573_v1 = vpop.f32.mrf.mxu0 }
 0x4a6   : > { %v3603_v14 = vadd.f32 %v3573_v1, %v3506_v36  ;;  %v8605_v61 = vpop.f32.mrf.mxu1 }
 0x4a8   : > { %v3616_v27 = vadd.f32 %v8570_v3, %v3603_v14  ;;  %6918 = vmatmul.msk.bf16.gmra.mxu3 %vm609_vm3, %v3876_v44  ;;  %v3509_v14 = vadd.f32 %v8589_v13, %v3412_v49  ;;  %v8644_v13 = vld [vmem:[#allocation2 + $0x174] sm:$0xff] }
 0x4a9   : > { %6930 = vmatmul.msk.bf16.gmra.mxu1 %vm609_vm3, %v4068_v29 }
 0x4aa   : > { %v3629_v33 = vmax.f32 %v3616_v27, 0.0 }
 0x4ab   : > { %v3389_v18 = vpop.f32.mrf.mxu2  ;;  %v8612_v55 = vpop.f32.mrf.mxu3 }
 0x4ac   : > { %3642 = vst.msk [vmem:[#allocation3 + $0x18] sm:$0xff] %vm1775_vm4, %v3629_v33  ;;  %v3413_v27 = vadd.f32 %v3389_v18, %v8448_v62  ;;  %v4246_v62 = vld [vmem:[#allocation2 + $0x16c] sm:$0xff] }
 0x4ad   : > { %v3576_v2 = vpop.f32.mrf.mxu0 }
 0x4ae   : > { %v3604_v43 = vadd.f32 %v3576_v2, %v3507_v11  ;;  %v8616_v41 = vpop.f32.mrf.mxu1  ;;  %v4062_v11 = vld [vmem:[#allocation2 + $0x1a3] sm:$0xff]  ;;  %v4063_v2 = vld [vmem:[#allocation2 + $0x1ab] sm:$0xff]  ;;  %v3510_v39 = vadd.f32 %v8602_v7, %v3413_v27 }
 0x4af   : > { %v4070_v19 = vpack.c.bf16 %v4063_v2, %v4062_v11 }
 0x4b0   : > { %v3617_v17 = vadd.f32 %v8570_v3, %v3604_v43  ;;  %6911 = vmatmul.msk.bf16.gmra.mxu2 %vm609_vm3, %v3708_v9  ;;  %6923 = vmatmul.msk.bf16.gmra.mxu0 %vm609_vm3, %v3971_v48 }
 0x4b2   : > { %v3630_v5 = vmax.f32 %v3617_v17, 0.0  ;;  %v4259_v17 = vpack.c.bf16 %v8644_v13, %v4246_v62 }
 0x4b3   : > { %v3392_v24 = vpop.f32.mrf.mxu2  ;;  %v8624_v54 = vpop.f32.mrf.mxu3 }
 0x4b4   : > { %3643 = vst.msk [vmem:[#allocation3 + $0x20] sm:$0xff] %vm1775_vm4, %v3630_v5  ;;  %v3414_v5 = vadd.f32 %v3392_v24, %v8455_v6 }
 0x4b5   : > { %v3578_v35 = vpop.f32.mrf.mxu0 }
 0x4b6   : > { %v3605_v50 = vadd.f32 %v3578_v35, %v3508_v0  ;;  %v8627_v46 = vpop.f32.mrf.mxu1  ;;  %v3965_v0 = vld [vmem:[#allocation2 + $0x1a2] sm:$0xff]  ;;  %v3966_v35 = vld [vmem:[#allocation2 + $0x1aa] sm:$0xff] }
 0x4b8   : > { %v3618_v4 = vadd.f32 %v8570_v3, %v3605_v50  ;;  %6919 = vmatmul.msk.bf16.gmra.mxu3 %vm609_vm3, %v3877_v23  ;;  %v3511_v50 = vadd.f32 %v8612_v55, %v3414_v5 }
 0x4b9   : > { %6931 = vmatmul.msk.bf16.gmra.mxu1 %vm609_vm3, %v4069_v59  ;;  %v8665_v59 = vpack.c.bf16 %v3966_v35, %v3965_v0  ;;  %v4440_v35 = vld [vmem:[#allocation2 + $0x16e] sm:$0xff] }
 0x4ba   : > { %v3631_v36 = vmax.f32 %v3618_v4, 0.0  ;;  %v4064_v4 = vld [vmem:[#allocation2 + $0x1b3] sm:$0xff] }
 0x4bb   : > { %v3394_v1 = vpop.f32.mrf.mxu2  ;;  %v8634_v52 = vpop.f32.mrf.mxu3 }
 0x4bc   : > { %3644 = vst.msk [vmem:[#allocation3 + $0x28] sm:$0xff] %vm1775_vm4, %v3631_v36 }
 0x4bd   : > { %v3581_v44 = vpop.f32.mrf.mxu0 }
 0x4be   : > { %v3606_v29 = vadd.f32 %v3581_v44, %v3509_v14  ;;  %v8637_v45 = vpop.f32.mrf.mxu1  ;;  %v4071_v14 = vpack.c.bf16 %v4064_v4, %v4064_v4 }
 0x4c0   : > { %v3619_v33 = vadd.f32 %v8570_v3, %v3606_v29  ;;  %6912 = vmatmul.msk.bf16.gmra.mxu2 %vm609_vm3, %v3709_v15  ;;  %6924 = vmatmul.msk.bf16.gmra.mxu0 %vm609_vm3, %v3972_v12  ;;  %v8688_v29 = vld [vmem:[%s9601_s3 + $0x40] sm:$0xff] }
 0x4c2   : > { %v3632_v53 = vmax.f32 %v3619_v33, 0.0 }
 0x4c3   : > { %v3397_v51 = vpop.f32.mrf.mxu2  ;;  %v8647_v43 = vpop.f32.mrf.mxu3 }
 0x4c4   : > { %3645 = vst.msk [vmem:[#allocation3 + $0x30] sm:$0xff] %vm1775_vm4, %v3632_v53  ;;  %v3416_v33 = vadd.f32 %v3397_v51, %v8484_v26  ;;  %v8699_v53 = vld [vmem:[#allocation2 + $0x1b2] sm:$0xff] }
 0x4c5   : > { %v3583_v9 = vpop.f32.mrf.mxu0 }
 0x4c6   : > { %v3607_v18 = vadd.f32 %v3583_v9, %v3510_v39  ;;  %v8650_v48 = vpop.f32.mrf.mxu1  ;;  %v3513_v9 = vadd.f32 %v8634_v52, %v3416_v33  ;;  %v8712_v52 = vld [vmem:[#allocation2 + $0x194] sm:$0xff] }
 0x4c8   : > { %v3620_v63 = vadd.f32 %v8570_v3, %v3607_v18  ;;  %6941 = vmatmul.msk.bf16.vlgmr.msrb.gmra.mxu3 %vm609_vm3, %v4259_v17  ;;  %v3974_v18 = vpack.c.bf16 %v8699_v53, %v8699_v53  ;;  %v4163_v17 = vpack.c.bf16 %v4246_v62, %v8433_v30  ;;  %v4250_v62 = vld [vmem:[#allocation2 + $0x18c] sm:$0xff] }
 0x4c9   : > { %6932 = vmatmul.msk.bf16.gmra.mxu1 %vm609_vm3, %v4070_v19  ;;  %5120 = vmatpush.bf16.msrb.mxu3 %v8325_v38  ;;  %v3415_v38 = vadd.f32 %v3394_v1, %v8478_v56 }
 0x4ca   : > { %v3633_v58 = vmax.f32 %v3620_v63, 0.0 }
 0x4cb   : > { %v3399_v7 = vpop.f32.mrf.mxu2  ;;  %v8659_v40 = vpop.f32.mrf.mxu3  ;;  %v3512_v1 = vadd.f32 %v8624_v54, %v3415_v38 }
 0x4cc   : > { %3646 = vst.msk [vmem:[#allocation3 + $0x38] sm:$0xff] %vm1775_vm4, %v3633_v58  ;;  %v3417_v5 = vadd.f32 %v3399_v7, %v8502_v60 }
 0x4cd   : > { %v3586_v23 = vpop.f32.mrf.mxu0  ;;  %5121 = vmatpush.bf16.msrb.mxu3 %v8335_v37  ;;  %v8676_v37 = vld [vmem:[%s9601_s3 + $0x48] sm:$0xff] }
 0x4ce   : > { %v3608_v6 = vadd.f32 %v3586_v23, %v3511_v50  ;;  %v8663_v24 = vpop.f32.mrf.mxu1  ;;  %v4441_v50 = vld [vmem:[#allocation2 + $0x176] sm:$0xff]  ;;  %v3514_v30 = vadd.f32 %v8647_v43, %v3417_v5  ;;  %v8747_v5 = vld [vmem:[%s9601_s3 + $0x60] sm:$0xff] }
 0x4cf   : > { %v4453_v4 = vpack.c.bf16 %v4441_v50, %v4440_v35  ;;  %v4345_v50 = vld [vmem:[#allocation2 + $0x17d] sm:$0xff] }
 0x4d0   : > { %v3621_v49 = vadd.f32 %v8570_v3, %v3608_v6  ;;  %6925 = vmatmul.msk.bf16.gmra.mxu0 %vm609_vm3, %v8665_v59  ;;  %6934 = vmatmul.msk.bf16.vlgmr.msrb.gmra.mxu2 %vm609_vm3, %v8419_v20  ;;  %v8683_v20 = vld [vmem:[#allocation2 + $0x17c] sm:$0xff] }
 0x4d1   : > { %5023 = vmatpush.bf16.msrb.mxu2 %v8676_v37  ;;  %v4260_v27 = vpack.c.bf16 %v8679_v32, %v8683_v20 }
 0x4d2   : > { %v3634_v55 = vmax.f32 %v3621_v49, 0.0  ;;  %v4261_v49 = vpack.c.bf16 %v8712_v52, %v4250_v62 }
 0x4d3   : > { %v3402_v36 = vpop.f32.mrf.mxu2  ;;  %v3501_v56 = vpop.f32.mrf.mxu3 }
 0x4d4   : > { %3647 = vst.msk [vmem:[#allocation3 + $0x40] sm:$0xff] %vm1775_vm4, %v3634_v55  ;;  %v3418_v56 = vadd.f32 %v3402_v36, %v8525_v21 }
 0x4d5   : > { %v3588_v44 = vpop.f32.mrf.mxu0  ;;  %5024 = vmatpush.bf16.msrb.mxu2 %v8688_v29 }
 0x4d6   : > { %v3609_v15 = vadd.f32 %v3588_v44, %v3512_v1  ;;  %v8691_v12 = vpop.f32.mrf.mxu1  ;;  %v4344_v44 = vld [vmem:[#allocation2 + $0x175] sm:$0xff]  ;;  %v3515_v33 = vadd.f32 %v8659_v40, %v3418_v56 }
 0x4d8   : > { %v3622_v54 = vadd.f32 %v8570_v3, %v3609_v15  ;;  %6942 = vmatmul.msk.bf16.gmra.mxu3 %vm609_vm3, %v4260_v27 }
 0x4d9   : > { %6933 = vmatmul.msk.bf16.gmra.mxu1 %vm609_vm3, %v4071_v14  ;;  %v4343_v14 = vld [vmem:[#allocation2 + $0x16d] sm:$0xff] }
 0x4da   : > { %v3635_v11 = vmax.f32 %v3622_v54, 0.0 }
 0x4db   : > { %v3404_v2 = vpop.f32.mrf.mxu2  ;;  %v3908_v39 = vpop.f32.mrf.mxu3 }
 0x4dc   : > { %3648 = vst.msk [vmem:[#allocation3 + $0x48] sm:$0xff] %vm1775_vm4, %v3635_v11  ;;  %v4164_v11 = vpack.c.bf16 %v8683_v20, %v8644_v13  ;;  %v4442_v13 = vld [vmem:[#allocation2 + $0x17e] sm:$0xff]  ;;  %v4443_v20 = vld [vmem:[#allocation2 + $0x186] sm:$0xff] }
 0x4dd   : > { %v3591_v19 = vpop.f32.mrf.mxu0 }
 0x4de   : > { %v3610_v26 = vadd.f32 %v3591_v19, %v3513_v9  ;;  %v8705_v51 = vpop.f32.mrf.mxu1  ;;  %v8740_v9 = vld [vmem:[#allocation2 + $0x1a4] sm:$0xff] }
 0x4e0   : > { %v3623_v63 = vadd.f32 %v8570_v3, %v3610_v26  ;;  %6926 = vmatmul.msk.bf16.gmra.mxu0 %vm609_vm3, %v3974_v18  ;;  %6935 = vmatmul.msk.bf16.gmra.mxu2 %vm609_vm3, %v4163_v17  ;;  %v4252_v17 = vld [vmem:[#allocation2 + $0x19c] sm:$0xff] }
 0x4e2   : > { %v3636_v58 = vmax.f32 %v3623_v63, 0.0 }
 0x4e3   : > { %v3824_v0 = vpop.f32.mrf.mxu2  ;;  %v3910_v6 = vpop.f32.mrf.mxu3 }
 0x4e4   : > { %3649 = vst.msk [vmem:[#allocation3 + $0x50] sm:$0xff] %vm1775_vm4, %v3636_v58  ;;  %v3825_v23 = vadd.f32 %v3824_v0, %v8555_v47  ;;  %v4262_v58 = vpack.c.bf16 %v8740_v9, %v4252_v17  ;;  %v4454_v0 = vpack.c.bf16 %v4443_v20, %v4442_v13 }
 0x4e5   : > { %v3593_v60 = vpop.f32.mrf.mxu0 }
 0x4e6   : > { %v3611_v7 = vadd.f32 %v3593_v60, %v3514_v30  ;;  %v8717_v38 = vpop.f32.mrf.mxu1  ;;  %v3942_v55 = vadd.f32 %v3908_v39, %v3825_v23  ;;  %v4346_v23 = vld [vmem:[#allocation2 + $0x185] sm:$0xff] }
 0x4e7   : > { %v4357_v56 = vpack.c.bf16 %v4346_v23, %v4345_v50  ;;  %v4257_v50 = vld [vmem:[#allocation2 + $0x1c4] sm:$0xff] }
 0x4e8   : > { %v3624_v1 = vadd.f32 %v8570_v3, %v3611_v7  ;;  %6943 = vmatmul.msk.bf16.gmra.mxu3 %vm609_vm3, %v4261_v49  ;;  %v4447_v23 = vld [vmem:[#allocation2 + $0x1a6] sm:$0xff] }
 0x4e9   : > { %6955 = vmatmul.msk.bf16.vlgmr.msrb.gmra.mxu1 %vm609_vm3, %v4453_v4  ;;  %v4165_v4 = vpack.c.bf16 %v4250_v62, %v8679_v32 }
 0x4ea   : > { %5314 = vmatpush.bf16.msrb.mxu1 %v8377_v42  ;;  %v3637_v47 = vmax.f32 %v3624_v1, 0.0  ;;  %v4356_v42 = vpack.c.bf16 %v4344_v44, %v4343_v14  ;;  %v8759_v14 = vld [vmem:[#allocation2 + $0x1b4] sm:$0xff] }
 0x4eb   : > { %v3826_v43 = vpop.f32.mrf.mxu2  ;;  %v3913_v27 = vpop.f32.mrf.mxu3  ;;  %v4444_v44 = vld [vmem:[#allocation2 + $0x18e] sm:$0xff] }
 0x4ec   : > { %3650 = vst.msk [vmem:[#allocation3 + $0x58] sm:$0xff] %vm1775_vm4, %v3637_v47  ;;  %v3827_v15 = vadd.f32 %v3826_v43, %v8565_v8  ;;  %v8737_v8 = vld [vmem:[%s9601_s3 + $0x68] sm:$0xff] }
 0x4ed   : > { %v3596_v21 = vpop.f32.mrf.mxu0 }
 0x4ee   : > { %5315 = vmatpush.bf16.msrb.mxu1 %v8384_v22  ;;  %v3612_v36 = vadd.f32 %v3596_v21, %v3515_v33  ;;  %v3792_v54 = vpop.f32.mrf.mxu1  ;;  %v3943_v2 = vadd.f32 %v3910_v6, %v3827_v15  ;;  %v4445_v15 = vld [vmem:[#allocation2 + $0x196] sm:$0xff]  ;;  %v4254_v33 = vld [vmem:[#allocation2 + $0x1ac] sm:$0xff] }
 0x4ef   : > { %v4263_v62 = vpack.c.bf16 %v8759_v14, %v4254_v33 }
 0x4f0   : > { %v3625_v39 = vadd.f32 %v8570_v3, %v3612_v36  ;;  %6936 = vmatmul.msk.bf16.gmra.mxu2 %vm609_vm3, %v4164_v11  ;;  %6948 = vmatmul.msk.bf16.vlgmr.msrb.gmra.mxu0 %vm609_vm3, %v4356_v42  ;;  %v4455_v36 = vpack.c.bf16 %v4445_v15, %v4444_v44 }
 0x4f1   : > { %5217 = vmatpush.bf16.msrb.mxu0 %v8737_v8 }
 0x4f2   : > { %v3638_v22 = vmax.f32 %v3625_v39, 0.0  ;;  %v4347_v39 = vld [vmem:[#allocation2 + $0x18d] sm:$0xff] }
 0x4f3   : > { %v3829_v40 = vpop.f32.mrf.mxu2  ;;  %v3915_v19 = vpop.f32.mrf.mxu3 }
 0x4f4   : > { %3651 = vst.msk [vmem:[#allocation3 + $0x60] sm:$0xff] %vm1775_vm4, %v3638_v22  ;;  %v3830_v18 = vadd.f32 %v3829_v40, %v8581_v25  ;;  %v4348_v22 = vld [vmem:[#allocation2 + $0x195] sm:$0xff] }
 0x4f5   : > { %v3598_v26 = vpop.f32.mrf.mxu0  ;;  %5218 = vmatpush.bf16.msrb.mxu0 %v8747_v5 }
 0x4f6   : > { %v4102_v63 = vpop.f32.mrf.mxu1  ;;  %v3944_v35 = vadd.f32 %v3913_v27, %v3830_v18  ;;  %v4166_v18 = vpack.c.bf16 %v4252_v17, %v8712_v52 }
 0x4f8   : > { %6944 = vmatmul.msk.bf16.gmra.mxu3 %vm609_vm3, %v4262_v58  ;;  %v4446_v58 = vld [vmem:[#allocation2 + $0x19e] sm:$0xff] }
 0x4f9   : > { %6956 = vmatmul.msk.bf16.gmra.mxu1 %vm609_vm3, %v4454_v0  ;;  %v4456_v17 = vpack.c.bf16 %v4447_v23, %v4446_v58 }
 0x4fb   : > { %v3831_v25 = vpop.f32.mrf.mxu2  ;;  %v3918_v30 = vpop.f32.mrf.mxu3 }
 0x4fc   : > { %v3832_v6 = vadd.f32 %v3831_v25, %v8592_v16  ;;  %v4256_v25 = vld [vmem:[#allocation2 + $0x1bc] sm:$0xff] }
 0x4fd   : > { %v4005_v60 = vpop.f32.mrf.mxu0  ;;  %v8774_v52 = vpack.c.bf16 %v4257_v50, %v4256_v25  ;;  %v4168_v50 = vpack.c.bf16 %v8759_v14, %v8759_v14 }
 0x4fe   : > { %v4039_v7 = vadd.f32 %v4005_v60, %v3942_v55  ;;  %v4104_v49 = vpop.f32.mrf.mxu1  ;;  %v3945_v1 = vadd.f32 %v3915_v19, %v3832_v6  ;;  %v4358_v19 = vpack.c.bf16 %v4348_v22, %v4347_v39  ;;  %v4449_v39 = vld [vmem:[#allocation2 + $0x1b6] sm:$0xff] }
 0x500   : > { %6937 = vmatmul.msk.bf16.gmra.mxu2 %vm609_vm3, %v4165_v4  ;;  %6949 = vmatmul.msk.bf16.gmra.mxu0 %vm609_vm3, %v4357_v56  ;;  %v8757_v47 = vadd.f32 %v4102_v63, %v4039_v7  ;;  %v4349_v56 = vld [vmem:[#allocation2 + $0x19d] sm:$0xff] }
 0x503   : > { %v3834_v43 = vpop.f32.mrf.mxu2  ;;  %v3920_v27 = vpop.f32.mrf.mxu3 }
 0x504   : > { %v3835_v16 = vadd.f32 %v3834_v43, %v8605_v61  ;;  %v4350_v43 = vld [vmem:[#allocation2 + $0x1a5] sm:$0xff] }
 0x505   : > { %v4007_v55 = vpop.f32.mrf.mxu0 }
 0x506   : > { %v4040_v21 = vadd.f32 %v4007_v55, %v3943_v2  ;;  %v4107_v32 = vpop.f32.mrf.mxu1  ;;  %v3946_v54 = vadd.f32 %v3918_v30, %v3835_v16  ;;  %v4359_v55 = vpack.c.bf16 %v4350_v43, %v4349_v56 }
 0x508   : > { %6945 = vmatmul.msk.bf16.gmra.mxu3 %vm609_vm3, %v4263_v62  ;;  %v8765_v11 = vadd.f32 %v4104_v49, %v4040_v21 }
 0x509   : > { %6957 = vmatmul.msk.bf16.gmra.mxu1 %vm609_vm3, %v4455_v36  ;;  %v8787_v36 = vld [vmem:[#allocation2 + $0x1cc] sm:$0xff] }
 0x50b   : > { %v3836_v42 = vpop.f32.mrf.mxu2  ;;  %v3923_v40 = vpop.f32.mrf.mxu3 }
 0x50c   : > { %v3837_v61 = vadd.f32 %v3836_v42, %v8616_v41  ;;  %v4448_v42 = vld [vmem:[#allocation2 + $0x1ae] sm:$0xff] }
 0x50d   : > { %v4010_v13 = vpop.f32.mrf.mxu0 }
 0x50e   : > { %v4041_v20 = vadd.f32 %v4010_v13, %v3944_v35  ;;  %v4109_v2 = vpop.f32.mrf.mxu1  ;;  %v3947_v26 = vadd.f32 %v3920_v27, %v3837_v61  ;;  %v4167_v27 = vpack.c.bf16 %v4254_v33, %v8740_v9  ;;  %v4265_v9 = vpack.c.bf16 %v8787_v36, %v8787_v36 }
 0x50f   : > { %v4457_v33 = vpack.c.bf16 %v4449_v39, %v4448_v42 }
 0x510   : > { %6938 = vmatmul.msk.bf16.gmra.mxu2 %vm609_vm3, %v4166_v18  ;;  %6950 = vmatmul.msk.bf16.gmra.mxu0 %vm609_vm3, %v4358_v19  ;;  %v8771_v63 = vadd.f32 %v4107_v32, %v4041_v20  ;;  %v4351_v18 = vld [vmem:[#allocation2 + $0x1ad] sm:$0xff]  ;;  %v4352_v19 = vld [vmem:[#allocation2 + $0x1b5] sm:$0xff] }
 0x511   : > { %v4360_v23 = vpack.c.bf16 %v4352_v19, %v4351_v18 }
 0x513   : > { %v3839_v0 = vpop.f32.mrf.mxu2  ;;  %v3925_v6 = vpop.f32.mrf.mxu3 }
 0x514   : > { %v3840_v41 = vadd.f32 %v3839_v0, %v8627_v46 }
 0x515   : > { %v4012_v35 = vpop.f32.mrf.mxu0 }
 0x516   : > { %v4042_v30 = vadd.f32 %v4012_v35, %v3945_v1  ;;  %v4112_v60 = vpop.f32.mrf.mxu1  ;;  %v3948_v7 = vadd.f32 %v3923_v40, %v3840_v41  ;;  %v4614_v35 = vld [vmem:[#allocation2 + $0x1a0] sm:$0xff] }
 0x518   : > { %6946 = vmatmul.msk.bf16.gmra.mxu3 %vm609_vm3, %v8774_v52  ;;  %v8779_v49 = vadd.f32 %v4109_v2, %v4042_v30 }
 0x519   : > { %6958 = vmatmul.msk.bf16.gmra.mxu1 %vm609_vm3, %v4456_v17  ;;  %v4451_v17 = vld [vmem:[#allocation2 + $0x1c6] sm:$0xff] }
 0x51b   : > { %v3841_v4 = vpop.f32.mrf.mxu2  ;;  %v3928_v44 = vpop.f32.mrf.mxu3 }
 0x51c   : > { %v3842_v46 = vadd.f32 %v3841_v4, %v8637_v45 }
 0x51d   : > { %v4015_v15 = vpop.f32.mrf.mxu0 }
 0x51e   : > { %v4043_v1 = vadd.f32 %v4015_v15, %v3946_v54  ;;  %v4114_v16 = vpop.f32.mrf.mxu1  ;;  %v3949_v21 = vadd.f32 %v3925_v6, %v3842_v46 }
 0x520   : > { %6939 = vmatmul.msk.bf16.gmra.mxu2 %vm609_vm3, %v4167_v27  ;;  %6951 = vmatmul.msk.bf16.gmra.mxu0 %vm609_vm3, %v4359_v55  ;;  %v8785_v32 = vadd.f32 %v4112_v60, %v4043_v1  ;;  %v4450_v60 = vld [vmem:[#allocation2 + $0x1be] sm:$0xff] }
 0x521   : > { %v4458_v14 = vpack.c.bf16 %v4451_v17, %v4450_v60  ;;  %v4353_v55 = vld [vmem:[#allocation2 + $0x1bd] sm:$0xff] }
 0x522   : > { %v4637_v60 = vld [vmem:[#allocation2 + $0x1b9] sm:$0xff] }
 0x523   : > { %v3844_v62 = vpop.f32.mrf.mxu2  ;;  %v3930_v22 = vpop.f32.mrf.mxu3 }
 0x524   : > { %v3845_v45 = vadd.f32 %v3844_v62, %v8650_v48  ;;  %v4354_v62 = vld [vmem:[#allocation2 + $0x1c5] sm:$0xff] }
 0x525   : > { %v4017_v54 = vpop.f32.mrf.mxu0 }
 0x526   : > { %v4044_v61 = vadd.f32 %v4017_v54, %v3947_v26  ;;  %v4117_v40 = vpop.f32.mrf.mxu1  ;;  %v3950_v13 = vadd.f32 %v3928_v44, %v3845_v45  ;;  %v4361_v54 = vpack.c.bf16 %v4354_v62, %v4353_v55  ;;  %v4879_v62 = vld [vmem:[#allocation2 + $0x1ba] sm:$0xff] }
 0x528   : > { %6947 = vmatmul.msk.bf16.gmra.mxu3 %vm609_vm3, %v4265_v9  ;;  %v8794_v20 = vadd.f32 %v4114_v16, %v4044_v61  ;;  %v4634_v16 = vld [vmem:[#allocation2 + $0x1a1] sm:$0xff] }
 0x529   : > { %6959 = vmatmul.msk.bf16.gmra.mxu1 %vm609_vm3, %v4457_v33  ;;  %v8818_v9 = vld [vmem:[%s9601_s3 + $0x88] sm:$0xff]  ;;  %v4616_v33 = vld [vmem:[#allocation2 + $0x1b0] sm:$0xff] }
 0x52b   : > { %v3846_v2 = vpop.f32.mrf.mxu2  ;;  %v3933_v58 = vpop.f32.mrf.mxu3 }
 0x52c   : > { %v3847_v48 = vadd.f32 %v3846_v2, %v8663_v24  ;;  %v4615_v24 = vld [vmem:[#allocation2 + $0x1a8] sm:$0xff] }
 0x52d   : > { %v4020_v0 = vpop.f32.mrf.mxu0  ;;  %v4627_v44 = vpack.c.bf16 %v4615_v24, %v4614_v35  ;;  %v4355_v35 = vld [vmem:[#allocation2 + $0x1cd] sm:$0xff] }
 0x52e   : > { %v4045_v26 = vadd.f32 %v4020_v0, %v3948_v7  ;;  %v4119_v25 = vpop.f32.mrf.mxu1  ;;  %v3951_v41 = vadd.f32 %v3930_v22, %v3847_v48  ;;  %v8825_v48 = vld [vmem:[%s9601_s3 + $0x80] sm:$0xff] }
 0x530   : > { %6940 = vmatmul.msk.bf16.gmra.mxu2 %vm609_vm3, %v4168_v50  ;;  %6952 = vmatmul.msk.bf16.gmra.mxu0 %vm609_vm3, %v4360_v23  ;;  %v8801_v6 = vadd.f32 %v4117_v40, %v4045_v26 }
 0x533   : > { %v3849_v30 = vpop.f32.mrf.mxu2  ;;  %v3935_v7 = vpop.f32.mrf.mxu3 }
 0x534   : > { %v3850_v4 = vadd.f32 %v3849_v30, %v8691_v12  ;;  %v4635_v12 = vld [vmem:[#allocation2 + $0x1a9] sm:$0xff]  ;;  %v4636_v30 = vld [vmem:[#allocation2 + $0x1b1] sm:$0xff] }
 0x535   : > { %v4022_v56 = vpop.f32.mrf.mxu0  ;;  %v4647_v61 = vpack.c.bf16 %v4635_v12, %v4634_v16  ;;  %v8836_v16 = vld [vmem:[#allocation2 + $0x1c2] sm:$0xff] }
 0x536   : > { %v4046_v43 = vadd.f32 %v4022_v56, %v3949_v21  ;;  %v4122_v46 = vpop.f32.mrf.mxu1  ;;  %v3952_v15 = vadd.f32 %v3933_v58, %v3850_v4  ;;  %v4362_v56 = vpack.c.bf16 %v4355_v35, %v4355_v35 }
 0x538   : > { %6969 = vmatmul.msk.bf16.vlgmr.msra.gmra.mxu3 %vm609_vm3, %v4627_v44  ;;  %v8806_v1 = vadd.f32 %v4119_v25, %v4046_v43  ;;  %v4619_v44 = vld [vmem:[#allocation2 + $0x1c8] sm:$0xff] }
 0x539   : > { %6960 = vmatmul.msk.bf16.gmra.mxu1 %vm609_vm3, %v4458_v14  ;;  %5605 = vmatpush.bf16.msra.mxu3 %v8460_v28  ;;  %v4618_v14 = vld [vmem:[#allocation2 + $0x1c0] sm:$0xff] }
 0x53b   : > { %v3851_v27 = vpop.f32.mrf.mxu2  ;;  %v3938_v21 = vpop.f32.mrf.mxu3 }
 0x53c   : > { %v3852_v42 = vadd.f32 %v3851_v27, %v8705_v51 }
 0x53d   : > { %v4025_v39 = vpop.f32.mrf.mxu0  ;;  %5606 = vmatpush.bf16.msra.mxu3 %v8469_v34  ;;  %v4452_v34 = vld [vmem:[#allocation2 + $0x1ce] sm:$0xff] }
 0x53e   : > { %v4047_v45 = vadd.f32 %v4025_v39, %v3950_v13  ;;  %v4124_v22 = vpop.f32.mrf.mxu1  ;;  %v3953_v40 = vadd.f32 %v3935_v7, %v3852_v42  ;;  %v4617_v13 = vld [vmem:[#allocation2 + $0x1b8] sm:$0xff]  ;;  %v4459_v26 = vpack.c.bf16 %v4452_v34, %v4452_v34  ;;  %v4629_v42 = vpack.c.bf16 %v4619_v44, %v4618_v14 }
 0x53f   : > { %v4628_v25 = vpack.c.bf16 %v4617_v13, %v4616_v33 }
 0x540   : > { %6953 = vmatmul.msk.bf16.gmra.mxu0 %vm609_vm3, %v4361_v54  ;;  %6962 = vmatmul.msk.bf16.vlgmr.msra.gmra.mxu2 %vm609_vm3, %v4647_v61  ;;  %v8813_v28 = vadd.f32 %v4122_v46, %v4047_v45  ;;  %v4639_v54 = vld [vmem:[#allocation2 + $0x1c9] sm:$0xff] }
 0x541   : > { %5411 = vmatpush.bf16.msra.mxu2 %v8818_v9 }
 0x543   : > { %v3854_v51 = vpop.f32.mrf.mxu2  ;;  %v3940_v18 = vpop.f32.mrf.mxu3 }
 0x544   : > { %v3855_v2 = vadd.f32 %v3854_v51, %v8717_v38  ;;  %v4620_v18 = vld [vmem:[#allocation2 + $0x1d0] sm:$0xff] }
 0x545   : > { %v4027_v19 = vpop.f32.mrf.mxu0  ;;  %5412 = vmatpush.bf16.msra.mxu2 %v8825_v48 }
 0x546   : > { %v4048_v58 = vadd.f32 %v4027_v19, %v3951_v41  ;;  %v4127_v0 = vpop.f32.mrf.mxu1  ;;  %v3954_v50 = vadd.f32 %v3938_v21, %v3855_v2  ;;  %v4648_v41 = vpack.c.bf16 %v4637_v60, %v4636_v30  ;;  %v4892_v21 = vpack.c.bf16 %v8836_v16, %v4879_v62  ;;  %v4621_v19 = vld [vmem:[#allocation2 + $0x1d8] sm:$0xff] }
 0x547   : > { %v4640_v60 = vld [vmem:[#allocation2 + $0x1d1] sm:$0xff] }
 0x548   : > { %6970 = vmatmul.msk.bf16.gmra.mxu3 %vm609_vm3, %v4628_v25  ;;  %v8830_v23 = vadd.f32 %v4124_v22, %v4048_v58  ;;  %v4638_v22 = vld [vmem:[#allocation2 + $0x1c1] sm:$0xff]  ;;  %v8857_v58 = vld [vmem:[#allocation2 + $0x1d2] sm:$0xff] }
 0x549   : > { %6961 = vmatmul.msk.bf16.gmra.mxu1 %vm609_vm3, %v4459_v26  ;;  %v4649_v33 = vpack.c.bf16 %v4639_v54, %v4638_v22  ;;  %v8861_v26 = vld [vmem:[#allocation2 + $0x1ca] sm:$0xff]  ;;  %v8882_v54 = vld [vmem:[#allocation2 + $0x1e2] sm:$0xff] }
 0x54a   : > { %v4623_v22 = vld [vmem:[#allocation2 + $0x1e8] sm:$0xff] }
 0x54b   : > { %v3856_v38 = vpop.f32.mrf.mxu2  ;;  %v4296_v17 = vpop.f32.mrf.mxu3 }
 0x54c   : > { %v4893_v38 = vpack.c.bf16 %v8857_v58, %v8861_v26 }
 0x54d   : > { %v4030_v24 = vpop.f32.mrf.mxu0 }
 0x54e   : > { %v4049_v4 = vadd.f32 %v4030_v24, %v3952_v15  ;;  %v4129_v7 = vpop.f32.mrf.mxu1  ;;  %v4641_v24 = vld [vmem:[#allocation2 + $0x1d9] sm:$0xff] }
 0x54f   : > { %v4650_v44 = vpack.c.bf16 %v4641_v24, %v4640_v60 }
 0x550   : > { %6954 = vmatmul.msk.bf16.gmra.mxu0 %vm609_vm3, %v4362_v56  ;;  %6963 = vmatmul.msk.bf16.gmra.mxu2 %vm609_vm3, %v4648_v41  ;;  %v8834_v43 = vadd.f32 %v4127_v0, %v4049_v4 }
 0x553   : > { %v4199_v46 = vpop.f32.mrf.mxu2  ;;  %v8838_v27 = vpop.f32.mrf.mxu3 }
 0x554   : > { %v4233_v35 = vadd.f32 %v4199_v46, %v8757_v47  ;;  %v8878_v46 = vld [vmem:[#allocation3] ss:$4 sm:$0x3f] }
 0x555   : > { %v4032_v55 = vpop.f32.mrf.mxu0 }
 0x556   : > { %v4050_v12 = vadd.f32 %v4032_v55, %v3953_v40  ;;  %v4132_v15 = vpop.f32.mrf.mxu1  ;;  %v4796_v55 = vpack.c.bf16 %v4879_v62, %v8699_v53 }
 0x558   : > { %6971 = vmatmul.msk.bf16.gmra.mxu3 %vm609_vm3, %v4629_v42  ;;  %v8843_v39 = vadd.f32 %v4129_v7, %v4050_v12  ;;  %v4330_v7 = vadd.f32 %v4296_v17, %v4233_v35  ;;  %v8880_v42 = vld [vmem:[#allocation3 + $0x1] ss:$4 sm:$0x3f] }
 0x559   : > { %6983 = vmatmul.msk.bf16.vlgmr.msra.gmra.mxu1 %vm609_vm3, %v4892_v21  ;;  %v4622_v21 = vld [vmem:[#allocation2 + $0x1e0] sm:$0xff] }
 0x55a   : > { %5753 = vmatpush.bf16.msra.mxu1 %v8530_v31  ;;  %v7238_v31 = vld [vmem:[%s9601_s3 + $0x8] sm:$0xff] }
 0x55b   : > { %v4201_v45 = vpop.f32.mrf.mxu2  ;;  %v8846_v61 = vpop.f32.mrf.mxu3 }
 0x55c   : > { %v4234_v12 = vadd.f32 %v4201_v45, %v8765_v11  ;;  %v8889_v45 = vld [vmem:[#allocation3 + $0x3] ss:$4 sm:$0x3f] }
 0x55d   : > { %v4035_v51 = vpop.f32.mrf.mxu0 }
 0x55e   : > { %5754 = vmatpush.bf16.msra.mxu1 %v8551_v57  ;;  %v4051_v40 = vadd.f32 %v4035_v51, %v3954_v50  ;;  %v4134_v34 = vpop.f32.mrf.mxu1  ;;  %v4630_v50 = vpack.c.bf16 %v4621_v19, %v4620_v18  ;;  %v8884_v51 = vld [vmem:[#allocation3 + $0x2] ss:$4 sm:$0x3f]  ;;  %v4331_v62 = vadd.f32 %v8838_v27, %v4234_v12  ;;  %v4631_v18 = vpack.c.bf16 %v4623_v22, %v4622_v21 }
 0x55f   : > { %v8891_v34 = vld [vmem:[#allocation2 + $0x1da] sm:$0xff] }
 0x560   : > { %6964 = vmatmul.msk.bf16.gmra.mxu2 %vm609_vm3, %v4649_v33  ;;  %6976 = vmatmul.msk.bf16.vlgmr.msra.gmra.mxu0 %vm609_vm3, %v8665_v59  ;;  %v8852_v13 = vadd.f32 %v4132_v15, %v4051_v40  ;;  %v7239_v59 = vld [vmem:[%s9601_s3] sm:$0xff]  ;;  %v4894_v19 = vpack.c.bf16 %v8882_v54, %v8891_v34 }
 0x561   : > { %5669 = vmatpush.bf16.msra.mxu0 %v7238_v31 }
 0x563   : > { %v4204_v2 = vpop.f32.mrf.mxu2  ;;  %v8859_v57 = vpop.f32.mrf.mxu3 }
 0x565   : > { %v4037_v0 = vpop.f32.mrf.mxu0  ;;  %5670 = vmatpush.bf16.msra.mxu0 %v7239_v59 }
 0x566   : > { %v4490_v25 = vpop.f32.mrf.mxu1  ;;  %v4235_v0 = vadd.f32 %v4204_v2, %v8771_v63 }
 0x568   : > { %6972 = vmatmul.msk.bf16.gmra.mxu3 %vm609_vm3, %v4630_v50  ;;  %v4642_v50 = vld [vmem:[#allocation2 + $0x1e1] sm:$0xff]  ;;  %v4332_v24 = vadd.f32 %v8846_v61, %v4235_v0  ;;  %v4624_v61 = vld [vmem:[#allocation2 + $0x1f0] sm:$0xff] }
 0x569   : > { %6984 = vmatmul.msk.bf16.gmra.mxu1 %vm609_vm3, %v4893_v38  ;;  %v4643_v38 = vld [vmem:[#allocation2 + $0x1e9] sm:$0xff]  ;;  %v4644_v0 = vld [vmem:[#allocation2 + $0x1f1] sm:$0xff] }
 0x56a   : > { %v4651_v2 = vpack.c.bf16 %v4643_v38, %v4642_v50 }
 0x56b   : > { %v4206_v30 = vpop.f32.mrf.mxu2  ;;  %v8871_v4 = vpop.f32.mrf.mxu3 }
 0x56d   : > { %v4393_v56 = vpop.f32.mrf.mxu0 }
 0x56e   : > { %v4427_v41 = vadd.f32 %v4393_v56, %v4330_v7  ;;  %v4492_v14 = vpop.f32.mrf.mxu1 }
 0x570   : > { %v4524_v15 = vadd.f32 %v4490_v25, %v4427_v41  ;;  %6965 = vmatmul.msk.bf16.gmra.mxu2 %vm609_vm3, %v4650_v44  ;;  %6977 = vmatmul.msk.bf16.gmra.mxu0 %vm609_vm3, %v4796_v55  ;;  %v4797_v41 = vpack.c.bf16 %v8861_v26, %v8836_v16  ;;  %v8915_v26 = vld [vmem:[#allocation2 + $0x1ea] sm:$0xff] }
 0x572   : > { %v4537_v47 = vadd.f32 %v8570_v3, %v4524_v15  ;;  %v4625_v15 = vld [vmem:[#allocation2 + $0x1f8] sm:$0xff] }
 0x573   : > { %v4209_v17 = vpop.f32.mrf.mxu2  ;;  %v8886_v11 = vpop.f32.mrf.mxu3 }
 0x574   : > { %v4550_v53 = vmax.f32 %v4537_v47, 0.0  ;;  %v8910_v47 = vld [vmem:[#allocation2 + $0x1f2] sm:$0xff] }
 0x575   : > { %v4395_v40 = vpop.f32.mrf.mxu0 }
 0x576   : > { %4563 = vst.msk [vmem:[#allocation3] sm:$0xff] %vm1775_vm4, %v4550_v53  ;;  %v4428_v33 = vadd.f32 %v4395_v40, %v4331_v62  ;;  %v4495_v31 = vpop.f32.mrf.mxu1  ;;  %v4632_v62 = vpack.c.bf16 %v4625_v15, %v4624_v61  ;;  %v4895_v40 = vpack.c.bf16 %v8910_v47, %v8915_v26  ;;  %v8944_v61 = vld [vmem:[#allocation2 + $0x202] sm:$0xff] }
 0x578   : > { %v4525_v59 = vadd.f32 %v4492_v14, %v4428_v33  ;;  %6973 = vmatmul.msk.bf16.gmra.mxu3 %vm609_vm3, %v4631_v18  ;;  %v4236_v14 = vadd.f32 %v4206_v30, %v8779_v49  ;;  %v4237_v33 = vadd.f32 %v4209_v17, %v8785_v32  ;;  %v8924_v18 = vld [vmem:[#allocation3 + $0x1a] ss:$4 sm:$0x3f]  ;;  %v8931_v17 = vld [vmem:[#allocation3 + $0x1c] ss:$4 sm:$0x3f] }
 0x579   : > { %6985 = vmatmul.msk.bf16.gmra.mxu1 %vm609_vm3, %v4894_v19 }
 0x57a   : > { %v4538_v27 = vadd.f32 %v8570_v3, %v4525_v59  ;;  %v4333_v53 = vadd.f32 %v8859_v57, %v4236_v14  ;;  %v4645_v59 = vld [vmem:[#allocation2 + $0x1f9] sm:$0xff] }
 0x57b   : > { %v4211_v25 = vpop.f32.mrf.mxu2  ;;  %v8900_v60 = vpop.f32.mrf.mxu3 }
 0x57c   : > { %v4551_v35 = vmax.f32 %v4538_v27, 0.0  ;;  %v8926_v27 = vld [vmem:[#allocation3 + $0x1b] ss:$4 sm:$0x3f] }
 0x57d   : > { %v4398_v7 = vpop.f32.mrf.mxu0 }
 0x57e   : > { %4564 = vst.msk [vmem:[#allocation3 + $0x8] sm:$0xff] %vm1775_vm4, %v4551_v35  ;;  %v4429_v56 = vadd.f32 %v4398_v7, %v4332_v24  ;;  %v4497_v63 = vpop.f32.mrf.mxu1  ;;  %v4334_v35 = vadd.f32 %v8871_v4, %v4237_v33  ;;  %v8933_v24 = vld [vmem:[#allocation3 + $0x1d] ss:$4 sm:$0x3f]  ;;  %v8941_v4 = vld [vmem:[#allocation4] ss:$0 sm:$0xff] }
 0x57f   : > { %v4646_v33 = vld [vmem:[#allocation2 + $0x201] sm:$0xff] }
 0x580   : > { %v4526_v44 = vadd.f32 %v4495_v31, %v4429_v56  ;;  %6966 = vmatmul.msk.bf16.gmra.mxu2 %vm609_vm3, %v4651_v2  ;;  %6978 = vmatmul.msk.bf16.gmra.mxu0 %vm609_vm3, %v4797_v41  ;;  %v4238_v2 = vadd.f32 %v4211_v25, %v8794_v20  ;;  %v8949_v20 = vld [vmem:[#allocation2 + $0x1fa] sm:$0xff] }
 0x582   : > { %v4539_v55 = vadd.f32 %v8570_v3, %v4526_v44 }
 0x583   : > { %v4214_v12 = vpop.f32.mrf.mxu2  ;;  %v8912_v22 = vpop.f32.mrf.mxu3 }
 0x584   : > { %v4552_v21 = vmax.f32 %v4539_v55, 0.0  ;;  %v4626_v55 = vld [vmem:[#allocation2 + $0x200] sm:$0xff] }
 0x585   : > { %v4400_v16 = vpop.f32.mrf.mxu0 }
 0x586   : > { %4565 = vst.msk [vmem:[#allocation3 + $0x10] sm:$0xff] %vm1775_vm4, %v4552_v21  ;;  %v4430_v49 = vadd.f32 %v4400_v16, %v4333_v53  ;;  %v4500_v30 = vpop.f32.mrf.mxu1  ;;  %v4633_v16 = vpack.c.bf16 %v4626_v55, %v4626_v55  ;;  %v3679_v55 = vld [vmem:[#allocation3 + $0x37] ss:$4 sm:$0x3f] }
 0x588   : > { %v4527_v31 = vadd.f32 %v4497_v63, %v4430_v49  ;;  %6974 = vmatmul.msk.bf16.gmra.mxu3 %vm609_vm3, %v4632_v62  ;;  %v4798_v63 = vpack.c.bf16 %v8891_v34, %v8857_v58  ;;  %v4335_v58 = vadd.f32 %v8886_v11, %v4238_v2  ;;  %v4896_v49 = vpack.c.bf16 %v8944_v61, %v8949_v20  ;;  %v8970_v2 = vld [vmem:[#allocation3 + $0x34] ss:$4 sm:$0x3f] }
 0x589   : > { %6986 = vmatmul.msk.bf16.gmra.mxu1 %vm609_vm3, %v4895_v40 }
 0x58a   : > { %v4540_v57 = vadd.f32 %v8570_v3, %v4527_v31  ;;  %v4652_v3 = vpack.c.bf16 %v4645_v59, %v4644_v0 }
 0x58b   : > { %v4216_v19 = vpop.f32.mrf.mxu2  ;;  %v8928_v38 = vpop.f32.mrf.mxu3 }
 0x58c   : > { %v4553_v50 = vmax.f32 %v4540_v57, 0.0 }
 0x58d   : > { %v4403_v32 = vpop.f32.mrf.mxu0 }
 0x58e   : > { %v4431_v7 = vadd.f32 %v4403_v32, %v4334_v35  ;;  %v4502_v56 = vpop.f32.mrf.mxu1  ;;  %4566 = vst.msk [vmem:[#allocation3 + $0x18] sm:$0xff] %vm1775_vm4, %v4553_v50  ;;  %v4653_v32 = vpack.c.bf16 %v4646_v33, %v4646_v33 }
 0x590   : > { %v4528_v41 = vadd.f32 %v4500_v30, %v4431_v7  ;;  %6967 = vmatmul.msk.bf16.gmra.mxu2 %vm609_vm3, %v4652_v3  ;;  %6979 = vmatmul.msk.bf16.gmra.mxu0 %vm609_vm3, %v4798_v63  ;;  %v4239_v30 = vadd.f32 %v4214_v12, %v8801_v6  ;;  %v4799_v6 = vpack.c.bf16 %v8915_v26, %v8882_v54  ;;  %v4890_v63 = vld [vmem:[#allocation2 + $0x212] sm:$0xff]  ;;  %v8975_v26 = vld [vmem:[#allocation3 + $0x35] ss:$4 sm:$0x3f] }
 0x591   : > { %v4240_v12 = vadd.f32 %v4216_v19, %v8806_v1  ;;  %v3678_v19 = vld [vmem:[#allocation3 + $0x36] ss:$4 sm:$0x3f] }
 0x592   : > { %v4541_v14 = vadd.f32 %v8941_v4, %v4528_v41  ;;  %v4336_v0 = vadd.f32 %v8900_v60, %v4239_v30  ;;  %v4889_v60 = vld [vmem:[#allocation2 + $0x20a] sm:$0xff]  ;;  %v4976_v30 = vld [vmem:[#allocation2 + $0x1bb] sm:$0xff] }
 0x593   : > { %v4219_v44 = vpop.f32.mrf.mxu2  ;;  %v8946_v21 = vpop.f32.mrf.mxu3  ;;  %v4337_v54 = vadd.f32 %v8912_v22, %v4240_v12  ;;  %v3681_v22 = vld [vmem:[#allocation3 + $0x50] ss:$4 sm:$0x3f] }
 0x594   : > { %v4554_v15 = vmax.f32 %v4541_v14, 0.0 }
 0x595   : > { %v4405_v34 = vpop.f32.mrf.mxu0 }
 0x596   : > { %v4432_v25 = vadd.f32 %v4405_v34, %v4335_v58  ;;  %v4505_v53 = vpop.f32.mrf.mxu1  ;;  %4567 = vst.msk [vmem:[#allocation3 + $0x20] sm:$0xff] %vm1775_vm4, %v4554_v15  ;;  %v8977_v34 = vpack.c.bf16 %v4890_v63, %v4889_v60 }
 0x598   : > { %v4529_v62 = vadd.f32 %v4502_v56, %v4432_v25  ;;  %6975 = vmatmul.msk.bf16.gmra.mxu3 %vm609_vm3, %v4633_v16  ;;  %v4241_v25 = vadd.f32 %v4219_v44, %v8813_v28  ;;  %v3682_v16 = vld [vmem:[#allocation3 + $0x51] ss:$4 sm:$0x3f]  ;;  %v4584_v28 = vld [vmem:[#allocation3 + $0x3] ss:$4 sm:$0x3f] }
 0x599   : > { %6987 = vmatmul.msk.bf16.gmra.mxu1 %vm609_vm3, %v4896_v49  ;;  %v3683_v33 = vmax.f32 %v3681_v22, %v3682_v16 }
 0x59a   : > { %v4542_v11 = vadd.f32 %v8941_v4, %v4529_v62  ;;  %v4977_v62 = vld [vmem:[#allocation2 + $0x1c3] sm:$0xff] }
 0x59b   : > { %v4221_v40 = vpop.f32.mrf.mxu2  ;;  %v8958_v57 = vpop.f32.mrf.mxu3 }
 0x59c   : > { %v4555_v31 = vmax.f32 %v4542_v11, 0.0 }
 0x59d   : > { %v4408_v59 = vpop.f32.mrf.mxu0 }
 0x59e   : > { %v4433_v50 = vadd.f32 %v4408_v59, %v4336_v0  ;;  %v4507_v35 = vpop.f32.mrf.mxu1  ;;  %4568 = vst.msk [vmem:[#allocation3 + $0x28] sm:$0xff] %vm1775_vm4, %v4555_v31  ;;  %v4583_v31 = vld [vmem:[#allocation3 + $0x2] ss:$4 sm:$0x3f]  ;;  %v4338_v59 = vadd.f32 %v8928_v38, %v4241_v25 }
 0x5a0   : > { %v4530_v7 = vadd.f32 %v4505_v53, %v4433_v50  ;;  %6968 = vmatmul.msk.bf16.gmra.mxu2 %vm609_vm3, %v4653_v32  ;;  %6980 = vmatmul.msk.bf16.gmra.mxu0 %vm609_vm3, %v4799_v6 }
 0x5a2   : > { %v4543_v56 = vadd.f32 %v8941_v4, %v4530_v7  ;;  %v4800_v7 = vpack.c.bf16 %v8949_v20, %v8910_v47 }
 0x5a3   : > { %v8968_v3 = vpop.f32.mrf.mxu2  ;;  %v8972_v14 = vpop.f32.mrf.mxu3 }
 0x5a4   : > { %v4556_v41 = vmax.f32 %v4543_v56, 0.0  ;;  %v4585_v56 = vmax.f32 %v4583_v31, %v4584_v28  ;;  %v4978_v31 = vld [vmem:[#allocation2 + $0x1cb] sm:$0xff]  ;;  %v4979_v28 = vld [vmem:[#allocation2 + $0x1d3] sm:$0xff] }
 0x5a5   : > { %v4410_v1 = vpop.f32.mrf.mxu0 }
 0x5a6   : > { %v4434_v15 = vadd.f32 %v4410_v1, %v4337_v54  ;;  %v4510_v58 = vpop.f32.mrf.mxu1  ;;  %4569 = vst.msk [vmem:[#allocation3 + $0x30] sm:$0xff] %vm1775_vm4, %v4556_v41  ;;  %v4242_v41 = vadd.f32 %v4221_v40, %v8830_v23  ;;  %v8999_v1 = vld [vmem:[#allocation2 + $0x21a] sm:$0xff] }
 0x5a8   : > { %v4531_v53 = vadd.f32 %v4507_v35, %v4434_v15  ;;  %6997 = vmatmul.msk.bf16.vlgmr.msrb.gmra.mxu3 %vm609_vm3, %v8774_v52  ;;  %v4989_v52 = vpack.c.bf16 %v4977_v62, %v4976_v30  ;;  %v3680_v35 = vmax.f32 %v3678_v19, %v3679_v55  ;;  %v9005_v55 = vld [vmem:[#allocation2 + $0x1d4] sm:$0xff]  ;;  %v4339_v15 = vadd.f32 %v8946_v21, %v4242_v41 }
 0x5a9   : > { %6988 = vmatmul.msk.bf16.gmra.mxu1 %vm609_vm3, %v8977_v34  ;;  %5947 = vmatpush.bf16.msrb.mxu3 %v8676_v37  ;;  %v4243_v30 = vadd.f32 %v8968_v3, %v8834_v43 }
 0x5aa   : > { %v4544_v49 = vadd.f32 %v8941_v4, %v4531_v53  ;;  %v3684_v63 = vmax.f32 %v3680_v35, %v3683_v33  ;;  %v7242_v53 = vld [vmem:[%s9601_s3 + $0x30] sm:$0xff] }
 0x5ab   : > { %v8987_v11 = vpop.f32.mrf.mxu2  ;;  %v8989_v0 = vpop.f32.mrf.mxu3  ;;  %v9023_v35 = vld [vmem:[#allocation3 + $0x4e] ss:$4 sm:$0x3f] }
 0x5ac   : > { %v4557_v44 = vmax.f32 %v4544_v49, 0.0  ;;  %v5087_v49 = vpack.c.bf16 %v9005_v55, %v8787_v36  ;;  %v9025_v36 = vld [vmem:[#allocation3 + $0x4f] ss:$4 sm:$0x3f] }
 0x5ad   : > { %v4413_v50 = vpop.f32.mrf.mxu0  ;;  %v4586_v32 = vld [vmem:[#allocation3 + $0x1c] ss:$4 sm:$0x3f]  ;;  %v4587_v6 = vld [vmem:[#allocation3 + $0x1d] ss:$4 sm:$0x3f]  ;;  %5948 = vmatpush.bf16.msrb.mxu3 %v8688_v29 }
 0x5ae   : > { %v4435_v37 = vadd.f32 %v4413_v50, %v4338_v59  ;;  %v4512_v12 = vpop.f32.mrf.mxu1  ;;  %v4588_v60 = vmax.f32 %v4586_v32, %v4587_v6  ;;  %4570 = vst.msk [vmem:[#allocation3 + $0x38] sm:$0xff] %vm1775_vm4, %v4557_v44  ;;  %v7241_v29 = vld [vmem:[%s9601_s3 + $0x38] sm:$0xff]  ;;  %v4340_v50 = vadd.f32 %v8958_v57, %v4243_v30  ;;  %v4801_v32 = vpack.c.bf16 %v8944_v61, %v8944_v61 }
 0x5af   : > { %v4990_v6 = vpack.c.bf16 %v4979_v28, %v4978_v31  ;;  %v7243_v31 = vld [vmem:[%s9601_s3 + $0x58] sm:$0xff] }
 0x5b0   : > { %v4532_v38 = vadd.f32 %v4510_v58, %v4435_v37  ;;  %6981 = vmatmul.msk.bf16.gmra.mxu0 %vm609_vm3, %v4800_v7  ;;  %6990 = vmatmul.msk.bf16.vlgmr.msrb.gmra.mxu2 %vm609_vm3, %v4989_v52  ;;  %v4589_v54 = vmax.f32 %v4585_v56, %v4588_v60  ;;  %v4898_v58 = vpack.c.bf16 %v8999_v1, %v8999_v1  ;;  %v9035_v56 = vld [vmem:[#allocation2 + $0x1e4] sm:$0xff]  ;;  %v5267_v60 = vld [vmem:[#allocation2 + $0x1d5] sm:$0xff] }
 0x5b1   : > { %5850 = vmatpush.bf16.msrb.mxu2 %v7241_v29  ;;  %v4244_v37 = vadd.f32 %v8987_v11, %v8843_v39  ;;  %v5080_v28 = vld [vmem:[#allocation2 + $0x1f4] sm:$0xff] }
 0x5b2   : > { %v4545_v47 = vadd.f32 %v8941_v4, %v4532_v38  ;;  %v7180_v20 = vpack.i.bf16 %v4589_v54, %v3684_v63  ;;  %v5268_v63 = vld [vmem:[#allocation2 + $0x1dd] sm:$0xff] }
 0x5b3   : > { %v4229_v19 = vpop.f32.mrf.mxu2  ;;  %v4328_v40 = vpop.f32.mrf.mxu3  ;;  %v4341_v54 = vadd.f32 %v8972_v14, %v4244_v37 }
 0x5b4   : > { %v4558_v23 = vmax.f32 %v4545_v47, 0.0  ;;  %7181 = vrot.lane.b32.xlu1 %v7180_v20, %s7294_s7  ;;  %v5077_v47 = vld [vmem:[#allocation2 + $0x1dc] sm:$0xff]  ;;  %v4245_v40 = vadd.f32 %v4229_v19, %v8852_v13 }
 0x5b5   : > { %v4415_v25 = vpop.f32.mrf.mxu0  ;;  %5851 = vmatpush.bf16.msrb.mxu2 %v7242_v53  ;;  %v5088_v20 = vpack.c.bf16 %v9035_v56, %v5077_v47  ;;  %v4981_v53 = vld [vmem:[#allocation2 + $0x1e3] sm:$0xff] }
 0x5b6   : > { %4571 = vst.msk [vmem:[#allocation3 + $0x40] sm:$0xff] %vm1775_vm4, %v4558_v23  ;;  %v4436_v22 = vadd.f32 %v4415_v25, %v4339_v15  ;;  %v4515_v16 = vpop.f32.mrf.mxu1  ;;  %v5280_v23 = vpack.c.bf16 %v5268_v63, %v5267_v60  ;;  %v4980_v25 = vld [vmem:[#allocation2 + $0x1db] sm:$0xff]  ;;  %v4342_v30 = vadd.f32 %v8989_v0, %v4245_v40 }
 0x5b7   : > { %v5271_v40 = vld [vmem:[#allocation2 + $0x1f5] sm:$0xff] }
 0x5b8   : > { %v4533_v21 = vadd.f32 %v4512_v12, %v4436_v22  ;;  %6998 = vmatmul.msk.bf16.gmra.mxu3 %vm609_vm3, %v5087_v49 }
 0x5b9   : > { %6989 = vmatmul.msk.bf16.gmra.mxu1 %vm609_vm3, %v4898_v58 }
 0x5ba   : > { %v4546_v62 = vadd.f32 %v8941_v4, %v4533_v21 }
 0x5bb   : > { %v4231_v33 = vpop.f32.mrf.mxu2  ;;  %v4748_v59 = vpop.f32.mrf.mxu3 }
 0x5bc   : > { %v4559_v44 = vmax.f32 %v4546_v62, 0.0  ;;  %v4991_v62 = vpack.c.bf16 %v4981_v53, %v4980_v25  ;;  %v5183_v33 = vpack.c.bf16 %v5077_v47, %v9005_v55  ;;  %v5081_v25 = vld [vmem:[#allocation2 + $0x1fc] sm:$0xff] }
 0x5bd   : > { %v4418_v52 = vpop.f32.mrf.mxu0 }
 0x5be   : > { %v4437_v43 = vadd.f32 %v4418_v52, %v4340_v50  ;;  %v4517_v3 = vpop.f32.mrf.mxu1  ;;  %4572 = vst.msk [vmem:[#allocation3 + $0x48] sm:$0xff] %vm1775_vm4, %v4559_v44  ;;  %v5269_v44 = vld [vmem:[#allocation2 + $0x1e5] sm:$0xff] }
 0x5c0   : > { %v4534_v12 = vadd.f32 %v4515_v16, %v4437_v43  ;;  %6982 = vmatmul.msk.bf16.gmra.mxu0 %vm609_vm3, %v4801_v32  ;;  %6991 = vmatmul.msk.bf16.gmra.mxu2 %vm609_vm3, %v4990_v6  ;;  %v7244_v32 = vld [vmem:[%s9601_s3 + $0x50] sm:$0xff] }
 0x5c2   : > { %v4547_v57 = vadd.f32 %v8941_v4, %v4534_v12 }
 0x5c3   : > { %v4684_v7 = vpop.f32.mrf.mxu2  ;;  %v4750_v38 = vpop.f32.mrf.mxu3 }
 0x5c4   : > { %v4560_v41 = vmax.f32 %v4547_v57, 0.0  ;;  %v4749_v61 = vadd.f32 %v4748_v59, %v4684_v7  ;;  %v5270_v59 = vld [vmem:[#allocation2 + $0x1ed] sm:$0xff] }
 0x5c5   : > { %v4420_v29 = vpop.f32.mrf.mxu0  ;;  %v5281_v12 = vpack.c.bf16 %v5270_v59, %v5269_v44  ;;  %v4982_v57 = vld [vmem:[#allocation2 + $0x1eb] sm:$0xff]  ;;  %v4983_v7 = vld [vmem:[#allocation2 + $0x1f3] sm:$0xff]  ;;  %v5185_v44 = vpack.c.bf16 %v5081_v25, %v5080_v28 }
 0x5c6   : > { %v4438_v39 = vadd.f32 %v4420_v29, %v4341_v54  ;;  %v4520_v11 = vpop.f32.mrf.mxu1  ;;  %4573 = vst.msk [vmem:[#allocation3 + $0x50] sm:$0xff] %vm1775_vm4, %v4560_v41  ;;  %v4992_v29 = vpack.c.bf16 %v4983_v7, %v4982_v57 }
 0x5c8   : > { %v4535_v15 = vadd.f32 %v4517_v3, %v4438_v39  ;;  %6999 = vmatmul.msk.bf16.gmra.mxu3 %vm609_vm3, %v5088_v20  ;;  %v5079_v3 = vld [vmem:[#allocation2 + $0x1ec] sm:$0xff]  ;;  %v738_v39 = vpop.trf.xlu1 }
 0x5c9   : > { %7011 = vmatmul.msk.bf16.vlgmr.msrb.gmra.mxu1 %vm609_vm3, %v5280_v23  ;;  %v5089_v37 = vpack.c.bf16 %v5080_v28, %v5079_v3  ;;  %v5184_v47 = vpack.c.bf16 %v5079_v3, %v9035_v56  ;;  %786 = vst.msk [vmem:[#allocation2 + $0x280] sm:$0xff] %vm609_vm3, %v738_v39  ;;  %v5082_v23 = vld [vmem:[#allocation2 + $0x204] sm:$0xff] }
 0x5ca   : > { %6141 = vmatpush.bf16.msrb.mxu1 %v8737_v8  ;;  %v4548_v14 = vadd.f32 %v8941_v4, %v4535_v15  ;;  %v5272_v15 = vld [vmem:[#allocation2 + $0x1fd] sm:$0xff]  ;;  %v5090_v56 = vpack.c.bf16 %v5082_v23, %v5081_v25  ;;  %v5273_v3 = vld [vmem:[#allocation2 + $0x205] sm:$0xff] }
 0x5cb   : > { %v4686_v58 = vpop.f32.mrf.mxu2  ;;  %v4753_v49 = vpop.f32.mrf.mxu3 }
 0x5cc   : > { %v4561_v22 = vmax.f32 %v4548_v14, 0.0  ;;  %v4751_v16 = vadd.f32 %v4750_v38, %v4686_v58 }
 0x5cd   : > { %v4423_v21 = vpop.f32.mrf.mxu0 }
 0x5ce   : > { %6142 = vmatpush.bf16.msrb.mxu1 %v8747_v5  ;;  %v4439_v13 = vadd.f32 %v4423_v21, %v4342_v30  ;;  %v4522_v19 = vpop.f32.mrf.mxu1  ;;  %4574 = vst.msk [vmem:[#allocation3 + $0x58] sm:$0xff] %vm1775_vm4, %v4561_v22 }
 0x5cf   : > { %v4984_v19 = vld [vmem:[#allocation2 + $0x1fb] sm:$0xff] }
 0x5d0   : > { %v4536_v8 = vadd.f32 %v4520_v11, %v4439_v13  ;;  %6992 = vmatmul.msk.bf16.gmra.mxu2 %vm609_vm3, %v4991_v62  ;;  %7004 = vmatmul.msk.bf16.vlgmr.msrb.gmra.mxu0 %vm609_vm3, %v5183_v33  ;;  %v739_v30 = vpop.trf.xlu1  ;;  %v4985_v62 = vld [vmem:[#allocation2 + $0x203] sm:$0xff] }
 0x5d1   : > { %6044 = vmatpush.bf16.msrb.mxu0 %v7243_v31  ;;  %787 = vst.msk [vmem:[#allocation2 + $0x288] sm:$0xff] %vm609_vm3, %v739_v30 }
 0x5d2   : > { %v4549_v0 = vadd.f32 %v8941_v4, %v4536_v8 }
 0x5d3   : > { %v4689_v5 = vpop.f32.mrf.mxu2  ;;  %v4755_v52 = vpop.f32.mrf.mxu3 }
 0x5d4   : > { %v4562_v50 = vmax.f32 %v4549_v0, 0.0  ;;  %v4754_v55 = vadd.f32 %v4753_v49, %v4689_v5  ;;  %v5282_v49 = vpack.c.bf16 %v5272_v15, %v5271_v40  ;;  %v4993_v5 = vpack.c.bf16 %v4985_v62, %v4984_v19  ;;  %v5085_v19 = vld [vmem:[#allocation2 + $0x21c] sm:$0xff] }
 0x5d5   : > { %v4425_v43 = vpop.f32.mrf.mxu0  ;;  %6045 = vmatpush.bf16.msrb.mxu0 %v7244_v32  ;;  %v5274_v32 = vld [vmem:[#allocation2 + $0x20d] sm:$0xff] }
 0x5d6   : > { %v4929_v6 = vpop.f32.mrf.mxu1  ;;  %4575 = vst.msk [vmem:[#allocation3 + $0x60] sm:$0xff] %vm1775_vm4, %v4562_v50  ;;  %v5084_v43 = vld [vmem:[#allocation2 + $0x214] sm:$0xff]  ;;  %v5283_v7 = vpack.c.bf16 %v5274_v32, %v5273_v3 }
 0x5d8   : > { %7000 = vmatmul.msk.bf16.gmra.mxu3 %vm609_vm3, %v5089_v37  ;;  %v740_v59 = vpop.trf.xlu1 }
 0x5d9   : > { %7012 = vmatmul.msk.bf16.gmra.mxu1 %vm609_vm3, %v5281_v12  ;;  %788 = vst.msk [vmem:[#allocation2 + $0x290] sm:$0xff] %vm609_vm3, %v740_v59 }
 0x5db   : > { %v4691_v4 = vpop.f32.mrf.mxu2  ;;  %v4758_v63 = vpop.f32.mrf.mxu3 }
 0x5dc   : > { %v4756_v60 = vadd.f32 %v4755_v52, %v4691_v4 }
 0x5dd   : > { %v4832_v41 = vpop.f32.mrf.mxu0 }
 0x5de   : > { %v4866_v38 = vadd.f32 %v4832_v41, %v4749_v61  ;;  %v4931_v54 = vpop.f32.mrf.mxu1 }
 0x5e0   : > { %6993 = vmatmul.msk.bf16.gmra.mxu2 %vm609_vm3, %v4992_v29  ;;  %7005 = vmatmul.msk.bf16.gmra.mxu0 %vm609_vm3, %v5184_v47  ;;  %v9065_v11 = vadd.f32 %v4929_v6, %v4866_v38  ;;  %v4987_v29 = vld [vmem:[#allocation2 + $0x213] sm:$0xff] }
 0x5e3   : > { %v4694_v20 = vpop.f32.mrf.mxu2  ;;  %v4760_v58 = vpop.f32.mrf.mxu3 }
 0x5e4   : > { %v4759_v14 = vadd.f32 %v4758_v63, %v4694_v20  ;;  %v741_v63 = vpop.trf.xlu1 }
 0x5e5   : > { %v4834_v61 = vpop.f32.mrf.mxu0  ;;  %789 = vst.msk [vmem:[#allocation2 + $0x298] sm:$0xff] %vm609_vm3, %v741_v63 }
 0x5e6   : > { %v4867_v53 = vadd.f32 %v4834_v61, %v4751_v16  ;;  %v4934_v22 = vpop.f32.mrf.mxu1 }
 0x5e8   : > { %7001 = vmatmul.msk.bf16.gmra.mxu3 %vm609_vm3, %v5090_v56  ;;  %v9070_v21 = vadd.f32 %v4931_v54, %v4867_v53  ;;  %v4986_v54 = vld [vmem:[#allocation2 + $0x20b] sm:$0xff]  ;;  %v5276_v56 = vld [vmem:[#allocation2 + $0x21d] sm:$0xff] }
 0x5e9   : > { %7013 = vmatmul.msk.bf16.gmra.mxu1 %vm609_vm3, %v5282_v49  ;;  %v4994_v15 = vpack.c.bf16 %v4987_v29, %v4986_v54 }
 0x5eb   : > { %v4696_v13 = vpop.f32.mrf.mxu2  ;;  %v4763_v8 = vpop.f32.mrf.mxu3 }
 0x5ec   : > { %v4761_v33 = vadd.f32 %v4760_v58, %v4696_v13  ;;  %v742_v61 = vpop.trf.xlu1 }
 0x5ed   : > { %v4837_v31 = vpop.f32.mrf.mxu0  ;;  %790 = vst.msk [vmem:[#allocation2 + $0x2a0] sm:$0xff] %vm609_vm3, %v742_v61 }
 0x5ee   : > { %v4868_v0 = vadd.f32 %v4837_v31, %v4754_v55  ;;  %v4936_v16 = vpop.f32.mrf.mxu1  ;;  %v5083_v55 = vld [vmem:[#allocation2 + $0x20c] sm:$0xff] }
 0x5ef   : > { %v5091_v28 = vpack.c.bf16 %v5084_v43, %v5083_v55  ;;  %v5186_v58 = vpack.c.bf16 %v5083_v55, %v5082_v23 }
 0x5f0   : > { %6994 = vmatmul.msk.bf16.gmra.mxu2 %vm609_vm3, %v4993_v5  ;;  %7006 = vmatmul.msk.bf16.gmra.mxu0 %vm609_vm3, %v5185_v44  ;;  %v9075_v50 = vadd.f32 %v4934_v22, %v4868_v0  ;;  %v5275_v22 = vld [vmem:[#allocation2 + $0x215] sm:$0xff] }
 0x5f1   : > { %v5284_v23 = vpack.c.bf16 %v5276_v56, %v5275_v22 }
 0x5f3   : > { %v4699_v52 = vpop.f32.mrf.mxu2  ;;  %v4765_v37 = vpop.f32.mrf.mxu3 }
 0x5f4   : > { %v4764_v6 = vadd.f32 %v4763_v8, %v4699_v52  ;;  %v5092_v8 = vpack.c.bf16 %v5085_v19, %v5085_v19 }
 0x5f5   : > { %v4839_v12 = vpop.f32.mrf.mxu0 }
 0x5f6   : > { %v4869_v4 = vadd.f32 %v4839_v12, %v4756_v60  ;;  %v4939_v57 = vpop.f32.mrf.mxu1  ;;  %v5558_v12 = vld [vmem:[#allocation2 + $0x209] sm:$0xff] }
 0x5f8   : > { %7002 = vmatmul.msk.bf16.gmra.mxu3 %vm609_vm3, %v5091_v28  ;;  %v9080_v41 = vadd.f32 %v4936_v16, %v4869_v4  ;;  %v4988_v16 = vld [vmem:[#allocation2 + $0x21b] sm:$0xff]  ;;  %v5277_v4 = vld [vmem:[#allocation2 + $0x225] sm:$0xff]  ;;  %v5559_v28 = vld [vmem:[#allocation2 + $0x211] sm:$0xff] }
 0x5f9   : > { %7014 = vmatmul.msk.bf16.gmra.mxu1 %vm609_vm3, %v5283_v7  ;;  %v4995_v32 = vpack.c.bf16 %v4988_v16, %v4988_v16 }
 0x5fb   : > { %v4701_v38 = vpop.f32.mrf.mxu2  ;;  %v4768_v39 = vpop.f32.mrf.mxu3 }
 0x5fc   : > { %v4766_v47 = vadd.f32 %v4765_v37, %v4701_v38  ;;  %v5187_v37 = vpack.c.bf16 %v5085_v19, %v5084_v43  ;;  %v5279_v19 = vld [vmem:[#allocation2 + $0x235] sm:$0xff] }
 0x5fd   : > { %v4842_v20 = vpop.f32.mrf.mxu0 }
 0x5fe   : > { %v4870_v40 = vadd.f32 %v4842_v20, %v4759_v14  ;;  %v4941_v60 = vpop.f32.mrf.mxu1  ;;  %v5364_v20 = vld [vmem:[#allocation2 + $0x1d6] sm:$0xff] }
 0x600   : > { %6995 = vmatmul.msk.bf16.gmra.mxu2 %vm609_vm3, %v4994_v15  ;;  %7007 = vmatmul.msk.bf16.gmra.mxu0 %vm609_vm3, %v5186_v58  ;;  %v9085_v25 = vadd.f32 %v4939_v57, %v4870_v40  ;;  %v5278_v57 = vld [vmem:[#allocation2 + $0x22d] sm:$0xff]  ;;  %v5365_v58 = vld [vmem:[#allocation2 + $0x1de] sm:$0xff] }
 0x601   : > { %v5181_v15 = vld [vmem:[#allocation2 + $0x22c] sm:$0xff] }
 0x603   : > { %v4704_v53 = vpop.f32.mrf.mxu2  ;;  %v4770_v30 = vpop.f32.mrf.mxu3 }
 0x604   : > { %v4769_v49 = vadd.f32 %v4768_v39, %v4704_v53  ;;  %v5571_v39 = vpack.c.bf16 %v5559_v28, %v5558_v12 }
 0x605   : > { %v4844_v13 = vpop.f32.mrf.mxu0 }
 0x606   : > { %v4871_v14 = vadd.f32 %v4844_v13, %v4761_v33  ;;  %v4944_v62 = vpop.f32.mrf.mxu1  ;;  %v5377_v13 = vpack.c.bf16 %v5365_v58, %v5364_v20  ;;  %v5563_v20 = vld [vmem:[#allocation2 + $0x231] sm:$0xff] }
 0x608   : > { %7003 = vmatmul.msk.bf16.gmra.mxu3 %vm609_vm3, %v5092_v8  ;;  %v9089_v31 = vadd.f32 %v4941_v60, %v4871_v14  ;;  %v5180_v60 = vld [vmem:[#allocation2 + $0x224] sm:$0xff]  ;;  %v7245_v14 = vld [vmem:[%s9601_s3 + $0x78] sm:$0xff] }
 0x609   : > { %7015 = vmatmul.msk.bf16.gmra.mxu1 %vm609_vm3, %v5284_v23 }
 0x60b   : > { %v4706_v0 = vpop.f32.mrf.mxu2  ;;  %v4773_v44 = vpop.f32.mrf.mxu3 }
 0x60c   : > { %v4771_v5 = vadd.f32 %v4770_v30, %v4706_v0  ;;  %v9101_v30 = vpack.c.bf16 %v5181_v15, %v5180_v60  ;;  %v5286_v0 = vpack.c.bf16 %v5279_v19, %v5279_v19  ;;  %v5369_v19 = vld [vmem:[#allocation2 + $0x1fe] sm:$0xff] }
 0x60d   : > { %v4847_v59 = vpop.f32.mrf.mxu0 }
 0x60e   : > { %v4872_v52 = vadd.f32 %v4847_v59, %v4764_v6  ;;  %v4946_v3 = vpop.f32.mrf.mxu1  ;;  %v5285_v6 = vpack.c.bf16 %v5278_v57, %v5277_v4  ;;  %v5367_v4 = vld [vmem:[#allocation2 + $0x1ee] sm:$0xff] }
 0x610   : > { %6996 = vmatmul.msk.bf16.gmra.mxu2 %vm609_vm3, %v4995_v32  ;;  %7008 = vmatmul.msk.bf16.gmra.mxu0 %vm609_vm3, %v5187_v37  ;;  %v9093_v33 = vadd.f32 %v4944_v62, %v4872_v52  ;;  %v9118_v37 = vld [vmem:[#allocation2 + $0x234] sm:$0xff] }
 0x611   : > { %v5189_v28 = vpack.c.bf16 %v9118_v37, %v9118_v37 }
 0x613   : > { %v4709_v55 = vpop.f32.mrf.mxu2  ;;  %v4775_v63 = vpop.f32.mrf.mxu3 }
 0x614   : > { %v4774_v7 = vadd.f32 %v4773_v44, %v4709_v55  ;;  %v7246_v44 = vld [vmem:[%s9601_s3 + $0x70] sm:$0xff]  ;;  %v5366_v55 = vld [vmem:[#allocation2 + $0x1e6] sm:$0xff] }
 0x615   : > { %v4849_v38 = vpop.f32.mrf.mxu0 }
 0x616   : > { %v4873_v54 = vadd.f32 %v4849_v38, %v4766_v47  ;;  %v4949_v29 = vpop.f32.mrf.mxu1 }
 0x618   : > { %7025 = vmatmul.msk.bf16.vlgmr.msra.gmra.mxu3 %vm609_vm3, %v5571_v39  ;;  %v9097_v43 = vadd.f32 %v4946_v3, %v4873_v54  ;;  %v5378_v54 = vpack.c.bf16 %v5367_v4, %v5366_v55  ;;  %v5562_v39 = vld [vmem:[#allocation2 + $0x229] sm:$0xff] }
 0x619   : > { %7016 = vmatmul.msk.bf16.gmra.mxu1 %vm609_vm3, %v5285_v6  ;;  %6335 = vmatpush.bf16.msra.mxu3 %v8818_v9 }
 0x61b   : > { %v4711_v40 = vpop.f32.mrf.mxu2  ;;  %v4778_v53 = vpop.f32.mrf.mxu3 }
 0x61c   : > { %v4776_v61 = vadd.f32 %v4775_v63, %v4711_v40 }
 0x61d   : > { %v4852_v22 = vpop.f32.mrf.mxu0  ;;  %6336 = vmatpush.bf16.msra.mxu3 %v8825_v48  ;;  %v5560_v48 = vld [vmem:[#allocation2 + $0x219] sm:$0xff] }
 0x61e   : > { %v4874_v47 = vadd.f32 %v4852_v22, %v4769_v49  ;;  %v4951_v56 = vpop.f32.mrf.mxu1  ;;  %v5561_v49 = vld [vmem:[#allocation2 + $0x221] sm:$0xff]  ;;  %v5573_v22 = vpack.c.bf16 %v5563_v20, %v5562_v39 }
 0x61f   : > { %v5572_v3 = vpack.c.bf16 %v5561_v49, %v5560_v48  ;;  %v5541_v39 = vld [vmem:[#allocation2 + $0x220] sm:$0xff] }
 0x620   : > { %7009 = vmatmul.msk.bf16.gmra.mxu0 %vm609_vm3, %v9101_v30  ;;  %7018 = vmatmul.msk.bf16.vlgmr.msra.gmra.mxu2 %vm609_vm3, %v5377_v13  ;;  %v9106_v9 = vadd.f32 %v4949_v29, %v4874_v47 }
 0x621   : > { %6238 = vmatpush.bf16.msra.mxu2 %v7245_v14  ;;  %v5538_v14 = vld [vmem:[#allocation2 + $0x208] sm:$0xff] }
 0x623   : > { %v4714_v62 = vpop.f32.mrf.mxu2  ;;  %v4780_v23 = vpop.f32.mrf.mxu3 }
 0x624   : > { %v4779_v8 = vadd.f32 %v4778_v53, %v4714_v62  ;;  %v5539_v62 = vld [vmem:[#allocation2 + $0x210] sm:$0xff] }
 0x625   : > { %v4854_v16 = vpop.f32.mrf.mxu0  ;;  %6239 = vmatpush.bf16.msra.mxu2 %v7246_v44 }
 0x626   : > { %v4875_v59 = vadd.f32 %v4854_v16, %v4771_v5  ;;  %v4954_v52 = vpop.f32.mrf.mxu1  ;;  %v5551_v16 = vpack.c.bf16 %v5539_v62, %v5538_v14  ;;  %v9149_v14 = vld [vmem:[#allocation2 + $0x232] sm:$0xff] }
 0x628   : > { %7026 = vmatmul.msk.bf16.gmra.mxu3 %vm609_vm3, %v5572_v3  ;;  %v9116_v32 = vadd.f32 %v4951_v56, %v4875_v59  ;;  %v5368_v56 = vld [vmem:[#allocation2 + $0x1f6] sm:$0xff]  ;;  %v5565_v3 = vld [vmem:[#allocation2 + $0x241] sm:$0xff] }
 0x629   : > { %7017 = vmatmul.msk.bf16.gmra.mxu1 %vm609_vm3, %v5286_v0  ;;  %v5379_v0 = vpack.c.bf16 %v5369_v19, %v5368_v56  ;;  %v5567_v19 = vld [vmem:[#allocation2 + $0x251] sm:$0xff] }
 0x62b   : > { %v4716_v12 = vpop.f32.mrf.mxu2  ;;  %v5123_v57 = vpop.f32.mrf.mxu3 }
 0x62c   : > { %v9137_v12 = vld [vmem:[#allocation2 + $0x222] sm:$0xff] }
 0x62d   : > { %v4857_v63 = vpop.f32.mrf.mxu0 }
 0x62e   : > { %v4876_v38 = vadd.f32 %v4857_v63, %v4774_v7  ;;  %v4956_v5 = vpop.f32.mrf.mxu1 }
 0x630   : > { %7010 = vmatmul.msk.bf16.gmra.mxu0 %vm609_vm3, %v5189_v28  ;;  %7019 = vmatmul.msk.bf16.gmra.mxu2 %vm609_vm3, %v5378_v54  ;;  %v9124_v29 = vadd.f32 %v4954_v52, %v4876_v38  ;;  %v5564_v52 = vld [vmem:[#allocation2 + $0x239] sm:$0xff]  ;;  %v5720_v28 = vpack.c.bf16 %v9137_v12, %v8999_v1  ;;  %v5370_v38 = vld [vmem:[#allocation2 + $0x206] sm:$0xff]  ;;  %v5371_v54 = vld [vmem:[#allocation2 + $0x20e] sm:$0xff] }
 0x633   : > { %v5026_v6 = vpop.f32.mrf.mxu2  ;;  %v5125_v60 = vpop.f32.mrf.mxu3 }
 0x634   : > { %v5060_v40 = vadd.f32 %v5026_v6, %v9065_v11  ;;  %v5540_v6 = vld [vmem:[#allocation2 + $0x218] sm:$0xff] }
 0x635   : > { %v4859_v15 = vpop.f32.mrf.mxu0 }
 0x636   : > { %v4877_v58 = vadd.f32 %v4859_v15, %v4776_v61  ;;  %v4959_v53 = vpop.f32.mrf.mxu1  ;;  %v5157_v47 = vadd.f32 %v5123_v57, %v5060_v40  ;;  %v5574_v57 = vpack.c.bf16 %v5565_v3, %v5564_v52  ;;  %v5542_v3 = vld [vmem:[#allocation2 + $0x228] sm:$0xff] }
 0x638   : > { %7027 = vmatmul.msk.bf16.gmra.mxu3 %vm609_vm3, %v5573_v22  ;;  %v9130_v7 = vadd.f32 %v4956_v5, %v4877_v58  ;;  %v5380_v58 = vpack.c.bf16 %v5371_v54, %v5370_v38 }
 0x639   : > { %7039 = vmatmul.msk.bf16.vlgmr.msra.gmra.mxu1 %vm609_vm3, %v8977_v34 }
 0x63b   : > { %v5028_v13 = vpop.f32.mrf.mxu2  ;;  %v5128_v48 = vpop.f32.mrf.mxu3 }
 0x63c   : > { %v5061_v11 = vadd.f32 %v5028_v13, %v9070_v21  ;;  %v5566_v13 = vld [vmem:[#allocation2 + $0x249] sm:$0xff] }
 0x63d   : > { %v4862_v49 = vpop.f32.mrf.mxu0 }
 0x63e   : > { %v4878_v61 = vadd.f32 %v4862_v49, %v4779_v8  ;;  %v4961_v23 = vpop.f32.mrf.mxu1  ;;  %v5158_v44 = vadd.f32 %v5125_v60, %v5061_v11 }
 0x640   : > { %7020 = vmatmul.msk.bf16.gmra.mxu2 %vm609_vm3, %v5379_v0  ;;  %7032 = vmatmul.msk.bf16.vlgmr.msra.gmra.mxu0 %vm609_vm3, %v5551_v16  ;;  %v9135_v34 = vadd.f32 %v4959_v53, %v4878_v61  ;;  %v5552_v53 = vpack.c.bf16 %v5541_v39, %v5540_v6  ;;  %v5575_v61 = vpack.c.bf16 %v5567_v19, %v5566_v13  ;;  %v5568_v39 = vld [vmem:[#allocation2 + $0x259] sm:$0xff] }
 0x643   : > { %v5031_v59 = vpop.f32.mrf.mxu2  ;;  %v5130_v55 = vpop.f32.mrf.mxu3 }
 0x644   : > { %v5062_v21 = vadd.f32 %v5031_v59, %v9075_v50  ;;  %v5372_v59 = vld [vmem:[#allocation2 + $0x216] sm:$0xff] }
 0x645   : > { %v4864_v4 = vpop.f32.mrf.mxu0 }
 0x646   : > { %v5317_v8 = vpop.f32.mrf.mxu1  ;;  %v5159_v63 = vadd.f32 %v5128_v48, %v5062_v21  ;;  %v5543_v21 = vld [vmem:[#allocation2 + $0x230] sm:$0xff] }
 0x647   : > { %v5553_v38 = vpack.c.bf16 %v5543_v21, %v5542_v3 }
 0x648   : > { %7028 = vmatmul.msk.bf16.gmra.mxu3 %vm609_vm3, %v5574_v57 }
 0x649   : > { %7040 = vmatmul.msk.bf16.gmra.mxu1 %vm609_vm3, %v5720_v28 }
 0x64b   : > { %v5033_v5 = vpop.f32.mrf.mxu2  ;;  %v5133_v50 = vpop.f32.mrf.mxu3 }
 0x64c   : > { %v5063_v20 = vadd.f32 %v5033_v5, %v9080_v41 }
 0x64d   : > { %v5220_v40 = vpop.f32.mrf.mxu0 }
 0x64e   : > { %v5254_v60 = vadd.f32 %v5220_v40, %v5157_v47  ;;  %v5319_v15 = vpop.f32.mrf.mxu1  ;;  %v5160_v22 = vadd.f32 %v5130_v55, %v5063_v20  ;;  %v9152_v47 = vld [vmem:[#allocation2 + $0x22a] sm:$0xff]  ;;  %v5569_v20 = vld [vmem:[#allocation2 + $0x261] sm:$0xff] }
 0x64f   : > { %v5721_v23 = vpack.c.bf16 %v9149_v14, %v9152_v47 }
 0x650   : > { %7021 = vmatmul.msk.bf16.gmra.mxu2 %vm609_vm3, %v5380_v58  ;;  %7033 = vmatmul.msk.bf16.gmra.mxu0 %vm609_vm3, %v5552_v53  ;;  %v9147_v1 = vadd.f32 %v5317_v8, %v5254_v60  ;;  %v5576_v53 = vpack.c.bf16 %v5569_v20, %v5568_v39 }
 0x653   : > { %v5036_v56 = vpop.f32.mrf.mxu2  ;;  %v5135_v62 = vpop.f32.mrf.mxu3 }
 0x654   : > { %v5064_v41 = vadd.f32 %v5036_v56, %v9085_v25  ;;  %v5373_v25 = vld [vmem:[#allocation2 + $0x21e] sm:$0xff] }
 0x655   : > { %v5222_v11 = vpop.f32.mrf.mxu0  ;;  %v5381_v28 = vpack.c.bf16 %v5373_v25, %v5372_v59 }
 0x656   : > { %v5255_v48 = vadd.f32 %v5222_v11, %v5158_v44  ;;  %v5322_v49 = vpop.f32.mrf.mxu1  ;;  %v5161_v0 = vadd.f32 %v5133_v50, %v5064_v41  ;;  %v9165_v50 = vld [vmem:[#allocation2 + $0x242] sm:$0xff]  ;;  %v5544_v11 = vld [vmem:[#allocation2 + $0x238] sm:$0xff] }
 0x657   : > { %v5374_v41 = vld [vmem:[#allocation2 + $0x226] sm:$0xff] }
 0x658   : > { %7029 = vmatmul.msk.bf16.gmra.mxu3 %vm609_vm3, %v5575_v61  ;;  %v9158_v16 = vadd.f32 %v5319_v15, %v5255_v48  ;;  %v5545_v48 = vld [vmem:[#allocation2 + $0x240] sm:$0xff] }
 0x659   : > { %7041 = vmatmul.msk.bf16.gmra.mxu1 %vm609_vm3, %v5721_v23  ;;  %v5554_v25 = vpack.c.bf16 %v5545_v48, %v5544_v11 }
 0x65b   : > { %v5038_v52 = vpop.f32.mrf.mxu2  ;;  %v5138_v44 = vpop.f32.mrf.mxu3 }
 0x65c   : > { %v5065_v55 = vadd.f32 %v5038_v52, %v9089_v31 }
 0x65d   : > { %v5225_v4 = vpop.f32.mrf.mxu0 }
 0x65e   : > { %v5256_v8 = vadd.f32 %v5225_v4, %v5159_v63  ;;  %v5324_v57 = vpop.f32.mrf.mxu1  ;;  %v5162_v5 = vadd.f32 %v5135_v62, %v5065_v55  ;;  %v9168_v63 = vld [vmem:[#allocation2 + $0x23a] sm:$0xff]  ;;  %v9181_v4 = vld [vmem:[#allocation2 + $0x252] sm:$0xff] }
 0x65f   : > { %v5722_v56 = vpack.c.bf16 %v9165_v50, %v9168_v63 }
 0x660   : > { %7022 = vmatmul.msk.bf16.gmra.mxu2 %vm609_vm3, %v5381_v28  ;;  %7034 = vmatmul.msk.bf16.gmra.mxu0 %vm609_vm3, %v5553_v38  ;;  %v9163_v54 = vadd.f32 %v5322_v49, %v5256_v8  ;;  %v9184_v28 = vld [vmem:[#allocation2 + $0x24a] sm:$0xff] }
 0x661   : > { %v5723_v39 = vpack.c.bf16 %v9181_v4, %v9184_v28 }
 0x663   : > { %v5041_v6 = vpop.f32.mrf.mxu2  ;;  %v5140_v40 = vpop.f32.mrf.mxu3 }
 0x664   : > { %v5066_v31 = vadd.f32 %v5041_v6, %v9093_v33  ;;  %v5375_v33 = vld [vmem:[#allocation2 + $0x22e] sm:$0xff] }
 0x665   : > { %v5227_v60 = vpop.f32.mrf.mxu0  ;;  %v5382_v52 = vpack.c.bf16 %v5375_v33, %v5374_v41 }
 0x666   : > { %v5257_v15 = vadd.f32 %v5227_v60, %v5160_v22  ;;  %v5327_v58 = vpop.f32.mrf.mxu1  ;;  %v5163_v13 = vadd.f32 %v5138_v44, %v5066_v31  ;;  %v5570_v44 = vld [vmem:[#allocation2 + $0x269] sm:$0xff]  ;;  %v5376_v60 = vld [vmem:[#allocation2 + $0x236] sm:$0xff] }
 0x667   : > { %v5577_v6 = vpack.c.bf16 %v5570_v44, %v5570_v44 }
 0x668   : > { %7030 = vmatmul.msk.bf16.gmra.mxu3 %vm609_vm3, %v5576_v53  ;;  %v9174_v19 = vadd.f32 %v5324_v57, %v5257_v15  ;;  %v5547_v15 = vld [vmem:[#allocation2 + $0x250] sm:$0xff] }
 0x669   : > { %7042 = vmatmul.msk.bf16.gmra.mxu1 %vm609_vm3, %v5722_v56 }
 0x66b   : > { %v5043_v62 = vpop.f32.mrf.mxu2  ;;  %v5143_v22 = vpop.f32.mrf.mxu3 }
 0x66c   : > { %v5067_v49 = vadd.f32 %v5043_v62, %v9097_v43  ;;  %v5383_v62 = vpack.c.bf16 %v5376_v60, %v5376_v60 }
 0x66d   : > { %v5230_v61 = vpop.f32.mrf.mxu0 }
 0x66e   : > { %v5258_v23 = vadd.f32 %v5230_v61, %v5161_v0  ;;  %v5329_v59 = vpop.f32.mrf.mxu1  ;;  %v5164_v3 = vadd.f32 %v5140_v40, %v5067_v49  ;;  %v5900_v61 = vld [vmem:[#allocation2 + $0x223] sm:$0xff] }
 0x670   : > { %7023 = vmatmul.msk.bf16.gmra.mxu2 %vm609_vm3, %v5382_v52  ;;  %7035 = vmatmul.msk.bf16.gmra.mxu0 %vm609_vm3, %v5554_v25  ;;  %v9179_v21 = vadd.f32 %v5327_v58, %v5258_v23  ;;  %v5901_v23 = vld [vmem:[#allocation2 + $0x22b] sm:$0xff] }
 0x673   : > { %v5046_v55 = vpop.f32.mrf.mxu2  ;;  %v5145_v43 = vpop.f32.mrf.mxu3 }
 0x674   : > { %v5068_v8 = vadd.f32 %v5046_v55, %v9106_v9  ;;  %v5546_v9 = vld [vmem:[#allocation2 + $0x248] sm:$0xff] }
 0x675   : > { %v5232_v57 = vpop.f32.mrf.mxu0  ;;  %v5555_v33 = vpack.c.bf16 %v5547_v15, %v5546_v9  ;;  %v5816_v15 = vpack.c.bf16 %v9152_v47, %v9137_v12 }
 0x676   : > { %v5259_v0 = vadd.f32 %v5232_v57, %v5162_v5  ;;  %v5332_v38 = vpop.f32.mrf.mxu1  ;;  %v5165_v20 = vadd.f32 %v5143_v22, %v5068_v8  ;;  %v9197_v22 = vld [vmem:[#allocation2 + $0x262] sm:$0xff]  ;;  %v5913_v8 = vpack.c.bf16 %v5901_v23, %v5900_v61 }
 0x678   : > { %7031 = vmatmul.msk.bf16.gmra.mxu3 %vm609_vm3, %v5577_v6  ;;  %v9190_v31 = vadd.f32 %v5329_v59, %v5259_v0 }
 0x679   : > { %7043 = vmatmul.msk.bf16.gmra.mxu1 %vm609_vm3, %v5723_v39 }
 0x67b   : > { %v5048_v40 = vpop.f32.mrf.mxu2  ;;  %v5148_v53 = vpop.f32.mrf.mxu3 }
 0x67c   : > { %v5069_v58 = vadd.f32 %v5048_v40, %v9116_v32 }
 0x67d   : > { %v5235_v5 = vpop.f32.mrf.mxu0 }
 0x67e   : > { %v5260_v56 = vadd.f32 %v5235_v5, %v5163_v13  ;;  %v5334_v41 = vpop.f32.mrf.mxu1  ;;  %v5166_v11 = vadd.f32 %v5145_v43, %v5069_v58  ;;  %v9200_v13 = vld [vmem:[#allocation2 + $0x25a] sm:$0xff] }
 0x67f   : > { %v5724_v44 = vpack.c.bf16 %v9197_v22, %v9200_v13 }
 0x680   : > { %7024 = vmatmul.msk.bf16.gmra.mxu2 %vm609_vm3, %v5383_v62  ;;  %7036 = vmatmul.msk.bf16.gmra.mxu0 %vm609_vm3, %v5555_v33  ;;  %v9195_v48 = vadd.f32 %v5332_v38, %v5260_v56  ;;  %v5548_v38 = vld [vmem:[#allocation2 + $0x258] sm:$0xff] }
 0x681   : > { %v5902_v56 = vld [vmem:[#allocation2 + $0x233] sm:$0xff] }
 0x683   : > { %v5051_v49 = vpop.f32.mrf.mxu2  ;;  %v5150_v59 = vpop.f32.mrf.mxu3 }
 0x684   : > { %v5070_v32 = vadd.f32 %v5051_v49, %v9124_v29  ;;  %v5549_v29 = vld [vmem:[#allocation2 + $0x260] sm:$0xff] }
 0x685   : > { %v5237_v52 = vpop.f32.mrf.mxu0  ;;  %v5556_v9 = vpack.c.bf16 %v5549_v29, %v5548_v38  ;;  %v5904_v29 = vld [vmem:[#allocation2 + $0x243] sm:$0xff] }
 0x686   : > { %v5261_v25 = vadd.f32 %v5237_v52, %v5164_v3  ;;  %v5337_v55 = vpop.f32.mrf.mxu1  ;;  %v5167_v43 = vadd.f32 %v5148_v53, %v5070_v32  ;;  %v5550_v52 = vld [vmem:[#allocation2 + $0x268] sm:$0xff] }
 0x688   : > { %7053 = vmatmul.msk.bf16.vlgmr.msrb.gmra.mxu3 %vm609_vm3, %v5913_v8  ;;  %v9206_v57 = vadd.f32 %v5334_v41, %v5261_v25  ;;  %v5903_v41 = vld [vmem:[#allocation2 + $0x23b] sm:$0xff]  ;;  %v5817_v8 = vpack.c.bf16 %v9168_v63, %v9149_v14 }
 0x689   : > { %7044 = vmatmul.msk.bf16.gmra.mxu1 %vm609_vm3, %v5724_v44  ;;  %v5914_v47 = vpack.c.bf16 %v5903_v41, %v5902_v56 }
 0x68b   : > { %v5053_v0 = vpop.f32.mrf.mxu2  ;;  %v5153_v39 = vpop.f32.mrf.mxu3 }
 0x68c   : > { %v5071_v6 = vadd.f32 %v5053_v0, %v9130_v7 }
 0x68d   : > { %v5240_v40 = vpop.f32.mrf.mxu0 }
 0x68e   : > { %v5262_v3 = vadd.f32 %v5240_v40, %v5165_v20  ;;  %v5339_v60 = vpop.f32.mrf.mxu1  ;;  %v5168_v58 = vadd.f32 %v5150_v59, %v5071_v6  ;;  %v9216_v20 = vld [vmem:[#allocation2 + $0x26a] sm:$0xff] }
 0x68f   : > { %v5725_v12 = vpack.c.bf16 %v9216_v20, %v9216_v20  ;;  %v5905_v6 = vld [vmem:[#allocation2 + $0x24b] sm:$0xff] }
 0x690   : > { %7037 = vmatmul.msk.bf16.gmra.mxu0 %vm609_vm3, %v5556_v9  ;;  %7046 = vmatmul.msk.bf16.vlgmr.msrb.gmra.mxu2 %vm609_vm3, %v5816_v15  ;;  %v9213_v53 = vadd.f32 %v5337_v55, %v5262_v3  ;;  %v9237_v9 = vld [vmem:[#allocation4] ss:$0 sm:$0xff] }
 0x693   : > { %v5056_v5 = vpop.f32.mrf.mxu2  ;;  %v5155_v62 = vpop.f32.mrf.mxu3 }
 0x694   : > { %v5072_v7 = vadd.f32 %v5056_v5, %v9135_v34  ;;  %v5915_v5 = vpack.c.bf16 %v5905_v6, %v5904_v29  ;;  %v9247_v62 = vld [vmem:[#allocation3 + $0x1] ss:$4 sm:$0x3f] }
 0x695   : > { %v5242_v33 = vpop.f32.mrf.mxu0 }
 0x696   : > { %v5263_v49 = vadd.f32 %v5242_v33, %v5166_v11  ;;  %v5342_v61 = vpop.f32.mrf.mxu1  ;;  %v5169_v23 = vadd.f32 %v5153_v39, %v5072_v7  ;;  %v5557_v11 = vpack.c.bf16 %v5550_v52, %v5550_v52  ;;  %v9232_v39 = vld [vmem:[#allocation2 + $0x244] sm:$0xff]  ;;  %v5818_v52 = vpack.c.bf16 %v9184_v28, %v9165_v50  ;;  %v6096_v28 = vld [vmem:[#allocation2 + $0x24c] sm:$0xff] }
 0x698   : > { %7054 = vmatmul.msk.bf16.gmra.mxu3 %vm609_vm3, %v5914_v47  ;;  %v9222_v32 = vadd.f32 %v5339_v60, %v5263_v49  ;;  %v6094_v60 = vld [vmem:[#allocation2 + $0x23c] sm:$0xff] }
 0x699   : > { %7045 = vmatmul.msk.bf16.gmra.mxu1 %vm609_vm3, %v5725_v12  ;;  %v6107_v56 = vpack.c.bf16 %v9232_v39, %v6094_v60 }
 0x69b   : > { %v5058_v59 = vpop.f32.mrf.mxu2  ;;  %v9224_v34 = vpop.f32.mrf.mxu3 }
 0x69d   : > { %v5245_v25 = vpop.f32.mrf.mxu0 }
 0x69e   : > { %v5264_v55 = vadd.f32 %v5245_v25, %v5167_v43  ;;  %v5344_v44 = vpop.f32.mrf.mxu1 }
 0x6a0   : > { %7038 = vmatmul.msk.bf16.gmra.mxu0 %vm609_vm3, %v5557_v11  ;;  %7047 = vmatmul.msk.bf16.gmra.mxu2 %vm609_vm3, %v5817_v8  ;;  %v9230_v0 = vadd.f32 %v5342_v61, %v5264_v55  ;;  %v5907_v11 = vld [vmem:[#allocation2 + $0x25b] sm:$0xff] }
 0x6a1   : > { %v9262_v8 = vld [vmem:[#allocation2 + $0x254] sm:$0xff] }
 0x6a3   : > { %v5414_v38 = vpop.f32.mrf.mxu2  ;;  %v9235_v3 = vpop.f32.mrf.mxu3 }
 0x6a4   : > { %v5448_v40 = vadd.f32 %v5414_v38, %v9147_v1  ;;  %v9245_v1 = vld [vmem:[#allocation3] ss:$4 sm:$0x3f] }
 0x6a5   : > { %v5247_v43 = vpop.f32.mrf.mxu0 }
 0x6a6   : > { %v5461_v14 = vadd.f32 %v9237_v9, %v5448_v40  ;;  %v5265_v63 = vadd.f32 %v5247_v43, %v5168_v58  ;;  %v5347_v15 = vpop.f32.mrf.mxu1 }
 0x6a8   : > { %v5474_v41 = vmax.f32 %v5461_v14, 0.0  ;;  %7055 = vmatmul.msk.bf16.gmra.mxu3 %vm609_vm3, %v5915_v5  ;;  %v9243_v7 = vadd.f32 %v5344_v44, %v5265_v63  ;;  %v5906_v44 = vld [vmem:[#allocation2 + $0x253] sm:$0xff] }
 0x6a9   : > { %7067 = vmatmul.msk.bf16.vlgmr.msrb.gmra.mxu1 %vm609_vm3, %v6107_v56  ;;  %v5916_v40 = vpack.c.bf16 %v5907_v11, %v5906_v44 }
 0x6aa   : > { %5487 = vst.msk [vmem:[#allocation3] sm:$0xff] %vm1775_vm4, %v5474_v41 }
 0x6ab   : > { %v5416_v33 = vpop.f32.mrf.mxu2  ;;  %v9251_v49 = vpop.f32.mrf.mxu3 }
 0x6ac   : > { %v5449_v58 = vadd.f32 %v5416_v33, %v9158_v16  ;;  %v5819_v33 = vpack.c.bf16 %v9200_v13, %v9181_v4 }
 0x6ad   : > { %v5250_v61 = vpop.f32.mrf.mxu0 }
 0x6ae   : > { %v5462_v12 = vadd.f32 %v9237_v9, %v5449_v58  ;;  %v5266_v47 = vadd.f32 %v5250_v61, %v5169_v23  ;;  %v5349_v59 = vpop.f32.mrf.mxu1  ;;  %v6011_v58 = vpack.c.bf16 %v6094_v60, %v9118_v37  ;;  %v6098_v60 = vld [vmem:[#allocation2 + $0x25c] sm:$0xff] }
 0x6af   : > { %v5908_v59 = vld [vmem:[#allocation2 + $0x263] sm:$0xff] }
 0x6b0   : > { %v5475_v25 = vmax.f32 %v5462_v12, 0.0  ;;  %7048 = vmatmul.msk.bf16.gmra.mxu2 %vm609_vm3, %v5818_v52  ;;  %7060 = vmatmul.msk.bf16.vlgmr.msrb.gmra.mxu0 %vm609_vm3, %v9101_v30  ;;  %v9259_v55 = vadd.f32 %v5347_v15, %v5266_v47  ;;  %v6108_v30 = vpack.c.bf16 %v9262_v8, %v6096_v28  ;;  %v9282_v12 = vld [vmem:[#allocation3 + $0x1a] ss:$4 sm:$0x3f] }
 0x6b1   : > { %v5909_v52 = vld [vmem:[#allocation2 + $0x26b] sm:$0xff] }
 0x6b2   : > { %5488 = vst.msk [vmem:[#allocation3 + $0x8] sm:$0xff] %vm1775_vm4, %v5475_v25  ;;  %v9289_v25 = vld [vmem:[#allocation2 + $0x264] sm:$0xff] }
 0x6b3   : > { %v5419_v16 = vpop.f32.mrf.mxu2  ;;  %v9265_v38 = vpop.f32.mrf.mxu3 }
 0x6b4   : > { %v5450_v23 = vadd.f32 %v5419_v16, %v9163_v54 }
 0x6b5   : > { %v5252_v50 = vpop.f32.mrf.mxu0 }
 0x6b6   : > { %v5463_v29 = vadd.f32 %v9237_v9, %v5450_v23  ;;  %v5756_v6 = vpop.f32.mrf.mxu1  ;;  %v5917_v23 = vpack.c.bf16 %v5909_v52, %v5908_v59  ;;  %v6109_v50 = vpack.c.bf16 %v9289_v25, %v6098_v60 }
 0x6b8   : > { %v5476_v43 = vmax.f32 %v5463_v29, 0.0  ;;  %7056 = vmatmul.msk.bf16.gmra.mxu3 %vm609_vm3, %v5916_v40 }
 0x6b9   : > { %7068 = vmatmul.msk.bf16.gmra.mxu1 %vm609_vm3, %v6108_v30 }
 0x6ba   : > { %5489 = vst.msk [vmem:[#allocation3 + $0x10] sm:$0xff] %vm1775_vm4, %v5476_v43 }
 0x6bb   : > { %v5421_v14 = vpop.f32.mrf.mxu2  ;;  %v9273_v63 = vpop.f32.mrf.mxu3 }
 0x6bc   : > { %v5451_v54 = vadd.f32 %v5421_v14, %v9174_v19  ;;  %v9284_v19 = vld [vmem:[#allocation3 + $0x1b] ss:$4 sm:$0x3f] }
 0x6bd   : > { %v5672_v15 = vpop.f32.mrf.mxu0 }
 0x6be   : > { %v5464_v5 = vadd.f32 %v9237_v9, %v5451_v54  ;;  %v5673_v56 = vadd.f32 %v5672_v15, %v9224_v34  ;;  %v5758_v41 = vpop.f32.mrf.mxu1  ;;  %v5820_v15 = vpack.c.bf16 %v9216_v20, %v9197_v22  ;;  %v6100_v20 = vld [vmem:[#allocation2 + $0x26c] sm:$0xff] }
 0x6c0   : > { %v5477_v61 = vmax.f32 %v5464_v5, 0.0  ;;  %7049 = vmatmul.msk.bf16.gmra.mxu2 %vm609_vm3, %v5819_v33  ;;  %7061 = vmatmul.msk.bf16.gmra.mxu0 %vm609_vm3, %v6011_v58  ;;  %v9286_v47 = vadd.f32 %v5756_v6, %v5673_v56  ;;  %v6012_v5 = vpack.c.bf16 %v6096_v28, %v9232_v39  ;;  %v5910_v33 = vld [vmem:[#allocation2 + $0x273] sm:$0xff]  ;;  %v5911_v58 = vld [vmem:[#allocation2 + $0x27b] sm:$0xff] }
 0x6c1   : > { %v5918_v52 = vpack.c.bf16 %v5911_v58, %v5910_v33  ;;  %v5912_v33 = vld [vmem:[#allocation2 + $0x283] sm:$0xff] }
 0x6c2   : > { %5490 = vst.msk [vmem:[#allocation3 + $0x18] sm:$0xff] %vm1775_vm4, %v5477_v61  ;;  %v9315_v61 = vld [vmem:[#allocation2 + $0x274] sm:$0xff]  ;;  %v9347_v58 = vld [vmem:[#allocation2 + $0x284] sm:$0xff] }
 0x6c3   : > { %v5424_v34 = vpop.f32.mrf.mxu2  ;;  %v9292_v4 = vpop.f32.mrf.mxu3 }
 0x6c4   : > { %v5452_v37 = vadd.f32 %v5424_v34, %v9179_v21 }
 0x6c5   : > { %v5674_v13 = vpop.f32.mrf.mxu0 }
 0x6c6   : > { %v5465_v16 = vadd.f32 %v9237_v9, %v5452_v37  ;;  %v5675_v44 = vadd.f32 %v5674_v13, %v9235_v3  ;;  %v5761_v11 = vpop.f32.mrf.mxu1  ;;  %v6110_v37 = vpack.c.bf16 %v9315_v61, %v6100_v20  ;;  %v9323_v13 = vld [vmem:[#allocation3 + $0x34] ss:$4 sm:$0x3f] }
 0x6c8   : > { %v5478_v29 = vmax.f32 %v5465_v16, 0.0  ;;  %7057 = vmatmul.msk.bf16.gmra.mxu3 %vm609_vm3, %v5917_v23  ;;  %v9299_v6 = vadd.f32 %v5758_v41, %v5675_v44  ;;  %v9333_v23 = vld [vmem:[#allocation3 + $0x37] ss:$4 sm:$0x3f] }
 0x6c9   : > { %7069 = vmatmul.msk.bf16.gmra.mxu1 %vm609_vm3, %v6109_v50  ;;  %v5813_v50 = vld [vmem:[#allocation2 + $0x272] sm:$0xff] }
 0x6ca   : > { %5491 = vst.msk [vmem:[#allocation3 + $0x20] sm:$0xff] %vm1775_vm4, %v5478_v29  ;;  %v5814_v29 = vld [vmem:[#allocation2 + $0x27a] sm:$0xff] }
 0x6cb   : > { %v5426_v21 = vpop.f32.mrf.mxu2  ;;  %v9303_v30 = vpop.f32.mrf.mxu3 }
 0x6cc   : > { %v5453_v40 = vadd.f32 %v5426_v21, %v9190_v31 }
 0x6cd   : > { %v5677_v43 = vpop.f32.mrf.mxu0 }
 0x6ce   : > { %v5466_v3 = vadd.f32 %v9237_v9, %v5453_v40  ;;  %v5678_v14 = vadd.f32 %v5677_v43, %v9251_v49  ;;  %v5763_v54 = vpop.f32.mrf.mxu1 }
 0x6d0   : > { %v5479_v56 = vmax.f32 %v5466_v3, 0.0  ;;  %7050 = vmatmul.msk.bf16.gmra.mxu2 %vm609_vm3, %v5820_v15  ;;  %7062 = vmatmul.msk.bf16.gmra.mxu0 %vm609_vm3, %v6012_v5  ;;  %v9312_v41 = vadd.f32 %v5761_v11, %v5678_v14  ;;  %v9331_v11 = vld [vmem:[#allocation3 + $0x36] ss:$4 sm:$0x3f]  ;;  %v5821_v15 = vpack.c.bf16 %v5814_v29, %v5813_v50  ;;  %v6013_v5 = vpack.c.bf16 %v6098_v60, %v9262_v8 }
 0x6d2   : > { %5492 = vst.msk [vmem:[#allocation3 + $0x28] sm:$0xff] %vm1775_vm4, %v5479_v56 }
 0x6d3   : > { %v5429_v31 = vpop.f32.mrf.mxu2  ;;  %v9318_v34 = vpop.f32.mrf.mxu3 }
 0x6d4   : > { %v5454_v49 = vadd.f32 %v5429_v31, %v9195_v48  ;;  %v9327_v48 = vld [vmem:[#allocation3 + $0x35] ss:$4 sm:$0x3f] }
 0x6d5   : > { %v5679_v22 = vpop.f32.mrf.mxu0 }
 0x6d6   : > { %v5467_v39 = vadd.f32 %v9237_v9, %v5454_v49  ;;  %v5680_v28 = vadd.f32 %v5679_v22, %v9265_v38  ;;  %v5766_v59 = vpop.f32.mrf.mxu1 }
 0x6d8   : > { %v5480_v16 = vmax.f32 %v5467_v39, 0.0  ;;  %7058 = vmatmul.msk.bf16.gmra.mxu3 %vm609_vm3, %v5918_v52  ;;  %v9329_v44 = vadd.f32 %v5763_v54, %v5680_v28  ;;  %v6102_v39 = vld [vmem:[#allocation2 + $0x27c] sm:$0xff]  ;;  %v5919_v52 = vpack.c.bf16 %v5912_v33, %v5912_v33 }
 0x6d9   : > { %7070 = vmatmul.msk.bf16.gmra.mxu1 %vm609_vm3, %v6110_v37 }
 0x6da   : > { %5493 = vst.msk [vmem:[#allocation3 + $0x30] sm:$0xff] %vm1775_vm4, %v5480_v16 }
 0x6db   : > { %v5431_v38 = vpop.f32.mrf.mxu2  ;;  %v9337_v40 = vpop.f32.mrf.mxu3 }
 0x6dc   : > { %v5455_v21 = vadd.f32 %v5431_v38, %v9206_v57  ;;  %v5815_v38 = vld [vmem:[#allocation2 + $0x282] sm:$0xff] }
 0x6dd   : > { %v5682_v43 = vpop.f32.mrf.mxu0 }
 0x6de   : > { %v5468_v3 = vadd.f32 %v9237_v9, %v5455_v21  ;;  %v5683_v14 = vadd.f32 %v5682_v43, %v9273_v63  ;;  %v5768_v54 = vpop.f32.mrf.mxu1 }
 0x6e0   : > { %v5481_v56 = vmax.f32 %v5468_v3, 0.0  ;;  %7051 = vmatmul.msk.bf16.gmra.mxu2 %vm609_vm3, %v5821_v15  ;;  %7063 = vmatmul.msk.bf16.gmra.mxu0 %vm609_vm3, %v6013_v5  ;;  %v9344_v31 = vadd.f32 %v5766_v59, %v5683_v14  ;;  %v6111_v59 = vpack.c.bf16 %v9347_v58, %v6102_v39  ;;  %v5822_v14 = vpack.c.bf16 %v5815_v38, %v5815_v38 }
 0x6e1   : > { %v6014_v15 = vpack.c.bf16 %v6100_v20, %v9289_v25 }
 0x6e2   : > { %5494 = vst.msk [vmem:[#allocation3 + $0x38] sm:$0xff] %vm1775_vm4, %v5481_v56  ;;  %v9370_v56 = vld [vmem:[#allocation3 + $0x4e] ss:$4 sm:$0x3f] }
 0x6e3   : > { %v5434_v57 = vpop.f32.mrf.mxu2  ;;  %v9350_v63 = vpop.f32.mrf.mxu3 }
 0x6e4   : > { %v5456_v49 = vadd.f32 %v5434_v57, %v9213_v53  ;;  %v6288_v57 = vld [vmem:[#allocation2 + $0x23e] sm:$0xff] }
 0x6e5   : > { %v5684_v22 = vpop.f32.mrf.mxu0 }
 0x6e6   : > { %v5469_v8 = vadd.f32 %v9237_v9, %v5456_v49  ;;  %v5685_v60 = vadd.f32 %v5684_v22, %v9292_v4  ;;  %v5771_v28 = vpop.f32.mrf.mxu1  ;;  %v6105_v49 = vld [vmem:[#allocation2 + $0x294] sm:$0xff]  ;;  %v6289_v22 = vld [vmem:[#allocation2 + $0x246] sm:$0xff] }
 0x6e8   : > { %v5482_v37 = vmax.f32 %v5469_v8, 0.0  ;;  %7059 = vmatmul.msk.bf16.gmra.mxu3 %vm609_vm3, %v5919_v52  ;;  %v9357_v16 = vadd.f32 %v5768_v54, %v5685_v60 }
 0x6e9   : > { %7071 = vmatmul.msk.bf16.gmra.mxu1 %vm609_vm3, %v6111_v59 }
 0x6ea   : > { %5495 = vst.msk [vmem:[#allocation3 + $0x40] sm:$0xff] %vm1775_vm4, %v5482_v37  ;;  %v6301_v37 = vpack.c.bf16 %v6289_v22, %v6288_v57 }
 0x6eb   : > { %v5436_v53 = vpop.f32.mrf.mxu2  ;;  %v9361_v29 = vpop.f32.mrf.mxu3 }
 0x6ec   : > { %v5457_v50 = vadd.f32 %v5436_v53, %v9222_v32  ;;  %v9372_v32 = vld [vmem:[#allocation3 + $0x4f] ss:$4 sm:$0x3f] }
 0x6ed   : > { %v5687_v4 = vpop.f32.mrf.mxu0 }
 0x6ee   : > { %v5470_v21 = vadd.f32 %v9237_v9, %v5457_v50  ;;  %v5688_v43 = vadd.f32 %v5687_v4, %v9303_v30  ;;  %v5773_v3 = vpop.f32.mrf.mxu1  ;;  %v6104_v30 = vld [vmem:[#allocation2 + $0x28c] sm:$0xff] }
 0x6ef   : > { %v6112_v59 = vpack.c.bf16 %v6105_v49, %v6104_v30  ;;  %v4605_v50 = vld [vmem:[#allocation3 + $0x50] ss:$4 sm:$0x3f]  ;;  %v4606_v4 = vld [vmem:[#allocation3 + $0x51] ss:$4 sm:$0x3f] }
 0x6f0   : > { %v5483_v5 = vmax.f32 %v5470_v21, 0.0  ;;  %7052 = vmatmul.msk.bf16.gmra.mxu2 %vm609_vm3, %v5822_v14  ;;  %7064 = vmatmul.msk.bf16.gmra.mxu0 %vm609_vm3, %v6014_v15  ;;  %v9368_v54 = vadd.f32 %v5771_v28, %v5688_v43  ;;  %v6191_v21 = vld [vmem:[#allocation2 + $0x23d] sm:$0xff]  ;;  %v6192_v43 = vld [vmem:[#allocation2 + $0x245] sm:$0xff] }
 0x6f1   : > { %v6204_v30 = vpack.c.bf16 %v6192_v43, %v6191_v21 }
 0x6f2   : > { %5496 = vst.msk [vmem:[#allocation3 + $0x48] sm:$0xff] %vm1775_vm4, %v5483_v5 }
 0x6f3   : > { %v5439_v33 = vpop.f32.mrf.mxu2  ;;  %v9376_v20 = vpop.f32.mrf.mxu3 }
 0x6f4   : > { %v5458_v25 = vadd.f32 %v5439_v33, %v9230_v0 }
 0x6f5   : > { %v5689_v8 = vpop.f32.mrf.mxu0 }
 0x6f6   : > { %v5471_v60 = vadd.f32 %v9237_v9, %v5458_v25  ;;  %v5690_v28 = vadd.f32 %v5689_v8, %v9318_v34  ;;  %v5776_v52 = vpop.f32.mrf.mxu1  ;;  %v6106_v25 = vld [vmem:[#allocation2 + $0x29c] sm:$0xff]  ;;  %v6290_v8 = vld [vmem:[#allocation2 + $0x24e] sm:$0xff] }
 0x6f8   : > { %v5484_v53 = vmax.f32 %v5471_v60, 0.0  ;;  %7081 = vmatmul.msk.bf16.vlgmr.msra.gmra.mxu3 %vm609_vm3, %v6301_v37  ;;  %v9382_v38 = vadd.f32 %v5773_v3, %v5690_v28  ;;  %v6015_v3 = vpack.c.bf16 %v6102_v39, %v9315_v61  ;;  %v6291_v60 = vld [vmem:[#allocation2 + $0x256] sm:$0xff] }
 0x6f9   : > { %7072 = vmatmul.msk.bf16.gmra.mxu1 %vm609_vm3, %v6112_v59  ;;  %v6113_v59 = vpack.c.bf16 %v6106_v25, %v6106_v25  ;;  %v5527_v25 = vld [vmem:[#allocation3 + $0x37] ss:$4 sm:$0x3f] }
 0x6fa   : > { %5497 = vst.msk [vmem:[#allocation3 + $0x50] sm:$0xff] %vm1775_vm4, %v5484_v53 }
 0x6fb   : > { %v5441_v0 = vpop.f32.mrf.mxu2  ;;  %v9386_v34 = vpop.f32.mrf.mxu3 }
 0x6fc   : > { %v5459_v14 = vadd.f32 %v5441_v0, %v9243_v7  ;;  %v6302_v0 = vpack.c.bf16 %v6291_v60, %v6290_v8 }
 0x6fd   : > { %v5692_v15 = vpop.f32.mrf.mxu0 }
 0x6fe   : > { %v5472_v5 = vadd.f32 %v9237_v9, %v5459_v14  ;;  %v5693_v57 = vadd.f32 %v5692_v15, %v9337_v40  ;;  %v5778_v33 = vpop.f32.mrf.mxu1  ;;  %v6194_v14 = vld [vmem:[#allocation2 + $0x255] sm:$0xff] }
 0x700   : > { %v5485_v49 = vmax.f32 %v5472_v5, 0.0  ;;  %7065 = vmatmul.msk.bf16.gmra.mxu0 %vm609_vm3, %v6015_v3  ;;  %7074 = vmatmul.msk.bf16.vlgmr.msra.gmra.mxu2 %vm609_vm3, %v6204_v30  ;;  %v9393_v22 = vadd.f32 %v5776_v52, %v5693_v57 }
 0x702   : > { %5498 = vst.msk [vmem:[#allocation3 + $0x58] sm:$0xff] %vm1775_vm4, %v5485_v49  ;;  %v5526_v49 = vld [vmem:[#allocation3 + $0x36] ss:$4 sm:$0x3f] }
 0x703   : > { %v5444_v7 = vpop.f32.mrf.mxu2  ;;  %v5640_v40 = vpop.f32.mrf.mxu3 }
 0x704   : > { %v5460_v28 = vadd.f32 %v5444_v7, %v9259_v55  ;;  %v6193_v55 = vld [vmem:[#allocation2 + $0x24d] sm:$0xff] }
 0x705   : > { %v5694_v37 = vpop.f32.mrf.mxu0  ;;  %v6205_v30 = vpack.c.bf16 %v6194_v14, %v6193_v55 }
 0x706   : > { %v5473_v61 = vadd.f32 %v9237_v9, %v5460_v28  ;;  %v5695_v39 = vadd.f32 %v5694_v37, %v9350_v63  ;;  %v5781_v53 = vpop.f32.mrf.mxu1  ;;  %v6016_v63 = vpack.c.bf16 %v9347_v58, %v9347_v58  ;;  %v4604_v28 = vmax.f32 %v9331_v11, %v9333_v23  ;;  %v6292_v37 = vld [vmem:[#allocation2 + $0x25e] sm:$0xff]  ;;  %v6293_v58 = vld [vmem:[#allocation2 + $0x266] sm:$0xff] }
 0x708   : > { %v5486_v21 = vmax.f32 %v5473_v61, 0.0  ;;  %7082 = vmatmul.msk.bf16.gmra.mxu3 %vm609_vm3, %v6302_v0  ;;  %v9401_v52 = vadd.f32 %v5778_v33, %v5695_v39  ;;  %v4607_v33 = vmax.f32 %v4605_v50, %v4606_v4 }
 0x709   : > { %7073 = vmatmul.msk.bf16.gmra.mxu1 %vm609_vm3, %v6113_v59 }
 0x70a   : > { %5499 = vst.msk [vmem:[#allocation3 + $0x60] sm:$0xff] %vm1775_vm4, %v5486_v21  ;;  %v4608_v0 = vmax.f32 %v4604_v28, %v4607_v33 }
 0x70b   : > { %v5446_v43 = vpop.f32.mrf.mxu2  ;;  %v5950_v15 = vpop.f32.mrf.mxu3 }
 0x70d   : > { %v5697_v5 = vpop.f32.mrf.mxu0 }
 0x70e   : > { %v5698_v57 = vadd.f32 %v5697_v5, %v9361_v29  ;;  %v5783_v3 = vpop.f32.mrf.mxu1  ;;  %v5528_v29 = vmax.f32 %v5526_v49, %v5527_v25  ;;  %v6195_v5 = vld [vmem:[#allocation2 + $0x25d] sm:$0xff] }
 0x710   : > { %7066 = vmatmul.msk.bf16.gmra.mxu0 %vm609_vm3, %v6016_v63  ;;  %7075 = vmatmul.msk.bf16.gmra.mxu2 %vm609_vm3, %v6205_v30  ;;  %v9409_v7 = vadd.f32 %v5781_v53, %v5698_v57  ;;  %v6303_v53 = vpack.c.bf16 %v6293_v58, %v6292_v37  ;;  %v6196_v57 = vld [vmem:[#allocation2 + $0x265] sm:$0xff]  ;;  %v6197_v58 = vld [vmem:[#allocation2 + $0x26d] sm:$0xff] }
 0x711   : > { %v5529_v8 = vld [vmem:[#allocation3 + $0x50] ss:$4 sm:$0x3f]  ;;  %v5530_v60 = vld [vmem:[#allocation3 + $0x51] ss:$4 sm:$0x3f]  ;;  %v6206_v25 = vpack.c.bf16 %v6196_v57, %v6195_v5 }
 0x712   : > { %v5531_v40 = vmax.f32 %v5529_v8, %v5530_v60  ;;  %v6294_v60 = vld [vmem:[#allocation2 + $0x26e] sm:$0xff]  ;;  %v6297_v5 = vld [vmem:[#allocation2 + $0x286] sm:$0xff] }
 0x713   : > { %v5853_v59 = vpop.f32.mrf.mxu2  ;;  %v5952_v39 = vpop.f32.mrf.mxu3 }
 0x714   : > { %v5887_v61 = vadd.f32 %v5853_v59, %v9286_v47  ;;  %v5532_v21 = vmax.f32 %v5528_v29, %v5531_v40 }
 0x715   : > { %v5699_v43 = vpop.f32.mrf.mxu0 }
 0x716   : > { %v5700_v50 = vadd.f32 %v5699_v43, %v9376_v20  ;;  %v5786_v4 = vpop.f32.mrf.mxu1  ;;  %v7185_v55 = vpack.i.bf16 %v5532_v21, %v4608_v0  ;;  %v5984_v14 = vadd.f32 %v5950_v15, %v5887_v61  ;;  %v6198_v61 = vld [vmem:[#allocation2 + $0x275] sm:$0xff] }
 0x718   : > { %7083 = vmatmul.msk.bf16.gmra.mxu3 %vm609_vm3, %v6303_v53  ;;  %7186 = vrot.lane.b32.xlu1 %v7185_v55, %s7294_s7  ;;  %v9417_v11 = vadd.f32 %v5783_v3, %v5700_v50  ;;  %v6295_v3 = vld [vmem:[#allocation2 + $0x276] sm:$0xff] }
 0x71b   : > { %v5855_v23 = vpop.f32.mrf.mxu2  ;;  %v5955_v63 = vpop.f32.mrf.mxu3 }
 0x71c   : > { %v5888_v47 = vadd.f32 %v5855_v23, %v9299_v6  ;;  %v6304_v6 = vpack.c.bf16 %v6295_v3, %v6294_v60  ;;  %v6296_v23 = vld [vmem:[#allocation2 + $0x27e] sm:$0xff] }
 0x71d   : > { %v5702_v30 = vpop.f32.mrf.mxu0  ;;  %v6200_v60 = vld [vmem:[#allocation2 + $0x285] sm:$0xff] }
 0x71e   : > { %v5703_v49 = vadd.f32 %v5702_v30, %v9386_v34  ;;  %v5788_v20 = vpop.f32.mrf.mxu1  ;;  %v5985_v33 = vadd.f32 %v5952_v39, %v5888_v47 }
 0x720   : > { %7076 = vmatmul.msk.bf16.gmra.mxu2 %vm609_vm3, %v6206_v25  ;;  %v9422_v15 = vadd.f32 %v5786_v4, %v5703_v49  ;;  %v6207_v4 = vpack.c.bf16 %v6198_v61, %v6197_v58  ;;  %v6298_v58 = vld [vmem:[#allocation2 + $0x28e] sm:$0xff]  ;;  %v6299_v61 = vld [vmem:[#allocation2 + $0x296] sm:$0xff] }
 0x723   : > { %v5858_v8 = vpop.f32.mrf.mxu2  ;;  %v5957_v29 = vpop.f32.mrf.mxu3 }
 0x724   : > { %v5889_v28 = vadd.f32 %v5858_v8, %v9312_v41  ;;  %v6199_v8 = vld [vmem:[#allocation2 + $0x27d] sm:$0xff] }
 0x725   : > { %v5704_v40 = vpop.f32.mrf.mxu0 }
 0x726   : > { %v6144_v59 = vpop.f32.mrf.mxu1  ;;  %v5986_v37 = vadd.f32 %v5955_v63, %v5889_v28 }
 0x728   : > { %7084 = vmatmul.msk.bf16.gmra.mxu3 %vm609_vm3, %v6304_v6 }
 0x72b   : > { %v5860_v34 = vpop.f32.mrf.mxu2  ;;  %v5960_v0 = vpop.f32.mrf.mxu3 }
 0x72c   : > { %v5890_v39 = vadd.f32 %v5860_v34, %v9329_v44  ;;  %v6305_v44 = vpack.c.bf16 %v6297_v5, %v6296_v23  ;;  %v6201_v23 = vld [vmem:[#allocation2 + $0x28d] sm:$0xff]  ;;  %v6202_v5 = vld [vmem:[#allocation2 + $0x295] sm:$0xff] }
 0x72d   : > { %v6047_v21 = vpop.f32.mrf.mxu0 }
 0x72e   : > { %v6081_v43 = vadd.f32 %v6047_v21, %v5984_v14  ;;  %v6146_v50 = vpop.f32.mrf.mxu1  ;;  %v5987_v53 = vadd.f32 %v5957_v29, %v5890_v39 }
 0x730   : > { %7077 = vmatmul.msk.bf16.gmra.mxu2 %vm609_vm3, %v6207_v4  ;;  %v9428_v41 = vadd.f32 %v6144_v59, %v6081_v43 }
 0x733   : > { %v5863_v55 = vpop.f32.mrf.mxu2  ;;  %v5962_v47 = vpop.f32.mrf.mxu3 }
 0x734   : > { %v5891_v57 = vadd.f32 %v5863_v55, %v9344_v31  ;;  %v6208_v31 = vpack.c.bf16 %v6200_v60, %v6199_v8  ;;  %v6300_v8 = vld [vmem:[#allocation2 + $0x29e] sm:$0xff] }
 0x735   : > { %v6049_v63 = vpop.f32.mrf.mxu0 }
 0x736   : > { %v6082_v30 = vadd.f32 %v6049_v63, %v5985_v33  ;;  %v6149_v49 = vpop.f32.mrf.mxu1  ;;  %v5988_v20 = vadd.f32 %v5960_v0, %v5891_v57 }
 0x738   : > { %7085 = vmatmul.msk.bf16.gmra.mxu3 %vm609_vm3, %v6305_v44  ;;  %v9432_v14 = vadd.f32 %v6146_v50, %v6082_v30 }
 0x73b   : > { %v5865_v25 = vpop.f32.mrf.mxu2  ;;  %v5965_v28 = vpop.f32.mrf.mxu3 }
 0x73c   : > { %v5892_v3 = vadd.f32 %v5865_v25, %v9357_v16  ;;  %v6306_v16 = vpack.c.bf16 %v6299_v61, %v6298_v58 }
 0x73d   : > { %v6052_v29 = vpop.f32.mrf.mxu0 }
 0x73e   : > { %v6083_v40 = vadd.f32 %v6052_v29, %v5986_v37  ;;  %v6151_v59 = vpop.f32.mrf.mxu1  ;;  %v5989_v6 = vadd.f32 %v5962_v47, %v5892_v3 }
 0x740   : > { %7078 = vmatmul.msk.bf16.gmra.mxu2 %vm609_vm3, %v6208_v31  ;;  %v9436_v33 = vadd.f32 %v6149_v49, %v6083_v40 }
 0x743   : > { %v5868_v34 = vpop.f32.mrf.mxu2  ;;  %v5967_v0 = vpop.f32.mrf.mxu3 }
 0x744   : > { %v5893_v39 = vadd.f32 %v5868_v34, %v9368_v54  ;;  %v6209_v54 = vpack.c.bf16 %v6202_v5, %v6201_v23  ;;  %v6203_v34 = vld [vmem:[#allocation2 + $0x29d] sm:$0xff] }
 0x745   : > { %v6054_v21 = vpop.f32.mrf.mxu0 }
 0x746   : > { %v6084_v43 = vadd.f32 %v6054_v21, %v5987_v53  ;;  %v6154_v50 = vpop.f32.mrf.mxu1  ;;  %v5990_v4 = vadd.f32 %v5965_v28, %v5893_v39 }
 0x748   : > { %7086 = vmatmul.msk.bf16.gmra.mxu3 %vm609_vm3, %v6306_v16  ;;  %v9440_v37 = vadd.f32 %v6151_v59, %v6084_v43  ;;  %v6307_v59 = vpack.c.bf16 %v6300_v8, %v6300_v8  ;;  %v6210_v43 = vpack.c.bf16 %v6203_v34, %v6203_v34 }
 0x74b   : > { %v5870_v55 = vpop.f32.mrf.mxu2  ;;  %v5970_v47 = vpop.f32.mrf.mxu3 }
 0x74c   : > { %v5894_v57 = vadd.f32 %v5870_v55, %v9382_v38 }
 0x74d   : > { %v6057_v63 = vpop.f32.mrf.mxu0 }
 0x74e   : > { %v6085_v30 = vadd.f32 %v6057_v63, %v5988_v20  ;;  %v6156_v49 = vpop.f32.mrf.mxu1  ;;  %v5991_v44 = vadd.f32 %v5967_v0, %v5894_v57 }
 0x750   : > { %7079 = vmatmul.msk.bf16.gmra.mxu2 %vm609_vm3, %v6209_v54  ;;  %v9444_v53 = vadd.f32 %v6154_v50, %v6085_v30 }
 0x753   : > { %v5873_v25 = vpop.f32.mrf.mxu2  ;;  %v5972_v3 = vpop.f32.mrf.mxu3 }
 0x754   : > { %v5895_v60 = vadd.f32 %v5873_v25, %v9393_v22 }
 0x755   : > { %v6059_v28 = vpop.f32.mrf.mxu0 }
 0x756   : > { %v6086_v29 = vadd.f32 %v6059_v28, %v5989_v6  ;;  %v6159_v40 = vpop.f32.mrf.mxu1  ;;  %v5992_v38 = vadd.f32 %v5970_v47, %v5895_v60 }
 0x758   : > { %7087 = vmatmul.msk.bf16.gmra.mxu3 %vm609_vm3, %v6307_v59  ;;  %v9448_v20 = vadd.f32 %v6156_v49, %v6086_v29 }
 0x75b   : > { %v5875_v31 = vpop.f32.mrf.mxu2  ;;  %v5975_v61 = vpop.f32.mrf.mxu3 }
 0x75c   : > { %v5896_v58 = vadd.f32 %v5875_v31, %v9401_v52 }
 0x75d   : > { %v6062_v39 = vpop.f32.mrf.mxu0 }
 0x75e   : > { %v6087_v0 = vadd.f32 %v6062_v39, %v5990_v4  ;;  %v6161_v21 = vpop.f32.mrf.mxu1  ;;  %v5993_v22 = vadd.f32 %v5972_v3, %v5896_v58 }
 0x760   : > { %7080 = vmatmul.msk.bf16.gmra.mxu2 %vm609_vm3, %v6210_v43  ;;  %v9452_v6 = vadd.f32 %v6159_v40, %v6087_v0  ;;  %v7182_v0 = vpop.permute.xlu1 %7181 }
 0x763   : > { %v5878_v50 = vpop.f32.mrf.mxu2  ;;  %v5977_v55 = vpop.f32.mrf.mxu3 }
 0x764   : > { %v5897_v16 = vadd.f32 %v5878_v50, %v9409_v7 }
 0x765   : > { %v6064_v23 = vpop.f32.mrf.mxu0 }
 0x766   : > { %v6088_v5 = vadd.f32 %v6064_v23, %v5991_v44  ;;  %v6164_v57 = vpop.f32.mrf.mxu1  ;;  %v5994_v47 = vadd.f32 %v5975_v61, %v5897_v16  ;;  %v3673_v16 = vmax.f32 %v8970_v2, %v8975_v26  ;;  %v7184_v23 = vunpack.i.h.bf16 %v7182_v0 }
 0x768   : > { %v9455_v63 = vadd.f32 %v6161_v21, %v6088_v5  ;;  %v3676_v21 = vmax.f32 %v9023_v35, %v9025_v36  ;;  %v7183_v5 = vunpack.i.l.bf16 %v7182_v0 }
 0x76a   : > { %v3677_v35 = vmax.f32 %v3673_v16, %v3676_v21 }
 0x76b   : > { %v5880_v52 = vpop.f32.mrf.mxu2  ;;  %v5980_v30 = vpop.f32.mrf.mxu3 }
 0x76c   : > { %v5898_v4 = vadd.f32 %v5880_v52, %v9417_v11  ;;  %v9481_v26 = vsel %vm1775_vm4, %v3677_v35, %v7183_v5  ;;  %v9514_v35 = vld [vmem:[#allocation3 + $0x1a] ss:$4 sm:$0x3f] }
 0x76d   : > { %v6067_v49 = vpop.f32.mrf.mxu0 }
 0x76e   : > { %v6089_v54 = vadd.f32 %v6067_v49, %v5992_v38  ;;  %v6166_v25 = vpop.f32.mrf.mxu1  ;;  %v5995_v8 = vadd.f32 %v5977_v55, %v5898_v4  ;;  %v4578_v55 = vmax.f32 %v9245_v1, %v9247_v62  ;;  %v4597_v1 = vmax.f32 %v9323_v13, %v9327_v48  ;;  %v9485_v62 = vld [vmem:[#allocation3] ss:$4 sm:$0x3f] }
 0x770   : > { %v9458_v60 = vadd.f32 %v6164_v57, %v6089_v54  ;;  %v9489_v54 = vld [vmem:[#allocation3 + $0x1] ss:$4 sm:$0x3f] }
 0x773   : > { %v5883_v3 = vpop.f32.mrf.mxu2  ;;  %v5982_v28 = vpop.f32.mrf.mxu3 }
 0x774   : > { %v5899_v7 = vadd.f32 %v5883_v3, %v9422_v15  ;;  %v4581_v15 = vmax.f32 %v9282_v12, %v9284_v19  ;;  %v4600_v12 = vmax.f32 %v9370_v56, %v9372_v32  ;;  %v9494_v3 = vld [vmem:[#allocation3 + $0x3] ss:$4 sm:$0x3f]  ;;  %v6472_v28 = vrot.slane %v9481_v26, 2 }
 0x775   : > { %v6069_v29 = vpop.f32.mrf.mxu0 }
 0x776   : > { %v6090_v44 = vadd.f32 %v6069_v29, %v5993_v22  ;;  %v6169_v40 = vpop.f32.mrf.mxu1  ;;  %v5996_v59 = vadd.f32 %v5980_v30, %v5899_v7  ;;  %v4582_v36 = vmax.f32 %v4578_v55, %v4581_v15  ;;  %v4601_v56 = vmax.f32 %v4597_v1, %v4600_v12 }
 0x778   : > { %v9461_v31 = vadd.f32 %v6166_v25, %v6090_v44  ;;  %v4594_v2 = vsel %vm1775_vm4, %v4582_v36, %v7184_v23  ;;  %v9516_v36 = vld [vmem:[#allocation3 + $0x1b] ss:$4 sm:$0x3f] }
 0x779   : > { %v6475_v7 = vrot.slane %v4594_v2, 4  ;;  %v9520_v2 = vld [vmem:[#allocation3 + $0x1d] ss:$4 sm:$0x3f] }
 0x77b   : > { %v5885_v34 = vpop.f32.mrf.mxu2  ;;  %v6338_v58 = vpop.f32.mrf.mxu3 }
 0x77d   : > { %v6072_v11 = vpop.f32.mrf.mxu0 }
 0x77e   : > { %v6091_v61 = vadd.f32 %v6072_v11, %v5994_v47  ;;  %v6171_v39 = vpop.f32.mrf.mxu1 }
 0x780   : > { %v9463_v38 = vadd.f32 %v6169_v40, %v6091_v61  ;;  %v6495_v61 = vsel %vm353_vm0, %v6472_v28, %v6475_v7 }
 0x783   : > { %v6241_v43 = vpop.f32.mrf.mxu2  ;;  %v6340_v50 = vpop.f32.mrf.mxu3 }
 0x784   : > { %v6275_v22 = vadd.f32 %v6241_v43, %v9428_v41 }
 0x785   : > { %v6074_v57 = vpop.f32.mrf.mxu0 }
 0x786   : > { %v6372_v47 = vadd.f32 %v6338_v58, %v6275_v22  ;;  %v6092_v52 = vadd.f32 %v6074_v57, %v5995_v8  ;;  %v6174_v4 = vpop.f32.mrf.mxu1  ;;  %v9492_v8 = vld [vmem:[#allocation3 + $0x2] ss:$4 sm:$0x3f] }
 0x788   : > { %v6385_v19 = vadd.f32 %v9237_v9, %v6372_v47  ;;  %v9477_v41 = vadd.f32 %v6171_v39, %v6092_v52 }
 0x78a   : > { %v6398_v30 = vmax.f32 %v6385_v19, 0.0  ;;  %v9487_v49 = vpop.permute.xlu1 %7186  ;;  %v9518_v19 = vld [vmem:[#allocation3 + $0x1c] ss:$4 sm:$0x3f] }
 0x78b   : > { %v7188_v32 = vunpack.i.l.bf16 %v9487_v49  ;;  %v6243_v25 = vpop.f32.mrf.mxu2  ;;  %v6343_v48 = vpop.f32.mrf.mxu3 }
 0x78c   : > { %v6276_v13 = vadd.f32 %v6243_v25, %v9432_v14  ;;  %6411 = vst.msk [vmem:[#allocation3] sm:$0xff] %vm1775_vm4, %v6398_v30 }
 0x78d   : > { %v4613_v29 = vsel %vm1775_vm4, %v4601_v56, %v7188_v32  ;;  %v6077_v44 = vpop.f32.mrf.mxu0 }
 0x78e   : > { %v6478_v40 = vrot.slane %v4613_v29, 6  ;;  %v6373_v34 = vadd.f32 %v6340_v50, %v6276_v13  ;;  %v6093_v58 = vadd.f32 %v6077_v44, %v5996_v59  ;;  %v6176_v11 = vpop.f32.mrf.mxu1 }
 0x790   : > { %v6496_v39 = vsel %vm6492_vm6, %v6475_v7, %v6478_v40  ;;  %v6386_v0 = vadd.f32 %v9237_v9, %v6373_v34  ;;  %v9505_v21 = vadd.f32 %v6174_v4, %v6093_v58 }
 0x791   : > { %v7129_v14 = vpack.c.bf16 %v6496_v39, %v6495_v61  ;;  %v9531_v39 = vld [vmem:[#allocation3 + $0x34] ss:$4 sm:$0x3f] }
 0x792   : > { %v6399_v15 = vmax.f32 %v6386_v0, 0.0 }
 0x793   : > { %7137 = vst [vmem:[%s8538_s22 + $0x10] sm:$0xff] %v7129_v14   ;;  %v6246_v43 = vpop.f32.mrf.mxu2  ;;  %v6345_v16 = vpop.f32.mrf.mxu3 }
 0x794   : > { %v6277_v22 = vadd.f32 %v6246_v43, %v9436_v33  ;;  %6412 = vst.msk [vmem:[#allocation3 + $0x8] sm:$0xff] %vm1775_vm4, %v6399_v15 }
 0x795   : > { %v6079_v59 = vpop.f32.mrf.mxu0 }
 0x796   : > { %v6374_v50 = vadd.f32 %v6343_v48, %v6277_v22 }
 0x798   : > { %v6387_v55 = vadd.f32 %v9237_v9, %v6374_v50 }
 0x79a   : > { %v6400_v23 = vmax.f32 %v6387_v55, 0.0 }
 0x79b   : > { %v6248_v5 = vpop.f32.mrf.mxu2  ;;  %v6348_v47 = vpop.f32.mrf.mxu3 }
 0x79c   : > { %v6278_v57 = vadd.f32 %v6248_v5, %v9440_v37  ;;  %6413 = vst.msk [vmem:[#allocation3 + $0x10] sm:$0xff] %vm1775_vm4, %v6400_v23 }
 0x79e   : > { %v6375_v52 = vadd.f32 %v6345_v16, %v6278_v57 }
 0x7a0   : > { %v6388_v4 = vadd.f32 %v9237_v9, %v6375_v52 }
 0x7a2   : > { %v6401_v33 = vmax.f32 %v6388_v4, 0.0 }
 0x7a3   : > { %v6251_v12 = vpop.f32.mrf.mxu2  ;;  %v6350_v30 = vpop.f32.mrf.mxu3 }
 0x7a4   : > { %v6279_v1 = vadd.f32 %v6251_v12, %v9444_v53  ;;  %6414 = vst.msk [vmem:[#allocation3 + $0x18] sm:$0xff] %vm1775_vm4, %v6401_v33  ;;  %v9544_v12 = vld [vmem:[#allocation3 + $0x4e] ss:$4 sm:$0x3f] }
 0x7a6   : > { %v6376_v37 = vadd.f32 %v6348_v47, %v6279_v1  ;;  %v9546_v1 = vld [vmem:[#allocation3 + $0x4f] ss:$4 sm:$0x3f] }
 0x7a8   : > { %v6389_v56 = vadd.f32 %v9237_v9, %v6376_v37 }
 0x7aa   : > { %v6402_v32 = vmax.f32 %v6389_v56, 0.0 }
 0x7ab   : > { %v6253_v25 = vpop.f32.mrf.mxu2  ;;  %v6353_v13 = vpop.f32.mrf.mxu3 }
 0x7ac   : > { %v6280_v7 = vadd.f32 %v6253_v25, %v9448_v20  ;;  %6415 = vst.msk [vmem:[#allocation3 + $0x20] sm:$0xff] %vm1775_vm4, %v6402_v32  ;;  %v9533_v20 = vld [vmem:[#allocation3 + $0x35] ss:$4 sm:$0x3f] }
 0x7ae   : > { %v6377_v48 = vadd.f32 %v6350_v30, %v6280_v7 }
 0x7b0   : > { %v6390_v29 = vadd.f32 %v9237_v9, %v6377_v48 }
 0x7b2   : > { %v6403_v44 = vmax.f32 %v6390_v29, 0.0 }
 0x7b3   : > { %v6256_v40 = vpop.f32.mrf.mxu2  ;;  %v6355_v34 = vpop.f32.mrf.mxu3 }
 0x7b4   : > { %v6281_v53 = vadd.f32 %v6256_v40, %v9452_v6  ;;  %6416 = vst.msk [vmem:[#allocation3 + $0x28] sm:$0xff] %vm1775_vm4, %v6403_v44 }
 0x7b6   : > { %v6378_v58 = vadd.f32 %v6353_v13, %v6281_v53 }
 0x7b8   : > { %v6391_v11 = vadd.f32 %v9237_v9, %v6378_v58  ;;  %v7248_v58 = vld [vmem:[#allocation4] ss:$0 sm:$0xff] }
 0x7ba   : > { %v6404_v61 = vmax.f32 %v6391_v11, 0.0 }
 0x7bb   : > { %v6258_v0 = vpop.f32.mrf.mxu2  ;;  %v6358_v15 = vpop.f32.mrf.mxu3 }
 0x7bc   : > { %v6282_v14 = vadd.f32 %v6258_v0, %v9455_v63  ;;  %6417 = vst.msk [vmem:[#allocation3 + $0x30] sm:$0xff] %vm1775_vm4, %v6404_v61 }
 0x7be   : > { %v6379_v43 = vadd.f32 %v6355_v34, %v6282_v14 }
 0x7c0   : > { %v6392_v6 = vadd.f32 %v9237_v9, %v6379_v43  ;;  %v6432_v43 = vld [vmem:[#allocation3 + $0x3] ss:$4 sm:$0x3f] }
 0x7c2   : > { %v6405_v22 = vmax.f32 %v6392_v6, 0.0 }
 0x7c3   : > { %v6261_v16 = vpop.f32.mrf.mxu2  ;;  %v6360_v50 = vpop.f32.mrf.mxu3  ;;  %v6434_v14 = vld [vmem:[#allocation3 + $0x1c] ss:$4 sm:$0x3f] }
 0x7c4   : > { %6418 = vst.msk [vmem:[#allocation3 + $0x38] sm:$0xff] %vm1775_vm4, %v6405_v22  ;;  %v6283_v59 = vadd.f32 %v6261_v16, %v9458_v60 }
 0x7c6   : > { %v6380_v55 = vadd.f32 %v6358_v15, %v6283_v59  ;;  %v6431_v15 = vld [vmem:[#allocation3 + $0x2] ss:$4 sm:$0x3f] }
 0x7c8   : > { %v6393_v23 = vadd.f32 %v9237_v9, %v6380_v55 }
 0x7ca   : > { %v6406_v5 = vmax.f32 %v6393_v23, 0.0 }
 0x7cb   : > { %v6263_v57 = vpop.f32.mrf.mxu2  ;;  %v6363_v47 = vpop.f32.mrf.mxu3 }
 0x7cc   : > { %6419 = vst.msk [vmem:[#allocation3 + $0x40] sm:$0xff] %vm1775_vm4, %v6406_v5  ;;  %v6284_v63 = vadd.f32 %v6263_v57, %v9461_v31 }
 0x7ce   : > { %v6381_v52 = vadd.f32 %v6360_v50, %v6284_v63  ;;  %v6433_v50 = vmax.f32 %v6431_v15, %v6432_v43  ;;  %v5512_v63 = vmax.f32 %v9518_v19, %v9520_v2  ;;  %v6424_v2 = vld [vmem:[#allocation3] ss:$4 sm:$0x3f] }
 0x7d0   : > { %v6394_v4 = vadd.f32 %v9237_v9, %v6381_v52  ;;  %v5509_v52 = vmax.f32 %v9492_v8, %v9494_v3 }
 0x7d2   : > { %v6407_v33 = vmax.f32 %v6394_v4, 0.0  ;;  %v3661_v4 = vmax.f32 %v8884_v51, %v8889_v45  ;;  %v5524_v51 = vmax.f32 %v9544_v12, %v9546_v1  ;;  %v3657_v12 = vmax.f32 %v8924_v18, %v8926_v27 }
 0x7d3   : > { %v6266_v60 = vpop.f32.mrf.mxu2  ;;  %v6365_v37 = vpop.f32.mrf.mxu3  ;;  %v5505_v1 = vmax.f32 %v9514_v35, %v9516_v36 }
 0x7d4   : > { %6420 = vst.msk [vmem:[#allocation3 + $0x48] sm:$0xff] %vm1775_vm4, %v6407_v33  ;;  %v6285_v30 = vadd.f32 %v6266_v60, %v9463_v38  ;;  %v5513_v33 = vmax.f32 %v5509_v52, %v5512_v63 }
 0x7d6   : > { %v6382_v56 = vadd.f32 %v6363_v47, %v6285_v30  ;;  %v3664_v47 = vmax.f32 %v8931_v17, %v8933_v24 }
 0x7d8   : > { %v6395_v32 = vadd.f32 %v9237_v9, %v6382_v56  ;;  %v3665_v60 = vmax.f32 %v3661_v4, %v3664_v47  ;;  %v6428_v56 = vld [vmem:[#allocation3 + $0x1b] ss:$4 sm:$0x3f] }
 0x7da   : > { %v6408_v25 = vmax.f32 %v6395_v32, 0.0  ;;  %v7195_v30 = vpack.i.bf16 %v5513_v33, %v3665_v60 }
 0x7db   : > { %v6268_v31 = vpop.f32.mrf.mxu2  ;;  %v6368_v13 = vpop.f32.mrf.mxu3  ;;  %v6450_v6 = vld [vmem:[#allocation3 + $0x36] ss:$4 sm:$0x3f] }
 0x7dc   : > { %6421 = vst.msk [vmem:[#allocation3 + $0x50] sm:$0xff] %vm1775_vm4, %v6408_v25  ;;  %v6286_v7 = vadd.f32 %v6268_v31, %v9477_v41  ;;  %v6435_v41 = vld [vmem:[#allocation3 + $0x1d] ss:$4 sm:$0x3f] }
 0x7dd   : > { %v6436_v22 = vmax.f32 %v6434_v14, %v6435_v41  ;;  %v6425_v25 = vld [vmem:[#allocation3 + $0x1] ss:$4 sm:$0x3f]  ;;  %v6443_v31 = vld [vmem:[#allocation3 + $0x34] ss:$4 sm:$0x3f] }
 0x7de   : > { %v6383_v48 = vadd.f32 %v6365_v37, %v6286_v7  ;;  %v6427_v37 = vld [vmem:[#allocation3 + $0x1a] ss:$4 sm:$0x3f]  ;;  %v6444_v7 = vld [vmem:[#allocation3 + $0x35] ss:$4 sm:$0x3f] }
 0x7df   : > { %v6437_v23 = vmax.f32 %v6433_v50, %v6436_v22  ;;  %v6429_v17 = vmax.f32 %v6427_v37, %v6428_v56  ;;  %v6445_v8 = vmax.f32 %v6443_v31, %v6444_v7 }
 0x7e0   : > { %v6396_v29 = vadd.f32 %v9237_v9, %v6383_v48  ;;  %v6451_v9 = vld [vmem:[#allocation3 + $0x37] ss:$4 sm:$0x3f] }
 0x7e1   : > { %v6452_v55 = vmax.f32 %v6450_v6, %v6451_v9 }
 0x7e2   : > { %v6409_v44 = vmax.f32 %v6396_v29, 0.0 }
 0x7e3   : > { %v6271_v40 = vpop.f32.mrf.mxu2  ;;  %v6370_v53 = vpop.f32.mrf.mxu3 }
 0x7e4   : > { %6422 = vst.msk [vmem:[#allocation3 + $0x58] sm:$0xff] %vm1775_vm4, %v6409_v44  ;;  %v6287_v38 = vadd.f32 %v6271_v40, %v9505_v21  ;;  %v5521_v40 = vmax.f32 %v9531_v39, %v9533_v20  ;;  %v5502_v20 = vmax.f32 %v9485_v62, %v9489_v54 }
 0x7e6   : > { %v6384_v34 = vadd.f32 %v6368_v13, %v6287_v38  ;;  %v6426_v13 = vmax.f32 %v6424_v2, %v6425_v25  ;;  %v7189_v38 = vunpack.i.h.bf16 %v9487_v49  ;;  %v3654_v49 = vmax.f32 %v8878_v46, %v8880_v42 }
 0x7e7   : > { %v5506_v18 = vmax.f32 %v5502_v20, %v5505_v1 }
 0x7e8   : > { %v6397_v11 = vadd.f32 %v7248_v58, %v6384_v34  ;;  %v6430_v3 = vmax.f32 %v6426_v13, %v6429_v17  ;;  %v3658_v15 = vmax.f32 %v3654_v49, %v3657_v12 }
 0x7ea   : > { %v6410_v61 = vmax.f32 %v6397_v11, 0.0 }
 0x7eb   : > { %v6273_v0 = vpop.f32.mrf.mxu2 }
 0x7ec   : > { %6423 = vst.msk [vmem:[#allocation3 + $0x60] sm:$0xff] %vm1775_vm4, %v6410_v61  ;;  %v5525_v61 = vmax.f32 %v5521_v40, %v5524_v51 }
 0x7ee   : > { %v5537_v14 = vsel %vm1775_vm4, %v5525_v61, %v7189_v38 }
 0x7ef   : > { %v6481_v35 = vrot.slane %v5537_v14, 2 }
 0x7f3   : > { %v6453_v16 = vld [vmem:[#allocation3 + $0x50] ss:$4 sm:$0x3f]  ;;  %v6454_v59 = vld [vmem:[#allocation3 + $0x51] ss:$4 sm:$0x3f] }
 0x7f4   : > { %v6455_v21 = vmax.f32 %v6453_v16, %v6454_v59  ;;  %v6446_v32 = vld [vmem:[#allocation3 + $0x4e] ss:$4 sm:$0x3f]  ;;  %v6447_v19 = vld [vmem:[#allocation3 + $0x4f] ss:$4 sm:$0x3f] }
 0x7f5   : > { %v6448_v24 = vmax.f32 %v6446_v32, %v6447_v19 }
 0x7f6   : > { %v6456_v5 = vmax.f32 %v6452_v55, %v6455_v21 }
 0x7f7   : > { %v6449_v44 = vmax.f32 %v6445_v8, %v6448_v24 }
 0x7f8   : > { %v7190_v57 = vpack.i.bf16 %v6456_v5, %v6437_v23 }
 0x7fa   : > { %7191 = vrot.lane.b32.xlu1 %v7190_v57, %s7294_s7 }
 0x802   : > { %7196 = vrot.lane.b32.xlu1 %v7195_v30, %s7294_s7 }
 0x86c   : > { %v7192_v45 = vpop.permute.xlu1 %7191 }
 0x86d   : > { %v7194_v48 = vunpack.i.h.bf16 %v7192_v45  ;;  %v7193_v29 = vunpack.i.l.bf16 %v7192_v45 }
 0x86f   : > { %v6442_v53 = vsel %vm1775_vm4, %v6430_v3, %v7193_v29  ;;  %v6461_v34 = vsel %vm1775_vm4, %v6449_v44, %v7194_v48 }
 0x870   : > { %v6484_v58 = vrot.slane %v6442_v53, 4  ;;  %v6487_v11 = vrot.slane %v6461_v34, 6 }
 0x872   : > { %v6499_v0 = vsel %vm6492_vm6, %v6484_v58, %v6487_v11  ;;  %v6498_v62 = vsel %vm353_vm0, %v6481_v35, %v6484_v58 }
 0x873   : > { %v6508_v39 = vpack.c.bf16 %v6499_v0, %v6499_v0 }
 0x874   : > { %v7197_v41 = vpop.permute.xlu1 %7196 }
 0x875   : > { %6517 = vst [vmem:[%s8538_s22 + $0x20] sm:$0xf] %v6508_v39  ;;  %v7199_v27 = vunpack.i.h.bf16 %v7197_v41  ;;  %v7198_v43 = vunpack.i.l.bf16 %v7197_v41 }
 0x877   : > { %v5518_v36 = vsel %vm1775_vm4, %v5506_v18, %v7199_v27  ;;  %v3670_v6 = vsel %vm1775_vm4, %v3658_v15, %v7198_v43 }
 0x878   : > { %v6494_v46 = vsel %vm6489_vm5, %v3670_v6, %v6472_v28  ;;  %v6497_v42 = vsel %vm6489_vm5, %v5518_v36, %v6481_v35 }
 0x879   : > { %v7124_v54 = vpack.c.bf16 %v6494_v46, %v8544_v10  ;;  %v7134_v9 = vpack.c.bf16 %v6498_v62, %v6497_v42 }
 0x87b   : > { %7136 = vst [vmem:[%s8538_s22 + $0x8] sm:$0xff] %v7124_v54  }
 0x87c   : > { %7138 = vst [vmem:[%s8538_s22 + $0x18] sm:$0xff] %v7134_v9  }
 0x87d PF: > { %s16_s18 = sadd.s32 1, %s7289_s18  }
 0x87e   : > { %p13_p7 = scmp.ge.s32.totalorder %s16_s18, 4  }
 0x880   :  { %15 = sbr.rel (!%p13_p7) target bundleno = 1 (0x1), region = 90 }
 0x885   :  { %6539 = vsyncpa [#allocation5], 1 }
 0x886   :  { %6541 = vsyncpa [#allocation5 + $0x1], 1 }

// kernel: mnist_net_forward.3
= control target key start
LH: loop header
LB: loop body
LE: loop exit
PB: predicated region body
PF: predicated region fallthrough
CT: control target
= control target key end

     0   :  { %12 = vsyncpa [#allocation3], 0  ;;  %s9112_s0 = inlined_call_operand.vmem [shape: bf16[2,9216], index: 0, kind: input, shape index: {}]   ;;  %s9113_s1 = inlined_call_operand.hbm [shape: bf16[9216,128], index: 1, kind: input, shape index: {}]   ;;  %s9114_s2 = inlined_call_operand.hbm [shape: f32[1,128], index: 2, kind: input, shape index: {}]   ;;  %s9115_s3 = inlined_call_operand.hbm [shape: bf16[128,128], index: 3, kind: input, shape index: {}]   ;;  %s9116_s4 = inlined_call_operand.hbm [shape: f32[1,128], index: 4, kind: input, shape index: {}]   ;;  %s9117_s5 = inlined_call_operand.hbm [shape: f32[2,128], index: 5, kind: output, shape index: {0}]   ;;  %s9118_s6 = inlined_call_operand.hbm [shape: f32[2,128], index: 6, kind: output, shape index: {1}]  }
   0x1   :  { %13 = vsyncpa [#allocation6], 0 }
   0x2   :  { %14 = vsyncpa [#allocation9], 0 }
   0x3   :  { %15 = vsyncpa [#allocation4], 0  ;;  %s37_s23 = sshll.u32 %s9114_s2, 4  ;;  %s38_s23 = int_to_ptr.hbm [resolvable:$true] %s37_s23 }
   0x4   :  { %16 = vsyncpa [#allocation12], 0  ;;  %s9006_s24 = smov [#allocation5]   ;;  %s23_s28 = sshll.u32 %s9113_s1, 4  ;;  %s24_s28 = int_to_ptr.hbm [resolvable:$true] %s23_s28 }
   0x5   :  { %s39_s25 = sshll.u32 %s9006_s24, 4  ;;  %s9007_s29 = smov [#allocation2]   ;;  %s40_s25 = int_to_ptr.vmem [resolvable:$true] %s39_s25 }
   0x6   :  { %42 = dma.hbm_to_vmem [thread:$0]  %s38_s23, 16, %s40_s25, [#allocation6]  }
   0x7   :  { %s25_s30 = sshll.u32 %s9007_s29, 4  ;;  %s9008_s7 = smov 64   ;;  %s26_s30 = int_to_ptr.vmem [resolvable:$true] %s25_s30 }
   0x8   :  { %s9009_s8 = smov 4   ;;  %s47_s2 = sshll.u32 %s9115_s3, 4  ;;  %s48_s2 = int_to_ptr.hbm [resolvable:$true] %s47_s2 }
   0x9   :  { %31 = dma.hbm_to_vmem [thread:$0]  %s24_s28, 73728, %s26_s30, [#allocation3], %s9008_s7, %s9008_s7, %s9009_s8  }
   0xa   :  { %s9010_s11 = smov [#allocation7]   ;;  %s61_s1 = sshll.u32 %s9116_s4, 4  ;;  %s62_s1 = int_to_ptr.hbm [resolvable:$true] %s61_s1 }
   0xb   :  { %s49_s12 = sshll.u32 %s9010_s11, 4  ;;  %s9011_s15 = smov [#allocation8]   ;;  %s50_s12 = int_to_ptr.vmem [resolvable:$true] %s49_s12 }
   0xc   :  { %55 = dma.hbm_to_vmem [thread:$0]  %s48_s2, 1024, %s50_s12, [#allocation6], %s9008_s7, %s9008_s7, %s9009_s8  }
   0xd   :  { %s63_s16 = sshll.u32 %s9011_s15, 4  ;;  %s64_s16 = int_to_ptr.vmem [resolvable:$true] %s63_s16 }
   0xe   :  { %66 = dma.hbm_to_vmem [thread:$0]  %s62_s1, 16, %s64_s16, [#allocation9]  }
   0xf   :  { %8996 = dma.done.wait [#allocation3], 73728  }
  0x10   :  { %8997 = vsyncadd [#allocation3], 4294893568 }
  0x11   :  { %8998 = dma.done.wait [#allocation6], 1040  }
  0x12   :  { %8999 = vsyncadd [#allocation6], 4294966256 }
  0x13   :  { %9000 = dma.done.wait [#allocation9], 16  }
  0x14   :  { %9001 = vsyncadd [#allocation9], 4294967280  ;;  %v8265_v0 = vld [vmem:[#allocation2 + $0x38] sm:$0xff]  ;;  %v8264_v4 = vld [vmem:[#allocation2 + $0x30] sm:$0xff]  ;;  %s5894_s11 = sshll.u32 %s9117_s5, 4  ;;  %s9013_s12 = smov [#allocation11]   ;;  %s5895_s11 = int_to_ptr.hbm [resolvable:$true] %s5894_s11 }
  0x15   :  { %v8273_v1 = vld [vmem:[#allocation2 + $0x78] sm:$0xff]  ;;  %4866 = vmatpush.bf16.msra.mxu0 %v8265_v0  ;;  %v8272_v5 = vld [vmem:[#allocation2 + $0x70] sm:$0xff]  ;;  %v8263_v8 = vld [vmem:[#allocation2 + $0x28] sm:$0xff]  ;;  %s5903_s13 = sshll.u32 %s9013_s12, 4  ;;  %s5905_s15 = sshll.u32 %s9118_s6, 4  ;;  %s5904_s13 = int_to_ptr.vmem [resolvable:$true] %s5903_s13  ;;  %s5906_s15 = int_to_ptr.hbm [resolvable:$true] %s5905_s15 }
  0x16   :  { %v8281_v2 = vld [vmem:[#allocation2 + $0xb8] sm:$0xff]  ;;  %4879 = vmatpush.bf16.msra.mxu1 %v8273_v1  ;;  %v8280_v6 = vld [vmem:[#allocation2 + $0xb0] sm:$0xff]  ;;  %v8271_v9 = vld [vmem:[#allocation2 + $0x68] sm:$0xff] }
  0x17   :  { %v8289_v3 = vld [vmem:[#allocation2 + $0xf8] sm:$0xff]  ;;  %4892 = vmatpush.bf16.msra.mxu2 %v8281_v2  ;;  %v8288_v7 = vld [vmem:[#allocation2 + $0xf0] sm:$0xff]  ;;  %v8279_v10 = vld [vmem:[#allocation2 + $0xa8] sm:$0xff] }
  0x18   :  { %4905 = vmatpush.bf16.msra.mxu3 %v8289_v3  ;;  %v8287_v11 = vld [vmem:[#allocation2 + $0xe8] sm:$0xff]  ;;  %v8262_v12 = vld [vmem:[#allocation2 + $0x20] sm:$0xff]  ;;  %v8261_v16 = vld [vmem:[#allocation2 + $0x18] sm:$0xff] }
  0x19   :  { %4867 = vmatpush.bf16.msra.mxu0 %v8264_v4  ;;  %v8270_v13 = vld [vmem:[#allocation2 + $0x60] sm:$0xff]  ;;  %v8269_v17 = vld [vmem:[#allocation2 + $0x58] sm:$0xff]  ;;  %v8260_v20 = vld [vmem:[#allocation2 + $0x10] sm:$0xff] }
  0x1a   :  { %4880 = vmatpush.bf16.msra.mxu1 %v8272_v5  ;;  %v8278_v14 = vld [vmem:[#allocation2 + $0xa0] sm:$0xff]  ;;  %v8277_v18 = vld [vmem:[#allocation2 + $0x98] sm:$0xff]  ;;  %v8268_v21 = vld [vmem:[#allocation2 + $0x50] sm:$0xff] }
  0x1b   :  { %4893 = vmatpush.bf16.msra.mxu2 %v8280_v6  ;;  %v8286_v15 = vld [vmem:[#allocation2 + $0xe0] sm:$0xff]  ;;  %v8285_v19 = vld [vmem:[#allocation2 + $0xd8] sm:$0xff]  ;;  %v8276_v23 = vld [vmem:[#allocation2 + $0x90] sm:$0xff] }
  0x1c   :  { %4906 = vmatpush.bf16.msra.mxu3 %v8288_v7  ;;  %v83_v22 = vld [vmem:[%s9112_s0] sm:$0xff]  ;;  %v8284_v24 = vld [vmem:[#allocation2 + $0xd0] sm:$0xff]  ;;  %v8259_v25 = vld [vmem:[#allocation2 + $0x8] sm:$0xff] }
  0x1d   :  { %4868 = vmatpush.bf16.msra.mxu0 %v8263_v8  ;;  %1249 = vst [vmem:[#allocation1] ss:$9 sm:$0xff] %v83_v22  ;;  %v8267_v26 = vld [vmem:[#allocation2 + $0x48] sm:$0xff]  ;;  %v8258_v29 = vld [vmem:[#allocation2] sm:$0xff]  ;;  %v8297_v33 = vld [vmem:[#allocation2 + $0x138] sm:$0xff] }
  0x1e   :  { %4881 = vmatpush.bf16.msra.mxu1 %v8271_v9  ;;  %v8275_v27 = vld [vmem:[#allocation2 + $0x88] sm:$0xff]  ;;  %v8266_v30 = vld [vmem:[#allocation2 + $0x40] sm:$0xff]  ;;  %v8305_v34 = vld [vmem:[#allocation2 + $0x178] sm:$0xff] }
  0x1f   :  { %4894 = vmatpush.bf16.msra.mxu2 %v8279_v10  ;;  %v8283_v28 = vld [vmem:[#allocation2 + $0xc8] sm:$0xff]  ;;  %v8274_v31 = vld [vmem:[#allocation2 + $0x80] sm:$0xff]  ;;  %v8313_v35 = vld [vmem:[#allocation2 + $0x1b8] sm:$0xff] }
  0x20   :  { %4907 = vmatpush.bf16.msra.mxu3 %v8287_v11  ;;  %v8282_v32 = vld [vmem:[#allocation2 + $0xc0] sm:$0xff]  ;;  %v8321_v36 = vld [vmem:[#allocation2 + $0x1f8] sm:$0xff]  ;;  %v8296_v37 = vld [vmem:[#allocation2 + $0x130] sm:$0xff] }
  0x21   :  { %4869 = vmatpush.bf16.msra.mxu0 %v8262_v12  ;;  %v8304_v40 = vld [vmem:[#allocation2 + $0x170] sm:$0xff]  ;;  %v8295_v45 = vld [vmem:[#allocation2 + $0x128] sm:$0xff]  ;;  %v8294_v49 = vld [vmem:[#allocation2 + $0x120] sm:$0xff] }
  0x22   :  { %4882 = vmatpush.bf16.msra.mxu1 %v8270_v13  ;;  %v8312_v43 = vld [vmem:[#allocation2 + $0x1b0] sm:$0xff]  ;;  %v8303_v46 = vld [vmem:[#allocation2 + $0x168] sm:$0xff]  ;;  %v8302_v50 = vld [vmem:[#allocation2 + $0x160] sm:$0xff] }
  0x23   :  { %4895 = vmatpush.bf16.msra.mxu2 %v8278_v14  ;;  %v8320_v44 = vld [vmem:[#allocation2 + $0x1f0] sm:$0xff]  ;;  %v8311_v47 = vld [vmem:[#allocation2 + $0x1a8] sm:$0xff]  ;;  %v8310_v51 = vld [vmem:[#allocation2 + $0x1a0] sm:$0xff] }
  0x24   :  { %4908 = vmatpush.bf16.msra.mxu3 %v8286_v15  ;;  %v1252_v38 = vld [vmem:[#allocation1 + $0x12] sm:$0xff]  ;;  %v1250_v39 = vld [vmem:[#allocation1] sm:$0xff]  ;;  %v1251_v42 = vld [vmem:[#allocation1 + $0x9] sm:$0xff] }
  0x25   :  { %4870 = vmatpush.bf16.msra.mxu0 %v8261_v16  ;;  %v1253_v41 = vld [vmem:[#allocation1 + $0x1b] sm:$0xff]  ;;  %v8319_v48 = vld [vmem:[#allocation2 + $0x1e8] sm:$0xff]  ;;  %v8318_v52 = vld [vmem:[#allocation2 + $0x1e0] sm:$0xff] }
  0x26   :  { %4883 = vmatpush.bf16.msra.mxu1 %v8269_v17  ;;  %v8293_v53 = vld [vmem:[#allocation2 + $0x118] sm:$0xff]  ;;  %v8292_v57 = vld [vmem:[#allocation2 + $0x110] sm:$0xff]  ;;  %v8291_v61 = vld [vmem:[#allocation2 + $0x108] sm:$0xff] }
  0x27   :  { %4896 = vmatpush.bf16.msra.mxu2 %v8277_v18  ;;  %v8301_v54 = vld [vmem:[#allocation2 + $0x158] sm:$0xff]  ;;  %v8300_v58 = vld [vmem:[#allocation2 + $0x150] sm:$0xff]  ;;  %v8299_v62 = vld [vmem:[#allocation2 + $0x148] sm:$0xff] }
  0x28   :  { %4909 = vmatpush.bf16.msra.mxu3 %v8285_v19  ;;  %v8309_v55 = vld [vmem:[#allocation2 + $0x198] sm:$0xff]  ;;  %v8308_v59 = vld [vmem:[#allocation2 + $0x190] sm:$0xff]  ;;  %v8307_v63 = vld [vmem:[#allocation2 + $0x188] sm:$0xff] }
  0x29   :  { %4871 = vmatpush.bf16.msra.mxu0 %v8260_v20  ;;  %v8317_v56 = vld [vmem:[#allocation2 + $0x1d8] sm:$0xff]  ;;  %v8316_v60 = vld [vmem:[#allocation2 + $0x1d0] sm:$0xff]  ;;  %v8315_v0 = vld [vmem:[#allocation2 + $0x1c8] sm:$0xff] }
  0x2a   :  { %4884 = vmatpush.bf16.msra.mxu1 %v8268_v21  ;;  %v1256_v1 = vld [vmem:[#allocation1 + $0x36] sm:$0xff]  ;;  %v1254_v2 = vld [vmem:[#allocation1 + $0x24] sm:$0xff]  ;;  %v1255_v4 = vld [vmem:[#allocation1 + $0x2d] sm:$0xff] }
  0x2b   :  { %4897 = vmatpush.bf16.msra.mxu2 %v8276_v23  ;;  %v1257_v3 = vld [vmem:[#allocation1 + $0x3f] sm:$0xff]  ;;  %v84_v5 = vld [vmem:[%s9112_s0 + $0x8] sm:$0xff]  ;;  %v8327_v18 = vld [vmem:[#allocation2 + $0x228] sm:$0xff] }
  0x2c   :  { %4910 = vmatpush.bf16.msra.mxu3 %v8284_v24  ;;  %1259 = vst [vmem:[#allocation1] ss:$9 sm:$0xff] %v84_v5  ;;  %v8290_v6 = vld [vmem:[#allocation2 + $0x100] sm:$0xff]  ;;  %v8329_v10 = vld [vmem:[#allocation2 + $0x238] sm:$0xff]  ;;  %v8328_v14 = vld [vmem:[#allocation2 + $0x230] sm:$0xff] }
  0x2d   :  { %4872 = vmatpush.bf16.msra.mxu0 %v8259_v25  ;;  %v8298_v7 = vld [vmem:[#allocation2 + $0x140] sm:$0xff]  ;;  %v8337_v11 = vld [vmem:[#allocation2 + $0x278] sm:$0xff]  ;;  %v8336_v15 = vld [vmem:[#allocation2 + $0x270] sm:$0xff] }
  0x2e   :  { %4885 = vmatpush.bf16.msra.mxu1 %v8267_v26  ;;  %v8306_v8 = vld [vmem:[#allocation2 + $0x180] sm:$0xff]  ;;  %v8345_v12 = vld [vmem:[#allocation2 + $0x2b8] sm:$0xff]  ;;  %v8344_v16 = vld [vmem:[#allocation2 + $0x2b0] sm:$0xff] }
  0x2f   :  { %4898 = vmatpush.bf16.msra.mxu2 %v8275_v27  ;;  %v8314_v9 = vld [vmem:[#allocation2 + $0x1c0] sm:$0xff]  ;;  %v8353_v13 = vld [vmem:[#allocation2 + $0x2f8] sm:$0xff]  ;;  %v8352_v17 = vld [vmem:[#allocation2 + $0x2f0] sm:$0xff] }
  0x30   :  { %4911 = vmatpush.bf16.msra.mxu3 %v8283_v28  ;;  %v8335_v19 = vld [vmem:[#allocation2 + $0x268] sm:$0xff]  ;;  %v8326_v22 = vld [vmem:[#allocation2 + $0x220] sm:$0xff]  ;;  %v8325_v26 = vld [vmem:[#allocation2 + $0x218] sm:$0xff] }
  0x31   :  { %4873 = vmatpush.bf16.msra.mxu0 %v8258_v29  ;;  %v8343_v20 = vld [vmem:[#allocation2 + $0x2a8] sm:$0xff]  ;;  %v8334_v23 = vld [vmem:[#allocation2 + $0x260] sm:$0xff]  ;;  %v8333_v27 = vld [vmem:[#allocation2 + $0x258] sm:$0xff] }
  0x32   :  { %4886 = vmatpush.bf16.msra.mxu1 %v8266_v30  ;;  %v8351_v21 = vld [vmem:[#allocation2 + $0x2e8] sm:$0xff]  ;;  %v8342_v24 = vld [vmem:[#allocation2 + $0x2a0] sm:$0xff]  ;;  %v8341_v28 = vld [vmem:[#allocation2 + $0x298] sm:$0xff] }
  0x33   :  { %4899 = vmatpush.bf16.msra.mxu2 %v8274_v31  ;;  %v8350_v25 = vld [vmem:[#allocation2 + $0x2e0] sm:$0xff]  ;;  %v8349_v29 = vld [vmem:[#allocation2 + $0x2d8] sm:$0xff]  ;;  %v8324_v30 = vld [vmem:[#allocation2 + $0x210] sm:$0xff] }
  0x34   :  { %4912 = vmatpush.bf16.msra.mxu3 %v8282_v32  ;;  %4874 = vmatmul.bf16.vlgmr.msra.gmra.mxu0 %v1250_v39  ;;  %v8332_v31 = vld [vmem:[#allocation2 + $0x250] sm:$0xff]  ;;  %v8330_v39 = vld [vmem:[#allocation2 + $0x240] sm:$0xff] }
  0x35   :  { %4918 = vmatpush.bf16.msrb.mxu0 %v8297_v33  ;;  %4887 = vmatmul.bf16.vlgmr.msra.gmra.mxu1 %v1251_v42  ;;  %v8340_v32 = vld [vmem:[#allocation2 + $0x290] sm:$0xff]  ;;  %v8361_v42 = vld [vmem:[#allocation2 + $0x338] sm:$0xff] }
  0x36   :  { %4931 = vmatpush.bf16.msrb.mxu1 %v8305_v34  ;;  %4900 = vmatmul.bf16.vlgmr.msra.gmra.mxu2 %v1252_v38  ;;  %v8348_v33 = vld [vmem:[#allocation2 + $0x2d0] sm:$0xff]  ;;  %v8323_v34 = vld [vmem:[#allocation2 + $0x208] sm:$0xff]  ;;  %v8322_v38 = vld [vmem:[#allocation2 + $0x200] sm:$0xff] }
  0x37   :  { %4944 = vmatpush.bf16.msrb.mxu2 %v8313_v35  ;;  %4913 = vmatmul.bf16.vlgmr.msra.gmra.mxu3 %v1253_v41  ;;  %v8331_v35 = vld [vmem:[#allocation2 + $0x248] sm:$0xff]  ;;  %v8346_v41 = vld [vmem:[#allocation2 + $0x2c0] sm:$0xff]  ;;  %v8380_v5 = vld [vmem:[#allocation2 + $0x3d0] sm:$0xff] }
  0x38   :  { %4957 = vmatpush.bf16.msrb.mxu3 %v8321_v36  ;;  %v8339_v36 = vld [vmem:[#allocation2 + $0x288] sm:$0xff] }
  0x39   :  { %4919 = vmatpush.bf16.msrb.mxu0 %v8296_v37  ;;  %v8347_v37 = vld [vmem:[#allocation2 + $0x2c8] sm:$0xff] }
  0x3a   :  { %4932 = vmatpush.bf16.msrb.mxu1 %v8304_v40  ;;  %v8338_v40 = vld [vmem:[#allocation2 + $0x280] sm:$0xff] }
  0x3b   :  { %4945 = vmatpush.bf16.msrb.mxu2 %v8312_v43  ;;  %v8369_v43 = vld [vmem:[#allocation2 + $0x378] sm:$0xff] }
  0x3c   :  { %4958 = vmatpush.bf16.msrb.mxu3 %v8320_v44  ;;  %v8377_v44 = vld [vmem:[#allocation2 + $0x3b8] sm:$0xff] }
  0x3d   :  { %4920 = vmatpush.bf16.msrb.mxu0 %v8295_v45  ;;  %v8385_v45 = vld [vmem:[#allocation2 + $0x3f8] sm:$0xff] }
  0x3e   :  { %4933 = vmatpush.bf16.msrb.mxu1 %v8303_v46  ;;  %v1260_v46 = vld [vmem:[#allocation1] sm:$0xff] }
  0x3f   :  { %4946 = vmatpush.bf16.msrb.mxu2 %v8311_v47  ;;  %v1262_v47 = vld [vmem:[#allocation1 + $0x12] sm:$0xff] }
  0x40   :  { %4959 = vmatpush.bf16.msrb.mxu3 %v8319_v48  ;;  %v1261_v48 = vld [vmem:[#allocation1 + $0x9] sm:$0xff] }
  0x41   :  { %4921 = vmatpush.bf16.msrb.mxu0 %v8294_v49  ;;  %v1263_v49 = vld [vmem:[#allocation1 + $0x1b] sm:$0xff] }
  0x42   :  { %4934 = vmatpush.bf16.msrb.mxu1 %v8302_v50  ;;  %v8360_v50 = vld [vmem:[#allocation2 + $0x330] sm:$0xff] }
  0x43   :  { %4947 = vmatpush.bf16.msrb.mxu2 %v8310_v51  ;;  %v8368_v51 = vld [vmem:[#allocation2 + $0x370] sm:$0xff] }
  0x44   :  { %4960 = vmatpush.bf16.msrb.mxu3 %v8318_v52  ;;  %v8376_v52 = vld [vmem:[#allocation2 + $0x3b0] sm:$0xff] }
  0x45   :  { %4922 = vmatpush.bf16.msrb.mxu0 %v8293_v53  ;;  %v8384_v53 = vld [vmem:[#allocation2 + $0x3f0] sm:$0xff] }
  0x46   :  { %4935 = vmatpush.bf16.msrb.mxu1 %v8301_v54  ;;  %v8359_v54 = vld [vmem:[#allocation2 + $0x328] sm:$0xff] }
  0x47   :  { %4948 = vmatpush.bf16.msrb.mxu2 %v8309_v55  ;;  %v8367_v55 = vld [vmem:[#allocation2 + $0x368] sm:$0xff] }
  0x48   :  { %4961 = vmatpush.bf16.msrb.mxu3 %v8317_v56  ;;  %v8375_v56 = vld [vmem:[#allocation2 + $0x3a8] sm:$0xff] }
  0x49   :  { %4923 = vmatpush.bf16.msrb.mxu0 %v8292_v57  ;;  %v8383_v57 = vld [vmem:[#allocation2 + $0x3e8] sm:$0xff] }
  0x4a   :  { %4936 = vmatpush.bf16.msrb.mxu1 %v8300_v58  ;;  %v8358_v58 = vld [vmem:[#allocation2 + $0x320] sm:$0xff] }
  0x4b   :  { %4949 = vmatpush.bf16.msrb.mxu2 %v8308_v59  ;;  %v8366_v59 = vld [vmem:[#allocation2 + $0x360] sm:$0xff] }
  0x4c   :  { %4962 = vmatpush.bf16.msrb.mxu3 %v8316_v60  ;;  %v8374_v60 = vld [vmem:[#allocation2 + $0x3a0] sm:$0xff] }
  0x4d   :  { %4924 = vmatpush.bf16.msrb.mxu0 %v8291_v61  ;;  %v8382_v61 = vld [vmem:[#allocation2 + $0x3e0] sm:$0xff] }
  0x4e   :  { %4937 = vmatpush.bf16.msrb.mxu1 %v8299_v62  ;;  %v8357_v62 = vld [vmem:[#allocation2 + $0x318] sm:$0xff] }
  0x4f   :  { %4950 = vmatpush.bf16.msrb.mxu2 %v8307_v63  ;;  %v8365_v63 = vld [vmem:[#allocation2 + $0x358] sm:$0xff] }
  0x50   :  { %4963 = vmatpush.bf16.msrb.mxu3 %v8315_v0  ;;  %v8373_v0 = vld [vmem:[#allocation2 + $0x398] sm:$0xff] }
  0x51   :  { %4925 = vmatpush.bf16.msrb.mxu0 %v8290_v6  ;;  %v8355_v6 = vld [vmem:[#allocation2 + $0x308] sm:$0xff] }
  0x52   :  { %4938 = vmatpush.bf16.msrb.mxu1 %v8298_v7  ;;  %v8363_v7 = vld [vmem:[#allocation2 + $0x348] sm:$0xff] }
  0x53   :  { %4951 = vmatpush.bf16.msrb.mxu2 %v8306_v8  ;;  %v8371_v8 = vld [vmem:[#allocation2 + $0x388] sm:$0xff] }
  0x54   :  { %4964 = vmatpush.bf16.msrb.mxu3 %v8314_v9  ;;  %4926 = vmatmul.bf16.vlgmr.msrb.gmra.mxu0 %v1254_v2  ;;  %v8356_v2 = vld [vmem:[#allocation2 + $0x310] sm:$0xff]  ;;  %v8379_v9 = vld [vmem:[#allocation2 + $0x3c8] sm:$0xff] }
  0x55   :  { %4970 = vmatpush.bf16.msra.mxu0 %v8329_v10  ;;  %4939 = vmatmul.bf16.vlgmr.msrb.gmra.mxu1 %v1255_v4  ;;  %v8372_v4 = vld [vmem:[#allocation2 + $0x390] sm:$0xff]  ;;  %v1264_v10 = vld [vmem:[#allocation1 + $0x24] sm:$0xff] }
  0x56   :  { %4983 = vmatpush.bf16.msra.mxu1 %v8337_v11  ;;  %4952 = vmatmul.bf16.vlgmr.msrb.gmra.mxu2 %v1256_v1  ;;  %v8381_v1 = vld [vmem:[#allocation2 + $0x3d8] sm:$0xff]  ;;  %v1266_v11 = vld [vmem:[#allocation1 + $0x36] sm:$0xff] }
  0x57   :  { %4996 = vmatpush.bf16.msra.mxu2 %v8345_v12  ;;  %4965 = vmatmul.bf16.vlgmr.msrb.gmra.mxu3 %v1257_v3  ;;  %v8364_v3 = vld [vmem:[#allocation2 + $0x350] sm:$0xff]  ;;  %v1265_v12 = vld [vmem:[#allocation1 + $0x2d] sm:$0xff] }
  0x58   :  { %5009 = vmatpush.bf16.msra.mxu3 %v8353_v13  ;;  %v1267_v13 = vld [vmem:[#allocation1 + $0x3f] sm:$0xff] }
  0x59   :  { %4971 = vmatpush.bf16.msra.mxu0 %v8328_v14  ;;  %v85_v14 = vld [vmem:[%s9112_s0 + $0x10] sm:$0xff] }
  0x5a   :  { %4984 = vmatpush.bf16.msra.mxu1 %v8336_v15  ;;  %1269 = vst [vmem:[#allocation1] ss:$9 sm:$0xff] %v85_v14  ;;  %v8354_v15 = vld [vmem:[#allocation2 + $0x300] sm:$0xff]  ;;  %v8437_v14 = vld [vmem:[#allocation2 + $0x598] sm:$0xff] }
  0x5b   :  { %4997 = vmatpush.bf16.msra.mxu2 %v8344_v16  ;;  %v8362_v16 = vld [vmem:[#allocation2 + $0x340] sm:$0xff] }
  0x5c   :  { %5010 = vmatpush.bf16.msra.mxu3 %v8352_v17  ;;  %v8370_v17 = vld [vmem:[#allocation2 + $0x380] sm:$0xff] }
  0x5d   :  { %4972 = vmatpush.bf16.msra.mxu0 %v8327_v18  ;;  %v8378_v18 = vld [vmem:[#allocation2 + $0x3c0] sm:$0xff] }
  0x5e   :  { %4985 = vmatpush.bf16.msra.mxu1 %v8335_v19  ;;  %v8393_v19 = vld [vmem:[#allocation2 + $0x438] sm:$0xff] }
  0x5f   :  { %4998 = vmatpush.bf16.msra.mxu2 %v8343_v20  ;;  %v8401_v20 = vld [vmem:[#allocation2 + $0x478] sm:$0xff] }
  0x60   :  { %5011 = vmatpush.bf16.msra.mxu3 %v8351_v21  ;;  %v8409_v21 = vld [vmem:[#allocation2 + $0x4b8] sm:$0xff] }
  0x61   :  { %4973 = vmatpush.bf16.msra.mxu0 %v8326_v22  ;;  %v8417_v22 = vld [vmem:[#allocation2 + $0x4f8] sm:$0xff] }
  0x62   :  { %4986 = vmatpush.bf16.msra.mxu1 %v8334_v23  ;;  %v8392_v23 = vld [vmem:[#allocation2 + $0x430] sm:$0xff] }
  0x63   :  { %4999 = vmatpush.bf16.msra.mxu2 %v8342_v24  ;;  %v8400_v24 = vld [vmem:[#allocation2 + $0x470] sm:$0xff] }
  0x64   :  { %5012 = vmatpush.bf16.msra.mxu3 %v8350_v25  ;;  %v8408_v25 = vld [vmem:[#allocation2 + $0x4b0] sm:$0xff] }
  0x65   :  { %4974 = vmatpush.bf16.msra.mxu0 %v8325_v26  ;;  %v8416_v26 = vld [vmem:[#allocation2 + $0x4f0] sm:$0xff] }
  0x66   :  { %4987 = vmatpush.bf16.msra.mxu1 %v8333_v27  ;;  %v8391_v27 = vld [vmem:[#allocation2 + $0x428] sm:$0xff] }
  0x67   :  { %5000 = vmatpush.bf16.msra.mxu2 %v8341_v28  ;;  %v8399_v28 = vld [vmem:[#allocation2 + $0x468] sm:$0xff] }
  0x68   :  { %5013 = vmatpush.bf16.msra.mxu3 %v8349_v29  ;;  %v8407_v29 = vld [vmem:[#allocation2 + $0x4a8] sm:$0xff] }
  0x69   :  { %4975 = vmatpush.bf16.msra.mxu0 %v8324_v30  ;;  %v8415_v30 = vld [vmem:[#allocation2 + $0x4e8] sm:$0xff] }
  0x6a   :  { %4988 = vmatpush.bf16.msra.mxu1 %v8332_v31  ;;  %v8390_v31 = vld [vmem:[#allocation2 + $0x420] sm:$0xff] }
  0x6b   :  { %5001 = vmatpush.bf16.msra.mxu2 %v8340_v32  ;;  %v8398_v32 = vld [vmem:[#allocation2 + $0x460] sm:$0xff] }
  0x6c   :  { %5014 = vmatpush.bf16.msra.mxu3 %v8348_v33  ;;  %v8406_v33 = vld [vmem:[#allocation2 + $0x4a0] sm:$0xff] }
  0x6d   :  { %4976 = vmatpush.bf16.msra.mxu0 %v8323_v34  ;;  %v8414_v34 = vld [vmem:[#allocation2 + $0x4e0] sm:$0xff] }
  0x6e   :  { %4989 = vmatpush.bf16.msra.mxu1 %v8331_v35  ;;  %v8389_v35 = vld [vmem:[#allocation2 + $0x418] sm:$0xff] }
  0x6f   :  { %5002 = vmatpush.bf16.msra.mxu2 %v8339_v36  ;;  %v8397_v36 = vld [vmem:[#allocation2 + $0x458] sm:$0xff] }
  0x70   :  { %5015 = vmatpush.bf16.msra.mxu3 %v8347_v37  ;;  %v8405_v37 = vld [vmem:[#allocation2 + $0x498] sm:$0xff] }
  0x71   :  { %4977 = vmatpush.bf16.msra.mxu0 %v8322_v38  ;;  %v8413_v38 = vld [vmem:[#allocation2 + $0x4d8] sm:$0xff] }
  0x72   :  { %4990 = vmatpush.bf16.msra.mxu1 %v8330_v39  ;;  %v8388_v39 = vld [vmem:[#allocation2 + $0x410] sm:$0xff] }
  0x73   :  { %5003 = vmatpush.bf16.msra.mxu2 %v8338_v40  ;;  %v8396_v40 = vld [vmem:[#allocation2 + $0x450] sm:$0xff] }
  0x74   :  { %5016 = vmatpush.bf16.msra.mxu3 %v8346_v41  ;;  %4978 = vmatmul.bf16.vlgmr.msra.gmra.mxu0 %v1260_v46  ;;  %v8404_v41 = vld [vmem:[#allocation2 + $0x490] sm:$0xff]  ;;  %v8411_v46 = vld [vmem:[#allocation2 + $0x4c8] sm:$0xff] }
  0x75   :  { %5022 = vmatpush.bf16.msrb.mxu0 %v8361_v42  ;;  %4991 = vmatmul.bf16.vlgmr.msra.gmra.mxu1 %v1261_v48  ;;  %v8412_v42 = vld [vmem:[#allocation2 + $0x4d0] sm:$0xff]  ;;  %v8394_v48 = vld [vmem:[#allocation2 + $0x440] sm:$0xff] }
  0x76   :  { %5035 = vmatpush.bf16.msrb.mxu1 %v8369_v43  ;;  %5004 = vmatmul.bf16.vlgmr.msra.gmra.mxu2 %v1262_v47  ;;  %v8387_v43 = vld [vmem:[#allocation2 + $0x408] sm:$0xff]  ;;  %v8386_v47 = vld [vmem:[#allocation2 + $0x400] sm:$0xff] }
  0x77   :  { %5048 = vmatpush.bf16.msrb.mxu2 %v8377_v44  ;;  %5017 = vmatmul.bf16.vlgmr.msra.gmra.mxu3 %v1263_v49  ;;  %v8395_v44 = vld [vmem:[#allocation2 + $0x448] sm:$0xff]  ;;  %v8402_v49 = vld [vmem:[#allocation2 + $0x480] sm:$0xff] }
  0x78   :  { %5061 = vmatpush.bf16.msrb.mxu3 %v8385_v45  ;;  %v8403_v45 = vld [vmem:[#allocation2 + $0x488] sm:$0xff] }
  0x79   :  { %5023 = vmatpush.bf16.msrb.mxu0 %v8360_v50  ;;  %v8410_v50 = vld [vmem:[#allocation2 + $0x4c0] sm:$0xff] }
  0x7a   :  { %5036 = vmatpush.bf16.msrb.mxu1 %v8368_v51  ;;  %v8425_v51 = vld [vmem:[#allocation2 + $0x538] sm:$0xff] }
  0x7b   :  { %5049 = vmatpush.bf16.msrb.mxu2 %v8376_v52  ;;  %v8433_v52 = vld [vmem:[#allocation2 + $0x578] sm:$0xff] }
  0x7c   :  { %5062 = vmatpush.bf16.msrb.mxu3 %v8384_v53  ;;  %v8441_v53 = vld [vmem:[#allocation2 + $0x5b8] sm:$0xff] }
  0x7d   :  { %5024 = vmatpush.bf16.msrb.mxu0 %v8359_v54  ;;  %v8449_v54 = vld [vmem:[#allocation2 + $0x5f8] sm:$0xff] }
  0x7e   :  { %5037 = vmatpush.bf16.msrb.mxu1 %v8367_v55  ;;  %v1270_v55 = vld [vmem:[#allocation1] sm:$0xff] }
  0x7f   :  { %5050 = vmatpush.bf16.msrb.mxu2 %v8375_v56  ;;  %v1272_v56 = vld [vmem:[#allocation1 + $0x12] sm:$0xff] }
  0x80   :  { %5063 = vmatpush.bf16.msrb.mxu3 %v8383_v57  ;;  %v1271_v57 = vld [vmem:[#allocation1 + $0x9] sm:$0xff] }
  0x81   :  { %5025 = vmatpush.bf16.msrb.mxu0 %v8358_v58  ;;  %v1273_v58 = vld [vmem:[#allocation1 + $0x1b] sm:$0xff] }
  0x82   :  { %5038 = vmatpush.bf16.msrb.mxu1 %v8366_v59  ;;  %v8424_v59 = vld [vmem:[#allocation2 + $0x530] sm:$0xff] }
  0x83   :  { %5051 = vmatpush.bf16.msrb.mxu2 %v8374_v60  ;;  %v8432_v60 = vld [vmem:[#allocation2 + $0x570] sm:$0xff] }
  0x84   :  { %5064 = vmatpush.bf16.msrb.mxu3 %v8382_v61  ;;  %v8440_v61 = vld [vmem:[#allocation2 + $0x5b0] sm:$0xff] }
  0x85   :  { %5026 = vmatpush.bf16.msrb.mxu0 %v8357_v62  ;;  %v8448_v62 = vld [vmem:[#allocation2 + $0x5f0] sm:$0xff] }
  0x86   :  { %5039 = vmatpush.bf16.msrb.mxu1 %v8365_v63  ;;  %v8423_v63 = vld [vmem:[#allocation2 + $0x528] sm:$0xff] }
  0x87   :  { %5052 = vmatpush.bf16.msrb.mxu2 %v8373_v0  ;;  %v8431_v0 = vld [vmem:[#allocation2 + $0x568] sm:$0xff] }
  0x88   :  { %5065 = vmatpush.bf16.msrb.mxu3 %v8381_v1  ;;  %v8850_v1 = vld [vmem:[#allocation5] ss:$0 sm:$0xff] }
  0x89   :  { %5027 = vmatpush.bf16.msrb.mxu0 %v8356_v2  ;;  %v8439_v2 = vld [vmem:[#allocation2 + $0x5a8] sm:$0xff] }
  0x8a   :  { %5040 = vmatpush.bf16.msrb.mxu1 %v8364_v3  ;;  %v8447_v3 = vld [vmem:[#allocation2 + $0x5e8] sm:$0xff] }
  0x8b   :  { %5053 = vmatpush.bf16.msrb.mxu2 %v8372_v4 }
  0x8c   :  { %5066 = vmatpush.bf16.msrb.mxu3 %v8380_v5  ;;  %v8422_v5 = vld [vmem:[#allocation2 + $0x520] sm:$0xff] }
  0x8d   :  { %5028 = vmatpush.bf16.msrb.mxu0 %v8355_v6  ;;  %v8430_v6 = vld [vmem:[#allocation2 + $0x560] sm:$0xff] }
  0x8e   :  { %5041 = vmatpush.bf16.msrb.mxu1 %v8363_v7 }
  0x8f   :  { %5054 = vmatpush.bf16.msrb.mxu2 %v8371_v8 }
  0x90   :  { %5067 = vmatpush.bf16.msrb.mxu3 %v8379_v9  ;;  %v8438_v9 = vld [vmem:[#allocation2 + $0x5a0] sm:$0xff] }
  0x91   :  { %5029 = vmatpush.bf16.msrb.mxu0 %v8354_v15  ;;  %v8445_v15 = vld [vmem:[#allocation2 + $0x5d8] sm:$0xff] }
  0x92   :  { %5042 = vmatpush.bf16.msrb.mxu1 %v8362_v16 }
  0x93   :  { %5055 = vmatpush.bf16.msrb.mxu2 %v8370_v17 }
  0x94   :  { %5068 = vmatpush.bf16.msrb.mxu3 %v8378_v18  ;;  %5030 = vmatmul.bf16.vlgmr.msrb.gmra.mxu0 %v1264_v10  ;;  %v8446_v10 = vld [vmem:[#allocation2 + $0x5e0] sm:$0xff] }
  0x95   :  { %5074 = vmatpush.bf16.msra.mxu0 %v8393_v19  ;;  %5043 = vmatmul.bf16.vlgmr.msrb.gmra.mxu1 %v1265_v12  ;;  %v8421_v12 = vld [vmem:[#allocation2 + $0x518] sm:$0xff] }
  0x96   :  { %5087 = vmatpush.bf16.msra.mxu1 %v8401_v20  ;;  %5056 = vmatmul.bf16.vlgmr.msrb.gmra.mxu2 %v1266_v11  ;;  %v8420_v20 = vld [vmem:[#allocation2 + $0x510] sm:$0xff] }
  0x97   :  { %5100 = vmatpush.bf16.msra.mxu2 %v8409_v21  ;;  %5069 = vmatmul.bf16.vlgmr.msrb.gmra.mxu3 %v1267_v13  ;;  %v8429_v13 = vld [vmem:[#allocation2 + $0x558] sm:$0xff]  ;;  %v8428_v21 = vld [vmem:[#allocation2 + $0x550] sm:$0xff] }
  0x98   :  { %5113 = vmatpush.bf16.msra.mxu3 %v8417_v22 }
  0x99   :  { %5075 = vmatpush.bf16.msra.mxu0 %v8392_v23 }
  0x9a   :  { %5088 = vmatpush.bf16.msra.mxu1 %v8400_v24  ;;  %v8436_v24 = vld [vmem:[#allocation2 + $0x590] sm:$0xff] }
  0x9b   :  { %5101 = vmatpush.bf16.msra.mxu2 %v8408_v25  ;;  %v8444_v25 = vld [vmem:[#allocation2 + $0x5d0] sm:$0xff] }
  0x9c   :  { %5114 = vmatpush.bf16.msra.mxu3 %v8416_v26  ;;  %v8419_v26 = vld [vmem:[#allocation2 + $0x508] sm:$0xff] }
  0x9d   :  { %5076 = vmatpush.bf16.msra.mxu0 %v8391_v27  ;;  %v8427_v27 = vld [vmem:[#allocation2 + $0x548] sm:$0xff] }
  0x9e   :  { %5089 = vmatpush.bf16.msra.mxu1 %v8399_v28  ;;  %v8435_v28 = vld [vmem:[#allocation2 + $0x588] sm:$0xff] }
  0x9f   :  { %5102 = vmatpush.bf16.msra.mxu2 %v8407_v29  ;;  %v8443_v29 = vld [vmem:[#allocation2 + $0x5c8] sm:$0xff] }
  0xa0   :  { %5115 = vmatpush.bf16.msra.mxu3 %v8415_v30  ;;  %v1274_v30 = vld [vmem:[#allocation1 + $0x24] sm:$0xff] }
  0xa1   :  { %5077 = vmatpush.bf16.msra.mxu0 %v8390_v31  ;;  %v1276_v31 = vld [vmem:[#allocation1 + $0x36] sm:$0xff] }
  0xa2   :  { %5090 = vmatpush.bf16.msra.mxu1 %v8398_v32 }
  0xa3   :  { %5103 = vmatpush.bf16.msra.mxu2 %v8406_v33  ;;  %v1275_v33 = vld [vmem:[#allocation1 + $0x2d] sm:$0xff] }
  0xa4   :  { %5116 = vmatpush.bf16.msra.mxu3 %v8414_v34  ;;  %v1277_v34 = vld [vmem:[#allocation1 + $0x3f] sm:$0xff] }
  0xa5   :  { %5078 = vmatpush.bf16.msra.mxu0 %v8389_v35 }
  0xa6   :  { %5091 = vmatpush.bf16.msra.mxu1 %v8397_v36  ;;  %v86_v36 = vld [vmem:[%s9112_s0 + $0x18] sm:$0xff] }
  0xa7   :  { %5104 = vmatpush.bf16.msra.mxu2 %v8405_v37  ;;  %1279 = vst [vmem:[#allocation1] ss:$9 sm:$0xff] %v86_v36  ;;  %v8418_v37 = vld [vmem:[#allocation2 + $0x500] sm:$0xff]  ;;  %v8511_v36 = vld [vmem:[#allocation2 + $0x7e8] sm:$0xff] }
  0xa8   :  { %5117 = vmatpush.bf16.msra.mxu3 %v8413_v38  ;;  %v8426_v38 = vld [vmem:[#allocation2 + $0x540] sm:$0xff] }
  0xa9   :  { %5079 = vmatpush.bf16.msra.mxu0 %v8388_v39  ;;  %v8434_v39 = vld [vmem:[#allocation2 + $0x580] sm:$0xff] }
  0xaa   :  { %5092 = vmatpush.bf16.msra.mxu1 %v8396_v40  ;;  %v8442_v40 = vld [vmem:[#allocation2 + $0x5c0] sm:$0xff] }
  0xab   :  { %5105 = vmatpush.bf16.msra.mxu2 %v8404_v41  ;;  %v8457_v41 = vld [vmem:[#allocation2 + $0x638] sm:$0xff] }
  0xac   :  { %5118 = vmatpush.bf16.msra.mxu3 %v8412_v42  ;;  %v8465_v42 = vld [vmem:[#allocation2 + $0x678] sm:$0xff] }
  0xad   :  { %5080 = vmatpush.bf16.msra.mxu0 %v8387_v43  ;;  %v8473_v43 = vld [vmem:[#allocation2 + $0x6b8] sm:$0xff] }
  0xae   :  { %5093 = vmatpush.bf16.msra.mxu1 %v8395_v44  ;;  %v8481_v44 = vld [vmem:[#allocation2 + $0x6f8] sm:$0xff] }
  0xaf   :  { %5106 = vmatpush.bf16.msra.mxu2 %v8403_v45  ;;  %v8456_v45 = vld [vmem:[#allocation2 + $0x630] sm:$0xff] }
  0xb0   :  { %5119 = vmatpush.bf16.msra.mxu3 %v8411_v46  ;;  %v8464_v46 = vld [vmem:[#allocation2 + $0x670] sm:$0xff] }
  0xb1   :  { %5081 = vmatpush.bf16.msra.mxu0 %v8386_v47  ;;  %v4875_v4 = vpop.f32.mrf.mxu0  ;;  %v8472_v47 = vld [vmem:[#allocation2 + $0x6b0] sm:$0xff] }
  0xb2   :  { %5094 = vmatpush.bf16.msra.mxu1 %v8394_v48  ;;  %v4876_v7 = vadd.f32 %v8850_v1, %v4875_v4  ;;  %v4888_v8 = vpop.f32.mrf.mxu1  ;;  %v8480_v48 = vld [vmem:[#allocation2 + $0x6f0] sm:$0xff] }
  0xb3   :  { %5107 = vmatpush.bf16.msra.mxu2 %v8402_v49  ;;  %v8455_v49 = vld [vmem:[#allocation2 + $0x628] sm:$0xff] }
  0xb4   :  { %5120 = vmatpush.bf16.msra.mxu3 %v8410_v50  ;;  %5082 = vmatmul.bf16.vlgmr.msra.gmra.mxu0 %v1270_v55  ;;  %v4889_v11 = vadd.f32 %v4888_v8, %v4876_v7  ;;  %v8463_v50 = vld [vmem:[#allocation2 + $0x668] sm:$0xff]  ;;  %v8462_v55 = vld [vmem:[#allocation2 + $0x660] sm:$0xff] }
  0xb5   :  { %5126 = vmatpush.bf16.msrb.mxu0 %v8425_v51  ;;  %5095 = vmatmul.bf16.vlgmr.msra.gmra.mxu1 %v1271_v57  ;;  %v8471_v51 = vld [vmem:[#allocation2 + $0x6a8] sm:$0xff] }
  0xb6   :  { %5139 = vmatpush.bf16.msrb.mxu1 %v8433_v52  ;;  %5108 = vmatmul.bf16.vlgmr.msra.gmra.mxu2 %v1272_v56  ;;  %v8479_v52 = vld [vmem:[#allocation2 + $0x6e8] sm:$0xff] }
  0xb7   :  { %5152 = vmatpush.bf16.msrb.mxu2 %v8441_v53  ;;  %5121 = vmatmul.bf16.vlgmr.msra.gmra.mxu3 %v1273_v58  ;;  %v8470_v58 = vld [vmem:[#allocation2 + $0x6a0] sm:$0xff] }
  0xb8   :  { %5165 = vmatpush.bf16.msrb.mxu3 %v8449_v54  ;;  %v8454_v54 = vld [vmem:[#allocation2 + $0x620] sm:$0xff] }
  0xb9   :  { %5127 = vmatpush.bf16.msrb.mxu0 %v8424_v59  ;;  %v4901_v16 = vpop.f32.mrf.mxu2  ;;  %v4877_v19 = vpop.f32.mrf.mxu0  ;;  %v8478_v59 = vld [vmem:[#allocation2 + $0x6e0] sm:$0xff] }
  0xba   :  { %5140 = vmatpush.bf16.msrb.mxu1 %v8432_v60  ;;  %v4902_v17 = vadd.f32 %v4901_v16, %v4889_v11  ;;  %v4914_v18 = vpop.f32.mrf.mxu3  ;;  %v4890_v23 = vpop.f32.mrf.mxu1  ;;  %v8451_v11 = vld [vmem:[#allocation2 + $0x608] sm:$0xff]  ;;  %v8466_v19 = vld [vmem:[#allocation2 + $0x680] sm:$0xff] }
  0xbb   :  { %5153 = vmatpush.bf16.msrb.mxu2 %v8440_v61  ;;  %v8453_v61 = vld [vmem:[#allocation2 + $0x618] sm:$0xff] }
  0xbc   :  { %5166 = vmatpush.bf16.msrb.mxu3 %v8448_v62  ;;  %v9070_v22 = vadd.f32 %v4914_v18, %v4902_v17  ;;  %v8461_v62 = vld [vmem:[#allocation2 + $0x658] sm:$0xff]  ;;  %v8450_v17 = vld [vmem:[#allocation2 + $0x600] sm:$0xff] }
  0xbd   :  { %5128 = vmatpush.bf16.msrb.mxu0 %v8423_v63  ;;  %v8469_v63 = vld [vmem:[#allocation2 + $0x698] sm:$0xff]  ;;  %v8458_v18 = vld [vmem:[#allocation2 + $0x640] sm:$0xff] }
  0xbe   :  { %5141 = vmatpush.bf16.msrb.mxu1 %v8431_v0  ;;  %v8477_v0 = vld [vmem:[#allocation2 + $0x6d8] sm:$0xff] }
  0xbf   :  { %5154 = vmatpush.bf16.msrb.mxu2 %v8439_v2  ;;  %v8505_v23 = vld [vmem:[#allocation2 + $0x7b8] sm:$0xff] }
  0xc0   :  { %5167 = vmatpush.bf16.msrb.mxu3 %v8447_v3 }
  0xc1   :  { %5129 = vmatpush.bf16.msrb.mxu0 %v8422_v5  ;;  %v4903_v32 = vpop.f32.mrf.mxu2  ;;  %v8452_v5 = vld [vmem:[#allocation2 + $0x610] sm:$0xff] }
  0xc2   :  { %5142 = vmatpush.bf16.msrb.mxu1 %v8430_v6  ;;  %v4916_v35 = vpop.f32.mrf.mxu3  ;;  %v8460_v6 = vld [vmem:[#allocation2 + $0x650] sm:$0xff] }
  0xc3   :  { %5155 = vmatpush.bf16.msrb.mxu2 %v8438_v9  ;;  %v8468_v9 = vld [vmem:[#allocation2 + $0x690] sm:$0xff]  ;;  %v8503_v35 = vld [vmem:[#allocation2 + $0x7a8] sm:$0xff] }
  0xc4   :  { %5168 = vmatpush.bf16.msrb.mxu3 %v8446_v10  ;;  %v8476_v10 = vld [vmem:[#allocation2 + $0x6d0] sm:$0xff] }
  0xc5   :  { %5130 = vmatpush.bf16.msrb.mxu0 %v8421_v12  ;;  %v8459_v12 = vld [vmem:[#allocation2 + $0x648] sm:$0xff]  ;;  %v8512_v32 = vld [vmem:[#allocation2 + $0x7f0] sm:$0xff] }
  0xc6   :  { %5143 = vmatpush.bf16.msrb.mxu1 %v8429_v13  ;;  %v8467_v13 = vld [vmem:[#allocation2 + $0x688] sm:$0xff] }
  0xc7   :  { %5156 = vmatpush.bf16.msrb.mxu2 %v8437_v14  ;;  %v8475_v14 = vld [vmem:[#allocation2 + $0x6c8] sm:$0xff] }
  0xc8   :  { %5169 = vmatpush.bf16.msrb.mxu3 %v8445_v15 }
  0xc9   :  { %5131 = vmatpush.bf16.msrb.mxu0 %v8420_v20  ;;  %v8474_v20 = vld [vmem:[#allocation2 + $0x6c0] sm:$0xff] }
  0xca   :  { %5144 = vmatpush.bf16.msrb.mxu1 %v8428_v21  ;;  %v8489_v21 = vld [vmem:[#allocation2 + $0x738] sm:$0xff] }
  0xcb   :  { %5157 = vmatpush.bf16.msrb.mxu2 %v8436_v24  ;;  %v8513_v24 = vld [vmem:[#allocation2 + $0x7f8] sm:$0xff] }
  0xcc   :  { %5170 = vmatpush.bf16.msrb.mxu3 %v8444_v25  ;;  %v1280_v25 = vld [vmem:[#allocation1] sm:$0xff] }
  0xcd   :  { %5132 = vmatpush.bf16.msrb.mxu0 %v8419_v26  ;;  %v1282_v26 = vld [vmem:[#allocation1 + $0x12] sm:$0xff] }
  0xce   :  { %5145 = vmatpush.bf16.msrb.mxu1 %v8427_v27  ;;  %v1281_v27 = vld [vmem:[#allocation1 + $0x9] sm:$0xff] }
  0xcf   :  { %5158 = vmatpush.bf16.msrb.mxu2 %v8435_v28  ;;  %v1283_v28 = vld [vmem:[#allocation1 + $0x1b] sm:$0xff] }
  0xd0   :  { %5171 = vmatpush.bf16.msrb.mxu3 %v8443_v29  ;;  %v8488_v29 = vld [vmem:[#allocation2 + $0x730] sm:$0xff] }
  0xd1   :  { %5133 = vmatpush.bf16.msrb.mxu0 %v8418_v37  ;;  %v4927_v53 = vpop.f32.mrf.mxu0 }
  0xd2   :  { %5146 = vmatpush.bf16.msrb.mxu1 %v8426_v38  ;;  %v4928_v56 = vadd.f32 %v4927_v53, %v9070_v22  ;;  %v4940_v57 = vpop.f32.mrf.mxu1  ;;  %v8497_v22 = vld [vmem:[#allocation2 + $0x778] sm:$0xff] }
  0xd3   :  { %5159 = vmatpush.bf16.msrb.mxu2 %v8434_v39  ;;  %v8486_v39 = vld [vmem:[#allocation2 + $0x720] sm:$0xff] }
  0xd4   :  { %5172 = vmatpush.bf16.msrb.mxu3 %v8442_v40  ;;  %5134 = vmatmul.bf16.vlgmr.msrb.gmra.mxu0 %v1274_v30  ;;  %v4941_v60 = vadd.f32 %v4940_v57, %v4928_v56  ;;  %v8496_v30 = vld [vmem:[#allocation2 + $0x770] sm:$0xff]  ;;  %v8494_v40 = vld [vmem:[#allocation2 + $0x760] sm:$0xff] }
  0xd5   :  { %5178 = vmatpush.bf16.msra.mxu0 %v8457_v41  ;;  %5147 = vmatmul.bf16.vlgmr.msrb.gmra.mxu1 %v1275_v33  ;;  %v8487_v33 = vld [vmem:[#allocation2 + $0x728] sm:$0xff]  ;;  %v8500_v57 = vld [vmem:[#allocation2 + $0x790] sm:$0xff] }
  0xd6   :  { %5191 = vmatpush.bf16.msra.mxu1 %v8465_v42  ;;  %5160 = vmatmul.bf16.vlgmr.msrb.gmra.mxu2 %v1276_v31  ;;  %v8504_v31 = vld [vmem:[#allocation2 + $0x7b0] sm:$0xff]  ;;  %v8502_v42 = vld [vmem:[#allocation2 + $0x7a0] sm:$0xff] }
  0xd7   :  { %5204 = vmatpush.bf16.msra.mxu2 %v8473_v43  ;;  %5173 = vmatmul.bf16.vlgmr.msrb.gmra.mxu3 %v1277_v34  ;;  %v8495_v34 = vld [vmem:[#allocation2 + $0x768] sm:$0xff]  ;;  %v8510_v43 = vld [vmem:[#allocation2 + $0x7e0] sm:$0xff] }
  0xd8   :  { %5217 = vmatpush.bf16.msra.mxu3 %v8481_v44 }
  0xd9   :  { %5179 = vmatpush.bf16.msra.mxu0 %v8456_v45  ;;  %v4953_v1 = vpop.f32.mrf.mxu2  ;;  %v4929_v4 = vpop.f32.mrf.mxu0  ;;  %v8485_v45 = vld [vmem:[#allocation2 + $0x718] sm:$0xff] }
  0xda   :  { %5192 = vmatpush.bf16.msra.mxu1 %v8464_v46  ;;  %v4954_v2 = vadd.f32 %v4953_v1, %v4941_v60  ;;  %v4966_v3 = vpop.f32.mrf.mxu3  ;;  %v4942_v8 = vpop.f32.mrf.mxu1  ;;  %v8493_v46 = vld [vmem:[#allocation2 + $0x758] sm:$0xff]  ;;  %v8491_v60 = vld [vmem:[#allocation2 + $0x748] sm:$0xff] }
  0xdb   :  { %5205 = vmatpush.bf16.msra.mxu2 %v8472_v47  ;;  %v8501_v47 = vld [vmem:[#allocation2 + $0x798] sm:$0xff]  ;;  %v8498_v8 = vld [vmem:[#allocation2 + $0x780] sm:$0xff] }
  0xdc   :  { %5218 = vmatpush.bf16.msra.mxu3 %v8480_v48  ;;  %v4967_v7 = vadd.f32 %v4966_v3, %v4954_v2  ;;  %v8509_v48 = vld [vmem:[#allocation2 + $0x7d8] sm:$0xff]  ;;  %v1285_v2 = vld [vmem:[#allocation1 + $0x2d] sm:$0xff] }
  0xdd   :  { %5180 = vmatpush.bf16.msra.mxu0 %v8455_v49  ;;  %v1287_v3 = vld [vmem:[#allocation1 + $0x3f] sm:$0xff] }
  0xde   :  { %5193 = vmatpush.bf16.msra.mxu1 %v8463_v50 }
  0xdf   :  { %5206 = vmatpush.bf16.msra.mxu2 %v8471_v51 }
  0xe0   :  { %5219 = vmatpush.bf16.msra.mxu3 %v8479_v52 }
  0xe1   :  { %5181 = vmatpush.bf16.msra.mxu0 %v8454_v54  ;;  %v4955_v15 = vpop.f32.mrf.mxu2  ;;  %v8484_v54 = vld [vmem:[#allocation2 + $0x710] sm:$0xff] }
  0xe2   :  { %5194 = vmatpush.bf16.msra.mxu1 %v8462_v55  ;;  %v4968_v16 = vpop.f32.mrf.mxu3  ;;  %v8492_v55 = vld [vmem:[#allocation2 + $0x750] sm:$0xff] }
  0xe3   :  { %5207 = vmatpush.bf16.msra.mxu2 %v8470_v58  ;;  %v8508_v58 = vld [vmem:[#allocation2 + $0x7d0] sm:$0xff] }
  0xe4   :  { %5220 = vmatpush.bf16.msra.mxu3 %v8478_v59  ;;  %v8483_v59 = vld [vmem:[#allocation2 + $0x708] sm:$0xff]  ;;  %v8528_v15 = vld [vmem:[#allocation2 + $0x870] sm:$0xff] }
  0xe5   :  { %5182 = vmatpush.bf16.msra.mxu0 %v8453_v61  ;;  %v8499_v61 = vld [vmem:[#allocation2 + $0x788] sm:$0xff]  ;;  %v8536_v16 = vld [vmem:[#allocation2 + $0x8b0] sm:$0xff] }
  0xe6   :  { %5195 = vmatpush.bf16.msra.mxu1 %v8461_v62  ;;  %v8507_v62 = vld [vmem:[#allocation2 + $0x7c8] sm:$0xff] }
  0xe7   :  { %5208 = vmatpush.bf16.msra.mxu2 %v8469_v63  ;;  %v1284_v63 = vld [vmem:[#allocation1 + $0x24] sm:$0xff] }
  0xe8   :  { %5221 = vmatpush.bf16.msra.mxu3 %v8477_v0  ;;  %v1286_v0 = vld [vmem:[#allocation1 + $0x36] sm:$0xff] }
  0xe9   :  { %5183 = vmatpush.bf16.msra.mxu0 %v8452_v5  ;;  %v87_v5 = vld [vmem:[%s9112_s0 + $0x20] sm:$0xff] }
  0xea   :  { %5196 = vmatpush.bf16.msra.mxu1 %v8460_v6  ;;  %1289 = vst [vmem:[#allocation1] ss:$9 sm:$0xff] %v87_v5  ;;  %v8482_v6 = vld [vmem:[#allocation2 + $0x700] sm:$0xff]  ;;  %v8575_v5 = vld [vmem:[#allocation2 + $0x9e8] sm:$0xff] }
  0xeb   :  { %5209 = vmatpush.bf16.msra.mxu2 %v8468_v9  ;;  %v8506_v9 = vld [vmem:[#allocation2 + $0x7c0] sm:$0xff] }
  0xec   :  { %5222 = vmatpush.bf16.msra.mxu3 %v8476_v10  ;;  %v8521_v10 = vld [vmem:[#allocation2 + $0x838] sm:$0xff] }
  0xed   :  { %5184 = vmatpush.bf16.msra.mxu0 %v8451_v11  ;;  %v8529_v11 = vld [vmem:[#allocation2 + $0x878] sm:$0xff] }
  0xee   :  { %5197 = vmatpush.bf16.msra.mxu1 %v8459_v12  ;;  %v8537_v12 = vld [vmem:[#allocation2 + $0x8b8] sm:$0xff] }
  0xef   :  { %5210 = vmatpush.bf16.msra.mxu2 %v8467_v13  ;;  %v8545_v13 = vld [vmem:[#allocation2 + $0x8f8] sm:$0xff] }
  0xf0   :  { %5223 = vmatpush.bf16.msra.mxu3 %v8475_v14  ;;  %v8520_v14 = vld [vmem:[#allocation2 + $0x830] sm:$0xff] }
  0xf1   :  { %5185 = vmatpush.bf16.msra.mxu0 %v8450_v17  ;;  %v4979_v37 = vpop.f32.mrf.mxu0  ;;  %v8544_v17 = vld [vmem:[#allocation2 + $0x8f0] sm:$0xff] }
  0xf2   :  { %5198 = vmatpush.bf16.msra.mxu1 %v8458_v18  ;;  %v4980_v38 = vadd.f32 %v4979_v37, %v4967_v7  ;;  %v4992_v41 = vpop.f32.mrf.mxu1  ;;  %v8490_v7 = vld [vmem:[#allocation2 + $0x740] sm:$0xff]  ;;  %v8519_v18 = vld [vmem:[#allocation2 + $0x828] sm:$0xff] }
  0xf3   :  { %5211 = vmatpush.bf16.msra.mxu2 %v8466_v19  ;;  %v8527_v19 = vld [vmem:[#allocation2 + $0x868] sm:$0xff] }
  0xf4   :  { %5224 = vmatpush.bf16.msra.mxu3 %v8474_v20  ;;  %5186 = vmatmul.bf16.vlgmr.msra.gmra.mxu0 %v1280_v25  ;;  %v4993_v44 = vadd.f32 %v4992_v41, %v4980_v38  ;;  %v8535_v20 = vld [vmem:[#allocation2 + $0x8a8] sm:$0xff]  ;;  %v8526_v25 = vld [vmem:[#allocation2 + $0x860] sm:$0xff] }
  0xf5   :  { %5230 = vmatpush.bf16.msrb.mxu0 %v8489_v21  ;;  %5199 = vmatmul.bf16.vlgmr.msra.gmra.mxu1 %v1281_v27  ;;  %v8543_v21 = vld [vmem:[#allocation2 + $0x8e8] sm:$0xff]  ;;  %v8534_v27 = vld [vmem:[#allocation2 + $0x8a0] sm:$0xff] }
  0xf6   :  { %5243 = vmatpush.bf16.msrb.mxu1 %v8497_v22  ;;  %5212 = vmatmul.bf16.vlgmr.msra.gmra.mxu2 %v1282_v26 }
  0xf7   :  { %5256 = vmatpush.bf16.msrb.mxu2 %v8505_v23  ;;  %5225 = vmatmul.bf16.vlgmr.msra.gmra.mxu3 %v1283_v28  ;;  %v8542_v28 = vld [vmem:[#allocation2 + $0x8e0] sm:$0xff] }
  0xf8   :  { %5269 = vmatpush.bf16.msrb.mxu3 %v8513_v24  ;;  %v8518_v24 = vld [vmem:[#allocation2 + $0x820] sm:$0xff] }
  0xf9   :  { %5231 = vmatpush.bf16.msrb.mxu0 %v8488_v29  ;;  %v5005_v49 = vpop.f32.mrf.mxu2  ;;  %v4981_v52 = vpop.f32.mrf.mxu0 }
  0xfa   :  { %5244 = vmatpush.bf16.msrb.mxu1 %v8496_v30  ;;  %v5006_v50 = vadd.f32 %v5005_v49, %v4993_v44  ;;  %v5018_v51 = vpop.f32.mrf.mxu3  ;;  %v4994_v56 = vpop.f32.mrf.mxu1  ;;  %v8517_v30 = vld [vmem:[#allocation2 + $0x818] sm:$0xff]  ;;  %v8515_v44 = vld [vmem:[#allocation2 + $0x808] sm:$0xff]  ;;  %v8530_v52 = vld [vmem:[#allocation2 + $0x880] sm:$0xff] }
  0xfb   :  { %5257 = vmatpush.bf16.msrb.mxu2 %v8504_v31  ;;  %v8525_v31 = vld [vmem:[#allocation2 + $0x858] sm:$0xff] }
  0xfc   :  { %5270 = vmatpush.bf16.msrb.mxu3 %v8512_v32  ;;  %v9076_v53 = vadd.f32 %v5018_v51, %v5006_v50  ;;  %v8533_v32 = vld [vmem:[#allocation2 + $0x898] sm:$0xff]  ;;  %v8514_v50 = vld [vmem:[#allocation2 + $0x800] sm:$0xff] }
  0xfd   :  { %5232 = vmatpush.bf16.msrb.mxu0 %v8487_v33  ;;  %v8541_v33 = vld [vmem:[#allocation2 + $0x8d8] sm:$0xff]  ;;  %v8522_v51 = vld [vmem:[#allocation2 + $0x840] sm:$0xff] }
  0xfe   :  { %5245 = vmatpush.bf16.msrb.mxu1 %v8495_v34  ;;  %v8569_v56 = vld [vmem:[#allocation2 + $0x9b8] sm:$0xff] }
  0xff   :  { %5258 = vmatpush.bf16.msrb.mxu2 %v8503_v35 }
 0x100   :  { %5271 = vmatpush.bf16.msrb.mxu3 %v8511_v36 }
 0x101   :  { %5233 = vmatpush.bf16.msrb.mxu0 %v8486_v39  ;;  %v5007_v1 = vpop.f32.mrf.mxu2  ;;  %v8516_v39 = vld [vmem:[#allocation2 + $0x810] sm:$0xff] }
 0x102   :  { %5246 = vmatpush.bf16.msrb.mxu1 %v8494_v40  ;;  %v5020_v4 = vpop.f32.mrf.mxu3  ;;  %v8524_v40 = vld [vmem:[#allocation2 + $0x850] sm:$0xff] }
 0x103   :  { %5259 = vmatpush.bf16.msrb.mxu2 %v8502_v42  ;;  %v8532_v42 = vld [vmem:[#allocation2 + $0x890] sm:$0xff]  ;;  %v8567_v4 = vld [vmem:[#allocation2 + $0x9a8] sm:$0xff] }
 0x104   :  { %5272 = vmatpush.bf16.msrb.mxu3 %v8510_v43  ;;  %v8540_v43 = vld [vmem:[#allocation2 + $0x8d0] sm:$0xff] }
 0x105   :  { %5234 = vmatpush.bf16.msrb.mxu0 %v8485_v45  ;;  %v8523_v45 = vld [vmem:[#allocation2 + $0x848] sm:$0xff]  ;;  %v8576_v1 = vld [vmem:[#allocation2 + $0x9f0] sm:$0xff] }
 0x106   :  { %5247 = vmatpush.bf16.msrb.mxu1 %v8493_v46  ;;  %v8531_v46 = vld [vmem:[#allocation2 + $0x888] sm:$0xff] }
 0x107   :  { %5260 = vmatpush.bf16.msrb.mxu2 %v8501_v47  ;;  %v8539_v47 = vld [vmem:[#allocation2 + $0x8c8] sm:$0xff] }
 0x108   :  { %5273 = vmatpush.bf16.msrb.mxu3 %v8509_v48 }
 0x109   :  { %5235 = vmatpush.bf16.msrb.mxu0 %v8484_v54  ;;  %v8553_v54 = vld [vmem:[#allocation2 + $0x938] sm:$0xff] }
 0x10a   :  { %5248 = vmatpush.bf16.msrb.mxu1 %v8492_v55  ;;  %v8561_v55 = vld [vmem:[#allocation2 + $0x978] sm:$0xff] }
 0x10b   :  { %5261 = vmatpush.bf16.msrb.mxu2 %v8500_v57  ;;  %v8577_v57 = vld [vmem:[#allocation2 + $0x9f8] sm:$0xff] }
 0x10c   :  { %5274 = vmatpush.bf16.msrb.mxu3 %v8508_v58  ;;  %v1290_v58 = vld [vmem:[#allocation1] sm:$0xff] }
 0x10d   :  { %5236 = vmatpush.bf16.msrb.mxu0 %v8483_v59  ;;  %v1292_v59 = vld [vmem:[#allocation1 + $0x12] sm:$0xff] }
 0x10e   :  { %5249 = vmatpush.bf16.msrb.mxu1 %v8491_v60  ;;  %v1291_v60 = vld [vmem:[#allocation1 + $0x9] sm:$0xff] }
 0x10f   :  { %5262 = vmatpush.bf16.msrb.mxu2 %v8499_v61  ;;  %v1293_v61 = vld [vmem:[#allocation1 + $0x1b] sm:$0xff] }
 0x110   :  { %5275 = vmatpush.bf16.msrb.mxu3 %v8507_v62  ;;  %v8552_v62 = vld [vmem:[#allocation2 + $0x930] sm:$0xff] }
 0x111   :  { %5237 = vmatpush.bf16.msrb.mxu0 %v8482_v6  ;;  %v5031_v22 = vpop.f32.mrf.mxu0 }
 0x112   :  { %5250 = vmatpush.bf16.msrb.mxu1 %v8490_v7  ;;  %v5032_v23 = vadd.f32 %v5031_v22, %v9076_v53  ;;  %v5044_v26 = vpop.f32.mrf.mxu1  ;;  %v8538_v53 = vld [vmem:[#allocation2 + $0x8c0] sm:$0xff] }
 0x113   :  { %5263 = vmatpush.bf16.msrb.mxu2 %v8498_v8  ;;  %v8550_v8 = vld [vmem:[#allocation2 + $0x920] sm:$0xff] }
 0x114   :  { %5276 = vmatpush.bf16.msrb.mxu3 %v8506_v9  ;;  %5238 = vmatmul.bf16.vlgmr.msrb.gmra.mxu0 %v1284_v63  ;;  %v5045_v29 = vadd.f32 %v5044_v26, %v5032_v23  ;;  %v8560_v63 = vld [vmem:[#allocation2 + $0x970] sm:$0xff]  ;;  %v8558_v9 = vld [vmem:[#allocation2 + $0x960] sm:$0xff] }
 0x115   :  { %5282 = vmatpush.bf16.msra.mxu0 %v8521_v10  ;;  %5251 = vmatmul.bf16.vlgmr.msrb.gmra.mxu1 %v1285_v2  ;;  %v8551_v2 = vld [vmem:[#allocation2 + $0x928] sm:$0xff]  ;;  %v8548_v23 = vld [vmem:[#allocation2 + $0x910] sm:$0xff] }
 0x116   :  { %5295 = vmatpush.bf16.msra.mxu1 %v8529_v11  ;;  %5264 = vmatmul.bf16.vlgmr.msrb.gmra.mxu2 %v1286_v0  ;;  %v8568_v0 = vld [vmem:[#allocation2 + $0x9b0] sm:$0xff]  ;;  %v8566_v11 = vld [vmem:[#allocation2 + $0x9a0] sm:$0xff] }
 0x117   :  { %5308 = vmatpush.bf16.msra.mxu2 %v8537_v12  ;;  %5277 = vmatmul.bf16.vlgmr.msrb.gmra.mxu3 %v1287_v3  ;;  %v8559_v3 = vld [vmem:[#allocation2 + $0x968] sm:$0xff]  ;;  %v8574_v12 = vld [vmem:[#allocation2 + $0x9e0] sm:$0xff]  ;;  %v8564_v26 = vld [vmem:[#allocation2 + $0x990] sm:$0xff] }
 0x118   :  { %5321 = vmatpush.bf16.msra.mxu3 %v8545_v13 }
 0x119   :  { %5283 = vmatpush.bf16.msra.mxu0 %v8520_v14  ;;  %v5057_v34 = vpop.f32.mrf.mxu2  ;;  %v5033_v37 = vpop.f32.mrf.mxu0  ;;  %v8549_v14 = vld [vmem:[#allocation2 + $0x918] sm:$0xff] }
 0x11a   :  { %5296 = vmatpush.bf16.msra.mxu1 %v8528_v15  ;;  %v5058_v35 = vadd.f32 %v5057_v34, %v5045_v29  ;;  %v5070_v36 = vpop.f32.mrf.mxu3  ;;  %v5046_v41 = vpop.f32.mrf.mxu1  ;;  %v8557_v15 = vld [vmem:[#allocation2 + $0x958] sm:$0xff]  ;;  %v8555_v29 = vld [vmem:[#allocation2 + $0x948] sm:$0xff] }
 0x11b   :  { %5309 = vmatpush.bf16.msra.mxu2 %v8536_v16  ;;  %v8565_v16 = vld [vmem:[#allocation2 + $0x998] sm:$0xff]  ;;  %v8562_v41 = vld [vmem:[#allocation2 + $0x980] sm:$0xff] }
 0x11c   :  { %5322 = vmatpush.bf16.msra.mxu3 %v8544_v17  ;;  %v5071_v38 = vadd.f32 %v5070_v36, %v5058_v35  ;;  %v8573_v17 = vld [vmem:[#allocation2 + $0x9d8] sm:$0xff]  ;;  %v1295_v35 = vld [vmem:[#allocation1 + $0x2d] sm:$0xff] }
 0x11d   :  { %5284 = vmatpush.bf16.msra.mxu0 %v8519_v18  ;;  %v1297_v36 = vld [vmem:[#allocation1 + $0x3f] sm:$0xff] }
 0x11e   :  { %5297 = vmatpush.bf16.msra.mxu1 %v8527_v19 }
 0x11f   :  { %5310 = vmatpush.bf16.msra.mxu2 %v8535_v20 }
 0x120   :  { %5323 = vmatpush.bf16.msra.mxu3 %v8543_v21 }
 0x121   :  { %5285 = vmatpush.bf16.msra.mxu0 %v8518_v24  ;;  %v5059_v48 = vpop.f32.mrf.mxu2  ;;  %v8556_v24 = vld [vmem:[#allocation2 + $0x950] sm:$0xff] }
 0x122   :  { %5298 = vmatpush.bf16.msra.mxu1 %v8526_v25  ;;  %v5072_v49 = vpop.f32.mrf.mxu3  ;;  %v8592_v48 = vld [vmem:[#allocation2 + $0xa70] sm:$0xff] }
 0x123   :  { %5311 = vmatpush.bf16.msra.mxu2 %v8534_v27  ;;  %v8572_v27 = vld [vmem:[#allocation2 + $0x9d0] sm:$0xff] }
 0x124   :  { %5324 = vmatpush.bf16.msra.mxu3 %v8542_v28  ;;  %v8547_v28 = vld [vmem:[#allocation2 + $0x908] sm:$0xff]  ;;  %v8600_v49 = vld [vmem:[#allocation2 + $0xab0] sm:$0xff] }
 0x125   :  { %5286 = vmatpush.bf16.msra.mxu0 %v8517_v30  ;;  %v8563_v30 = vld [vmem:[#allocation2 + $0x988] sm:$0xff] }
 0x126   :  { %5299 = vmatpush.bf16.msra.mxu1 %v8525_v31  ;;  %v8571_v31 = vld [vmem:[#allocation2 + $0x9c8] sm:$0xff] }
 0x127   :  { %5312 = vmatpush.bf16.msra.mxu2 %v8533_v32  ;;  %v1294_v32 = vld [vmem:[#allocation1 + $0x24] sm:$0xff] }
 0x128   :  { %5325 = vmatpush.bf16.msra.mxu3 %v8541_v33  ;;  %v1296_v33 = vld [vmem:[#allocation1 + $0x36] sm:$0xff] }
 0x129   :  { %5287 = vmatpush.bf16.msra.mxu0 %v8516_v39  ;;  %v8546_v39 = vld [vmem:[#allocation2 + $0x900] sm:$0xff] }
 0x12a   :  { %5300 = vmatpush.bf16.msra.mxu1 %v8524_v40  ;;  %v8554_v40 = vld [vmem:[#allocation2 + $0x940] sm:$0xff] }
 0x12b   :  { %5313 = vmatpush.bf16.msra.mxu2 %v8532_v42  ;;  %v8570_v42 = vld [vmem:[#allocation2 + $0x9c0] sm:$0xff] }
 0x12c   :  { %5326 = vmatpush.bf16.msra.mxu3 %v8540_v43  ;;  %v8585_v43 = vld [vmem:[#allocation2 + $0xa38] sm:$0xff] }
 0x12d   :  { %5288 = vmatpush.bf16.msra.mxu0 %v8515_v44  ;;  %v8593_v44 = vld [vmem:[#allocation2 + $0xa78] sm:$0xff] }
 0x12e   :  { %5301 = vmatpush.bf16.msra.mxu1 %v8523_v45  ;;  %v8601_v45 = vld [vmem:[#allocation2 + $0xab8] sm:$0xff] }
 0x12f   :  { %5314 = vmatpush.bf16.msra.mxu2 %v8531_v46  ;;  %v8609_v46 = vld [vmem:[#allocation2 + $0xaf8] sm:$0xff] }
 0x130   :  { %5327 = vmatpush.bf16.msra.mxu3 %v8539_v47  ;;  %v8584_v47 = vld [vmem:[#allocation2 + $0xa30] sm:$0xff] }
 0x131   :  { %5289 = vmatpush.bf16.msra.mxu0 %v8514_v50  ;;  %v5083_v6 = vpop.f32.mrf.mxu0  ;;  %v8608_v50 = vld [vmem:[#allocation2 + $0xaf0] sm:$0xff] }
 0x132   :  { %5302 = vmatpush.bf16.msra.mxu1 %v8522_v51  ;;  %v5084_v7 = vadd.f32 %v5083_v6, %v5071_v38  ;;  %v5096_v10 = vpop.f32.mrf.mxu1  ;;  %v88_v38 = vld [vmem:[%s9112_s0 + $0x28] sm:$0xff]  ;;  %v8583_v51 = vld [vmem:[#allocation2 + $0xa28] sm:$0xff] }
 0x133   :  { %5315 = vmatpush.bf16.msra.mxu2 %v8530_v52  ;;  %1299 = vst [vmem:[#allocation1] ss:$9 sm:$0xff] %v88_v38  ;;  %v8591_v52 = vld [vmem:[#allocation2 + $0xa68] sm:$0xff] }
 0x134   :  { %5328 = vmatpush.bf16.msra.mxu3 %v8538_v53  ;;  %5290 = vmatmul.bf16.vlgmr.msra.gmra.mxu0 %v1290_v58  ;;  %v5097_v13 = vadd.f32 %v5096_v10, %v5084_v7  ;;  %v8599_v53 = vld [vmem:[#allocation2 + $0xaa8] sm:$0xff]  ;;  %v8590_v58 = vld [vmem:[#allocation2 + $0xa60] sm:$0xff] }
 0x135   :  { %5334 = vmatpush.bf16.msrb.mxu0 %v8553_v54  ;;  %5303 = vmatmul.bf16.vlgmr.msra.gmra.mxu1 %v1291_v60  ;;  %v8607_v54 = vld [vmem:[#allocation2 + $0xae8] sm:$0xff]  ;;  %v8598_v60 = vld [vmem:[#allocation2 + $0xaa0] sm:$0xff] }
 0x136   :  { %5347 = vmatpush.bf16.msrb.mxu1 %v8561_v55  ;;  %5316 = vmatmul.bf16.vlgmr.msra.gmra.mxu2 %v1292_v59  ;;  %v8639_v38 = vld [vmem:[#allocation2 + $0xbe8] sm:$0xff] }
 0x137   :  { %5360 = vmatpush.bf16.msrb.mxu2 %v8569_v56  ;;  %5329 = vmatmul.bf16.vlgmr.msra.gmra.mxu3 %v1293_v61  ;;  %v8606_v61 = vld [vmem:[#allocation2 + $0xae0] sm:$0xff] }
 0x138   :  { %5373 = vmatpush.bf16.msrb.mxu3 %v8577_v57  ;;  %v8582_v57 = vld [vmem:[#allocation2 + $0xa20] sm:$0xff] }
 0x139   :  { %5335 = vmatpush.bf16.msrb.mxu0 %v8552_v62  ;;  %v5109_v18 = vpop.f32.mrf.mxu2  ;;  %v5085_v21 = vpop.f32.mrf.mxu0 }
 0x13a   :  { %5348 = vmatpush.bf16.msrb.mxu1 %v8560_v63  ;;  %v5110_v19 = vadd.f32 %v5109_v18, %v5097_v13  ;;  %v5122_v20 = vpop.f32.mrf.mxu3  ;;  %v5098_v25 = vpop.f32.mrf.mxu1  ;;  %v8581_v63 = vld [vmem:[#allocation2 + $0xa18] sm:$0xff]  ;;  %v8579_v13 = vld [vmem:[#allocation2 + $0xa08] sm:$0xff]  ;;  %v8594_v21 = vld [vmem:[#allocation2 + $0xa80] sm:$0xff] }
 0x13b   :  { %5361 = vmatpush.bf16.msrb.mxu2 %v8568_v0  ;;  %v8589_v0 = vld [vmem:[#allocation2 + $0xa58] sm:$0xff] }
 0x13c   :  { %5374 = vmatpush.bf16.msrb.mxu3 %v8576_v1  ;;  %v9082_v22 = vadd.f32 %v5122_v20, %v5110_v19  ;;  %v8597_v1 = vld [vmem:[#allocation2 + $0xa98] sm:$0xff]  ;;  %v8578_v19 = vld [vmem:[#allocation2 + $0xa00] sm:$0xff] }
 0x13d   :  { %5336 = vmatpush.bf16.msrb.mxu0 %v8551_v2  ;;  %v8605_v2 = vld [vmem:[#allocation2 + $0xad8] sm:$0xff]  ;;  %v8586_v20 = vld [vmem:[#allocation2 + $0xa40] sm:$0xff] }
 0x13e   :  { %5349 = vmatpush.bf16.msrb.mxu1 %v8559_v3  ;;  %v8633_v25 = vld [vmem:[#allocation2 + $0xbb8] sm:$0xff] }
 0x13f   :  { %5362 = vmatpush.bf16.msrb.mxu2 %v8567_v4 }
 0x140   :  { %5375 = vmatpush.bf16.msrb.mxu3 %v8575_v5 }
 0x141   :  { %5337 = vmatpush.bf16.msrb.mxu0 %v8550_v8  ;;  %v5111_v34 = vpop.f32.mrf.mxu2  ;;  %v8580_v8 = vld [vmem:[#allocation2 + $0xa10] sm:$0xff] }
 0x142   :  { %5350 = vmatpush.bf16.msrb.mxu1 %v8558_v9  ;;  %v5124_v37 = vpop.f32.mrf.mxu3  ;;  %v8588_v9 = vld [vmem:[#allocation2 + $0xa50] sm:$0xff] }
 0x143   :  { %5363 = vmatpush.bf16.msrb.mxu2 %v8566_v11  ;;  %v8596_v11 = vld [vmem:[#allocation2 + $0xa90] sm:$0xff]  ;;  %v8631_v37 = vld [vmem:[#allocation2 + $0xba8] sm:$0xff] }
 0x144   :  { %5376 = vmatpush.bf16.msrb.mxu3 %v8574_v12  ;;  %v8604_v12 = vld [vmem:[#allocation2 + $0xad0] sm:$0xff] }
 0x145   :  { %5338 = vmatpush.bf16.msrb.mxu0 %v8549_v14  ;;  %v8587_v14 = vld [vmem:[#allocation2 + $0xa48] sm:$0xff]  ;;  %v8640_v34 = vld [vmem:[#allocation2 + $0xbf0] sm:$0xff] }
 0x146   :  { %5351 = vmatpush.bf16.msrb.mxu1 %v8557_v15  ;;  %v8595_v15 = vld [vmem:[#allocation2 + $0xa88] sm:$0xff] }
 0x147   :  { %5364 = vmatpush.bf16.msrb.mxu2 %v8565_v16  ;;  %v8603_v16 = vld [vmem:[#allocation2 + $0xac8] sm:$0xff] }
 0x148   :  { %5377 = vmatpush.bf16.msrb.mxu3 %v8573_v17 }
 0x149   :  { %5339 = vmatpush.bf16.msrb.mxu0 %v8548_v23  ;;  %v8617_v23 = vld [vmem:[#allocation2 + $0xb38] sm:$0xff] }
 0x14a   :  { %5352 = vmatpush.bf16.msrb.mxu1 %v8556_v24  ;;  %v8625_v24 = vld [vmem:[#allocation2 + $0xb78] sm:$0xff] }
 0x14b   :  { %5365 = vmatpush.bf16.msrb.mxu2 %v8564_v26  ;;  %v8641_v26 = vld [vmem:[#allocation2 + $0xbf8] sm:$0xff] }
 0x14c   :  { %5378 = vmatpush.bf16.msrb.mxu3 %v8572_v27  ;;  %v1300_v27 = vld [vmem:[#allocation1] sm:$0xff] }
 0x14d   :  { %5340 = vmatpush.bf16.msrb.mxu0 %v8547_v28  ;;  %v1302_v28 = vld [vmem:[#allocation1 + $0x12] sm:$0xff] }
 0x14e   :  { %5353 = vmatpush.bf16.msrb.mxu1 %v8555_v29  ;;  %v1301_v29 = vld [vmem:[#allocation1 + $0x9] sm:$0xff] }
 0x14f   :  { %5366 = vmatpush.bf16.msrb.mxu2 %v8563_v30  ;;  %v1303_v30 = vld [vmem:[#allocation1 + $0x1b] sm:$0xff] }
 0x150   :  { %5379 = vmatpush.bf16.msrb.mxu3 %v8571_v31  ;;  %v8616_v31 = vld [vmem:[#allocation2 + $0xb30] sm:$0xff] }
 0x151   :  { %5341 = vmatpush.bf16.msrb.mxu0 %v8546_v39  ;;  %v5135_v55 = vpop.f32.mrf.mxu0 }
 0x152   :  { %5354 = vmatpush.bf16.msrb.mxu1 %v8554_v40  ;;  %v5136_v56 = vadd.f32 %v5135_v55, %v9082_v22  ;;  %v5148_v59 = vpop.f32.mrf.mxu1  ;;  %v8602_v22 = vld [vmem:[#allocation2 + $0xac0] sm:$0xff] }
 0x153   :  { %5367 = vmatpush.bf16.msrb.mxu2 %v8562_v41  ;;  %v8614_v41 = vld [vmem:[#allocation2 + $0xb20] sm:$0xff] }
 0x154   :  { %5380 = vmatpush.bf16.msrb.mxu3 %v8570_v42  ;;  %5342 = vmatmul.bf16.vlgmr.msrb.gmra.mxu0 %v1294_v32  ;;  %v5149_v62 = vadd.f32 %v5148_v59, %v5136_v56  ;;  %v8624_v32 = vld [vmem:[#allocation2 + $0xb70] sm:$0xff]  ;;  %v8622_v42 = vld [vmem:[#allocation2 + $0xb60] sm:$0xff] }
 0x155   :  { %5386 = vmatpush.bf16.msra.mxu0 %v8585_v43  ;;  %5355 = vmatmul.bf16.vlgmr.msrb.gmra.mxu1 %v1295_v35  ;;  %v8615_v35 = vld [vmem:[#allocation2 + $0xb28] sm:$0xff]  ;;  %v8612_v56 = vld [vmem:[#allocation2 + $0xb10] sm:$0xff] }
 0x156   :  { %5399 = vmatpush.bf16.msra.mxu1 %v8593_v44  ;;  %5368 = vmatmul.bf16.vlgmr.msrb.gmra.mxu2 %v1296_v33  ;;  %v8632_v33 = vld [vmem:[#allocation2 + $0xbb0] sm:$0xff]  ;;  %v8630_v44 = vld [vmem:[#allocation2 + $0xba0] sm:$0xff] }
 0x157   :  { %5412 = vmatpush.bf16.msra.mxu2 %v8601_v45  ;;  %5381 = vmatmul.bf16.vlgmr.msrb.gmra.mxu3 %v1297_v36  ;;  %v8623_v36 = vld [vmem:[#allocation2 + $0xb68] sm:$0xff]  ;;  %v8638_v45 = vld [vmem:[#allocation2 + $0xbe0] sm:$0xff]  ;;  %v8628_v59 = vld [vmem:[#allocation2 + $0xb90] sm:$0xff] }
 0x158   :  { %5425 = vmatpush.bf16.msra.mxu3 %v8609_v46 }
 0x159   :  { %5387 = vmatpush.bf16.msra.mxu0 %v8584_v47  ;;  %v5161_v3 = vpop.f32.mrf.mxu2  ;;  %v5137_v6 = vpop.f32.mrf.mxu0  ;;  %v8613_v47 = vld [vmem:[#allocation2 + $0xb18] sm:$0xff] }
 0x15a   :  { %5400 = vmatpush.bf16.msra.mxu1 %v8592_v48  ;;  %v5162_v4 = vadd.f32 %v5161_v3, %v5149_v62  ;;  %v5174_v5 = vpop.f32.mrf.mxu3  ;;  %v5150_v10 = vpop.f32.mrf.mxu1  ;;  %v8621_v48 = vld [vmem:[#allocation2 + $0xb58] sm:$0xff]  ;;  %v8619_v62 = vld [vmem:[#allocation2 + $0xb48] sm:$0xff] }
 0x15b   :  { %5413 = vmatpush.bf16.msra.mxu2 %v8600_v49  ;;  %v8629_v49 = vld [vmem:[#allocation2 + $0xb98] sm:$0xff]  ;;  %v8626_v10 = vld [vmem:[#allocation2 + $0xb80] sm:$0xff] }
 0x15c   :  { %5426 = vmatpush.bf16.msra.mxu3 %v8608_v50  ;;  %v5175_v7 = vadd.f32 %v5174_v5, %v5162_v4  ;;  %v8637_v50 = vld [vmem:[#allocation2 + $0xbd8] sm:$0xff]  ;;  %v1305_v4 = vld [vmem:[#allocation1 + $0x2d] sm:$0xff] }
 0x15d   :  { %5388 = vmatpush.bf16.msra.mxu0 %v8583_v51  ;;  %v1307_v5 = vld [vmem:[#allocation1 + $0x3f] sm:$0xff] }
 0x15e   :  { %5401 = vmatpush.bf16.msra.mxu1 %v8591_v52 }
 0x15f   :  { %5414 = vmatpush.bf16.msra.mxu2 %v8599_v53 }
 0x160   :  { %5427 = vmatpush.bf16.msra.mxu3 %v8607_v54 }
 0x161   :  { %5389 = vmatpush.bf16.msra.mxu0 %v8582_v57  ;;  %v5163_v17 = vpop.f32.mrf.mxu2  ;;  %v8620_v57 = vld [vmem:[#allocation2 + $0xb50] sm:$0xff] }
 0x162   :  { %5402 = vmatpush.bf16.msra.mxu1 %v8590_v58  ;;  %v5176_v18 = vpop.f32.mrf.mxu3  ;;  %v8656_v17 = vld [vmem:[#allocation2 + $0xc70] sm:$0xff] }
 0x163   :  { %5415 = vmatpush.bf16.msra.mxu2 %v8598_v60  ;;  %v8636_v60 = vld [vmem:[#allocation2 + $0xbd0] sm:$0xff] }
 0x164   :  { %5428 = vmatpush.bf16.msra.mxu3 %v8606_v61  ;;  %v8611_v61 = vld [vmem:[#allocation2 + $0xb08] sm:$0xff]  ;;  %v8664_v18 = vld [vmem:[#allocation2 + $0xcb0] sm:$0xff] }
 0x165   :  { %5390 = vmatpush.bf16.msra.mxu0 %v8581_v63  ;;  %v8627_v63 = vld [vmem:[#allocation2 + $0xb88] sm:$0xff] }
 0x166   :  { %5403 = vmatpush.bf16.msra.mxu1 %v8589_v0  ;;  %v8635_v0 = vld [vmem:[#allocation2 + $0xbc8] sm:$0xff] }
 0x167   :  { %5416 = vmatpush.bf16.msra.mxu2 %v8597_v1  ;;  %v1304_v1 = vld [vmem:[#allocation1 + $0x24] sm:$0xff] }
 0x168   :  { %5429 = vmatpush.bf16.msra.mxu3 %v8605_v2  ;;  %v1306_v2 = vld [vmem:[#allocation1 + $0x36] sm:$0xff] }
 0x169   :  { %5391 = vmatpush.bf16.msra.mxu0 %v8580_v8  ;;  %v8610_v8 = vld [vmem:[#allocation2 + $0xb00] sm:$0xff] }
 0x16a   :  { %5404 = vmatpush.bf16.msra.mxu1 %v8588_v9  ;;  %v8618_v9 = vld [vmem:[#allocation2 + $0xb40] sm:$0xff] }
 0x16b   :  { %5417 = vmatpush.bf16.msra.mxu2 %v8596_v11  ;;  %v8634_v11 = vld [vmem:[#allocation2 + $0xbc0] sm:$0xff] }
 0x16c   :  { %5430 = vmatpush.bf16.msra.mxu3 %v8604_v12  ;;  %v8649_v12 = vld [vmem:[#allocation2 + $0xc38] sm:$0xff] }
 0x16d   :  { %5392 = vmatpush.bf16.msra.mxu0 %v8579_v13  ;;  %v8657_v13 = vld [vmem:[#allocation2 + $0xc78] sm:$0xff] }
 0x16e   :  { %5405 = vmatpush.bf16.msra.mxu1 %v8587_v14  ;;  %v8665_v14 = vld [vmem:[#allocation2 + $0xcb8] sm:$0xff] }
 0x16f   :  { %5418 = vmatpush.bf16.msra.mxu2 %v8595_v15  ;;  %v8673_v15 = vld [vmem:[#allocation2 + $0xcf8] sm:$0xff] }
 0x170   :  { %5431 = vmatpush.bf16.msra.mxu3 %v8603_v16  ;;  %v8648_v16 = vld [vmem:[#allocation2 + $0xc30] sm:$0xff] }
 0x171   :  { %5393 = vmatpush.bf16.msra.mxu0 %v8578_v19  ;;  %v5187_v39 = vpop.f32.mrf.mxu0  ;;  %v8672_v19 = vld [vmem:[#allocation2 + $0xcf0] sm:$0xff] }
 0x172   :  { %5406 = vmatpush.bf16.msra.mxu1 %v8586_v20  ;;  %v5188_v40 = vadd.f32 %v5187_v39, %v5175_v7  ;;  %v5200_v43 = vpop.f32.mrf.mxu1  ;;  %v89_v7 = vld [vmem:[%s9112_s0 + $0x30] sm:$0xff] }
 0x173   :  { %5419 = vmatpush.bf16.msra.mxu2 %v8594_v21  ;;  %1309 = vst [vmem:[#allocation1] ss:$9 sm:$0xff] %v89_v7  ;;  %v8647_v20 = vld [vmem:[#allocation2 + $0xc28] sm:$0xff] }
 0x174   :  { %5432 = vmatpush.bf16.msra.mxu3 %v8602_v22  ;;  %5394 = vmatmul.bf16.vlgmr.msra.gmra.mxu0 %v1300_v27  ;;  %v5201_v46 = vadd.f32 %v5200_v43, %v5188_v40  ;;  %v8655_v21 = vld [vmem:[#allocation2 + $0xc68] sm:$0xff]  ;;  %v8654_v27 = vld [vmem:[#allocation2 + $0xc60] sm:$0xff] }
 0x175   :  { %5438 = vmatpush.bf16.msrb.mxu0 %v8617_v23  ;;  %5407 = vmatmul.bf16.vlgmr.msra.gmra.mxu1 %v1301_v29  ;;  %v8663_v22 = vld [vmem:[#allocation2 + $0xca8] sm:$0xff]  ;;  %v8662_v29 = vld [vmem:[#allocation2 + $0xca0] sm:$0xff] }
 0x176   :  { %5451 = vmatpush.bf16.msrb.mxu1 %v8625_v24  ;;  %5420 = vmatmul.bf16.vlgmr.msra.gmra.mxu2 %v1302_v28  ;;  %v8671_v23 = vld [vmem:[#allocation2 + $0xce8] sm:$0xff] }
 0x177   :  { %5464 = vmatpush.bf16.msrb.mxu2 %v8633_v25  ;;  %5433 = vmatmul.bf16.vlgmr.msra.gmra.mxu3 %v1303_v30  ;;  %v8670_v30 = vld [vmem:[#allocation2 + $0xce0] sm:$0xff]  ;;  %v8703_v7 = vld [vmem:[#allocation2 + $0xde8] sm:$0xff] }
 0x178   :  { %5477 = vmatpush.bf16.msrb.mxu3 %v8641_v26  ;;  %v8646_v26 = vld [vmem:[#allocation2 + $0xc20] sm:$0xff] }
 0x179   :  { %5439 = vmatpush.bf16.msrb.mxu0 %v8616_v31  ;;  %v5213_v51 = vpop.f32.mrf.mxu2  ;;  %v5189_v54 = vpop.f32.mrf.mxu0 }
 0x17a   :  { %5452 = vmatpush.bf16.msrb.mxu1 %v8624_v32  ;;  %v5214_v52 = vadd.f32 %v5213_v51, %v5201_v46  ;;  %v5226_v53 = vpop.f32.mrf.mxu3  ;;  %v5202_v58 = vpop.f32.mrf.mxu1  ;;  %v8645_v32 = vld [vmem:[#allocation2 + $0xc18] sm:$0xff]  ;;  %v8643_v46 = vld [vmem:[#allocation2 + $0xc08] sm:$0xff]  ;;  %v8658_v54 = vld [vmem:[#allocation2 + $0xc80] sm:$0xff] }
 0x17b   :  { %5465 = vmatpush.bf16.msrb.mxu2 %v8632_v33  ;;  %v8653_v33 = vld [vmem:[#allocation2 + $0xc58] sm:$0xff] }
 0x17c   :  { %5478 = vmatpush.bf16.msrb.mxu3 %v8640_v34  ;;  %v9088_v55 = vadd.f32 %v5226_v53, %v5214_v52  ;;  %v8661_v34 = vld [vmem:[#allocation2 + $0xc98] sm:$0xff]  ;;  %v8642_v52 = vld [vmem:[#allocation2 + $0xc00] sm:$0xff] }
 0x17d   :  { %5440 = vmatpush.bf16.msrb.mxu0 %v8615_v35  ;;  %v8669_v35 = vld [vmem:[#allocation2 + $0xcd8] sm:$0xff]  ;;  %v8650_v53 = vld [vmem:[#allocation2 + $0xc40] sm:$0xff] }
 0x17e   :  { %5453 = vmatpush.bf16.msrb.mxu1 %v8623_v36  ;;  %v8697_v58 = vld [vmem:[#allocation2 + $0xdb8] sm:$0xff] }
 0x17f   :  { %5466 = vmatpush.bf16.msrb.mxu2 %v8631_v37 }
 0x180   :  { %5479 = vmatpush.bf16.msrb.mxu3 %v8639_v38 }
 0x181   :  { %5441 = vmatpush.bf16.msrb.mxu0 %v8614_v41  ;;  %v5215_v3 = vpop.f32.mrf.mxu2  ;;  %v8644_v41 = vld [vmem:[#allocation2 + $0xc10] sm:$0xff] }
 0x182   :  { %5454 = vmatpush.bf16.msrb.mxu1 %v8622_v42  ;;  %v5228_v6 = vpop.f32.mrf.mxu3  ;;  %v8652_v42 = vld [vmem:[#allocation2 + $0xc50] sm:$0xff] }
 0x183   :  { %5467 = vmatpush.bf16.msrb.mxu2 %v8630_v44  ;;  %v8660_v44 = vld [vmem:[#allocation2 + $0xc90] sm:$0xff]  ;;  %v8695_v6 = vld [vmem:[#allocation2 + $0xda8] sm:$0xff] }
 0x184   :  { %5480 = vmatpush.bf16.msrb.mxu3 %v8638_v45  ;;  %v8668_v45 = vld [vmem:[#allocation2 + $0xcd0] sm:$0xff] }
 0x185   :  { %5442 = vmatpush.bf16.msrb.mxu0 %v8613_v47  ;;  %v8651_v47 = vld [vmem:[#allocation2 + $0xc48] sm:$0xff]  ;;  %v8704_v3 = vld [vmem:[#allocation2 + $0xdf0] sm:$0xff] }
 0x186   :  { %5455 = vmatpush.bf16.msrb.mxu1 %v8621_v48  ;;  %v8659_v48 = vld [vmem:[#allocation2 + $0xc88] sm:$0xff] }
 0x187   :  { %5468 = vmatpush.bf16.msrb.mxu2 %v8629_v49  ;;  %v8667_v49 = vld [vmem:[#allocation2 + $0xcc8] sm:$0xff] }
 0x188   :  { %5481 = vmatpush.bf16.msrb.mxu3 %v8637_v50 }
 0x189   :  { %5443 = vmatpush.bf16.msrb.mxu0 %v8612_v56  ;;  %v8681_v56 = vld [vmem:[#allocation2 + $0xd38] sm:$0xff] }
 0x18a   :  { %5456 = vmatpush.bf16.msrb.mxu1 %v8620_v57  ;;  %v8689_v57 = vld [vmem:[#allocation2 + $0xd78] sm:$0xff] }
 0x18b   :  { %5469 = vmatpush.bf16.msrb.mxu2 %v8628_v59  ;;  %v8705_v59 = vld [vmem:[#allocation2 + $0xdf8] sm:$0xff] }
 0x18c   :  { %5482 = vmatpush.bf16.msrb.mxu3 %v8636_v60  ;;  %v1310_v60 = vld [vmem:[#allocation1] sm:$0xff] }
 0x18d   :  { %5444 = vmatpush.bf16.msrb.mxu0 %v8611_v61  ;;  %v1312_v61 = vld [vmem:[#allocation1 + $0x12] sm:$0xff] }
 0x18e   :  { %5457 = vmatpush.bf16.msrb.mxu1 %v8619_v62  ;;  %v1311_v62 = vld [vmem:[#allocation1 + $0x9] sm:$0xff] }
 0x18f   :  { %5470 = vmatpush.bf16.msrb.mxu2 %v8627_v63  ;;  %v1313_v63 = vld [vmem:[#allocation1 + $0x1b] sm:$0xff] }
 0x190   :  { %5483 = vmatpush.bf16.msrb.mxu3 %v8635_v0  ;;  %v8680_v0 = vld [vmem:[#allocation2 + $0xd30] sm:$0xff] }
 0x191   :  { %5445 = vmatpush.bf16.msrb.mxu0 %v8610_v8  ;;  %v5239_v24 = vpop.f32.mrf.mxu0 }
 0x192   :  { %5458 = vmatpush.bf16.msrb.mxu1 %v8618_v9  ;;  %v5240_v25 = vadd.f32 %v5239_v24, %v9088_v55  ;;  %v5252_v28 = vpop.f32.mrf.mxu1  ;;  %v8666_v55 = vld [vmem:[#allocation2 + $0xcc0] sm:$0xff] }
 0x193   :  { %5471 = vmatpush.bf16.msrb.mxu2 %v8626_v10  ;;  %v8678_v10 = vld [vmem:[#allocation2 + $0xd20] sm:$0xff] }
 0x194   :  { %5484 = vmatpush.bf16.msrb.mxu3 %v8634_v11  ;;  %5446 = vmatmul.bf16.vlgmr.msrb.gmra.mxu0 %v1304_v1  ;;  %v5253_v31 = vadd.f32 %v5252_v28, %v5240_v25  ;;  %v8688_v1 = vld [vmem:[#allocation2 + $0xd70] sm:$0xff]  ;;  %v8686_v11 = vld [vmem:[#allocation2 + $0xd60] sm:$0xff] }
 0x195   :  { %5490 = vmatpush.bf16.msra.mxu0 %v8649_v12  ;;  %5459 = vmatmul.bf16.vlgmr.msrb.gmra.mxu1 %v1305_v4  ;;  %v8679_v4 = vld [vmem:[#allocation2 + $0xd28] sm:$0xff]  ;;  %v8676_v25 = vld [vmem:[#allocation2 + $0xd10] sm:$0xff] }
 0x196   :  { %5503 = vmatpush.bf16.msra.mxu1 %v8657_v13  ;;  %5472 = vmatmul.bf16.vlgmr.msrb.gmra.mxu2 %v1306_v2  ;;  %v8696_v2 = vld [vmem:[#allocation2 + $0xdb0] sm:$0xff]  ;;  %v8694_v13 = vld [vmem:[#allocation2 + $0xda0] sm:$0xff] }
 0x197   :  { %5516 = vmatpush.bf16.msra.mxu2 %v8665_v14  ;;  %5485 = vmatmul.bf16.vlgmr.msrb.gmra.mxu3 %v1307_v5  ;;  %v8687_v5 = vld [vmem:[#allocation2 + $0xd68] sm:$0xff]  ;;  %v8702_v14 = vld [vmem:[#allocation2 + $0xde0] sm:$0xff]  ;;  %v8692_v28 = vld [vmem:[#allocation2 + $0xd90] sm:$0xff] }
 0x198   :  { %5529 = vmatpush.bf16.msra.mxu3 %v8673_v15 }
 0x199   :  { %5491 = vmatpush.bf16.msra.mxu0 %v8648_v16  ;;  %v5265_v36 = vpop.f32.mrf.mxu2  ;;  %v5241_v39 = vpop.f32.mrf.mxu0  ;;  %v8677_v16 = vld [vmem:[#allocation2 + $0xd18] sm:$0xff] }
 0x19a   :  { %5504 = vmatpush.bf16.msra.mxu1 %v8656_v17  ;;  %v5266_v37 = vadd.f32 %v5265_v36, %v5253_v31  ;;  %v5278_v38 = vpop.f32.mrf.mxu3  ;;  %v5254_v43 = vpop.f32.mrf.mxu1  ;;  %v8685_v17 = vld [vmem:[#allocation2 + $0xd58] sm:$0xff]  ;;  %v8683_v31 = vld [vmem:[#allocation2 + $0xd48] sm:$0xff] }
 0x19b   :  { %5517 = vmatpush.bf16.msra.mxu2 %v8664_v18  ;;  %v8693_v18 = vld [vmem:[#allocation2 + $0xd98] sm:$0xff]  ;;  %v8690_v43 = vld [vmem:[#allocation2 + $0xd80] sm:$0xff] }
 0x19c   :  { %5530 = vmatpush.bf16.msra.mxu3 %v8672_v19  ;;  %v5279_v40 = vadd.f32 %v5278_v38, %v5266_v37  ;;  %v8701_v19 = vld [vmem:[#allocation2 + $0xdd8] sm:$0xff]  ;;  %v1315_v37 = vld [vmem:[#allocation1 + $0x2d] sm:$0xff] }
 0x19d   :  { %5492 = vmatpush.bf16.msra.mxu0 %v8647_v20  ;;  %v1317_v38 = vld [vmem:[#allocation1 + $0x3f] sm:$0xff] }
 0x19e   :  { %5505 = vmatpush.bf16.msra.mxu1 %v8655_v21 }
 0x19f   :  { %5518 = vmatpush.bf16.msra.mxu2 %v8663_v22 }
 0x1a0   :  { %5531 = vmatpush.bf16.msra.mxu3 %v8671_v23 }
 0x1a1   :  { %5493 = vmatpush.bf16.msra.mxu0 %v8646_v26  ;;  %v5267_v50 = vpop.f32.mrf.mxu2  ;;  %v8684_v26 = vld [vmem:[#allocation2 + $0xd50] sm:$0xff] }
 0x1a2   :  { %5506 = vmatpush.bf16.msra.mxu1 %v8654_v27  ;;  %v5280_v51 = vpop.f32.mrf.mxu3  ;;  %v8720_v50 = vld [vmem:[#allocation2 + $0xe70] sm:$0xff] }
 0x1a3   :  { %5519 = vmatpush.bf16.msra.mxu2 %v8662_v29  ;;  %v8700_v29 = vld [vmem:[#allocation2 + $0xdd0] sm:$0xff] }
 0x1a4   :  { %5532 = vmatpush.bf16.msra.mxu3 %v8670_v30  ;;  %v8675_v30 = vld [vmem:[#allocation2 + $0xd08] sm:$0xff]  ;;  %v8728_v51 = vld [vmem:[#allocation2 + $0xeb0] sm:$0xff] }
 0x1a5   :  { %5494 = vmatpush.bf16.msra.mxu0 %v8645_v32  ;;  %v8691_v32 = vld [vmem:[#allocation2 + $0xd88] sm:$0xff] }
 0x1a6   :  { %5507 = vmatpush.bf16.msra.mxu1 %v8653_v33  ;;  %v8699_v33 = vld [vmem:[#allocation2 + $0xdc8] sm:$0xff] }
 0x1a7   :  { %5520 = vmatpush.bf16.msra.mxu2 %v8661_v34  ;;  %v1314_v34 = vld [vmem:[#allocation1 + $0x24] sm:$0xff] }
 0x1a8   :  { %5533 = vmatpush.bf16.msra.mxu3 %v8669_v35  ;;  %v1316_v35 = vld [vmem:[#allocation1 + $0x36] sm:$0xff] }
 0x1a9   :  { %5495 = vmatpush.bf16.msra.mxu0 %v8644_v41  ;;  %v8674_v41 = vld [vmem:[#allocation2 + $0xd00] sm:$0xff] }
 0x1aa   :  { %5508 = vmatpush.bf16.msra.mxu1 %v8652_v42  ;;  %v8682_v42 = vld [vmem:[#allocation2 + $0xd40] sm:$0xff] }
 0x1ab   :  { %5521 = vmatpush.bf16.msra.mxu2 %v8660_v44  ;;  %v8698_v44 = vld [vmem:[#allocation2 + $0xdc0] sm:$0xff] }
 0x1ac   :  { %5534 = vmatpush.bf16.msra.mxu3 %v8668_v45  ;;  %v8713_v45 = vld [vmem:[#allocation2 + $0xe38] sm:$0xff] }
 0x1ad   :  { %5496 = vmatpush.bf16.msra.mxu0 %v8643_v46  ;;  %v8721_v46 = vld [vmem:[#allocation2 + $0xe78] sm:$0xff] }
 0x1ae   :  { %5509 = vmatpush.bf16.msra.mxu1 %v8651_v47  ;;  %v8729_v47 = vld [vmem:[#allocation2 + $0xeb8] sm:$0xff] }
 0x1af   :  { %5522 = vmatpush.bf16.msra.mxu2 %v8659_v48  ;;  %v8737_v48 = vld [vmem:[#allocation2 + $0xef8] sm:$0xff] }
 0x1b0   :  { %5535 = vmatpush.bf16.msra.mxu3 %v8667_v49  ;;  %v8712_v49 = vld [vmem:[#allocation2 + $0xe30] sm:$0xff] }
 0x1b1   :  { %5497 = vmatpush.bf16.msra.mxu0 %v8642_v52  ;;  %v5291_v8 = vpop.f32.mrf.mxu0  ;;  %v8736_v52 = vld [vmem:[#allocation2 + $0xef0] sm:$0xff] }
 0x1b2   :  { %5510 = vmatpush.bf16.msra.mxu1 %v8650_v53  ;;  %v5292_v9 = vadd.f32 %v5291_v8, %v5279_v40  ;;  %v5304_v12 = vpop.f32.mrf.mxu1  ;;  %v90_v40 = vld [vmem:[%s9112_s0 + $0x38] sm:$0xff]  ;;  %v8711_v53 = vld [vmem:[#allocation2 + $0xe28] sm:$0xff] }
 0x1b3   :  { %5523 = vmatpush.bf16.msra.mxu2 %v8658_v54  ;;  %1319 = vst [vmem:[#allocation1] ss:$9 sm:$0xff] %v90_v40  ;;  %v8719_v54 = vld [vmem:[#allocation2 + $0xe68] sm:$0xff] }
 0x1b4   :  { %5536 = vmatpush.bf16.msra.mxu3 %v8666_v55  ;;  %5498 = vmatmul.bf16.vlgmr.msra.gmra.mxu0 %v1310_v60  ;;  %v5305_v15 = vadd.f32 %v5304_v12, %v5292_v9  ;;  %v8727_v55 = vld [vmem:[#allocation2 + $0xea8] sm:$0xff]  ;;  %v8718_v60 = vld [vmem:[#allocation2 + $0xe60] sm:$0xff] }
 0x1b5   :  { %5542 = vmatpush.bf16.msrb.mxu0 %v8681_v56  ;;  %5511 = vmatmul.bf16.vlgmr.msra.gmra.mxu1 %v1311_v62  ;;  %v8735_v56 = vld [vmem:[#allocation2 + $0xee8] sm:$0xff]  ;;  %v8726_v62 = vld [vmem:[#allocation2 + $0xea0] sm:$0xff] }
 0x1b6   :  { %5555 = vmatpush.bf16.msrb.mxu1 %v8689_v57  ;;  %5524 = vmatmul.bf16.vlgmr.msra.gmra.mxu2 %v1312_v61  ;;  %v8767_v40 = vld [vmem:[#allocation2 + $0xfe8] sm:$0xff] }
 0x1b7   :  { %5568 = vmatpush.bf16.msrb.mxu2 %v8697_v58  ;;  %5537 = vmatmul.bf16.vlgmr.msra.gmra.mxu3 %v1313_v63  ;;  %v8734_v63 = vld [vmem:[#allocation2 + $0xee0] sm:$0xff] }
 0x1b8   :  { %5581 = vmatpush.bf16.msrb.mxu3 %v8705_v59  ;;  %v8710_v59 = vld [vmem:[#allocation2 + $0xe20] sm:$0xff] }
 0x1b9   :  { %5543 = vmatpush.bf16.msrb.mxu0 %v8680_v0  ;;  %v5317_v20 = vpop.f32.mrf.mxu2  ;;  %v5293_v23 = vpop.f32.mrf.mxu0 }
 0x1ba   :  { %5556 = vmatpush.bf16.msrb.mxu1 %v8688_v1  ;;  %v5318_v21 = vadd.f32 %v5317_v20, %v5305_v15  ;;  %v5330_v22 = vpop.f32.mrf.mxu3  ;;  %v5306_v27 = vpop.f32.mrf.mxu1  ;;  %v8709_v1 = vld [vmem:[#allocation2 + $0xe18] sm:$0xff]  ;;  %v8707_v15 = vld [vmem:[#allocation2 + $0xe08] sm:$0xff]  ;;  %v8722_v23 = vld [vmem:[#allocation2 + $0xe80] sm:$0xff] }
 0x1bb   :  { %5569 = vmatpush.bf16.msrb.mxu2 %v8696_v2  ;;  %v8717_v2 = vld [vmem:[#allocation2 + $0xe58] sm:$0xff] }
 0x1bc   :  { %5582 = vmatpush.bf16.msrb.mxu3 %v8704_v3  ;;  %v9094_v24 = vadd.f32 %v5330_v22, %v5318_v21  ;;  %v8725_v3 = vld [vmem:[#allocation2 + $0xe98] sm:$0xff]  ;;  %v8706_v21 = vld [vmem:[#allocation2 + $0xe00] sm:$0xff] }
 0x1bd   :  { %5544 = vmatpush.bf16.msrb.mxu0 %v8679_v4  ;;  %v8733_v4 = vld [vmem:[#allocation2 + $0xed8] sm:$0xff]  ;;  %v8714_v22 = vld [vmem:[#allocation2 + $0xe40] sm:$0xff] }
 0x1be   :  { %5557 = vmatpush.bf16.msrb.mxu1 %v8687_v5  ;;  %v8761_v27 = vld [vmem:[#allocation2 + $0xfb8] sm:$0xff] }
 0x1bf   :  { %5570 = vmatpush.bf16.msrb.mxu2 %v8695_v6 }
 0x1c0   :  { %5583 = vmatpush.bf16.msrb.mxu3 %v8703_v7 }
 0x1c1   :  { %5545 = vmatpush.bf16.msrb.mxu0 %v8678_v10  ;;  %v5319_v36 = vpop.f32.mrf.mxu2  ;;  %v8708_v10 = vld [vmem:[#allocation2 + $0xe10] sm:$0xff] }
 0x1c2   :  { %5558 = vmatpush.bf16.msrb.mxu1 %v8686_v11  ;;  %v5332_v39 = vpop.f32.mrf.mxu3  ;;  %v8716_v11 = vld [vmem:[#allocation2 + $0xe50] sm:$0xff] }
 0x1c3   :  { %5571 = vmatpush.bf16.msrb.mxu2 %v8694_v13  ;;  %v8724_v13 = vld [vmem:[#allocation2 + $0xe90] sm:$0xff]  ;;  %v8759_v39 = vld [vmem:[#allocation2 + $0xfa8] sm:$0xff] }
 0x1c4   :  { %5584 = vmatpush.bf16.msrb.mxu3 %v8702_v14  ;;  %v8732_v14 = vld [vmem:[#allocation2 + $0xed0] sm:$0xff] }
 0x1c5   :  { %5546 = vmatpush.bf16.msrb.mxu0 %v8677_v16  ;;  %v8715_v16 = vld [vmem:[#allocation2 + $0xe48] sm:$0xff]  ;;  %v8768_v36 = vld [vmem:[#allocation2 + $0xff0] sm:$0xff] }
 0x1c6   :  { %5559 = vmatpush.bf16.msrb.mxu1 %v8685_v17  ;;  %v8723_v17 = vld [vmem:[#allocation2 + $0xe88] sm:$0xff] }
 0x1c7   :  { %5572 = vmatpush.bf16.msrb.mxu2 %v8693_v18  ;;  %v8731_v18 = vld [vmem:[#allocation2 + $0xec8] sm:$0xff] }
 0x1c8   :  { %5585 = vmatpush.bf16.msrb.mxu3 %v8701_v19 }
 0x1c9   :  { %5547 = vmatpush.bf16.msrb.mxu0 %v8676_v25  ;;  %v8745_v25 = vld [vmem:[#allocation2 + $0xf38] sm:$0xff] }
 0x1ca   :  { %5560 = vmatpush.bf16.msrb.mxu1 %v8684_v26  ;;  %v8753_v26 = vld [vmem:[#allocation2 + $0xf78] sm:$0xff] }
 0x1cb   :  { %5573 = vmatpush.bf16.msrb.mxu2 %v8692_v28  ;;  %v8769_v28 = vld [vmem:[#allocation2 + $0xff8] sm:$0xff] }
 0x1cc   :  { %5586 = vmatpush.bf16.msrb.mxu3 %v8700_v29  ;;  %v1320_v29 = vld [vmem:[#allocation1] sm:$0xff] }
 0x1cd   :  { %5548 = vmatpush.bf16.msrb.mxu0 %v8675_v30  ;;  %v1322_v30 = vld [vmem:[#allocation1 + $0x12] sm:$0xff] }
 0x1ce   :  { %5561 = vmatpush.bf16.msrb.mxu1 %v8683_v31  ;;  %v1321_v31 = vld [vmem:[#allocation1 + $0x9] sm:$0xff] }
 0x1cf   :  { %5574 = vmatpush.bf16.msrb.mxu2 %v8691_v32  ;;  %v1323_v32 = vld [vmem:[#allocation1 + $0x1b] sm:$0xff] }
 0x1d0   :  { %5587 = vmatpush.bf16.msrb.mxu3 %v8699_v33  ;;  %v8744_v33 = vld [vmem:[#allocation2 + $0xf30] sm:$0xff] }
 0x1d1   :  { %5549 = vmatpush.bf16.msrb.mxu0 %v8674_v41  ;;  %v5343_v57 = vpop.f32.mrf.mxu0 }
 0x1d2   :  { %5562 = vmatpush.bf16.msrb.mxu1 %v8682_v42  ;;  %v5344_v58 = vadd.f32 %v5343_v57, %v9094_v24  ;;  %v5356_v61 = vpop.f32.mrf.mxu1  ;;  %v8730_v24 = vld [vmem:[#allocation2 + $0xec0] sm:$0xff] }
 0x1d3   :  { %5575 = vmatpush.bf16.msrb.mxu2 %v8690_v43  ;;  %v8742_v43 = vld [vmem:[#allocation2 + $0xf20] sm:$0xff] }
 0x1d4   :  { %5588 = vmatpush.bf16.msrb.mxu3 %v8698_v44  ;;  %5550 = vmatmul.bf16.vlgmr.msrb.gmra.mxu0 %v1314_v34  ;;  %v5357_v0 = vadd.f32 %v5356_v61, %v5344_v58  ;;  %v8752_v34 = vld [vmem:[#allocation2 + $0xf70] sm:$0xff]  ;;  %v8750_v44 = vld [vmem:[#allocation2 + $0xf60] sm:$0xff] }
 0x1d5   :  { %5594 = vmatpush.bf16.msra.mxu0 %v8713_v45  ;;  %5563 = vmatmul.bf16.vlgmr.msrb.gmra.mxu1 %v1315_v37  ;;  %v8743_v37 = vld [vmem:[#allocation2 + $0xf28] sm:$0xff]  ;;  %v8740_v58 = vld [vmem:[#allocation2 + $0xf10] sm:$0xff] }
 0x1d6   :  { %5607 = vmatpush.bf16.msra.mxu1 %v8721_v46  ;;  %5576 = vmatmul.bf16.vlgmr.msrb.gmra.mxu2 %v1316_v35  ;;  %v8760_v35 = vld [vmem:[#allocation2 + $0xfb0] sm:$0xff]  ;;  %v8758_v46 = vld [vmem:[#allocation2 + $0xfa0] sm:$0xff] }
 0x1d7   :  { %5620 = vmatpush.bf16.msra.mxu2 %v8729_v47  ;;  %5589 = vmatmul.bf16.vlgmr.msrb.gmra.mxu3 %v1317_v38  ;;  %v8751_v38 = vld [vmem:[#allocation2 + $0xf68] sm:$0xff]  ;;  %v8766_v47 = vld [vmem:[#allocation2 + $0xfe0] sm:$0xff]  ;;  %v8756_v61 = vld [vmem:[#allocation2 + $0xf90] sm:$0xff] }
 0x1d8   :  { %5633 = vmatpush.bf16.msra.mxu3 %v8737_v48 }
 0x1d9   :  { %5595 = vmatpush.bf16.msra.mxu0 %v8712_v49  ;;  %v5369_v5 = vpop.f32.mrf.mxu2  ;;  %v5345_v8 = vpop.f32.mrf.mxu0  ;;  %v8741_v49 = vld [vmem:[#allocation2 + $0xf18] sm:$0xff] }
 0x1da   :  { %5608 = vmatpush.bf16.msra.mxu1 %v8720_v50  ;;  %v5370_v6 = vadd.f32 %v5369_v5, %v5357_v0  ;;  %v5382_v7 = vpop.f32.mrf.mxu3  ;;  %v5358_v12 = vpop.f32.mrf.mxu1  ;;  %v8749_v50 = vld [vmem:[#allocation2 + $0xf58] sm:$0xff]  ;;  %v8747_v0 = vld [vmem:[#allocation2 + $0xf48] sm:$0xff] }
 0x1db   :  { %5621 = vmatpush.bf16.msra.mxu2 %v8728_v51  ;;  %v8757_v51 = vld [vmem:[#allocation2 + $0xf98] sm:$0xff]  ;;  %v8754_v12 = vld [vmem:[#allocation2 + $0xf80] sm:$0xff] }
 0x1dc   :  { %5634 = vmatpush.bf16.msra.mxu3 %v8736_v52  ;;  %v5383_v9 = vadd.f32 %v5382_v7, %v5370_v6  ;;  %v8765_v52 = vld [vmem:[#allocation2 + $0xfd8] sm:$0xff]  ;;  %v1325_v6 = vld [vmem:[#allocation1 + $0x2d] sm:$0xff] }
 0x1dd   :  { %5596 = vmatpush.bf16.msra.mxu0 %v8711_v53  ;;  %v1327_v7 = vld [vmem:[#allocation1 + $0x3f] sm:$0xff] }
 0x1de   :  { %5609 = vmatpush.bf16.msra.mxu1 %v8719_v54 }
 0x1df   :  { %5622 = vmatpush.bf16.msra.mxu2 %v8727_v55 }
 0x1e0   :  { %5635 = vmatpush.bf16.msra.mxu3 %v8735_v56 }
 0x1e1   :  { %5597 = vmatpush.bf16.msra.mxu0 %v8710_v59  ;;  %v5371_v19 = vpop.f32.mrf.mxu2  ;;  %v8748_v59 = vld [vmem:[#allocation2 + $0xf50] sm:$0xff] }
 0x1e2   :  { %5610 = vmatpush.bf16.msra.mxu1 %v8718_v60  ;;  %v5384_v20 = vpop.f32.mrf.mxu3  ;;  %v8784_v19 = vld [vmem:[#allocation2 + $0x1070] sm:$0xff] }
 0x1e3   :  { %5623 = vmatpush.bf16.msra.mxu2 %v8726_v62  ;;  %v8764_v62 = vld [vmem:[#allocation2 + $0xfd0] sm:$0xff] }
 0x1e4   :  { %5636 = vmatpush.bf16.msra.mxu3 %v8734_v63  ;;  %v8739_v63 = vld [vmem:[#allocation2 + $0xf08] sm:$0xff]  ;;  %v8792_v20 = vld [vmem:[#allocation2 + $0x10b0] sm:$0xff] }
 0x1e5   :  { %5598 = vmatpush.bf16.msra.mxu0 %v8709_v1  ;;  %v8755_v1 = vld [vmem:[#allocation2 + $0xf88] sm:$0xff] }
 0x1e6   :  { %5611 = vmatpush.bf16.msra.mxu1 %v8717_v2  ;;  %v8763_v2 = vld [vmem:[#allocation2 + $0xfc8] sm:$0xff] }
 0x1e7   :  { %5624 = vmatpush.bf16.msra.mxu2 %v8725_v3  ;;  %v1324_v3 = vld [vmem:[#allocation1 + $0x24] sm:$0xff] }
 0x1e8   :  { %5637 = vmatpush.bf16.msra.mxu3 %v8733_v4  ;;  %v1326_v4 = vld [vmem:[#allocation1 + $0x36] sm:$0xff] }
 0x1e9   :  { %5599 = vmatpush.bf16.msra.mxu0 %v8708_v10  ;;  %v8738_v10 = vld [vmem:[#allocation2 + $0xf00] sm:$0xff] }
 0x1ea   :  { %5612 = vmatpush.bf16.msra.mxu1 %v8716_v11  ;;  %v8746_v11 = vld [vmem:[#allocation2 + $0xf40] sm:$0xff] }
 0x1eb   :  { %5625 = vmatpush.bf16.msra.mxu2 %v8724_v13  ;;  %v8762_v13 = vld [vmem:[#allocation2 + $0xfc0] sm:$0xff] }
 0x1ec   :  { %5638 = vmatpush.bf16.msra.mxu3 %v8732_v14  ;;  %v8777_v14 = vld [vmem:[#allocation2 + $0x1038] sm:$0xff] }
 0x1ed   :  { %5600 = vmatpush.bf16.msra.mxu0 %v8707_v15  ;;  %v8785_v15 = vld [vmem:[#allocation2 + $0x1078] sm:$0xff] }
 0x1ee   :  { %5613 = vmatpush.bf16.msra.mxu1 %v8715_v16  ;;  %v8793_v16 = vld [vmem:[#allocation2 + $0x10b8] sm:$0xff] }
 0x1ef   :  { %5626 = vmatpush.bf16.msra.mxu2 %v8723_v17  ;;  %v8801_v17 = vld [vmem:[#allocation2 + $0x10f8] sm:$0xff] }
 0x1f0   :  { %5639 = vmatpush.bf16.msra.mxu3 %v8731_v18  ;;  %v8776_v18 = vld [vmem:[#allocation2 + $0x1030] sm:$0xff] }
 0x1f1   :  { %5601 = vmatpush.bf16.msra.mxu0 %v8706_v21  ;;  %v5395_v41 = vpop.f32.mrf.mxu0  ;;  %v8800_v21 = vld [vmem:[#allocation2 + $0x10f0] sm:$0xff] }
 0x1f2   :  { %5614 = vmatpush.bf16.msra.mxu1 %v8714_v22  ;;  %v5396_v42 = vadd.f32 %v5395_v41, %v5383_v9  ;;  %v5408_v45 = vpop.f32.mrf.mxu1  ;;  %v91_v9 = vld [vmem:[%s9112_s0 + $0x40] sm:$0xff]  ;;  %v8775_v22 = vld [vmem:[#allocation2 + $0x1028] sm:$0xff]  ;;  %s9012_s0 = smov [#allocation10]  }
 0x1f3   :  { %5627 = vmatpush.bf16.msra.mxu2 %v8722_v23  ;;  %1329 = vst [vmem:[#allocation1] ss:$9 sm:$0xff] %v91_v9  ;;  %v8783_v23 = vld [vmem:[#allocation2 + $0x1068] sm:$0xff]  ;;  %s5892_s9 = sshll.u32 %s9012_s0, 4  ;;  %s5893_s9 = int_to_ptr.vmem [resolvable:$true] %s5892_s9 }
 0x1f4   :  { %5640 = vmatpush.bf16.msra.mxu3 %v8730_v24  ;;  %5602 = vmatmul.bf16.vlgmr.msra.gmra.mxu0 %v1320_v29  ;;  %v5409_v48 = vadd.f32 %v5408_v45, %v5396_v42  ;;  %v8791_v24 = vld [vmem:[#allocation2 + $0x10a8] sm:$0xff]  ;;  %v8782_v29 = vld [vmem:[#allocation2 + $0x1060] sm:$0xff] }
 0x1f5   :  { %5646 = vmatpush.bf16.msrb.mxu0 %v8745_v25  ;;  %5615 = vmatmul.bf16.vlgmr.msra.gmra.mxu1 %v1321_v31  ;;  %v8799_v25 = vld [vmem:[#allocation2 + $0x10e8] sm:$0xff]  ;;  %v8790_v31 = vld [vmem:[#allocation2 + $0x10a0] sm:$0xff] }
 0x1f6   :  { %5659 = vmatpush.bf16.msrb.mxu1 %v8753_v26  ;;  %5628 = vmatmul.bf16.vlgmr.msra.gmra.mxu2 %v1322_v30  ;;  %v8831_v9 = vld [vmem:[#allocation2 + $0x11e8] sm:$0xff] }
 0x1f7   :  { %5672 = vmatpush.bf16.msrb.mxu2 %v8761_v27  ;;  %5641 = vmatmul.bf16.vlgmr.msra.gmra.mxu3 %v1323_v32  ;;  %v8798_v32 = vld [vmem:[#allocation2 + $0x10e0] sm:$0xff] }
 0x1f8   :  { %5685 = vmatpush.bf16.msrb.mxu3 %v8769_v28  ;;  %v8774_v28 = vld [vmem:[#allocation2 + $0x1020] sm:$0xff] }
 0x1f9   :  { %5647 = vmatpush.bf16.msrb.mxu0 %v8744_v33  ;;  %v5421_v53 = vpop.f32.mrf.mxu2  ;;  %v5397_v56 = vpop.f32.mrf.mxu0 }
 0x1fa   :  { %5660 = vmatpush.bf16.msrb.mxu1 %v8752_v34  ;;  %v5422_v54 = vadd.f32 %v5421_v53, %v5409_v48  ;;  %v5434_v55 = vpop.f32.mrf.mxu3  ;;  %v5410_v60 = vpop.f32.mrf.mxu1  ;;  %v8773_v34 = vld [vmem:[#allocation2 + $0x1018] sm:$0xff]  ;;  %v8771_v48 = vld [vmem:[#allocation2 + $0x1008] sm:$0xff]  ;;  %v8786_v56 = vld [vmem:[#allocation2 + $0x1080] sm:$0xff] }
 0x1fb   :  { %5673 = vmatpush.bf16.msrb.mxu2 %v8760_v35  ;;  %v8781_v35 = vld [vmem:[#allocation2 + $0x1058] sm:$0xff] }
 0x1fc   :  { %5686 = vmatpush.bf16.msrb.mxu3 %v8768_v36  ;;  %v9100_v57 = vadd.f32 %v5434_v55, %v5422_v54  ;;  %v8789_v36 = vld [vmem:[#allocation2 + $0x1098] sm:$0xff]  ;;  %v8770_v54 = vld [vmem:[#allocation2 + $0x1000] sm:$0xff] }
 0x1fd   :  { %5648 = vmatpush.bf16.msrb.mxu0 %v8743_v37  ;;  %v8797_v37 = vld [vmem:[#allocation2 + $0x10d8] sm:$0xff]  ;;  %v8778_v55 = vld [vmem:[#allocation2 + $0x1040] sm:$0xff] }
 0x1fe   :  { %5661 = vmatpush.bf16.msrb.mxu1 %v8751_v38  ;;  %v8825_v60 = vld [vmem:[#allocation2 + $0x11b8] sm:$0xff] }
 0x1ff   :  { %5674 = vmatpush.bf16.msrb.mxu2 %v8759_v39 }
 0x200   :  { %5687 = vmatpush.bf16.msrb.mxu3 %v8767_v40 }
 0x201   :  { %5649 = vmatpush.bf16.msrb.mxu0 %v8742_v43  ;;  %v5423_v5 = vpop.f32.mrf.mxu2  ;;  %v8772_v43 = vld [vmem:[#allocation2 + $0x1010] sm:$0xff] }
 0x202   :  { %5662 = vmatpush.bf16.msrb.mxu1 %v8750_v44  ;;  %v5436_v8 = vpop.f32.mrf.mxu3  ;;  %v8780_v44 = vld [vmem:[#allocation2 + $0x1050] sm:$0xff] }
 0x203   :  { %5675 = vmatpush.bf16.msrb.mxu2 %v8758_v46  ;;  %v8788_v46 = vld [vmem:[#allocation2 + $0x1090] sm:$0xff]  ;;  %v8823_v8 = vld [vmem:[#allocation2 + $0x11a8] sm:$0xff] }
 0x204   :  { %5688 = vmatpush.bf16.msrb.mxu3 %v8766_v47  ;;  %v8796_v47 = vld [vmem:[#allocation2 + $0x10d0] sm:$0xff] }
 0x205   :  { %5650 = vmatpush.bf16.msrb.mxu0 %v8741_v49  ;;  %v8779_v49 = vld [vmem:[#allocation2 + $0x1048] sm:$0xff]  ;;  %v8832_v5 = vld [vmem:[#allocation2 + $0x11f0] sm:$0xff] }
 0x206   :  { %5663 = vmatpush.bf16.msrb.mxu1 %v8749_v50  ;;  %v8787_v50 = vld [vmem:[#allocation2 + $0x1088] sm:$0xff] }
 0x207   :  { %5676 = vmatpush.bf16.msrb.mxu2 %v8757_v51  ;;  %v8795_v51 = vld [vmem:[#allocation2 + $0x10c8] sm:$0xff] }
 0x208   :  { %5689 = vmatpush.bf16.msrb.mxu3 %v8765_v52 }
 0x209   :  { %5651 = vmatpush.bf16.msrb.mxu0 %v8740_v58  ;;  %v8809_v58 = vld [vmem:[#allocation2 + $0x1138] sm:$0xff] }
 0x20a   :  { %5664 = vmatpush.bf16.msrb.mxu1 %v8748_v59  ;;  %v8817_v59 = vld [vmem:[#allocation2 + $0x1178] sm:$0xff] }
 0x20b   :  { %5677 = vmatpush.bf16.msrb.mxu2 %v8756_v61  ;;  %v8833_v61 = vld [vmem:[#allocation2 + $0x11f8] sm:$0xff] }
 0x20c   :  { %5690 = vmatpush.bf16.msrb.mxu3 %v8764_v62  ;;  %v1330_v62 = vld [vmem:[#allocation1] sm:$0xff] }
 0x20d   :  { %5652 = vmatpush.bf16.msrb.mxu0 %v8739_v63  ;;  %v1332_v63 = vld [vmem:[#allocation1 + $0x12] sm:$0xff] }
 0x20e   :  { %5665 = vmatpush.bf16.msrb.mxu1 %v8747_v0  ;;  %v1331_v0 = vld [vmem:[#allocation1 + $0x9] sm:$0xff] }
 0x20f   :  { %5678 = vmatpush.bf16.msrb.mxu2 %v8755_v1  ;;  %v1333_v1 = vld [vmem:[#allocation1 + $0x1b] sm:$0xff] }
 0x210   :  { %5691 = vmatpush.bf16.msrb.mxu3 %v8763_v2  ;;  %v8808_v2 = vld [vmem:[#allocation2 + $0x1130] sm:$0xff] }
 0x211   :  { %5653 = vmatpush.bf16.msrb.mxu0 %v8738_v10  ;;  %v5447_v26 = vpop.f32.mrf.mxu0 }
 0x212   :  { %5666 = vmatpush.bf16.msrb.mxu1 %v8746_v11  ;;  %v5448_v27 = vadd.f32 %v5447_v26, %v9100_v57  ;;  %v5460_v30 = vpop.f32.mrf.mxu1  ;;  %v8794_v57 = vld [vmem:[#allocation2 + $0x10c0] sm:$0xff] }
 0x213   :  { %5679 = vmatpush.bf16.msrb.mxu2 %v8754_v12  ;;  %v8806_v12 = vld [vmem:[#allocation2 + $0x1120] sm:$0xff] }
 0x214   :  { %5692 = vmatpush.bf16.msrb.mxu3 %v8762_v13  ;;  %5654 = vmatmul.bf16.vlgmr.msrb.gmra.mxu0 %v1324_v3  ;;  %v5461_v33 = vadd.f32 %v5460_v30, %v5448_v27  ;;  %v8816_v3 = vld [vmem:[#allocation2 + $0x1170] sm:$0xff]  ;;  %v8814_v13 = vld [vmem:[#allocation2 + $0x1160] sm:$0xff] }
 0x215   :  { %5698 = vmatpush.bf16.msra.mxu0 %v8777_v14  ;;  %5667 = vmatmul.bf16.vlgmr.msrb.gmra.mxu1 %v1325_v6  ;;  %v8807_v6 = vld [vmem:[#allocation2 + $0x1128] sm:$0xff]  ;;  %v8804_v27 = vld [vmem:[#allocation2 + $0x1110] sm:$0xff] }
 0x216   :  { %5711 = vmatpush.bf16.msra.mxu1 %v8785_v15  ;;  %5680 = vmatmul.bf16.vlgmr.msrb.gmra.mxu2 %v1326_v4  ;;  %v8824_v4 = vld [vmem:[#allocation2 + $0x11b0] sm:$0xff]  ;;  %v8822_v15 = vld [vmem:[#allocation2 + $0x11a0] sm:$0xff] }
 0x217   :  { %5724 = vmatpush.bf16.msra.mxu2 %v8793_v16  ;;  %5693 = vmatmul.bf16.vlgmr.msrb.gmra.mxu3 %v1327_v7  ;;  %v8815_v7 = vld [vmem:[#allocation2 + $0x1168] sm:$0xff]  ;;  %v8830_v16 = vld [vmem:[#allocation2 + $0x11e0] sm:$0xff]  ;;  %v8820_v30 = vld [vmem:[#allocation2 + $0x1190] sm:$0xff] }
 0x218   :  { %5737 = vmatpush.bf16.msra.mxu3 %v8801_v17 }
 0x219   :  { %5699 = vmatpush.bf16.msra.mxu0 %v8776_v18  ;;  %v5473_v38 = vpop.f32.mrf.mxu2  ;;  %v5449_v41 = vpop.f32.mrf.mxu0  ;;  %v8805_v18 = vld [vmem:[#allocation2 + $0x1118] sm:$0xff] }
 0x21a   :  { %5712 = vmatpush.bf16.msra.mxu1 %v8784_v19  ;;  %v5474_v39 = vadd.f32 %v5473_v38, %v5461_v33  ;;  %v5486_v40 = vpop.f32.mrf.mxu3  ;;  %v5462_v45 = vpop.f32.mrf.mxu1  ;;  %v8813_v19 = vld [vmem:[#allocation2 + $0x1158] sm:$0xff]  ;;  %v8811_v33 = vld [vmem:[#allocation2 + $0x1148] sm:$0xff]  ;;  %v8802_v38 = vld [vmem:[#allocation2 + $0x1100] sm:$0xff] }
 0x21b   :  { %5725 = vmatpush.bf16.msra.mxu2 %v8792_v20  ;;  %v8821_v20 = vld [vmem:[#allocation2 + $0x1198] sm:$0xff]  ;;  %v8826_v41 = vld [vmem:[#allocation2 + $0x11c0] sm:$0xff] }
 0x21c   :  { %5738 = vmatpush.bf16.msra.mxu3 %v8800_v21  ;;  %v5487_v42 = vadd.f32 %v5486_v40, %v5474_v39  ;;  %v8829_v21 = vld [vmem:[#allocation2 + $0x11d8] sm:$0xff]  ;;  %v8810_v39 = vld [vmem:[#allocation2 + $0x1140] sm:$0xff] }
 0x21d   :  { %5700 = vmatpush.bf16.msra.mxu0 %v8775_v22  ;;  %v8818_v40 = vld [vmem:[#allocation2 + $0x1180] sm:$0xff]  ;;  %v1337_v45 = vld [vmem:[#allocation1 + $0x3f] sm:$0xff] }
 0x21e   :  { %5713 = vmatpush.bf16.msra.mxu1 %v8783_v23 }
 0x21f   :  { %5726 = vmatpush.bf16.msra.mxu2 %v8791_v24 }
 0x220   :  { %5739 = vmatpush.bf16.msra.mxu3 %v8799_v25 }
 0x221   :  { %5701 = vmatpush.bf16.msra.mxu0 %v8774_v28  ;;  %v5475_v52 = vpop.f32.mrf.mxu2  ;;  %v8812_v28 = vld [vmem:[#allocation2 + $0x1150] sm:$0xff] }
 0x222   :  { %5714 = vmatpush.bf16.msra.mxu1 %v8782_v29  ;;  %v5488_v53 = vpop.f32.mrf.mxu3 }
 0x223   :  { %5727 = vmatpush.bf16.msra.mxu2 %v8790_v31  ;;  %v8828_v31 = vld [vmem:[#allocation2 + $0x11d0] sm:$0xff] }
 0x224   :  { %5740 = vmatpush.bf16.msra.mxu3 %v8798_v32  ;;  %v8803_v32 = vld [vmem:[#allocation2 + $0x1108] sm:$0xff] }
 0x225   :  { %5702 = vmatpush.bf16.msra.mxu0 %v8773_v34  ;;  %v8819_v34 = vld [vmem:[#allocation2 + $0x1188] sm:$0xff] }
 0x226   :  { %5715 = vmatpush.bf16.msra.mxu1 %v8781_v35  ;;  %v8827_v35 = vld [vmem:[#allocation2 + $0x11c8] sm:$0xff] }
 0x227   :  { %5728 = vmatpush.bf16.msra.mxu2 %v8789_v36 }
 0x228   :  { %5741 = vmatpush.bf16.msra.mxu3 %v8797_v37 }
 0x229   :  { %5703 = vmatpush.bf16.msra.mxu0 %v8772_v43  ;;  %v1335_v43 = vld [vmem:[#allocation1 + $0x2d] sm:$0xff] }
 0x22a   :  { %5716 = vmatpush.bf16.msra.mxu1 %v8780_v44  ;;  %v1336_v44 = vld [vmem:[#allocation1 + $0x36] sm:$0xff] }
 0x22b   :  { %5729 = vmatpush.bf16.msra.mxu2 %v8788_v46 }
 0x22c   :  { %5742 = vmatpush.bf16.msra.mxu3 %v8796_v47 }
 0x22d   :  { %5704 = vmatpush.bf16.msra.mxu0 %v8771_v48 }
 0x22e   :  { %5717 = vmatpush.bf16.msra.mxu1 %v8779_v49 }
 0x22f   :  { %5730 = vmatpush.bf16.msra.mxu2 %v8787_v50 }
 0x230   :  { %5743 = vmatpush.bf16.msra.mxu3 %v8795_v51 }
 0x231   :  { %5705 = vmatpush.bf16.msra.mxu0 %v8770_v54  ;;  %v5499_v10 = vpop.f32.mrf.mxu0 }
 0x232   :  { %5718 = vmatpush.bf16.msra.mxu1 %v8778_v55  ;;  %v5500_v11 = vadd.f32 %v5499_v10, %v5487_v42  ;;  %v5512_v14 = vpop.f32.mrf.mxu1  ;;  %v1334_v42 = vld [vmem:[#allocation1 + $0x24] sm:$0xff] }
 0x233   :  { %5731 = vmatpush.bf16.msra.mxu2 %v8786_v56  ;;  %v8841_v10 = vld [vmem:[#allocation7 + $0x38] sm:$0xff] }
 0x234   :  { %5744 = vmatpush.bf16.msra.mxu3 %v8794_v57  ;;  %5706 = vmatmul.bf16.vlgmr.msra.gmra.mxu0 %v1330_v62  ;;  %v5513_v17 = vadd.f32 %v5512_v14, %v5500_v11  ;;  %v8839_v14 = vld [vmem:[#allocation7 + $0x28] sm:$0xff] }
 0x235   :  { %5750 = vmatpush.bf16.msrb.mxu0 %v8809_v58  ;;  %5719 = vmatmul.bf16.vlgmr.msra.gmra.mxu1 %v1331_v0 }
 0x236   :  { %5763 = vmatpush.bf16.msrb.mxu1 %v8817_v59  ;;  %5732 = vmatmul.bf16.vlgmr.msra.gmra.mxu2 %v1332_v63 }
 0x237   :  { %5776 = vmatpush.bf16.msrb.mxu2 %v8825_v60  ;;  %5745 = vmatmul.bf16.vlgmr.msra.gmra.mxu3 %v1333_v1 }
 0x238   :  { %5789 = vmatpush.bf16.msrb.mxu3 %v8833_v61 }
 0x239   :  { %5751 = vmatpush.bf16.msrb.mxu0 %v8808_v2  ;;  %v5525_v22 = vpop.f32.mrf.mxu2  ;;  %v5501_v25 = vpop.f32.mrf.mxu0 }
 0x23a   :  { %5764 = vmatpush.bf16.msrb.mxu1 %v8816_v3  ;;  %v5526_v23 = vadd.f32 %v5525_v22, %v5513_v17  ;;  %v5538_v24 = vpop.f32.mrf.mxu3  ;;  %v5514_v29 = vpop.f32.mrf.mxu1  ;;  %v8838_v17 = vld [vmem:[#allocation7 + $0x20] sm:$0xff]  ;;  %v8835_v22 = vld [vmem:[#allocation7 + $0x8] sm:$0xff] }
 0x23b   :  { %5777 = vmatpush.bf16.msrb.mxu2 %v8824_v4 }
 0x23c   :  { %5790 = vmatpush.bf16.msrb.mxu3 %v8832_v5  ;;  %v5539_v26 = vadd.f32 %v5538_v24, %v5526_v23 }
 0x23d   :  { %5752 = vmatpush.bf16.msrb.mxu0 %v8807_v6 }
 0x23e   :  { %5765 = vmatpush.bf16.msrb.mxu1 %v8815_v7 }
 0x23f   :  { %5778 = vmatpush.bf16.msrb.mxu2 %v8823_v8 }
 0x240   :  { %5791 = vmatpush.bf16.msrb.mxu3 %v8831_v9 }
 0x241   :  { %5753 = vmatpush.bf16.msrb.mxu0 %v8806_v12  ;;  %v5527_v36 = vpop.f32.mrf.mxu2 }
 0x242   :  { %5766 = vmatpush.bf16.msrb.mxu1 %v8814_v13  ;;  %v5540_v37 = vpop.f32.mrf.mxu3  ;;  %v8840_v13 = vld [vmem:[#allocation7 + $0x30] sm:$0xff] }
 0x243   :  { %5779 = vmatpush.bf16.msrb.mxu2 %v8822_v15 }
 0x244   :  { %5792 = vmatpush.bf16.msrb.mxu3 %v8830_v16 }
 0x245   :  { %5754 = vmatpush.bf16.msrb.mxu0 %v8805_v18  ;;  %v8837_v18 = vld [vmem:[#allocation7 + $0x18] sm:$0xff] }
 0x246   :  { %5767 = vmatpush.bf16.msrb.mxu1 %v8813_v19 }
 0x247   :  { %5780 = vmatpush.bf16.msrb.mxu2 %v8821_v20  ;;  %v8836_v20 = vld [vmem:[#allocation7 + $0x10] sm:$0xff] }
 0x248   :  { %5793 = vmatpush.bf16.msrb.mxu3 %v8829_v21 }
 0x249   :  { %5755 = vmatpush.bf16.msrb.mxu0 %v8804_v27  ;;  %v8834_v27 = vld [vmem:[#allocation7] sm:$0xff] }
 0x24a   :  { %5768 = vmatpush.bf16.msrb.mxu1 %v8812_v28 }
 0x24b   :  { %5781 = vmatpush.bf16.msrb.mxu2 %v8820_v30 }
 0x24c   :  { %5794 = vmatpush.bf16.msrb.mxu3 %v8828_v31 }
 0x24d   :  { %5756 = vmatpush.bf16.msrb.mxu0 %v8803_v32 }
 0x24e   :  { %5769 = vmatpush.bf16.msrb.mxu1 %v8811_v33 }
 0x24f   :  { %5782 = vmatpush.bf16.msrb.mxu2 %v8819_v34 }
 0x250   :  { %5795 = vmatpush.bf16.msrb.mxu3 %v8827_v35 }
 0x251   :  { %5757 = vmatpush.bf16.msrb.mxu0 %v8802_v38  ;;  %v5551_v46 = vpop.f32.mrf.mxu0 }
 0x252   :  { %5770 = vmatpush.bf16.msrb.mxu1 %v8810_v39  ;;  %v5552_v47 = vadd.f32 %v5551_v46, %v5539_v26  ;;  %v5564_v48 = vpop.f32.mrf.mxu1 }
 0x253   :  { %5783 = vmatpush.bf16.msrb.mxu2 %v8818_v40 }
 0x254   :  { %5796 = vmatpush.bf16.msrb.mxu3 %v8826_v41  ;;  %5758 = vmatmul.bf16.vlgmr.msrb.gmra.mxu0 %v1334_v42  ;;  %v5565_v49 = vadd.f32 %v5564_v48, %v5552_v47 }
 0x255   :  { %5771 = vmatmul.bf16.vlgmr.msrb.gmra.mxu1 %v1335_v43  ;;  %5873 = vmatpush.bf16.msra.mxu0 %v8841_v10 }
 0x256   :  { %5784 = vmatmul.bf16.vlgmr.msrb.gmra.mxu2 %v1336_v44 }
 0x257   :  { %5797 = vmatmul.bf16.vlgmr.msrb.gmra.mxu3 %v1337_v45 }
 0x259   :  { %v5577_v50 = vpop.f32.mrf.mxu2  ;;  %v5553_v53 = vpop.f32.mrf.mxu0  ;;  %5874 = vmatpush.bf16.msra.mxu0 %v8840_v13 }
 0x25a   :  { %v5578_v51 = vadd.f32 %v5577_v50, %v5565_v49  ;;  %v5590_v52 = vpop.f32.mrf.mxu3  ;;  %v5566_v55 = vpop.f32.mrf.mxu1 }
 0x25c   :  { %v5591_v54 = vadd.f32 %v5590_v52, %v5578_v51  ;;  %v8851_v52 = vld [vmem:[#allocation8] ss:$0 sm:$0xff] }
 0x25d   :  { %5875 = vmatpush.bf16.msra.mxu0 %v8839_v14 }
 0x261   :  { %v5579_v56 = vpop.f32.mrf.mxu2  ;;  %5876 = vmatpush.bf16.msra.mxu0 %v8838_v17 }
 0x262   :  { %v5592_v57 = vpop.f32.mrf.mxu3 }
 0x265   :  { %5877 = vmatpush.bf16.msra.mxu0 %v8837_v18 }
 0x269   :  { %5878 = vmatpush.bf16.msra.mxu0 %v8836_v20 }
 0x26d   :  { %5879 = vmatpush.bf16.msra.mxu0 %v8835_v22 }
 0x271   :  { %v5603_v58 = vpop.f32.mrf.mxu0  ;;  %5880 = vmatpush.bf16.msra.mxu0 %v8834_v27 }
 0x272   :  { %v5604_v59 = vadd.f32 %v5603_v58, %v5591_v54  ;;  %v5616_v60 = vpop.f32.mrf.mxu1 }
 0x274   :  { %v5617_v61 = vadd.f32 %v5616_v60, %v5604_v59 }
 0x279   :  { %v5629_v62 = vpop.f32.mrf.mxu2  ;;  %v5605_v1 = vpop.f32.mrf.mxu0 }
 0x27a   :  { %v5630_v63 = vadd.f32 %v5629_v62, %v5617_v61  ;;  %v5642_v0 = vpop.f32.mrf.mxu3  ;;  %v5618_v3 = vpop.f32.mrf.mxu1 }
 0x27c   :  { %v5643_v2 = vadd.f32 %v5642_v0, %v5630_v63 }
 0x281   :  { %v5631_v4 = vpop.f32.mrf.mxu2 }
 0x282   :  { %v5644_v5 = vpop.f32.mrf.mxu3 }
 0x291   :  { %v5655_v6 = vpop.f32.mrf.mxu0 }
 0x292   :  { %v5668_v7 = vpop.f32.mrf.mxu1  ;;  %v5656_v24 = vadd.f32 %v5655_v6, %v5643_v2 }
 0x294   :  { %v5669_v29 = vadd.f32 %v5668_v7, %v5656_v24 }
 0x299   :  { %v5681_v8 = vpop.f32.mrf.mxu2  ;;  %v5657_v11 = vpop.f32.mrf.mxu0 }
 0x29a   :  { %v5694_v9 = vpop.f32.mrf.mxu3  ;;  %v5670_v12 = vpop.f32.mrf.mxu1  ;;  %v5682_v30 = vadd.f32 %v5681_v8, %v5669_v29 }
 0x29c   :  { %v5695_v33 = vadd.f32 %v5694_v9, %v5682_v30 }
 0x2a1   :  { %v5683_v15 = vpop.f32.mrf.mxu2 }
 0x2a2   :  { %v5696_v16 = vpop.f32.mrf.mxu3 }
 0x2b1   :  { %v5707_v19 = vpop.f32.mrf.mxu0 }
 0x2b2   :  { %v5720_v21 = vpop.f32.mrf.mxu1  ;;  %v5708_v34 = vadd.f32 %v5707_v19, %v5695_v33 }
 0x2b4   :  { %v5721_v35 = vadd.f32 %v5720_v21, %v5708_v34 }
 0x2b9   :  { %v5733_v23 = vpop.f32.mrf.mxu2  ;;  %v5709_v26 = vpop.f32.mrf.mxu0 }
 0x2ba   :  { %v5746_v25 = vpop.f32.mrf.mxu3  ;;  %v5722_v28 = vpop.f32.mrf.mxu1  ;;  %v5734_v36 = vadd.f32 %v5733_v23, %v5721_v35 }
 0x2bc   :  { %v5747_v37 = vadd.f32 %v5746_v25, %v5734_v36 }
 0x2c1   :  { %v5735_v31 = vpop.f32.mrf.mxu2 }
 0x2c2   :  { %v5748_v32 = vpop.f32.mrf.mxu3 }
 0x2d1   :  { %v5759_v38 = vpop.f32.mrf.mxu0 }
 0x2d2   :  { %v5772_v39 = vpop.f32.mrf.mxu1  ;;  %v5760_v40 = vadd.f32 %v5759_v38, %v5747_v37 }
 0x2d4   :  { %v5773_v41 = vadd.f32 %v5772_v39, %v5760_v40 }
 0x2d9   :  { %v5785_v42 = vpop.f32.mrf.mxu2  ;;  %v5761_v45 = vpop.f32.mrf.mxu0 }
 0x2da   :  { %v5798_v43 = vpop.f32.mrf.mxu3  ;;  %v5786_v44 = vadd.f32 %v5785_v42, %v5773_v41  ;;  %v5774_v46 = vpop.f32.mrf.mxu1 }
 0x2dc   :  { %v5799_v47 = vadd.f32 %v5798_v43, %v5786_v44 }
 0x2de   :  { %v5802_v48 = vmax.f32 %v5799_v47, 0.0 }
 0x2e0   :  { %5803 = vst [vmem:[#allocation10] sm:$0x3] %v5802_v48  ;;  %v5804_v49 = vpack.c.bf16 %v5802_v48, %v5802_v48 }
 0x2e1   :  { %v5787_v50 = vpop.f32.mrf.mxu2  ;;  %5897 = dma.vmem_to_hbm [thread:$0]  %s5893_s9, 32, %s5895_s11, [#allocation4]  }
 0x2e2   :  { %v5800_v51 = vpop.f32.mrf.mxu3  ;;  %5881 = vmatmul.bf16.vlgmr.msra.gmra.mxu0 %v5804_v49 }
 0x35f   :  { %v5882_v53 = vpop.f32.mrf.mxu0 }
 0x360   :  { %v5883_v54 = vadd.f32 %v8851_v52, %v5882_v53 }
 0x362   :  { %5886 = vst [vmem:[#allocation11] sm:$0x3] %v5883_v54 }
 0x363   :  { %5908 = dma.vmem_to_hbm [thread:$0]  %s5904_s13, 32, %s5906_s15, [#allocation12]  }
 0x367   :  { %v5884_v55 = vpop.f32.mrf.mxu0 }
 0x368   :  { %9002 = dma.done.wait [#allocation4], 32  }
 0x369   :  { %9003 = vsyncadd [#allocation4], 4294967264 }
 0x36a   :  { %9004 = dma.done.wait [#allocation12], 32  }
 0x36b   :  { %9005 = vsyncadd [#allocation12], 4294967264 }
 0x36c   :  { %5917 = vsyncpa [#allocation3], 1 }
 0x36d   :  { %5918 = vsyncpa [#allocation6], 1 }
 0x36e   :  { %5919 = vsyncpa [#allocation9], 1 }
 0x36f   :  { %5920 = vsyncpa [#allocation4], 1 }
 0x370   :  { %5921 = vsyncpa [#allocation12], 1 }

</bundles_post_ra>
